<compile_context>
chip_gen: v5e
topology: v5e:2x2
jax: 0.10.0
libtpu: 0.0.40
codegen_flags: <defaults>
</compile_context>

<pallas_src>
import math
import functools

import jax
import jax.numpy as jnp
from jax.experimental import pallas as pl
from jax.experimental.pallas import tpu as pltpu

K = 256            # latent dim (module default)
D_IN = 784         # 1 * 28 * 28
D_PAD = 896        # 784 padded up to a multiple of 128
H = 1024           # hidden width
N_CLASSES = 10
LOGIT_PAD = 128    # 10 padded up to one full lane tile


def _round_up(n, m):
    return ((n + m - 1) // m) * m


def toynet_kernel(x_ref, w1_ref, b1_ref, w2_ref, b2_ref, w3_ref, b3_ref,
                  wd_ref, bd_ref, eps_ref,
                  mu_ref, std_ref, logit_ref):
    # x tile: (TILE_B, 896) f32 -> bf16 operand for the MXU (f32 accumulation).
    x = x_ref[...].astype(jnp.bfloat16)

    # encoder: Linear -> ReLU -> Linear -> ReLU -> Linear (weights already bf16)
    h1 = jnp.dot(x, w1_ref[...], preferred_element_type=jnp.float32) + b1_ref[...]
    h1 = jnp.maximum(h1, 0.0).astype(jnp.bfloat16)
    h2 = jnp.dot(h1, w2_ref[...], preferred_element_type=jnp.float32) + b2_ref[...]
    h2 = jnp.maximum(h2, 0.0).astype(jnp.bfloat16)
    stats = jnp.dot(h2, w3_ref[...], preferred_element_type=jnp.float32) + b3_ref[...]

    mu = stats[:, :K]                                    # (TILE_B, K) f32
    std = jax.nn.softplus(stats[:, K:] - 5.0)            # (TILE_B, K) f32

    # reparametrize (num_sample == 1): mu + eps * std
    encoding = (mu + eps_ref[...] * std).astype(jnp.bfloat16)

    # decoder: Linear(K, 10), output padded to 128 lanes (cols 10..127 are zero)
    logit = jnp.dot(encoding, wd_ref[...],
                    preferred_element_type=jnp.float32) + bd_ref[...]

    mu_ref[...] = mu
    std_ref[...] = std
    logit_ref[...] = logit


@jax.jit
def toynet_forward(x, params, eps):
    """x: (B, ...) -> ((mu, std), logit), matching ToyNet.forward(x, num_sample=1)."""
    B = x.shape[0]
    x = x.reshape(B, -1).astype(jnp.float32)             # (B, 784)

    # --- host-side padding / dtype prep ------------------------------------
    # Batch tile: cap at 128 rows (matches v5e MXU; fine on v6e/v7x), min 8 sublanes.
    tile_b = min(128, _round_up(B, 8))
    Bp = _round_up(B, tile_b)

    x_p = jnp.zeros((Bp, D_PAD), jnp.float32).at[:B, :D_IN].set(x)
    eps_p = jnp.zeros((Bp, K), jnp.float32).at[:B].set(eps.astype(jnp.float32))

    # Weights streamed in bf16 (biases stay f32, they are tiny).
    w1 = jnp.zeros((D_PAD, H), jnp.bfloat16).at[:D_IN].set(params["w1"].astype(jnp.bfloat16))
    w2 = params["w2"].astype(jnp.bfloat16)
    w3 = params["w3"].astype(jnp.bfloat16)
    wd = jnp.zeros((K, LOGIT_PAD), jnp.bfloat16).at[:, :N_CLASSES].set(
        params["wd"].astype(jnp.bfloat16))
    b1 = params["b1"].astype(jnp.float32)
    b2 = params["b2"].astype(jnp.float32)
    b3 = params["b3"].astype(jnp.float32)
    bd = jnp.zeros((1, LOGIT_PAD), jnp.float32).at[:, :N_CLASSES].set(
        params["bd"].astype(jnp.float32))

    grid = (Bp // tile_b,)

    mu, std, logit_pad = pl.pallas_call(
        toynet_kernel,
        out_shape=(
            jax.ShapeDtypeStruct((Bp, K), jnp.float32),          # mu
            jax.ShapeDtypeStruct((Bp, K), jnp.float32),          # std
            jax.ShapeDtypeStruct((Bp, LOGIT_PAD), jnp.float32),  # logit (padded)
        ),
        grid=grid,
        in_specs=[
            pl.BlockSpec((tile_b, D_PAD), lambda i: (i, 0)),     # x (tiled over batch)
            pl.BlockSpec((D_PAD, H), lambda i: (0, 0)),          # w1 (resident)
            pl.BlockSpec((1, H), lambda i: (0, 0)),              # b1
            pl.BlockSpec((H, H), lambda i: (0, 0)),              # w2
            pl.BlockSpec((1, H), lambda i: (0, 0)),              # b2
            pl.BlockSpec((H, 2 * K), lambda i: (0, 0)),          # w3
            pl.BlockSpec((1, 2 * K), lambda i: (0, 0)),          # b3
            pl.BlockSpec((K, LOGIT_PAD), lambda i: (0, 0)),      # wd
            pl.BlockSpec((1, LOGIT_PAD), lambda i: (0, 0)),      # bd
            pl.BlockSpec((tile_b, K), lambda i: (i, 0)),         # eps (tiled over batch)
        ],
        out_specs=(
            pl.BlockSpec((tile_b, K), lambda i: (i, 0)),
            pl.BlockSpec((tile_b, K), lambda i: (i, 0)),
            pl.BlockSpec((tile_b, LOGIT_PAD), lambda i: (i, 0)),
        ),
        compiler_params=pltpu.CompilerParams(
            dimension_semantics=("parallel",),
            vmem_limit_bytes=32 * 1024 * 1024,
        ),
    )(x_p, w1, b1, w2, b2, w3, b3, wd, bd, eps_p)

    return (mu[:B], std[:B]), logit_pad[:B, :N_CLASSES]


def toynet_reference(x, params, eps):
    """Pure-JAX reference with the same bf16-operand / f32-accumulate math."""
    B = x.shape[0]
    x = x.reshape(B, -1).astype(jnp.float32)

    def dot_bf16(a, w):
        return jnp.dot(a.astype(jnp.bfloat16), w.astype(jnp.bfloat16),
                       preferred_element_type=jnp.float32)

    h1 = jnp.maximum(dot_bf16(x, params["w1"]) + params["b1"], 0.0)
    h2 = jnp.maximum(dot_bf16(h1, params["w2"]) + params["b2"], 0.0)
    stats = dot_bf16(h2, params["w3"]) + params["b3"]
    mu = stats[:, :K]
    std = jax.nn.softplus(stats[:, K:] - 5.0)
    enc = mu + eps * std
    logit = dot_bf16(enc, params["wd"]) + params["bd"]
    return (mu, std), logit


def init_params(key):
    """Deterministic xavier_uniform(gain=sqrt(2)) weights, zero biases (like weight_init).

    Weights stored as (in_features, out_features), i.e. the transpose of
    PyTorch's Linear.weight, so forward is x @ W + b.
    """
    gain = math.sqrt(2.0)

    def xavier(k, fan_in, fan_out):
        bound = gain * math.sqrt(6.0 / (fan_in + fan_out))
        return jax.random.uniform(k, (fan_in, fan_out), jnp.float32, -bound, bound)

    k1, k2, k3, k4 = jax.random.split(key, 4)
    return {
        "w1": xavier(k1, D_IN, H),   "b1": jnp.zeros((1, H), jnp.float32),
        "w2": xavier(k2, H, H),      "b2": jnp.zeros((1, H), jnp.float32),
        "w3": xavier(k3, H, 2 * K),  "b3": jnp.zeros((1, 2 * K), jnp.float32),
        "wd": xavier(k4, K, N_CLASSES), "bd": jnp.zeros((1, N_CLASSES), jnp.float32),
    }


if __name__ == "__main__":
    key = jax.random.PRNGKey(0)
    k_params, k_x, k_eps = jax.random.split(key, 3)

    B = 4
    x = jax.random.normal(k_x, (B, 1, 28, 28), jnp.float32)   # NCHW, flattened to (B, 784)
    eps = jax.random.normal(k_eps, (B, K), jnp.float32)        # reparametrization noise
    params = init_params(k_params)

    (mu, std), logit = toynet_forward(x, params, eps)
    jax.block_until_ready((mu, std, logit))

    # shape / sanity checks
    assert mu.shape == (B, K) and std.shape == (B, K) and logit.shape == (B, N_CLASSES)
    assert bool(jnp.all(jnp.isfinite(mu))) and bool(jnp.all(jnp.isfinite(std)))
    assert bool(jnp.all(jnp.isfinite(logit))) and bool(jnp.all(std > 0))

    # numerical check against a pure-JAX reference using the same bf16 math
    (mu_r, std_r), logit_r = toynet_reference(x, params, eps)
    assert bool(jnp.allclose(mu, mu_r, rtol=5e-2, atol=5e-2))
    assert bool(jnp.allclose(std, std_r, rtol=5e-2, atol=5e-2))
    assert bool(jnp.allclose(logit, logit_r, rtol=5e-2, atol=5e-2))

    print("KERNEL_OK")
</pallas_src>

<mosaic_0001>
module attributes {stable_mosaic.version = 11 : i64} {
  func.func @toynet_kernel(%arg0: i32, %arg1: memref<8x896xf32, #tpu.memory_space<vmem>>, %arg2: memref<896x1024xbf16, #tpu.memory_space<vmem>>, %arg3: memref<1x1024xf32, #tpu.memory_space<vmem>>, %arg4: memref<1024x1024xbf16, #tpu.memory_space<vmem>>, %arg5: memref<1x1024xf32, #tpu.memory_space<vmem>>, %arg6: memref<1024x512xbf16, #tpu.memory_space<vmem>>, %arg7: memref<1x512xf32, #tpu.memory_space<vmem>>, %arg8: memref<256x128xbf16, #tpu.memory_space<vmem>>, %arg9: memref<1x128xf32, #tpu.memory_space<vmem>>, %arg10: memref<8x256xf32, #tpu.memory_space<vmem>>, %arg11: memref<8x256xf32, #tpu.memory_space<vmem>>, %arg12: memref<8x256xf32, #tpu.memory_space<vmem>>, %arg13: memref<8x128xf32, #tpu.memory_space<vmem>>) attributes {dimension_semantics = [#tpu.dimension_semantics<parallel>], iteration_bounds = array<i64: 1>, scalar_prefetch = 0 : i64, scratch_operands = 0 : i64, tpu.core_type = #tpu.core_type<tc>, window_params = [{transform_indices = @transform_0, window_bounds = array<i64: 8, 896>}, {pipeline_mode = #tpu.pipeline_mode<synchronous>, transform_indices = @transform_1, window_bounds = array<i64: 896, 1024>}, {pipeline_mode = #tpu.pipeline_mode<synchronous>, transform_indices = @transform_2, window_bounds = array<i64: 1, 1024>}, {pipeline_mode = #tpu.pipeline_mode<synchronous>, transform_indices = @transform_3, window_bounds = array<i64: 1024, 1024>}, {pipeline_mode = #tpu.pipeline_mode<synchronous>, transform_indices = @transform_4, window_bounds = array<i64: 1, 1024>}, {pipeline_mode = #tpu.pipeline_mode<synchronous>, transform_indices = @transform_5, window_bounds = array<i64: 1024, 512>}, {pipeline_mode = #tpu.pipeline_mode<synchronous>, transform_indices = @transform_6, window_bounds = array<i64: 1, 512>}, {pipeline_mode = #tpu.pipeline_mode<synchronous>, transform_indices = @transform_7, window_bounds = array<i64: 256, 128>}, {pipeline_mode = #tpu.pipeline_mode<synchronous>, transform_indices = @transform_8, window_bounds = array<i64: 1, 128>}, {transform_indices = @transform_9, window_bounds = array<i64: 8, 256>}, {transform_indices = @transform_10, window_bounds = array<i64: 8, 256>}, {transform_indices = @transform_11, window_bounds = array<i64: 8, 256>}, {transform_indices = @transform_12, window_bounds = array<i64: 8, 128>}]} {
    %c0 = arith.constant 0 : index
    %c0_0 = arith.constant 0 : index
    %0 = vector.load %arg1[%c0, %c0_0] : memref<8x896xf32, #tpu.memory_space<vmem>>, vector<8x896xf32>
    %1 = arith.truncf %0 : vector<8x896xf32> to vector<8x896xbf16>
    %c0_1 = arith.constant 0 : index
    %c0_2 = arith.constant 0 : index
    %2 = vector.load %arg2[%c0_1, %c0_2] : memref<896x1024xbf16, #tpu.memory_space<vmem>>, vector<896x1024xbf16>
    %cst = arith.constant dense<0.000000e+00> : vector<8x1024xf32>
    %3 = tpu.matmul %1, %2, %cst {dimension_numbers = #tpu.dot_dimension_numbers<[1], [0], [0], [1], [0, 0, 1, 1], [], []>} : vector<8x896xbf16>, vector<896x1024xbf16>, vector<8x1024xf32> -> vector<8x1024xf32>
    %c0_3 = arith.constant 0 : index
    %c0_4 = arith.constant 0 : index
    %4 = vector.load %arg3[%c0_3, %c0_4] : memref<1x1024xf32, #tpu.memory_space<vmem>>, vector<1x1024xf32>
    %5 = vector.broadcast %4 : vector<1x1024xf32> to vector<8x1024xf32>
    %6 = arith.addf %3, %5 : vector<8x1024xf32>
    %cst_5 = arith.constant 0.000000e+00 : f32
    %7 = vector.broadcast %cst_5 : f32 to vector<8x1024xf32>
    %8 = arith.maximumf %6, %7 : vector<8x1024xf32>
    %9 = arith.truncf %8 : vector<8x1024xf32> to vector<8x1024xbf16>
    %c0_6 = arith.constant 0 : index
    %c0_7 = arith.constant 0 : index
    %10 = vector.load %arg4[%c0_6, %c0_7] : memref<1024x1024xbf16, #tpu.memory_space<vmem>>, vector<1024x1024xbf16>
    %cst_8 = arith.constant dense<0.000000e+00> : vector<8x1024xf32>
    %11 = tpu.matmul %9, %10, %cst_8 {dimension_numbers = #tpu.dot_dimension_numbers<[1], [0], [0], [1], [0, 0, 1, 1], [], []>} : vector<8x1024xbf16>, vector<1024x1024xbf16>, vector<8x1024xf32> -> vector<8x1024xf32>
    %c0_9 = arith.constant 0 : index
    %c0_10 = arith.constant 0 : index
    %12 = vector.load %arg5[%c0_9, %c0_10] : memref<1x1024xf32, #tpu.memory_space<vmem>>, vector<1x1024xf32>
    %13 = vector.broadcast %12 : vector<1x1024xf32> to vector<8x1024xf32>
    %14 = arith.addf %11, %13 : vector<8x1024xf32>
    %cst_11 = arith.constant 0.000000e+00 : f32
    %15 = vector.broadcast %cst_11 : f32 to vector<8x1024xf32>
    %16 = arith.maximumf %14, %15 : vector<8x1024xf32>
    %17 = arith.truncf %16 : vector<8x1024xf32> to vector<8x1024xbf16>
    %c0_12 = arith.constant 0 : index
    %c0_13 = arith.constant 0 : index
    %18 = vector.load %arg6[%c0_12, %c0_13] : memref<1024x512xbf16, #tpu.memory_space<vmem>>, vector<1024x512xbf16>
    %cst_14 = arith.constant dense<0.000000e+00> : vector<8x512xf32>
    %19 = tpu.matmul %17, %18, %cst_14 {dimension_numbers = #tpu.dot_dimension_numbers<[1], [0], [0], [1], [0, 0, 1, 1], [], []>} : vector<8x1024xbf16>, vector<1024x512xbf16>, vector<8x512xf32> -> vector<8x512xf32>
    %c0_15 = arith.constant 0 : index
    %c0_16 = arith.constant 0 : index
    %20 = vector.load %arg7[%c0_15, %c0_16] : memref<1x512xf32, #tpu.memory_space<vmem>>, vector<1x512xf32>
    %21 = vector.broadcast %20 : vector<1x512xf32> to vector<8x512xf32>
    %22 = arith.addf %19, %21 : vector<8x512xf32>
    %23 = vector.extract_strided_slice %22 {offsets = [0, 0], sizes = [8, 256], strides = [1, 1]} : vector<8x512xf32> to vector<8x256xf32>
    %24 = vector.extract_strided_slice %22 {offsets = [0, 256], sizes = [8, 256], strides = [1, 1]} : vector<8x512xf32> to vector<8x256xf32>
    %cst_17 = arith.constant 5.000000e+00 : f32
    %25 = vector.broadcast %cst_17 : f32 to vector<8x256xf32>
    %26 = arith.subf %24, %25 : vector<8x256xf32>
    %cst_18 = arith.constant 0.000000e+00 : f32
    %27 = vector.broadcast %cst_18 : f32 to vector<8x256xf32>
    %28 = arith.maximumf %26, %27 : vector<8x256xf32>
    %29 = vector.broadcast %cst_18 : f32 to vector<8x256xf32>
    %30 = arith.subf %26, %29 : vector<8x256xf32>
    %31 = arith.cmpf one, %30, %30 : vector<8x256xf32>
    %32 = vector.broadcast %cst_18 : f32 to vector<8x256xf32>
    %33 = arith.addf %26, %32 : vector<8x256xf32>
    %34 = math.absf %30 : vector<8x256xf32>
    %cst_19 = arith.constant 0.000000e+00 : f32
    %35 = vector.broadcast %cst_19 : f32 to vector<8x256xf32>
    %36 = arith.subf %35, %34 : vector<8x256xf32>
    %37 = math.exp %36 : vector<8x256xf32>
    %38 = math.log1p %37 : vector<8x256xf32>
    %39 = arith.addf %28, %38 : vector<8x256xf32>
    %40 = arith.select %31, %33, %39 : vector<8x256xi1>, vector<8x256xf32>
    %c0_20 = arith.constant 0 : index
    %c0_21 = arith.constant 0 : index
    %41 = vector.load %arg10[%c0_20, %c0_21] : memref<8x256xf32, #tpu.memory_space<vmem>>, vector<8x256xf32>
    %42 = arith.mulf %41, %40 : vector<8x256xf32>
    %43 = arith.addf %23, %42 : vector<8x256xf32>
    %44 = arith.truncf %43 : vector<8x256xf32> to vector<8x256xbf16>
    %c0_22 = arith.constant 0 : index
    %c0_23 = arith.constant 0 : index
    %45 = vector.load %arg8[%c0_22, %c0_23] : memref<256x128xbf16, #tpu.memory_space<vmem>>, vector<256x128xbf16>
    %cst_24 = arith.constant dense<0.000000e+00> : vector<8x128xf32>
    %46 = tpu.matmul %44, %45, %cst_24 {dimension_numbers = #tpu.dot_dimension_numbers<[1], [0], [0], [1], [0, 0, 1, 1], [], []>} : vector<8x256xbf16>, vector<256x128xbf16>, vector<8x128xf32> -> vector<8x128xf32>
    %c0_25 = arith.constant 0 : index
    %c0_26 = arith.constant 0 : index
    %47 = vector.load %arg9[%c0_25, %c0_26] : memref<1x128xf32, #tpu.memory_space<vmem>>, vector<1x128xf32>
    %48 = vector.broadcast %47 : vector<1x128xf32> to vector<8x128xf32>
    %49 = arith.addf %46, %48 : vector<8x128xf32>
    %c0_27 = arith.constant 0 : index
    %c0_28 = arith.constant 0 : index
    %50 = vector.load %arg11[%c0_27, %c0_28] : memref<8x256xf32, #tpu.memory_space<vmem>>, vector<8x256xf32>
    tpu.vector_store %arg11[%c0_27, %c0_28], %23 {strides = array<i32>} : memref<8x256xf32, #tpu.memory_space<vmem>>, vector<8x256xf32>,
    %c0_29 = arith.constant 0 : index
    %c0_30 = arith.constant 0 : index
    %51 = vector.load %arg12[%c0_29, %c0_30] : memref<8x256xf32, #tpu.memory_space<vmem>>, vector<8x256xf32>
    tpu.vector_store %arg12[%c0_29, %c0_30], %40 {strides = array<i32>} : memref<8x256xf32, #tpu.memory_space<vmem>>, vector<8x256xf32>,
    %c0_31 = arith.constant 0 : index
    %c0_32 = arith.constant 0 : index
    %52 = vector.load %arg13[%c0_31, %c0_32] : memref<8x128xf32, #tpu.memory_space<vmem>>, vector<8x128xf32>
    tpu.vector_store %arg13[%c0_31, %c0_32], %49 {strides = array<i32>} : memref<8x128xf32, #tpu.memory_space<vmem>>, vector<8x128xf32>,
    return
  }
  func.func @transform_0(%arg0: i32) -> (i32, i32) {
    %c0_i32 = arith.constant 0 : i32
    %c0_i32_0 = arith.constant 0 : i32
    return %arg0, %c0_i32 : i32, i32
  }
  func.func @transform_1(%arg0: i32) -> (i32, i32) {
    %c0_i32 = arith.constant 0 : i32
    %c0_i32_0 = arith.constant 0 : i32
    %c0_i32_1 = arith.constant 0 : i32
    return %c0_i32, %c0_i32_0 : i32, i32
  }
  func.func @transform_2(%arg0: i32) -> (i32, i32) {
    %c0_i32 = arith.constant 0 : i32
    %c0_i32_0 = arith.constant 0 : i32
    %c0_i32_1 = arith.constant 0 : i32
    return %c0_i32, %c0_i32_0 : i32, i32
  }
  func.func @transform_3(%arg0: i32) -> (i32, i32) {
    %c0_i32 = arith.constant 0 : i32
    %c0_i32_0 = arith.constant 0 : i32
    %c0_i32_1 = arith.constant 0 : i32
    return %c0_i32, %c0_i32_0 : i32, i32
  }
  func.func @transform_4(%arg0: i32) -> (i32, i32) {
    %c0_i32 = arith.constant 0 : i32
    %c0_i32_0 = arith.constant 0 : i32
    %c0_i32_1 = arith.constant 0 : i32
    return %c0_i32, %c0_i32_0 : i32, i32
  }
  func.func @transform_5(%arg0: i32) -> (i32, i32) {
    %c0_i32 = arith.constant 0 : i32
    %c0_i32_0 = arith.constant 0 : i32
    %c0_i32_1 = arith.constant 0 : i32
    return %c0_i32, %c0_i32_0 : i32, i32
  }
  func.func @transform_6(%arg0: i32) -> (i32, i32) {
    %c0_i32 = arith.constant 0 : i32
    %c0_i32_0 = arith.constant 0 : i32
    %c0_i32_1 = arith.constant 0 : i32
    return %c0_i32, %c0_i32_0 : i32, i32
  }
  func.func @transform_7(%arg0: i32) -> (i32, i32) {
    %c0_i32 = arith.constant 0 : i32
    %c0_i32_0 = arith.constant 0 : i32
    %c0_i32_1 = arith.constant 0 : i32
    return %c0_i32, %c0_i32_0 : i32, i32
  }
  func.func @transform_8(%arg0: i32) -> (i32, i32) {
    %c0_i32 = arith.constant 0 : i32
    %c0_i32_0 = arith.constant 0 : i32
    %c0_i32_1 = arith.constant 0 : i32
    return %c0_i32, %c0_i32_0 : i32, i32
  }
  func.func @transform_9(%arg0: i32) -> (i32, i32) {
    %c0_i32 = arith.constant 0 : i32
    %c0_i32_0 = arith.constant 0 : i32
    return %arg0, %c0_i32 : i32, i32
  }
  func.func @transform_10(%arg0: i32) -> (i32, i32) {
    %c0_i32 = arith.constant 0 : i32
    %c0_i32_0 = arith.constant 0 : i32
    return %arg0, %c0_i32 : i32, i32
  }
  func.func @transform_11(%arg0: i32) -> (i32, i32) {
    %c0_i32 = arith.constant 0 : i32
    %c0_i32_0 = arith.constant 0 : i32
    return %arg0, %c0_i32 : i32, i32
  }
  func.func @transform_12(%arg0: i32) -> (i32, i32) {
    %c0_i32 = arith.constant 0 : i32
    %c0_i32_0 = arith.constant 0 : i32
    return %arg0, %c0_i32 : i32, i32
  }
}

</mosaic_0001>

<bundles_post_ra>
// kernel: toynet_forward.1
= control target key start
LH: loop header
LB: loop body
LE: loop exit
PB: predicated region body
PF: predicated region fallthrough
CT: control target
= control target key end

     0   :  { %s23798_s1 = inlined_call_operand.vmem [shape: bf16[896,1024], index: 1, kind: input, shape index: {}]   ;;  %s23799_s0 = inlined_call_operand.vmem [shape: f32[8,896], index: 0, kind: input, shape index: {}]   ;;  %s23800_s2 = inlined_call_operand.vmem [shape: f32[1,1024], index: 2, kind: input, shape index: {}]   ;;  %s23801_s3 = inlined_call_operand.vmem [shape: bf16[1024,1024], index: 3, kind: input, shape index: {}]   ;;  %s23802_s4 = inlined_call_operand.vmem [shape: f32[1,1024], index: 4, kind: input, shape index: {}]   ;;  %s23803_s5 = inlined_call_operand.vmem [shape: bf16[1024,512], index: 5, kind: input, shape index: {}]   ;;  %s23804_s6 = inlined_call_operand.vmem [shape: f32[1,512], index: 6, kind: input, shape index: {}]   ;;  %s23805_s10 = inlined_call_operand.vmem [shape: f32[8,256], index: 10, kind: output, shape index: {0}]   ;;  %s23806_s8 = inlined_call_operand.vmem [shape: f32[1,128], index: 8, kind: input, shape index: {}]   ;;  %s23807_s7 = inlined_call_operand.vmem [shape: bf16[256,128], index: 7, kind: input, shape index: {}]   ;;  %s23808_s9 = inlined_call_operand.vmem [shape: f32[8,256], index: 9, kind: input, shape index: {}]   ;;  %s23809_s11 = inlined_call_operand.vmem [shape: f32[8,256], index: 11, kind: output, shape index: {1}]   ;;  %s23810_s12 = inlined_call_operand.vmem [shape: f32[8,128], index: 12, kind: output, shape index: {2}]  }
   0x1   :  { %v9849_v0 = vld [vmem:[%s23798_s1 + $0x1c0] sm:$0xf] }
   0x2   :  { %v14613_v1 = vld [vmem:[%s23798_s1 + $0x1dc] sm:$0xf0] }
   0x3   :  { %v10105_v2 = vld [vmem:[%s23798_s1 + $0x3c0] sm:$0xf]  ;;  %v9850_v3 = vor.u32 %v14613_v1, %v9849_v0 }
   0x4   :  { %v14677_v4 = vld [vmem:[%s23798_s1 + $0x3dc] sm:$0xf0] }
   0x5   :  { %v10361_v5 = vld [vmem:[%s23798_s1 + $0x5c0] sm:$0xf]  ;;  %v10106_v7 = vor.u32 %v14677_v4, %v10105_v2  ;;  %2758 = vmatpush.bf16.msra.mxu0 %v9850_v3 }
   0x6   :  { %v14741_v6 = vld [vmem:[%s23798_s1 + $0x5dc] sm:$0xf0] }
   0x7   :  { %v10362_v8 = vor.u32 %v14741_v6, %v10361_v5  ;;  %v10617_v9 = vld [vmem:[%s23798_s1 + $0x7c0] sm:$0xf]  ;;  %2771 = vmatpush.bf16.msra.mxu1 %v10106_v7 }
   0x8   :  { %v14805_v10 = vld [vmem:[%s23798_s1 + $0x7dc] sm:$0xf0] }
   0x9   :  { %v9817_v11 = vld [vmem:[%s23798_s1 + $0x180] sm:$0xf]  ;;  %v10618_v12 = vor.u32 %v14805_v10, %v10617_v9  ;;  %2784 = vmatpush.bf16.msra.mxu2 %v10362_v8 }
   0xa   :  { %v14605_v13 = vld [vmem:[%s23798_s1 + $0x19c] sm:$0xf0] }
   0xb   :  { %v10073_v14 = vld [vmem:[%s23798_s1 + $0x380] sm:$0xf]  ;;  %v9818_v16 = vor.u32 %v14605_v13, %v9817_v11  ;;  %2797 = vmatpush.bf16.msra.mxu3 %v10618_v12 }
   0xc   :  { %v14669_v15 = vld [vmem:[%s23798_s1 + $0x39c] sm:$0xf0] }
   0xd   :  { %v10074_v17 = vor.u32 %v14669_v15, %v10073_v14  ;;  %v10329_v18 = vld [vmem:[%s23798_s1 + $0x580] sm:$0xf]  ;;  %2759 = vmatpush.bf16.msra.mxu0 %v9818_v16 }
   0xe   :  { %v14733_v19 = vld [vmem:[%s23798_s1 + $0x59c] sm:$0xf0] }
   0xf   :  { %v10585_v20 = vld [vmem:[%s23798_s1 + $0x780] sm:$0xf]  ;;  %v10330_v21 = vor.u32 %v14733_v19, %v10329_v18  ;;  %2772 = vmatpush.bf16.msra.mxu1 %v10074_v17 }
  0x10   :  { %v14797_v22 = vld [vmem:[%s23798_s1 + $0x79c] sm:$0xf0] }
  0x11   :  { %v9785_v23 = vld [vmem:[%s23798_s1 + $0x140] sm:$0xf]  ;;  %v10586_v25 = vor.u32 %v14797_v22, %v10585_v20  ;;  %2785 = vmatpush.bf16.msra.mxu2 %v10330_v21 }
  0x12   :  { %v14597_v24 = vld [vmem:[%s23798_s1 + $0x15c] sm:$0xf0] }
  0x13   :  { %v10041_v26 = vld [vmem:[%s23798_s1 + $0x340] sm:$0xf]  ;;  %v9786_v29 = vor.u32 %v14597_v24, %v9785_v23  ;;  %2798 = vmatpush.bf16.msra.mxu3 %v10586_v25 }
  0x14   :  { %v14661_v27 = vld [vmem:[%s23798_s1 + $0x35c] sm:$0xf0] }
  0x15   :  { %v10297_v28 = vld [vmem:[%s23798_s1 + $0x540] sm:$0xf]  ;;  %v10042_v33 = vor.u32 %v14661_v27, %v10041_v26  ;;  %2760 = vmatpush.bf16.msra.mxu0 %v9786_v29 }
  0x16   :  { %v14725_v30 = vld [vmem:[%s23798_s1 + $0x55c] sm:$0xf0] }
  0x17   :  { %v10553_v31 = vld [vmem:[%s23798_s1 + $0x740] sm:$0xf]  ;;  %v10298_v34 = vor.u32 %v14725_v30, %v10297_v28  ;;  %2773 = vmatpush.bf16.msra.mxu1 %v10042_v33 }
  0x18   :  { %v14789_v32 = vld [vmem:[%s23798_s1 + $0x75c] sm:$0xf0] }
  0x19   :  { %v9753_v35 = vld [vmem:[%s23798_s1 + $0x100] sm:$0xf]  ;;  %v10554_v38 = vor.u32 %v14789_v32, %v10553_v31  ;;  %2786 = vmatpush.bf16.msra.mxu2 %v10298_v34 }
  0x1a   :  { %v14589_v36 = vld [vmem:[%s23798_s1 + $0x11c] sm:$0xf0] }
  0x1b   :  { %v10009_v37 = vld [vmem:[%s23798_s1 + $0x300] sm:$0xf]  ;;  %v9754_v44 = vor.u32 %v14589_v36, %v9753_v35  ;;  %2799 = vmatpush.bf16.msra.mxu3 %v10554_v38  ;;  %v9851_v38 = vld [vmem:[%s23798_s1 + $0x1e0] sm:$0xf0] }
  0x1c   :  { %v14653_v39 = vld [vmem:[%s23798_s1 + $0x31c] sm:$0xf0] }
  0x1d   :  { %v10265_v40 = vld [vmem:[%s23798_s1 + $0x500] sm:$0xf]  ;;  %v10010_v45 = vor.u32 %v14653_v39, %v10009_v37  ;;  %2761 = vmatpush.bf16.msra.mxu0 %v9754_v44  ;;  %v14609_v37 = vld [vmem:[%s23798_s1 + $0x1c4] sm:$0xf] }
  0x1e   :  { %v14717_v41 = vld [vmem:[%s23798_s1 + $0x51c] sm:$0xf0] }
  0x1f   :  { %v10521_v42 = vld [vmem:[%s23798_s1 + $0x700] sm:$0xf]  ;;  %v10266_v46 = vor.u32 %v14717_v41, %v10265_v40  ;;  %2774 = vmatpush.bf16.msra.mxu1 %v10010_v45 }
  0x20   :  { %v14781_v43 = vld [vmem:[%s23798_s1 + $0x71c] sm:$0xf0] }
  0x21   :  { %v9721_v47 = vld [vmem:[%s23798_s1 + $0xc0] sm:$0xf]  ;;  %v10522_v50 = vor.u32 %v14781_v43, %v10521_v42  ;;  %2787 = vmatpush.bf16.msra.mxu2 %v10266_v46  ;;  %v9854_v46 = vor.u32 %v14609_v37, %v9851_v38 }
  0x22   :  { %v14581_v48 = vld [vmem:[%s23798_s1 + $0xdc] sm:$0xf0] }
  0x23   :  { %v9977_v49 = vld [vmem:[%s23798_s1 + $0x2c0] sm:$0xf]  ;;  %v9722_v56 = vor.u32 %v14581_v48, %v9721_v47  ;;  %2800 = vmatpush.bf16.msra.mxu3 %v10522_v50  ;;  %v14601_v50 = vld [vmem:[%s23798_s1 + $0x184] sm:$0xf] }
  0x24   :  { %v14645_v51 = vld [vmem:[%s23798_s1 + $0x2dc] sm:$0xf0] }
  0x25   :  { %v10233_v52 = vld [vmem:[%s23798_s1 + $0x4c0] sm:$0xf]  ;;  %v9978_v57 = vor.u32 %v14645_v51, %v9977_v49  ;;  %2762 = vmatpush.bf16.msra.mxu0 %v9722_v56  ;;  %v9819_v51 = vld [vmem:[%s23798_s1 + $0x1a0] sm:$0xf0] }
  0x26   :  { %v14709_v53 = vld [vmem:[%s23798_s1 + $0x4dc] sm:$0xf0] }
  0x27   :  { %v10489_v54 = vld [vmem:[%s23798_s1 + $0x6c0] sm:$0xf]  ;;  %v10234_v58 = vor.u32 %v14709_v53, %v10233_v52  ;;  %2775 = vmatpush.bf16.msra.mxu1 %v9978_v57 }
  0x28   :  { %v14773_v55 = vld [vmem:[%s23798_s1 + $0x6dc] sm:$0xf0] }
  0x29   :  { %v9689_v59 = vld [vmem:[%s23798_s1 + $0x80] sm:$0xf]  ;;  %v10490_v62 = vor.u32 %v14773_v55, %v10489_v54  ;;  %2788 = vmatpush.bf16.msra.mxu2 %v10234_v58 }
  0x2a   :  { %v14573_v60 = vld [vmem:[%s23798_s1 + $0x9c] sm:$0xf0] }
  0x2b   :  { %v9945_v61 = vld [vmem:[%s23798_s1 + $0x280] sm:$0xf]  ;;  %v9690_v4 = vor.u32 %v14573_v60, %v9689_v59  ;;  %2801 = vmatpush.bf16.msra.mxu3 %v10490_v62  ;;  %v9822_v59 = vor.u32 %v14601_v50, %v9819_v51  ;;  %v14593_v62 = vld [vmem:[%s23798_s1 + $0x144] sm:$0xf] }
  0x2c   :  { %v14637_v63 = vld [vmem:[%s23798_s1 + $0x29c] sm:$0xf0] }
  0x2d   :  { %v10201_v0 = vld [vmem:[%s23798_s1 + $0x480] sm:$0xf]  ;;  %v9946_v5 = vor.u32 %v14637_v63, %v9945_v61  ;;  %2763 = vmatpush.bf16.msra.mxu0 %v9690_v4  ;;  %v9787_v63 = vld [vmem:[%s23798_s1 + $0x160] sm:$0xf0] }
  0x2e   :  { %v14701_v1 = vld [vmem:[%s23798_s1 + $0x49c] sm:$0xf0] }
  0x2f   :  { %v10457_v2 = vld [vmem:[%s23798_s1 + $0x680] sm:$0xf]  ;;  %v10202_v6 = vor.u32 %v14701_v1, %v10201_v0  ;;  %2776 = vmatpush.bf16.msra.mxu1 %v9946_v5 }
  0x30   :  { %v14765_v3 = vld [vmem:[%s23798_s1 + $0x69c] sm:$0xf0] }
  0x31   :  { %v9657_v7 = vld [vmem:[%s23798_s1 + $0x40] sm:$0xf]  ;;  %v10458_v10 = vor.u32 %v14765_v3, %v10457_v2  ;;  %2789 = vmatpush.bf16.msra.mxu2 %v10202_v6  ;;  %v40_v3 = vld [vmem:[%s23799_s0 + $0x10] sm:$0xff] }
  0x32   :  { %v14565_v8 = vld [vmem:[%s23798_s1 + $0x5c] sm:$0xf0] }
  0x33   :  { %v9913_v9 = vld [vmem:[%s23798_s1 + $0x240] sm:$0xf]  ;;  %v9658_v16 = vor.u32 %v14565_v8, %v9657_v7  ;;  %2802 = vmatpush.bf16.msra.mxu3 %v10458_v10  ;;  %v16144_v8 = vpack.c.bf16 %v40_v3, %v40_v3  ;;  %v41_v10 = vld [vmem:[%s23799_s0 + $0x18] sm:$0xff]  ;;  %v9627_v3 = vld [vmem:[%s23798_s1 + $0x20] sm:$0xf0] }
  0x34   :  { %v14629_v11 = vld [vmem:[%s23798_s1 + $0x25c] sm:$0xf0] }
  0x35   :  { %v10169_v12 = vld [vmem:[%s23798_s1 + $0x440] sm:$0xf]  ;;  %v9914_v19 = vor.u32 %v14629_v11, %v9913_v9  ;;  %2764 = vmatpush.bf16.msra.mxu0 %v9658_v16  ;;  %v9790_v11 = vor.u32 %v14593_v62, %v9787_v63  ;;  %v14585_v16 = vld [vmem:[%s23798_s1 + $0x104] sm:$0xf] }
  0x36   :  { %v14693_v13 = vld [vmem:[%s23798_s1 + $0x45c] sm:$0xf0] }
  0x37   :  { %v10425_v14 = vld [vmem:[%s23798_s1 + $0x640] sm:$0xf]  ;;  %v10170_v20 = vor.u32 %v14693_v13, %v10169_v12  ;;  %2777 = vmatpush.bf16.msra.mxu1 %v9914_v19  ;;  %v39_v19 = vld [vmem:[%s23799_s0 + $0x8] sm:$0xff] }
  0x38   :  { %v14757_v15 = vld [vmem:[%s23798_s1 + $0x65c] sm:$0xf0] }
  0x39   :  { %v9625_v17 = vld [vmem:[%s23798_s1] sm:$0xf]  ;;  %v10426_v24 = vor.u32 %v14757_v15, %v10425_v14  ;;  %2790 = vmatpush.bf16.msra.mxu2 %v10170_v20  ;;  %v16160_v15 = vpack.c.bf16 %v41_v10, %v41_v10  ;;  %v10363_v10 = vld [vmem:[%s23798_s1 + $0x5e0] sm:$0xf0] }
  0x3a   :  { %v14557_v18 = vld [vmem:[%s23798_s1 + $0x1c] sm:$0xf0] }
  0x3b   :  { %v9881_v21 = vld [vmem:[%s23798_s1 + $0x200] sm:$0xf]  ;;  %v9626_v31 = vor.u32 %v14557_v18, %v9625_v17  ;;  %2803 = vmatpush.bf16.msra.mxu3 %v10426_v24  ;;  %v9755_v17 = vld [vmem:[%s23798_s1 + $0x120] sm:$0xf0] }
  0x3c   :  { %v14621_v22 = vld [vmem:[%s23798_s1 + $0x21c] sm:$0xf0] }
  0x3d   :  { %v10137_v23 = vld [vmem:[%s23798_s1 + $0x400] sm:$0xf]  ;;  %v9882_v35 = vor.u32 %v14621_v22, %v9881_v21  ;;  %2765 = vmatpush.bf16.msra.mxu0 %v9626_v31  ;;  %v9723_v31 = vld [vmem:[%s23798_s1 + $0xe0] sm:$0xf0] }
  0x3e   :  { %v14685_v25 = vld [vmem:[%s23798_s1 + $0x41c] sm:$0xf0] }
  0x3f   :  { %v10393_v26 = vld [vmem:[%s23798_s1 + $0x600] sm:$0xf]  ;;  %v10138_v36 = vor.u32 %v14685_v25, %v10137_v23  ;;  %2778 = vmatpush.bf16.msra.mxu1 %v9882_v35  ;;  %v16183_v25 = vpack.c.bf16 %v39_v19, %v39_v19 }
  0x40   :  { %v14749_v27 = vld [vmem:[%s23798_s1 + $0x61c] sm:$0xf0] }
  0x41   :  { %v10873_v28 = vld [vmem:[%s23798_s1 + $0x9c0] sm:$0xf]  ;;  %v10394_v39 = vor.u32 %v14749_v27, %v10393_v26  ;;  %2791 = vmatpush.bf16.msra.mxu2 %v10138_v36  ;;  %v9758_v26 = vor.u32 %v14585_v16, %v9755_v17  ;;  %v14865_v16 = vld [vmem:[%s23798_s1 + $0x9c4] sm:$0xf] }
  0x42   :  { %v14869_v29 = vld [vmem:[%s23798_s1 + $0x9dc] sm:$0xf0]  ;;  %2779 = vmatmul.bf16.vlgmr.msra.gmra.mxu1 %v16183_v25  ;;  %v10875_v17 = vld [vmem:[%s23798_s1 + $0x9e0] sm:$0xf0] }
  0x43   :  { %v11129_v30 = vld [vmem:[%s23798_s1 + $0xbc0] sm:$0xf]  ;;  %v10874_v40 = vor.u32 %v14869_v29, %v10873_v28  ;;  %2804 = vmatpush.bf16.msra.mxu3 %v10394_v39 }
  0x44   :  { %v14933_v32 = vld [vmem:[%s23798_s1 + $0xbdc] sm:$0xf0]  ;;  %2792 = vmatmul.bf16.vlgmr.msra.gmra.mxu2 %v16144_v8 }
  0x45   :  { %v11385_v33 = vld [vmem:[%s23798_s1 + $0xdc0] sm:$0xf]  ;;  %v11130_v41 = vor.u32 %v14933_v32, %v11129_v30  ;;  %2810 = vmatpush.bf16.msrb.mxu0 %v10874_v40  ;;  %v14577_v30 = vld [vmem:[%s23798_s1 + $0xc4] sm:$0xf] }
  0x46   :  { %v14997_v34 = vld [vmem:[%s23798_s1 + $0xddc] sm:$0xf0]  ;;  %2805 = vmatmul.bf16.vlgmr.msra.gmra.mxu3 %v16160_v15  ;;  %v9726_v38 = vor.u32 %v14577_v30, %v9723_v31  ;;  %v10331_v30 = vld [vmem:[%s23798_s1 + $0x5a0] sm:$0xf0] }
  0x47   :  { %v11386_v42 = vor.u32 %v14997_v34, %v11385_v33  ;;  %v10841_v43 = vld [vmem:[%s23798_s1 + $0x980] sm:$0xf]  ;;  %2823 = vmatpush.bf16.msrb.mxu1 %v11130_v41  ;;  %2849 = vmatpush.bf16.msrb.mxu3 %v9854_v46  ;;  %v14793_v31 = vld [vmem:[%s23798_s1 + $0x784] sm:$0xf] }
  0x48   :  { %v14861_v44 = vld [vmem:[%s23798_s1 + $0x99c] sm:$0xf0] }
  0x49   :  { %v11097_v45 = vld [vmem:[%s23798_s1 + $0xb80] sm:$0xf]  ;;  %v10842_v52 = vor.u32 %v14861_v44, %v10841_v43  ;;  %2836 = vmatpush.bf16.msrb.mxu2 %v11386_v42  ;;  %v14569_v42 = vld [vmem:[%s23798_s1 + $0x84] sm:$0xf] }
  0x4a   :  { %v14925_v47 = vld [vmem:[%s23798_s1 + $0xb9c] sm:$0xf0]  ;;  %v9691_v43 = vld [vmem:[%s23798_s1 + $0xa0] sm:$0xf0] }
  0x4b   :  { %v11353_v48 = vld [vmem:[%s23798_s1 + $0xd80] sm:$0xf]  ;;  %v11098_v54 = vor.u32 %v14925_v47, %v11097_v45  ;;  %2811 = vmatpush.bf16.msrb.mxu0 %v10842_v52  ;;  %2850 = vmatpush.bf16.msrb.mxu3 %v9822_v59  ;;  %v9694_v50 = vor.u32 %v14569_v42, %v9691_v43  ;;  %v10043_v42 = vld [vmem:[%s23798_s1 + $0x360] sm:$0xf0] }
  0x4c   :  { %v14989_v49 = vld [vmem:[%s23798_s1 + $0xd9c] sm:$0xf0]  ;;  %v14721_v43 = vld [vmem:[%s23798_s1 + $0x544] sm:$0xf] }
  0x4d   :  { %v10809_v53 = vld [vmem:[%s23798_s1 + $0x940] sm:$0xf]  ;;  %v11354_v55 = vor.u32 %v14989_v49, %v11353_v48  ;;  %2824 = vmatpush.bf16.msrb.mxu1 %v11098_v54  ;;  %v14561_v54 = vld [vmem:[%s23798_s1 + $0x44] sm:$0xf] }
  0x4e   :  { %v14853_v56 = vld [vmem:[%s23798_s1 + $0x95c] sm:$0xf0] }
  0x4f   :  { %v11065_v57 = vld [vmem:[%s23798_s1 + $0xb40] sm:$0xf]  ;;  %v10810_v0 = vor.u32 %v14853_v56, %v10809_v53  ;;  %2837 = vmatpush.bf16.msrb.mxu2 %v11354_v55  ;;  %2851 = vmatpush.bf16.msrb.mxu3 %v9790_v11  ;;  %v9659_v55 = vld [vmem:[%s23798_s1 + $0x60] sm:$0xf0] }
  0x50   :  { %v14917_v58 = vld [vmem:[%s23798_s1 + $0xb5c] sm:$0xf0]  ;;  %v14801_v11 = vld [vmem:[%s23798_s1 + $0x7c4] sm:$0xf] }
  0x51   :  { %v11321_v60 = vld [vmem:[%s23798_s1 + $0xd40] sm:$0xf]  ;;  %v11066_v1 = vor.u32 %v14917_v58, %v11065_v57  ;;  %2812 = vmatpush.bf16.msrb.mxu0 %v10810_v0  ;;  %v9662_v0 = vor.u32 %v14561_v54, %v9659_v55  ;;  %v10011_v54 = vld [vmem:[%s23798_s1 + $0x320] sm:$0xf0] }
  0x52   :  { %v14981_v61 = vld [vmem:[%s23798_s1 + $0xd5c] sm:$0xf0]  ;;  %v14713_v55 = vld [vmem:[%s23798_s1 + $0x504] sm:$0xf] }
  0x53   :  { %v10777_v2 = vld [vmem:[%s23798_s1 + $0x900] sm:$0xf]  ;;  %v11322_v5 = vor.u32 %v14981_v61, %v11321_v60  ;;  %2825 = vmatpush.bf16.msrb.mxu1 %v11066_v1  ;;  %2852 = vmatpush.bf16.msrb.mxu3 %v9758_v26  ;;  %v14665_v26 = vld [vmem:[%s23798_s1 + $0x384] sm:$0xf] }
  0x54   :  { %v38_v4 = vld [vmem:[%s23799_s0] sm:$0xff] }
  0x55   :  { %v14845_v6 = vld [vmem:[%s23798_s1 + $0x91c] sm:$0xf0]  ;;  %v16146_v9 = vpack.c.bf16 %v38_v4, %v38_v4  ;;  %2838 = vmatpush.bf16.msrb.mxu2 %v11322_v5  ;;  %v14673_v4 = vld [vmem:[%s23798_s1 + $0x3c4] sm:$0xf] }
  0x56   :  { %v11033_v7 = vld [vmem:[%s23798_s1 + $0xb00] sm:$0xf]  ;;  %v10778_v18 = vor.u32 %v14845_v6, %v10777_v2  ;;  %v14553_v2 = vld [vmem:[%s23798_s1 + $0x4] sm:$0xf] }
  0x57   :  { %v14909_v12 = vld [vmem:[%s23798_s1 + $0xb1c] sm:$0xf0]  ;;  %2766 = vmatmul.bf16.vlgmr.msra.gmra.mxu0 %v16146_v9  ;;  %2853 = vmatpush.bf16.msrb.mxu3 %v9726_v38  ;;  %v10107_v5 = vld [vmem:[%s23798_s1 + $0x3e0] sm:$0xf0]  ;;  %v9630_v19 = vor.u32 %v14553_v2, %v9627_v3 }
  0x58   :  { %v11289_v13 = vld [vmem:[%s23798_s1 + $0xd00] sm:$0xf]  ;;  %v11034_v20 = vor.u32 %v14909_v12, %v11033_v7  ;;  %2813 = vmatpush.bf16.msrb.mxu0 %v10778_v18  ;;  %v14737_v6 = vld [vmem:[%s23798_s1 + $0x5c4] sm:$0xf]  ;;  %v44_v18 = vld [vmem:[%s23799_s0 + $0x30] sm:$0xff] }
  0x59   :  { %v14973_v14 = vld [vmem:[%s23798_s1 + $0xd1c] sm:$0xf0]  ;;  %v10619_v12 = vld [vmem:[%s23798_s1 + $0x7e0] sm:$0xf0] }
  0x5a   :  { %v11290_v21 = vor.u32 %v14973_v14, %v11289_v13  ;;  %v10745_v22 = vld [vmem:[%s23798_s1 + $0x8c0] sm:$0xf]  ;;  %2826 = vmatpush.bf16.msrb.mxu1 %v11034_v20  ;;  %v10110_v20 = vor.u32 %v14673_v4, %v10107_v5  ;;  %v9979_v2 = vld [vmem:[%s23798_s1 + $0x2e0] sm:$0xf0] }
  0x5b   :  { %v14837_v23 = vld [vmem:[%s23798_s1 + $0x8dc] sm:$0xf0]  ;;  %2854 = vmatpush.bf16.msrb.mxu3 %v9694_v50  ;;  %v14705_v3 = vld [vmem:[%s23798_s1 + $0x4c4] sm:$0xf] }
  0x5c   :  { %v11001_v24 = vld [vmem:[%s23798_s1 + $0xac0] sm:$0xf]  ;;  %v10746_v32 = vor.u32 %v14837_v23, %v10745_v22  ;;  %2839 = vmatpush.bf16.msrb.mxu2 %v11290_v21  ;;  %v43_v22 = vld [vmem:[%s23799_s0 + $0x28] sm:$0xff]  ;;  %v10366_v23 = vor.u32 %v14737_v6, %v10363_v10  ;;  %v10235_v5 = vld [vmem:[%s23798_s1 + $0x4e0] sm:$0xf0] }
  0x5d   :  { %v14901_v27 = vld [vmem:[%s23798_s1 + $0xadc] sm:$0xf0]  ;;  %v14769_v6 = vld [vmem:[%s23798_s1 + $0x6c4] sm:$0xf] }
  0x5e   :  { %v11257_v28 = vld [vmem:[%s23798_s1 + $0xcc0] sm:$0xf]  ;;  %v11002_v33 = vor.u32 %v14901_v27, %v11001_v24  ;;  %2814 = vmatpush.bf16.msrb.mxu0 %v10746_v32  ;;  %v10622_v24 = vor.u32 %v14801_v11, %v10619_v12  ;;  %v10075_v27 = vld [vmem:[%s23798_s1 + $0x3a0] sm:$0xf0] }
  0x5f   :  { %v14965_v29 = vld [vmem:[%s23798_s1 + $0xcdc] sm:$0xf0]  ;;  %2855 = vmatpush.bf16.msrb.mxu3 %v9662_v0  ;;  %v10587_v32 = vld [vmem:[%s23798_s1 + $0x7a0] sm:$0xf0]  ;;  %v10078_v38 = vor.u32 %v14665_v26, %v10075_v27 }
  0x60   :  { %v11258_v34 = vor.u32 %v14965_v29, %v11257_v28  ;;  %v10713_v35 = vld [vmem:[%s23798_s1 + $0x880] sm:$0xf]  ;;  %2827 = vmatpush.bf16.msrb.mxu1 %v11002_v33  ;;  %v14729_v28 = vld [vmem:[%s23798_s1 + $0x584] sm:$0xf]  ;;  %v10878_v29 = vor.u32 %v14865_v16, %v10875_v17  ;;  %v16324_v33 = vpack.c.bf16 %v44_v18, %v44_v18 }
  0x61   :  { %v14829_v36 = vld [vmem:[%s23798_s1 + $0x89c] sm:$0xf0]  ;;  %v14833_v10 = vld [vmem:[%s23798_s1 + $0x8c4] sm:$0xf] }
  0x62   :  { %v10969_v37 = vld [vmem:[%s23798_s1 + $0xa80] sm:$0xf]  ;;  %v10714_v44 = vor.u32 %v14829_v36, %v10713_v35  ;;  %2840 = vmatpush.bf16.msrb.mxu2 %v11258_v34  ;;  %v14857_v34 = vld [vmem:[%s23798_s1 + $0x984] sm:$0xf] }
  0x63   :  { %v14893_v39 = vld [vmem:[%s23798_s1 + $0xa9c] sm:$0xf0]  ;;  %v10843_v35 = vld [vmem:[%s23798_s1 + $0x9a0] sm:$0xf0]  ;;  %2856 = vmatpush.bf16.msrb.mxu3 %v9630_v19 }
  0x64   :  { %v11225_v40 = vld [vmem:[%s23798_s1 + $0xc80] sm:$0xf]  ;;  %v10970_v45 = vor.u32 %v14893_v39, %v10969_v37  ;;  %2815 = vmatpush.bf16.msrb.mxu0 %v10714_v44  ;;  %v16334_v37 = vpack.c.bf16 %v43_v22, %v43_v22  ;;  %v10334_v39 = vor.u32 %v14729_v28, %v10331_v30  ;;  %v10846_v44 = vor.u32 %v14857_v34, %v10843_v35  ;;  %v10747_v11 = vld [vmem:[%s23798_s1 + $0x8e0] sm:$0xf0] }
  0x65   :  { %v14957_v41 = vld [vmem:[%s23798_s1 + $0xc9c] sm:$0xf0]  ;;  %v14633_v16 = vld [vmem:[%s23798_s1 + $0x284] sm:$0xf]  ;;  %v10750_v19 = vor.u32 %v14833_v10, %v10747_v11  ;;  %v9825_v11 = vld [vmem:[%s23798_s1 + $0x188] sm:$0xf] }
  0x66   :  { %v11226_v46 = vor.u32 %v14957_v41, %v11225_v40  ;;  %v10681_v47 = vld [vmem:[%s23798_s1 + $0x840] sm:$0xf]  ;;  %2828 = vmatpush.bf16.msrb.mxu1 %v10970_v45  ;;  %v10590_v40 = vor.u32 %v14793_v31, %v10587_v32  ;;  %v14657_v41 = vld [vmem:[%s23798_s1 + $0x344] sm:$0xf]  ;;  %2857 = vmatmul.bf16.vlgmr.msrb.gmra.mxu3 %v16146_v9 }
  0x67   :  { %v14821_v48 = vld [vmem:[%s23798_s1 + $0x85c] sm:$0xf0]  ;;  %2901 = vmatpush.bf16.msra.mxu3 %v10878_v29  ;;  %v10299_v45 = vld [vmem:[%s23798_s1 + $0x560] sm:$0xf0]  ;;  %v10046_v50 = vor.u32 %v14657_v41, %v10043_v42 }
  0x68   :  { %v10937_v49 = vld [vmem:[%s23798_s1 + $0xa40] sm:$0xf]  ;;  %v10682_v56 = vor.u32 %v14821_v48, %v10681_v47  ;;  %2841 = vmatpush.bf16.msrb.mxu2 %v11226_v46  ;;  %v14785_v46 = vld [vmem:[%s23798_s1 + $0x744] sm:$0xf] }
  0x69   :  { %v14885_v51 = vld [vmem:[%s23798_s1 + $0xa5c] sm:$0xf0]  ;;  %v10555_v47 = vld [vmem:[%s23798_s1 + $0x760] sm:$0xf0] }
  0x6a   :  { %v11193_v52 = vld [vmem:[%s23798_s1 + $0xc40] sm:$0xf]  ;;  %v10938_v59 = vor.u32 %v14885_v51, %v10937_v49  ;;  %2816 = vmatpush.bf16.msrb.mxu0 %v10682_v56  ;;  %v14849_v48 = vld [vmem:[%s23798_s1 + $0x944] sm:$0xf]  ;;  %v10302_v51 = vor.u32 %v14721_v43, %v10299_v45 }
  0x6b   :  { %v14949_v53 = vld [vmem:[%s23798_s1 + $0xc5c] sm:$0xf0]  ;;  %v10811_v49 = vld [vmem:[%s23798_s1 + $0x960] sm:$0xf0]  ;;  %2902 = vmatpush.bf16.msra.mxu3 %v10846_v44 }
  0x6c   :  { %v10649_v57 = vld [vmem:[%s23798_s1 + $0x800] sm:$0xf]  ;;  %v11194_v60 = vor.u32 %v14949_v53, %v11193_v52  ;;  %2829 = vmatpush.bf16.msrb.mxu1 %v10938_v59  ;;  %v10558_v52 = vor.u32 %v14785_v46, %v10555_v47  ;;  %v14649_v53 = vld [vmem:[%s23798_s1 + $0x304] sm:$0xf]  ;;  %v10814_v56 = vor.u32 %v14849_v48, %v10811_v49 }
  0x6d   :  { %v14813_v58 = vld [vmem:[%s23798_s1 + $0x81c] sm:$0xf0]  ;;  %v10523_v59 = vld [vmem:[%s23798_s1 + $0x720] sm:$0xf0] }
  0x6e   :  { %v10905_v61 = vld [vmem:[%s23798_s1 + $0xa00] sm:$0xf]  ;;  %v10650_v7 = vor.u32 %v14813_v58, %v10649_v57  ;;  %2842 = vmatpush.bf16.msrb.mxu2 %v11194_v60  ;;  %v10267_v57 = vld [vmem:[%s23798_s1 + $0x520] sm:$0xf0] }
  0x6f   :  { %v14877_v62 = vld [vmem:[%s23798_s1 + $0xa1c] sm:$0xf0]  ;;  %v14777_v58 = vld [vmem:[%s23798_s1 + $0x704] sm:$0xf]  ;;  %2903 = vmatpush.bf16.msra.mxu3 %v10814_v56 }
  0x70   :  { %v11161_v63 = vld [vmem:[%s23798_s1 + $0xc00] sm:$0xf]  ;;  %v10906_v13 = vor.u32 %v14877_v62, %v10905_v61  ;;  %2817 = vmatpush.bf16.msrb.mxu0 %v10650_v7  ;;  %v14841_v60 = vld [vmem:[%s23798_s1 + $0x904] sm:$0xf]  ;;  %v10014_v62 = vor.u32 %v14649_v53, %v10011_v54  ;;  %v10526_v0 = vor.u32 %v14777_v58, %v10523_v59  ;;  %v9857_v58 = vld [vmem:[%s23798_s1 + $0x1c8] sm:$0xf] }
  0x71   :  { %v14941_v1 = vld [vmem:[%s23798_s1 + $0xc1c] sm:$0xf0]  ;;  %v10779_v61 = vld [vmem:[%s23798_s1 + $0x920] sm:$0xf0]  ;;  %v14614_v59 = vld [vmem:[%s23798_s1 + $0x1e4] sm:$0xf0] }
  0x72   :  { %v11162_v14 = vor.u32 %v14941_v1, %v11161_v63  ;;  %v42_v21 = vld [vmem:[%s23799_s0 + $0x20] sm:$0xff]  ;;  %2830 = vmatpush.bf16.msrb.mxu1 %v10906_v13  ;;  %v10270_v63 = vor.u32 %v14713_v55, %v10267_v57  ;;  %v10782_v4 = vor.u32 %v14841_v60, %v10779_v61  ;;  %v10238_v13 = vor.u32 %v14705_v3, %v10235_v5 }
  0x73   :  { %v16332_v36 = vpack.c.bf16 %v42_v21, %v42_v21  ;;  %v14641_v1 = vld [vmem:[%s23798_s1 + $0x2c4] sm:$0xf]  ;;  %v9858_v3 = vor.u32 %v14614_v59, %v9857_v58 }
  0x74   :  { %2843 = vmatpush.bf16.msrb.mxu2 %v11162_v14  ;;  %2862 = vmatpush.bf16.msra.mxu0 %v10110_v20  ;;  %v10491_v7 = vld [vmem:[%s23798_s1 + $0x6e0] sm:$0xf0]  ;;  %v9982_v12 = vor.u32 %v14641_v1, %v9979_v2 }
  0x75   :  { %2818 = vmatmul.bf16.vlgmr.msrb.gmra.mxu0 %v16332_v36  ;;  %2831 = vmatmul.bf16.vlgmr.msrb.gmra.mxu1 %v16334_v37  ;;  %v10494_v14 = vor.u32 %v14769_v6, %v10491_v7  ;;  %v9947_v17 = vld [vmem:[%s23798_s1 + $0x2a0] sm:$0xf0] }
  0x76   :  { %2875 = vmatpush.bf16.msra.mxu1 %v10366_v23  ;;  %v14697_v18 = vld [vmem:[%s23798_s1 + $0x484] sm:$0xf]  ;;  %2904 = vmatpush.bf16.msra.mxu3 %v10782_v4  ;;  %v9950_v26 = vor.u32 %v14633_v16, %v9947_v17 }
  0x77   :  { %2844 = vmatmul.bf16.vlgmr.msrb.gmra.mxu2 %v16324_v33  ;;  %v10203_v20 = vld [vmem:[%s23798_s1 + $0x4a0] sm:$0xf0] }
  0x78   :  { %2888 = vmatpush.bf16.msra.mxu2 %v10622_v24  ;;  %2863 = vmatpush.bf16.msra.mxu0 %v10078_v38  ;;  %v14761_v21 = vld [vmem:[%s23798_s1 + $0x684] sm:$0xf]  ;;  %v10206_v27 = vor.u32 %v14697_v18, %v10203_v20 }
  0x79   :  { %v10459_v22 = vld [vmem:[%s23798_s1 + $0x6a0] sm:$0xf0] }
  0x7a   :  { %2876 = vmatpush.bf16.msra.mxu1 %v10334_v39  ;;  %v14825_v23 = vld [vmem:[%s23798_s1 + $0x884] sm:$0xf]  ;;  %v10462_v28 = vor.u32 %v14761_v21, %v10459_v22  ;;  %2905 = vmatpush.bf16.msra.mxu3 %v10750_v19 }
  0x7b   :  { %v10715_v24 = vld [vmem:[%s23798_s1 + $0x8a0] sm:$0xf0] }
  0x7c   :  { %2889 = vmatpush.bf16.msra.mxu2 %v10590_v40  ;;  %2864 = vmatpush.bf16.msra.mxu0 %v10046_v50  ;;  %v14625_v29 = vld [vmem:[%s23798_s1 + $0x244] sm:$0xf]  ;;  %v10718_v32 = vor.u32 %v14825_v23, %v10715_v24  ;;  %v9793_v24 = vld [vmem:[%s23798_s1 + $0x148] sm:$0xf] }
  0x7d   :  { %v9915_v30 = vld [vmem:[%s23798_s1 + $0x260] sm:$0xf0] }
  0x7e   :  { %2877 = vmatpush.bf16.msra.mxu1 %v10302_v51  ;;  %v14689_v31 = vld [vmem:[%s23798_s1 + $0x444] sm:$0xf]  ;;  %v9918_v41 = vor.u32 %v14625_v29, %v9915_v30  ;;  %2906 = vmatpush.bf16.msra.mxu3 %v10718_v32 }
  0x7f   :  { %v10171_v34 = vld [vmem:[%s23798_s1 + $0x460] sm:$0xf0] }
  0x80   :  { %2890 = vmatpush.bf16.msra.mxu2 %v10558_v52  ;;  %2865 = vmatpush.bf16.msra.mxu0 %v10014_v62  ;;  %v14753_v35 = vld [vmem:[%s23798_s1 + $0x644] sm:$0xf]  ;;  %v10174_v44 = vor.u32 %v14689_v31, %v10171_v34  ;;  %v10113_v62 = vld [vmem:[%s23798_s1 + $0x3c8] sm:$0xf] }
  0x81   :  { %v10427_v38 = vld [vmem:[%s23798_s1 + $0x660] sm:$0xf0] }
  0x82   :  { %2878 = vmatpush.bf16.msra.mxu1 %v10270_v63  ;;  %v14817_v39 = vld [vmem:[%s23798_s1 + $0x844] sm:$0xf]  ;;  %v10430_v45 = vor.u32 %v14753_v35, %v10427_v38  ;;  %v14678_v63 = vld [vmem:[%s23798_s1 + $0x3e4] sm:$0xf0] }
  0x83   :  { %v10683_v40 = vld [vmem:[%s23798_s1 + $0x860] sm:$0xf0]  ;;  %v10114_v7 = vor.u32 %v14678_v63, %v10113_v62 }
  0x84   :  { %2891 = vmatpush.bf16.msra.mxu2 %v10526_v0  ;;  %2866 = vmatpush.bf16.msra.mxu0 %v9982_v12  ;;  %v14617_v42 = vld [vmem:[%s23798_s1 + $0x204] sm:$0xf]  ;;  %v10686_v49 = vor.u32 %v14817_v39, %v10683_v40  ;;  %v14606_v12 = vld [vmem:[%s23798_s1 + $0x1a4] sm:$0xf0] }
  0x85   :  { %v9883_v43 = vld [vmem:[%s23798_s1 + $0x220] sm:$0xf0]  ;;  %v9826_v18 = vor.u32 %v14606_v12, %v9825_v11  ;;  %v9761_v40 = vld [vmem:[%s23798_s1 + $0x108] sm:$0xf] }
  0x86   :  { %2879 = vmatpush.bf16.msra.mxu1 %v10238_v13  ;;  %v14681_v46 = vld [vmem:[%s23798_s1 + $0x404] sm:$0xf]  ;;  %v9886_v56 = vor.u32 %v14617_v42, %v9883_v43  ;;  %2907 = vmatpush.bf16.msra.mxu3 %v10686_v49  ;;  %v10081_v13 = vld [vmem:[%s23798_s1 + $0x388] sm:$0xf] }
  0x87   :  { %v10139_v47 = vld [vmem:[%s23798_s1 + $0x420] sm:$0xf0]  ;;  %v10017_v42 = vld [vmem:[%s23798_s1 + $0x308] sm:$0xf] }
  0x88   :  { %2892 = vmatpush.bf16.msra.mxu2 %v10494_v14  ;;  %2867 = vmatpush.bf16.msra.mxu0 %v9950_v26  ;;  %v14745_v48 = vld [vmem:[%s23798_s1 + $0x604] sm:$0xf]  ;;  %v10142_v60 = vor.u32 %v14681_v46, %v10139_v47  ;;  %v14670_v14 = vld [vmem:[%s23798_s1 + $0x3a4] sm:$0xf0] }
  0x89   :  { %v10395_v50 = vld [vmem:[%s23798_s1 + $0x620] sm:$0xf0]  ;;  %v10082_v22 = vor.u32 %v14670_v14, %v10081_v13  ;;  %v14598_v26 = vld [vmem:[%s23798_s1 + $0x164] sm:$0xf0] }
  0x8a   :  { %2880 = vmatpush.bf16.msra.mxu1 %v10206_v27  ;;  %v14809_v51 = vld [vmem:[%s23798_s1 + $0x804] sm:$0xf]  ;;  %v10398_v61 = vor.u32 %v14745_v48, %v10395_v50  ;;  %v10049_v27 = vld [vmem:[%s23798_s1 + $0x348] sm:$0xf]  ;;  %v9794_v31 = vor.u32 %v14598_v26, %v9793_v24 }
  0x8b   :  { %v10651_v52 = vld [vmem:[%s23798_s1 + $0x820] sm:$0xf0]  ;;  %v14654_v43 = vld [vmem:[%s23798_s1 + $0x324] sm:$0xf0] }
  0x8c   :  { %2893 = vmatpush.bf16.msra.mxu2 %v10462_v28  ;;  %v14929_v53 = vld [vmem:[%s23798_s1 + $0xbc4] sm:$0xf]  ;;  %2868 = vmatpush.bf16.msra.mxu0 %v9918_v41  ;;  %v10654_v0 = vor.u32 %v14809_v51, %v10651_v52  ;;  %v14662_v28 = vld [vmem:[%s23798_s1 + $0x364] sm:$0xf0]  ;;  %v10018_v50 = vor.u32 %v14654_v43, %v10017_v42 }
  0x8d   :  { %v11131_v54 = vld [vmem:[%s23798_s1 + $0xbe0] sm:$0xf0]  ;;  %v10050_v38 = vor.u32 %v14662_v28, %v10049_v27  ;;  %v14590_v41 = vld [vmem:[%s23798_s1 + $0x124] sm:$0xf0] }
  0x8e   :  { %v14993_v55 = vld [vmem:[%s23798_s1 + $0xdc4] sm:$0xf]  ;;  %2881 = vmatpush.bf16.msra.mxu1 %v10174_v44  ;;  %v11134_v1 = vor.u32 %v14929_v53, %v11131_v54  ;;  %2908 = vmatpush.bf16.msra.mxu3 %v10654_v0  ;;  %v9762_v46 = vor.u32 %v14590_v41, %v9761_v40  ;;  %v9729_v52 = vld [vmem:[%s23798_s1 + $0xc8] sm:$0xf] }
  0x8f   :  { %v11387_v57 = vld [vmem:[%s23798_s1 + $0xde0] sm:$0xf0]  ;;  %v14582_v53 = vld [vmem:[%s23798_s1 + $0xe4] sm:$0xf0] }
  0x90   :  { %2894 = vmatpush.bf16.msra.mxu2 %v10430_v45  ;;  %v11390_v2 = vor.u32 %v14993_v55, %v11387_v57  ;;  %v14921_v4 = vld [vmem:[%s23798_s1 + $0xb84] sm:$0xf]  ;;  %2869 = vmatpush.bf16.msra.mxu0 %v9886_v56  ;;  %v9985_v54 = vld [vmem:[%s23798_s1 + $0x2c8] sm:$0xf]  ;;  %v9730_v58 = vor.u32 %v14582_v53, %v9729_v52 }
  0x91   :  { %v11099_v5 = vld [vmem:[%s23798_s1 + $0xba0] sm:$0xf0]  ;;  %2909 = vmatmul.bf16.vlgmr.msra.gmra.mxu3 %v16332_v36  ;;  %v14646_v55 = vld [vmem:[%s23798_s1 + $0x2e4] sm:$0xf0] }
  0x92   :  { %v14985_v6 = vld [vmem:[%s23798_s1 + $0xd84] sm:$0xf]  ;;  %2882 = vmatpush.bf16.msra.mxu1 %v10142_v60  ;;  %v11102_v16 = vor.u32 %v14921_v4, %v11099_v5  ;;  %2953 = vmatpush.bf16.msrb.mxu3 %v10114_v7  ;;  %v9986_v62 = vor.u32 %v14646_v55, %v9985_v54  ;;  %v9697_v0 = vld [vmem:[%s23798_s1 + $0x88] sm:$0xf] }
  0x93   :  { %v11355_v10 = vld [vmem:[%s23798_s1 + $0xda0] sm:$0xf0]  ;;  %2870 = vmatmul.bf16.vlgmr.msra.gmra.mxu0 %v16183_v25  ;;  %v9665_v14 = vld [vmem:[%s23798_s1 + $0x48] sm:$0xf] }
  0x94   :  { %2895 = vmatpush.bf16.msra.mxu2 %v10398_v61  ;;  %2914 = vmatpush.bf16.msrb.mxu0 %v11134_v1  ;;  %v11358_v17 = vor.u32 %v14985_v6, %v11355_v10  ;;  %v14913_v19 = vld [vmem:[%s23798_s1 + $0xb44] sm:$0xf]  ;;  %v14574_v1 = vld [vmem:[%s23798_s1 + $0xa4] sm:$0xf0] }
  0x95   :  { %v11067_v20 = vld [vmem:[%s23798_s1 + $0xb60] sm:$0xf0]  ;;  %2883 = vmatmul.bf16.vlgmr.msra.gmra.mxu1 %v16144_v8  ;;  %v9698_v6 = vor.u32 %v14574_v1, %v9697_v0  ;;  %v9633_v27 = vld [vmem:[%s23798_s1 + $0x8] sm:$0xf] }
  0x96   :  { %2927 = vmatpush.bf16.msrb.mxu1 %v11390_v2  ;;  %v14977_v21 = vld [vmem:[%s23798_s1 + $0xd44] sm:$0xf]  ;;  %v11070_v29 = vor.u32 %v14913_v19, %v11067_v20  ;;  %2954 = vmatpush.bf16.msrb.mxu3 %v10082_v22  ;;  %v9953_v2 = vld [vmem:[%s23798_s1 + $0x288] sm:$0xf] }
  0x97   :  { %2896 = vmatmul.bf16.vlgmr.msra.gmra.mxu2 %v16160_v15  ;;  %v11323_v23 = vld [vmem:[%s23798_s1 + $0xd60] sm:$0xf0]  ;;  %v10881_v40 = vld [vmem:[%s23798_s1 + $0x9c8] sm:$0xf] }
  0x98   :  { %2940 = vmatpush.bf16.msrb.mxu2 %v9858_v3  ;;  %2915 = vmatpush.bf16.msrb.mxu0 %v11102_v16  ;;  %v11326_v30 = vor.u32 %v14977_v21, %v11323_v23  ;;  %v14905_v32 = vld [vmem:[%s23798_s1 + $0xb04] sm:$0xf]  ;;  %v14638_v3 = vld [vmem:[%s23798_s1 + $0x2a4] sm:$0xf0] }
  0x99   :  { %v11035_v34 = vld [vmem:[%s23798_s1 + $0xb20] sm:$0xf0]  ;;  %v9954_v12 = vor.u32 %v14638_v3, %v9953_v2  ;;  %v14566_v16 = vld [vmem:[%s23798_s1 + $0x64] sm:$0xf0] }
  0x9a   :  { %2928 = vmatpush.bf16.msrb.mxu1 %v11358_v17  ;;  %v14969_v35 = vld [vmem:[%s23798_s1 + $0xd04] sm:$0xf]  ;;  %v11038_v44 = vor.u32 %v14905_v32, %v11035_v34  ;;  %2955 = vmatpush.bf16.msrb.mxu3 %v10050_v38  ;;  %v9921_v17 = vld [vmem:[%s23798_s1 + $0x248] sm:$0xf]  ;;  %v9666_v23 = vor.u32 %v14566_v16, %v9665_v14 }
  0x9b   :  { %v11291_v39 = vld [vmem:[%s23798_s1 + $0xd20] sm:$0xf0]  ;;  %v10369_v32 = vld [vmem:[%s23798_s1 + $0x5c8] sm:$0xf] }
  0x9c   :  { %2941 = vmatpush.bf16.msrb.mxu2 %v9826_v18  ;;  %2916 = vmatpush.bf16.msrb.mxu0 %v11070_v29  ;;  %v11294_v45 = vor.u32 %v14969_v35, %v11291_v39  ;;  %v14897_v47 = vld [vmem:[%s23798_s1 + $0xac4] sm:$0xf]  ;;  %v14630_v18 = vld [vmem:[%s23798_s1 + $0x264] sm:$0xf0] }
  0x9d   :  { %v11003_v48 = vld [vmem:[%s23798_s1 + $0xae0] sm:$0xf0]  ;;  %v9922_v28 = vor.u32 %v14630_v18, %v9921_v17  ;;  %v14558_v29 = vld [vmem:[%s23798_s1 + $0x24] sm:$0xf0] }
  0x9e   :  { %2929 = vmatpush.bf16.msrb.mxu1 %v11326_v30  ;;  %v14961_v49 = vld [vmem:[%s23798_s1 + $0xcc4] sm:$0xf]  ;;  %v11006_v56 = vor.u32 %v14897_v47, %v11003_v48  ;;  %2956 = vmatpush.bf16.msrb.mxu3 %v10018_v50  ;;  %v9889_v30 = vld [vmem:[%s23798_s1 + $0x208] sm:$0xf]  ;;  %v9634_v43 = vor.u32 %v14558_v29, %v9633_v27 }
  0x9f   :  { %v11259_v51 = vld [vmem:[%s23798_s1 + $0xce0] sm:$0xf0]  ;;  %v14742_v34 = vld [vmem:[%s23798_s1 + $0x5e4] sm:$0xf0] }
  0xa0   :  { %2942 = vmatpush.bf16.msrb.mxu2 %v9794_v31  ;;  %2917 = vmatpush.bf16.msrb.mxu0 %v11038_v44  ;;  %v11262_v57 = vor.u32 %v14961_v49, %v11259_v51  ;;  %v14889_v59 = vld [vmem:[%s23798_s1 + $0xa84] sm:$0xf]  ;;  %v14622_v31 = vld [vmem:[%s23798_s1 + $0x224] sm:$0xf0]  ;;  %v10370_v47 = vor.u32 %v14742_v34, %v10369_v32 }
  0xa1   :  { %v10971_v60 = vld [vmem:[%s23798_s1 + $0xaa0] sm:$0xf0]  ;;  %v10625_v35 = vld [vmem:[%s23798_s1 + $0x7c8] sm:$0xf] }
  0xa2   :  { %2930 = vmatpush.bf16.msrb.mxu1 %v11294_v45  ;;  %v14953_v61 = vld [vmem:[%s23798_s1 + $0xc84] sm:$0xf]  ;;  %v10974_v4 = vor.u32 %v14889_v59, %v10971_v60  ;;  %2957 = vmatpush.bf16.msrb.mxu3 %v9986_v62  ;;  %v14806_v39 = vld [vmem:[%s23798_s1 + $0x7e4] sm:$0xf0] }
  0xa3   :  { %v11227_v63 = vld [vmem:[%s23798_s1 + $0xca0] sm:$0xf0]  ;;  %v14870_v41 = vld [vmem:[%s23798_s1 + $0x9e4] sm:$0xf0]  ;;  %v10626_v48 = vor.u32 %v14806_v39, %v10625_v35 }
  0xa4   :  { %2943 = vmatpush.bf16.msrb.mxu2 %v9762_v46  ;;  %2918 = vmatpush.bf16.msrb.mxu0 %v11006_v56  ;;  %v11230_v5 = vor.u32 %v14953_v61, %v11227_v63  ;;  %v14881_v7 = vld [vmem:[%s23798_s1 + $0xa44] sm:$0xf]  ;;  %v11137_v44 = vld [vmem:[%s23798_s1 + $0xbc8] sm:$0xf]  ;;  %v9890_v46 = vor.u32 %v14622_v31, %v9889_v30  ;;  %v10882_v49 = vor.u32 %v14870_v41, %v10881_v40 }
  0xa5   :  { %v10939_v10 = vld [vmem:[%s23798_s1 + $0xa60] sm:$0xf0]  ;;  %v14934_v45 = vld [vmem:[%s23798_s1 + $0xbe4] sm:$0xf0] }
  0xa6   :  { %2931 = vmatpush.bf16.msrb.mxu1 %v11262_v57  ;;  %v14945_v11 = vld [vmem:[%s23798_s1 + $0xc44] sm:$0xf]  ;;  %v10942_v19 = vor.u32 %v14881_v7, %v10939_v10  ;;  %2958 = vmatpush.bf16.msrb.mxu3 %v9954_v12  ;;  %v10337_v50 = vld [vmem:[%s23798_s1 + $0x588] sm:$0xf]  ;;  %v11138_v53 = vor.u32 %v14934_v45, %v11137_v44 }
  0xa7   :  { %v11195_v13 = vld [vmem:[%s23798_s1 + $0xc60] sm:$0xf0]  ;;  %v14734_v51 = vld [vmem:[%s23798_s1 + $0x5a4] sm:$0xf0] }
  0xa8   :  { %2944 = vmatpush.bf16.msrb.mxu2 %v9730_v58  ;;  %2919 = vmatpush.bf16.msrb.mxu0 %v10974_v4  ;;  %v14873_v20 = vld [vmem:[%s23798_s1 + $0xa04] sm:$0xf]  ;;  %v11198_v22 = vor.u32 %v14945_v11, %v11195_v13  ;;  %v10593_v52 = vld [vmem:[%s23798_s1 + $0x788] sm:$0xf]  ;;  %v10338_v59 = vor.u32 %v14734_v51, %v10337_v50 }
  0xa9   :  { %v10907_v21 = vld [vmem:[%s23798_s1 + $0xa20] sm:$0xf0]  ;;  %v14798_v54 = vld [vmem:[%s23798_s1 + $0x7a4] sm:$0xf0] }
  0xaa   :  { %2932 = vmatpush.bf16.msrb.mxu1 %v11230_v5  ;;  %v14937_v24 = vld [vmem:[%s23798_s1 + $0xc04] sm:$0xf]  ;;  %v10910_v38 = vor.u32 %v14873_v20, %v10907_v21  ;;  %2959 = vmatpush.bf16.msrb.mxu3 %v9922_v28  ;;  %v10849_v55 = vld [vmem:[%s23798_s1 + $0x988] sm:$0xf]  ;;  %v10594_v60 = vor.u32 %v14798_v54, %v10593_v52 }
  0xab   :  { %v11163_v26 = vld [vmem:[%s23798_s1 + $0xc20] sm:$0xf0]  ;;  %v14862_v56 = vld [vmem:[%s23798_s1 + $0x9a4] sm:$0xf0] }
  0xac   :  { %2945 = vmatpush.bf16.msrb.mxu2 %v9698_v6  ;;  %2920 = vmatpush.bf16.msrb.mxu0 %v10942_v19  ;;  %v11166_v42 = vor.u32 %v14937_v24, %v11163_v26  ;;  %v11105_v57 = vld [vmem:[%s23798_s1 + $0xb88] sm:$0xf]  ;;  %v10850_v61 = vor.u32 %v14862_v56, %v10849_v55 }
  0xad   :  { %v14926_v58 = vld [vmem:[%s23798_s1 + $0xba4] sm:$0xf0] }
  0xae   :  { %2933 = vmatpush.bf16.msrb.mxu1 %v11198_v22  ;;  %2960 = vmatpush.bf16.msrb.mxu3 %v9890_v46  ;;  %v10305_v62 = vld [vmem:[%s23798_s1 + $0x548] sm:$0xf]  ;;  %v11106_v1 = vor.u32 %v14926_v58, %v11105_v57 }
  0xaf   :  { %v14726_v63 = vld [vmem:[%s23798_s1 + $0x564] sm:$0xf0] }
  0xb0   :  { %2946 = vmatpush.bf16.msrb.mxu2 %v9666_v23  ;;  %2921 = vmatpush.bf16.msrb.mxu0 %v10910_v38  ;;  %v10561_v0 = vld [vmem:[%s23798_s1 + $0x748] sm:$0xf]  ;;  %v10306_v7 = vor.u32 %v14726_v63, %v10305_v62 }
  0xb1   :  { %v14790_v2 = vld [vmem:[%s23798_s1 + $0x764] sm:$0xf0]  ;;  %2961 = vmatmul.bf16.vlgmr.msrb.gmra.mxu3 %v16183_v25 }
  0xb2   :  { %2934 = vmatpush.bf16.msrb.mxu1 %v11166_v42  ;;  %3005 = vmatpush.bf16.msra.mxu3 %v11138_v53  ;;  %v10817_v3 = vld [vmem:[%s23798_s1 + $0x948] sm:$0xf]  ;;  %v10562_v10 = vor.u32 %v14790_v2, %v10561_v0 }
  0xb3   :  { %2922 = vmatmul.bf16.vlgmr.msrb.gmra.mxu0 %v16334_v37  ;;  %v14854_v4 = vld [vmem:[%s23798_s1 + $0x964] sm:$0xf0] }
  0xb4   :  { %2947 = vmatpush.bf16.msrb.mxu2 %v9634_v43  ;;  %2966 = vmatpush.bf16.msra.mxu0 %v10370_v47  ;;  %v11073_v5 = vld [vmem:[%s23798_s1 + $0xb48] sm:$0xf]  ;;  %v10818_v11 = vor.u32 %v14854_v4, %v10817_v3 }
  0xb5   :  { %2935 = vmatmul.bf16.vlgmr.msrb.gmra.mxu1 %v16324_v33  ;;  %v14918_v6 = vld [vmem:[%s23798_s1 + $0xb64] sm:$0xf0] }
  0xb6   :  { %2979 = vmatpush.bf16.msra.mxu1 %v10626_v48  ;;  %v10273_v12 = vld [vmem:[%s23798_s1 + $0x508] sm:$0xf]  ;;  %3006 = vmatpush.bf16.msra.mxu3 %v11106_v1  ;;  %v11074_v16 = vor.u32 %v14918_v6, %v11073_v5 }
  0xb7   :  { %2948 = vmatmul.bf16.vlgmr.msrb.gmra.mxu2 %v16146_v9  ;;  %v14718_v13 = vld [vmem:[%s23798_s1 + $0x524] sm:$0xf0] }
  0xb8   :  { %2992 = vmatpush.bf16.msra.mxu2 %v10882_v49  ;;  %2967 = vmatpush.bf16.msra.mxu0 %v10338_v59  ;;  %v10529_v14 = vld [vmem:[%s23798_s1 + $0x708] sm:$0xf]  ;;  %v10274_v22 = vor.u32 %v14718_v13, %v10273_v12 }
  0xb9   :  { %v14782_v17 = vld [vmem:[%s23798_s1 + $0x724] sm:$0xf0] }
  0xba   :  { %2980 = vmatpush.bf16.msra.mxu1 %v10594_v60  ;;  %v10785_v18 = vld [vmem:[%s23798_s1 + $0x908] sm:$0xf]  ;;  %v10530_v23 = vor.u32 %v14782_v17, %v10529_v14  ;;  %3007 = vmatpush.bf16.msra.mxu3 %v11074_v16  ;;  %v14610_v14 = vld [vmem:[%s23798_s1 + $0x1cc] sm:$0xf] }
  0xbb   :  { %v14846_v19 = vld [vmem:[%s23798_s1 + $0x924] sm:$0xf0]  ;;  %v9859_v17 = vld [vmem:[%s23798_s1 + $0x1e8] sm:$0xf0] }
  0xbc   :  { %2993 = vmatpush.bf16.msra.mxu2 %v10850_v61  ;;  %v11041_v20 = vld [vmem:[%s23798_s1 + $0xb08] sm:$0xf]  ;;  %2968 = vmatpush.bf16.msra.mxu0 %v10306_v7  ;;  %v10786_v24 = vor.u32 %v14846_v19, %v10785_v18  ;;  %v14674_v18 = vld [vmem:[%s23798_s1 + $0x3cc] sm:$0xf] }
  0xbd   :  { %v14910_v21 = vld [vmem:[%s23798_s1 + $0xb24] sm:$0xf0]  ;;  %v10115_v19 = vld [vmem:[%s23798_s1 + $0x3e8] sm:$0xf0] }
  0xbe   :  { %2981 = vmatpush.bf16.msra.mxu1 %v10562_v10  ;;  %v10241_v26 = vld [vmem:[%s23798_s1 + $0x4c8] sm:$0xf]  ;;  %v11042_v29 = vor.u32 %v14910_v21, %v11041_v20 }
  0xbf   :  { %v14710_v27 = vld [vmem:[%s23798_s1 + $0x4e4] sm:$0xf0] }
  0xc0   :  { %2994 = vmatpush.bf16.msra.mxu2 %v10818_v11  ;;  %v10497_v28 = vld [vmem:[%s23798_s1 + $0x6c8] sm:$0xf]  ;;  %2969 = vmatpush.bf16.msra.mxu0 %v10274_v22  ;;  %v10242_v38 = vor.u32 %v14710_v27, %v10241_v26  ;;  %v14738_v22 = vld [vmem:[%s23798_s1 + $0x5cc] sm:$0xf]  ;;  %v9862_v27 = vor.u32 %v14610_v14, %v9859_v17 }
  0xc1   :  { %v14774_v30 = vld [vmem:[%s23798_s1 + $0x6e4] sm:$0xf0]  ;;  %3008 = vmatpush.bf16.msra.mxu3 %v11042_v29  ;;  %v9987_v14 = vld [vmem:[%s23798_s1 + $0x2e8] sm:$0xf0] }
  0xc2   :  { %v10753_v31 = vld [vmem:[%s23798_s1 + $0x8c8] sm:$0xf]  ;;  %2982 = vmatpush.bf16.msra.mxu1 %v10530_v23  ;;  %v10498_v39 = vor.u32 %v14774_v30, %v10497_v28  ;;  %v10371_v23 = vld [vmem:[%s23798_s1 + $0x5e8] sm:$0xf0]  ;;  %v10118_v28 = vor.u32 %v14674_v18, %v10115_v19 }
  0xc3   :  { %v14838_v32 = vld [vmem:[%s23798_s1 + $0x8e4] sm:$0xf0]  ;;  %v10243_v17 = vld [vmem:[%s23798_s1 + $0x4e8] sm:$0xf0] }
  0xc4   :  { %v11009_v34 = vld [vmem:[%s23798_s1 + $0xac8] sm:$0xf]  ;;  %2995 = vmatpush.bf16.msra.mxu2 %v10786_v24  ;;  %v10754_v40 = vor.u32 %v14838_v32, %v10753_v31  ;;  %2970 = vmatpush.bf16.msra.mxu0 %v10242_v38  ;;  %v14602_v31 = vld [vmem:[%s23798_s1 + $0x18c] sm:$0xf]  ;;  %v10374_v32 = vor.u32 %v14738_v22, %v10371_v23 }
  0xc5   :  { %v14902_v35 = vld [vmem:[%s23798_s1 + $0xae4] sm:$0xf0]  ;;  %v10083_v38 = vld [vmem:[%s23798_s1 + $0x3a8] sm:$0xf0] }
  0xc6   :  { %v10209_v41 = vld [vmem:[%s23798_s1 + $0x488] sm:$0xf]  ;;  %v11010_v44 = vor.u32 %v14902_v35, %v11009_v34  ;;  %2983 = vmatpush.bf16.msra.mxu1 %v10498_v39  ;;  %v9827_v34 = vld [vmem:[%s23798_s1 + $0x1a8] sm:$0xf0] }
  0xc7   :  { %v14702_v42 = vld [vmem:[%s23798_s1 + $0x4a4] sm:$0xf0]  ;;  %v14666_v35 = vld [vmem:[%s23798_s1 + $0x38c] sm:$0xf] }
  0xc8   :  { %v10465_v43 = vld [vmem:[%s23798_s1 + $0x688] sm:$0xf]  ;;  %v10210_v50 = vor.u32 %v14702_v42, %v10209_v41  ;;  %2996 = vmatpush.bf16.msra.mxu2 %v10754_v40  ;;  %3009 = vmatpush.bf16.msra.mxu3 %v11010_v44  ;;  %v14730_v39 = vld [vmem:[%s23798_s1 + $0x58c] sm:$0xf]  ;;  %v9830_v42 = vor.u32 %v14602_v31, %v9827_v34 }
  0xc9   :  { %v14766_v45 = vld [vmem:[%s23798_s1 + $0x6a4] sm:$0xf0]  ;;  %v10339_v40 = vld [vmem:[%s23798_s1 + $0x5a8] sm:$0xf0] }
  0xca   :  { %v10721_v46 = vld [vmem:[%s23798_s1 + $0x888] sm:$0xf]  ;;  %v10466_v51 = vor.u32 %v14766_v45, %v10465_v43  ;;  %2971 = vmatpush.bf16.msra.mxu0 %v10210_v50  ;;  %v10086_v43 = vor.u32 %v14666_v35, %v10083_v38  ;;  %v10051_v50 = vld [vmem:[%s23798_s1 + $0x368] sm:$0xf0]  ;;  %v2780_v35 = vpop.f32.mrf.mxu1 }
  0xcb   :  { %v14830_v47 = vld [vmem:[%s23798_s1 + $0x8a4] sm:$0xf0]  ;;  %v14698_v31 = vld [vmem:[%s23798_s1 + $0x48c] sm:$0xf] }
  0xcc   :  { %v10977_v48 = vld [vmem:[%s23798_s1 + $0xa88] sm:$0xf]  ;;  %v10722_v52 = vor.u32 %v14830_v47, %v10721_v46  ;;  %2984 = vmatpush.bf16.msra.mxu1 %v10466_v51  ;;  %v14594_v46 = vld [vmem:[%s23798_s1 + $0x14c] sm:$0xf]  ;;  %v10342_v47 = vor.u32 %v14730_v39, %v10339_v40 }
  0xcd   :  { %v14894_v49 = vld [vmem:[%s23798_s1 + $0xaa4] sm:$0xf0]  ;;  %v14722_v51 = vld [vmem:[%s23798_s1 + $0x54c] sm:$0xf] }
  0xce   :  { %v10177_v53 = vld [vmem:[%s23798_s1 + $0x448] sm:$0xf]  ;;  %v10978_v56 = vor.u32 %v14894_v49, %v10977_v48  ;;  %2997 = vmatpush.bf16.msra.mxu2 %v10722_v52  ;;  %v9795_v48 = vld [vmem:[%s23798_s1 + $0x168] sm:$0xf0] }
  0xcf   :  { %v14694_v54 = vld [vmem:[%s23798_s1 + $0x464] sm:$0xf0]  ;;  %v14658_v49 = vld [vmem:[%s23798_s1 + $0x34c] sm:$0xf] }
  0xd0   :  { %v10433_v55 = vld [vmem:[%s23798_s1 + $0x648] sm:$0xf]  ;;  %v10178_v62 = vor.u32 %v14694_v54, %v10177_v53  ;;  %3010 = vmatpush.bf16.msra.mxu3 %v10978_v56  ;;  %v10307_v52 = vld [vmem:[%s23798_s1 + $0x568] sm:$0xf0]  ;;  %v10054_v56 = vor.u32 %v14658_v49, %v10051_v50 }
  0xd1   :  { %v14758_v57 = vld [vmem:[%s23798_s1 + $0x664] sm:$0xf0]  ;;  %v14690_v49 = vld [vmem:[%s23798_s1 + $0x44c] sm:$0xf] }
  0xd2   :  { %v10689_v58 = vld [vmem:[%s23798_s1 + $0x848] sm:$0xf]  ;;  %v10434_v1 = vor.u32 %v14758_v57, %v10433_v55  ;;  %2972 = vmatpush.bf16.msra.mxu0 %v10178_v62  ;;  %v9798_v55 = vor.u32 %v14594_v46, %v9795_v48  ;;  %v10019_v62 = vld [vmem:[%s23798_s1 + $0x328] sm:$0xf0]  ;;  %v2793_v48 = vpop.f32.mrf.mxu2 }
  0xd3   :  { %v14822_v59 = vld [vmem:[%s23798_s1 + $0x864] sm:$0xf0]  ;;  %v14626_v46 = vld [vmem:[%s23798_s1 + $0x24c] sm:$0xf] }
  0xd4   :  { %v10945_v60 = vld [vmem:[%s23798_s1 + $0xa48] sm:$0xf]  ;;  %v10690_v2 = vor.u32 %v14822_v59, %v10689_v58  ;;  %2985 = vmatpush.bf16.msra.mxu1 %v10434_v1  ;;  %v14586_v58 = vld [vmem:[%s23798_s1 + $0x10c] sm:$0xf]  ;;  %v2767_v19 = vpop.f32.mrf.mxu0 }
  0xd5   :  { %v14886_v61 = vld [vmem:[%s23798_s1 + $0xa64] sm:$0xf0]  ;;  %v9763_v59 = vld [vmem:[%s23798_s1 + $0x128] sm:$0xf0] }
  0xd6   :  { %v10145_v63 = vld [vmem:[%s23798_s1 + $0x408] sm:$0xf]  ;;  %v10946_v6 = vor.u32 %v14886_v61, %v10945_v60  ;;  %2998 = vmatpush.bf16.msra.mxu2 %v10690_v2  ;;  %v10310_v60 = vor.u32 %v14722_v51, %v10307_v52  ;;  %v14650_v61 = vld [vmem:[%s23798_s1 + $0x30c] sm:$0xf]  ;;  %v2806_v52 = vpop.f32.mrf.mxu3 }
  0xd7   :  { %v14686_v0 = vld [vmem:[%s23798_s1 + $0x424] sm:$0xf0]  ;;  %v10275_v1 = vld [vmem:[%s23798_s1 + $0x528] sm:$0xf0] }
  0xd8   :  { %v10401_v3 = vld [vmem:[%s23798_s1 + $0x608] sm:$0xf]  ;;  %v10146_v16 = vor.u32 %v14686_v0, %v10145_v63  ;;  %3011 = vmatpush.bf16.msra.mxu3 %v10946_v6  ;;  %v16973_v63 = vld [vmem:[%s23800_s2] sm:$0xff]  ;;  %v14714_v0 = vld [vmem:[%s23798_s1 + $0x50c] sm:$0xf] }
  0xd9   :  { %v14750_v4 = vld [vmem:[%s23798_s1 + $0x624] sm:$0xf0]  ;;  %v10179_v50 = vld [vmem:[%s23798_s1 + $0x468] sm:$0xf0] }
  0xda   :  { %v10657_v5 = vld [vmem:[%s23798_s1 + $0x808] sm:$0xf]  ;;  %v10402_v20 = vor.u32 %v14750_v4, %v10401_v3  ;;  %2973 = vmatpush.bf16.msra.mxu0 %v10146_v16  ;;  %v9766_v4 = vor.u32 %v14586_v58, %v9763_v59  ;;  %v14706_v16 = vld [vmem:[%s23798_s1 + $0x4cc] sm:$0xf] }
  0xdb   :  { %v14814_v7 = vld [vmem:[%s23798_s1 + $0x824] sm:$0xf0]  ;;  %v14554_v59 = vld [vmem:[%s23798_s1 + $0xc] sm:$0xf] }
  0xdc   :  { %v10913_v10 = vld [vmem:[%s23798_s1 + $0xa08] sm:$0xf]  ;;  %v10658_v21 = vor.u32 %v14814_v7, %v10657_v5  ;;  %2986 = vmatpush.bf16.msra.mxu1 %v10402_v20  ;;  %v10022_v5 = vor.u32 %v14650_v61, %v10019_v62  ;;  %v14578_v7 = vld [vmem:[%s23798_s1 + $0xcc] sm:$0xf] }
  0xdd   :  { %v14878_v11 = vld [vmem:[%s23798_s1 + $0xa24] sm:$0xf0]  ;;  %2974 = vmatmul.bf16.vlgmr.msra.gmra.mxu0 %v16144_v8  ;;  %v14618_v61 = vld [vmem:[%s23798_s1 + $0x20c] sm:$0xf] }
  0xde   :  { %v11393_v12 = vld [vmem:[%s23798_s1 + $0xdc8] sm:$0xf]  ;;  %v10914_v24 = vor.u32 %v14878_v11, %v10913_v10  ;;  %2999 = vmatpush.bf16.msra.mxu2 %v10658_v21  ;;  %v502_v10 = vperm.slane %v16973_v63, 0  ;;  %v10278_v11 = vor.u32 %v14714_v0, %v10275_v1  ;;  %v10182_v0 = vor.u32 %v14690_v49, %v10179_v50  ;;  %v9891_v1 = vld [vmem:[%s23798_s1 + $0x228] sm:$0xf0] }
  0xdf   :  { %v14998_v13 = vld [vmem:[%s23798_s1 + $0xde4] sm:$0xf0]  ;;  %2987 = vmatmul.bf16.vlgmr.msra.gmra.mxu1 %v16160_v15  ;;  %v11331_v49 = vld [vmem:[%s23798_s1 + $0xd68] sm:$0xf0] }
  0xe0   :  { %v11394_v26 = vor.u32 %v14998_v13, %v11393_v12  ;;  %v11361_v29 = vld [vmem:[%s23798_s1 + $0xd88] sm:$0xf]  ;;  %3012 = vmatpush.bf16.msra.mxu3 %v10914_v24  ;;  %3031 = vmatpush.bf16.msrb.mxu1 %v9862_v27  ;;  %v9731_v12 = vld [vmem:[%s23798_s1 + $0xe8] sm:$0xf0]  ;;  %v10246_v27 = vor.u32 %v14706_v16, %v10243_v17  ;;  %v9894_v16 = vor.u32 %v14618_v61, %v9891_v1 }
  0xe1   :  { %v14990_v30 = vld [vmem:[%s23798_s1 + $0xda4] sm:$0xf0]  ;;  %3000 = vmatmul.bf16.vlgmr.msra.gmra.mxu2 %v16332_v36  ;;  %v14642_v13 = vld [vmem:[%s23798_s1 + $0x2cc] sm:$0xf]  ;;  %v9734_v20 = vor.u32 %v14578_v7, %v9731_v12 }
  0xe2   :  { %3018 = vmatpush.bf16.msrb.mxu0 %v11394_v26  ;;  %v11362_v41 = vor.u32 %v14990_v30, %v11361_v29  ;;  %3044 = vmatpush.bf16.msrb.mxu2 %v10118_v28  ;;  %v11329_v44 = vld [vmem:[%s23798_s1 + $0xd48] sm:$0xf]  ;;  %v9990_v21 = vor.u32 %v14642_v13, %v9987_v14  ;;  %v14570_v24 = vld [vmem:[%s23798_s1 + $0x8c] sm:$0xf]  ;;  %v2768_v26 = vadd.f32 %v2767_v19, %v502_v10  ;;  %v2782_v13 = vpop.f32.mrf.mxu1 }
  0xe3   :  { %v14982_v45 = vld [vmem:[%s23798_s1 + $0xd64] sm:$0xf0]  ;;  %3013 = vmatmul.bf16.vlgmr.msra.gmra.mxu3 %v16334_v37  ;;  %v9699_v28 = vld [vmem:[%s23798_s1 + $0xa8] sm:$0xf0] }
  0xe4   :  { %3057 = vmatpush.bf16.msrb.mxu3 %v10374_v32  ;;  %v11330_v53 = vor.u32 %v14982_v45, %v11329_v44  ;;  %v11297_v54 = vld [vmem:[%s23798_s1 + $0xd08] sm:$0xf]  ;;  %3032 = vmatpush.bf16.msrb.mxu1 %v9830_v42  ;;  %v14634_v29 = vld [vmem:[%s23798_s1 + $0x28c] sm:$0xf]  ;;  %v9702_v38 = vor.u32 %v14570_v24, %v9699_v28  ;;  %v2808_v28 = vpop.f32.mrf.mxu3 }
  0xe5   :  { %v14974_v57 = vld [vmem:[%s23798_s1 + $0xd24] sm:$0xf0]  ;;  %v9955_v30 = vld [vmem:[%s23798_s1 + $0x2a8] sm:$0xf0] }
  0xe6   :  { %3019 = vmatpush.bf16.msrb.mxu0 %v11362_v41  ;;  %3045 = vmatpush.bf16.msrb.mxu2 %v10086_v43  ;;  %v11298_v2 = vor.u32 %v14974_v57, %v11297_v54  ;;  %v11265_v3 = vld [vmem:[%s23798_s1 + $0xcc8] sm:$0xf]  ;;  %v10211_v32 = vld [vmem:[%s23798_s1 + $0x4a8] sm:$0xf0]  ;;  %v9958_v39 = vor.u32 %v14634_v29, %v9955_v30  ;;  %v2781_v43 = vadd.f32 %v2780_v35, %v2768_v26 }
  0xe7   :  { %v14966_v6 = vld [vmem:[%s23798_s1 + $0xce4] sm:$0xf0]  ;;  %v14562_v42 = vld [vmem:[%s23798_s1 + $0x4c] sm:$0xf]  ;;  %v10214_v44 = vor.u32 %v14698_v31, %v10211_v32 }
  0xe8   :  { %3058 = vmatpush.bf16.msrb.mxu3 %v10342_v47  ;;  %3033 = vmatpush.bf16.msrb.mxu1 %v9798_v55  ;;  %v11266_v18 = vor.u32 %v14966_v6, %v11265_v3  ;;  %v11233_v22 = vld [vmem:[%s23798_s1 + $0xc88] sm:$0xf]  ;;  %v9667_v45 = vld [vmem:[%s23798_s1 + $0x68] sm:$0xf0]  ;;  %v2794_v51 = vadd.f32 %v2793_v48, %v2781_v43 }
  0xe9   :  { %v14958_v23 = vld [vmem:[%s23798_s1 + $0xca4] sm:$0xf0]  ;;  %v9923_v47 = vld [vmem:[%s23798_s1 + $0x268] sm:$0xf0]  ;;  %v9670_v57 = vor.u32 %v14562_v42, %v9667_v45 }
  0xea   :  { %3020 = vmatpush.bf16.msrb.mxu0 %v11330_v53  ;;  %3046 = vmatpush.bf16.msrb.mxu2 %v10054_v56  ;;  %v11234_v34 = vor.u32 %v14958_v23, %v11233_v22  ;;  %v11201_v40 = vld [vmem:[%s23798_s1 + $0xc48] sm:$0xf]  ;;  %v2769_v56 = vpop.f32.mrf.mxu0  ;;  %v9926_v58 = vor.u32 %v14626_v46, %v9923_v47  ;;  %v17069_v62 = vadd.f32 %v2806_v52, %v2794_v51  ;;  %v10147_v3 = vld [vmem:[%s23798_s1 + $0x428] sm:$0xf0] }
  0xeb   :  { %v14950_v41 = vld [vmem:[%s23798_s1 + $0xc64] sm:$0xf0]  ;;  %v14866_v6 = vld [vmem:[%s23798_s1 + $0x9cc] sm:$0xf] }
  0xec   :  { %3059 = vmatpush.bf16.msrb.mxu3 %v10310_v60  ;;  %3034 = vmatpush.bf16.msrb.mxu1 %v9766_v4  ;;  %v11202_v53 = vor.u32 %v14950_v41, %v11201_v40  ;;  %v11169_v54 = vld [vmem:[%s23798_s1 + $0xc08] sm:$0xf]  ;;  %v9635_v60 = vld [vmem:[%s23798_s1 + $0x28] sm:$0xf0] }
  0xed   :  { %v14942_v55 = vld [vmem:[%s23798_s1 + $0xc24] sm:$0xf0]  ;;  %v14802_v4 = vld [vmem:[%s23798_s1 + $0x7cc] sm:$0xf]  ;;  %v9638_v14 = vor.u32 %v14554_v59, %v9635_v60 }
  0xee   :  { %3021 = vmatpush.bf16.msrb.mxu0 %v11298_v2  ;;  %3047 = vmatpush.bf16.msrb.mxu2 %v10022_v5  ;;  %v14682_v2 = vld [vmem:[%s23798_s1 + $0x40c] sm:$0xf]  ;;  %v11170_v7 = vor.u32 %v14942_v55, %v11169_v54 }
  0xef   :  { %v10627_v5 = vld [vmem:[%s23798_s1 + $0x7e8] sm:$0xf0]  ;;  %v10150_v19 = vor.u32 %v14682_v2, %v10147_v3 }
  0xf0   :  { %3060 = vmatpush.bf16.msrb.mxu3 %v10278_v11  ;;  %3035 = vmatpush.bf16.msrb.mxu1 %v9734_v20  ;;  %v10883_v10 = vld [vmem:[%s23798_s1 + $0x9e8] sm:$0xf0]  ;;  %v10630_v20 = vor.u32 %v14802_v4, %v10627_v5 }
  0xf1   :  { %v14930_v11 = vld [vmem:[%s23798_s1 + $0xbcc] sm:$0xf]  ;;  %v10886_v22 = vor.u32 %v14866_v6, %v10883_v10 }
  0xf2   :  { %3022 = vmatpush.bf16.msrb.mxu0 %v11266_v18  ;;  %3048 = vmatpush.bf16.msrb.mxu2 %v9990_v21  ;;  %v11139_v12 = vld [vmem:[%s23798_s1 + $0xbe8] sm:$0xf0]  ;;  %v2795_v21 = vpop.f32.mrf.mxu2  ;;  %v2819_v1 = vpop.f32.mrf.mxu0 }
  0xf3   :  { %v14994_v17 = vld [vmem:[%s23798_s1 + $0xdcc] sm:$0xf]  ;;  %v11142_v23 = vor.u32 %v14930_v11, %v11139_v12  ;;  %v2832_v2 = vpop.f32.mrf.mxu1  ;;  %v2820_v10 = vadd.f32 %v2819_v1, %v17069_v62 }
  0xf4   :  { %3061 = vmatpush.bf16.msrb.mxu3 %v10246_v27  ;;  %3036 = vmatpush.bf16.msrb.mxu1 %v9702_v38  ;;  %v11395_v18 = vld [vmem:[%s23798_s1 + $0xde8] sm:$0xf0] }
  0xf5   :  { %v14794_v24 = vld [vmem:[%s23798_s1 + $0x78c] sm:$0xf]  ;;  %v11398_v29 = vor.u32 %v14994_v17, %v11395_v18  ;;  %v2833_v17 = vadd.f32 %v2832_v2, %v2820_v10  ;;  %v9865_v2 = vld [vmem:[%s23798_s1 + $0x1d0] sm:$0xf] }
  0xf6   :  { %3023 = vmatpush.bf16.msrb.mxu0 %v11234_v34  ;;  %3049 = vmatpush.bf16.msrb.mxu2 %v9958_v39  ;;  %v10595_v26 = vld [vmem:[%s23798_s1 + $0x7a8] sm:$0xf0]  ;;  %v10377_v10 = vld [vmem:[%s23798_s1 + $0x5d0] sm:$0xf] }
  0xf7   :  { %v14858_v27 = vld [vmem:[%s23798_s1 + $0x98c] sm:$0xf]  ;;  %v10598_v38 = vor.u32 %v14794_v24, %v10595_v26 }
  0xf8   :  { %3062 = vmatpush.bf16.msrb.mxu3 %v10214_v44  ;;  %3037 = vmatpush.bf16.msrb.mxu1 %v9670_v57  ;;  %v10851_v30 = vld [vmem:[%s23798_s1 + $0x9a8] sm:$0xf0] }
  0xf9   :  { %v14922_v31 = vld [vmem:[%s23798_s1 + $0xb8c] sm:$0xf]  ;;  %v10854_v39 = vor.u32 %v14858_v27, %v10851_v30 }
  0xfa   :  { %3024 = vmatpush.bf16.msrb.mxu0 %v11202_v53  ;;  %3050 = vmatpush.bf16.msrb.mxu2 %v9926_v58  ;;  %v11107_v32 = vld [vmem:[%s23798_s1 + $0xba8] sm:$0xf0]  ;;  %v2845_v24 = vpop.f32.mrf.mxu2 }
  0xfb   :  { %v14986_v34 = vld [vmem:[%s23798_s1 + $0xd8c] sm:$0xf]  ;;  %v11110_v40 = vor.u32 %v14922_v31, %v11107_v32  ;;  %v17223_v30 = vadd.f32 %v2845_v24, %v2833_v17  ;;  %v14671_v24 = vld [vmem:[%s23798_s1 + $0x3ac] sm:$0xf0] }
  0xfc   :  { %3063 = vmatpush.bf16.msrb.mxu3 %v10182_v0  ;;  %3038 = vmatpush.bf16.msrb.mxu1 %v9638_v14  ;;  %v11363_v35 = vld [vmem:[%s23798_s1 + $0xda8] sm:$0xf0] }
  0xfd   :  { %v14786_v41 = vld [vmem:[%s23798_s1 + $0x74c] sm:$0xf]  ;;  %v11366_v44 = vor.u32 %v14986_v34, %v11363_v35  ;;  %v17231_v34 = vpop.f32.mrf.mxu3 }
  0xfe   :  { %3025 = vmatpush.bf16.msrb.mxu0 %v11170_v7  ;;  %3051 = vmatpush.bf16.msrb.mxu2 %v9894_v16  ;;  %v10563_v42 = vld [vmem:[%s23798_s1 + $0x768] sm:$0xf0] }
  0xff   :  { %v14850_v43 = vld [vmem:[%s23798_s1 + $0x94c] sm:$0xf]  ;;  %v10566_v50 = vor.u32 %v14786_v41, %v10563_v42  ;;  %3039 = vmatmul.bf16.vlgmr.msrb.gmra.mxu1 %v16146_v9 }
 0x100   :  { %3064 = vmatpush.bf16.msrb.mxu3 %v10150_v19  ;;  %3083 = vmatpush.bf16.msra.mxu1 %v10886_v22  ;;  %v10819_v45 = vld [vmem:[%s23798_s1 + $0x968] sm:$0xf0] }
 0x101   :  { %3026 = vmatmul.bf16.vlgmr.msrb.gmra.mxu0 %v16324_v33  ;;  %v14914_v46 = vld [vmem:[%s23798_s1 + $0xb4c] sm:$0xf]  ;;  %3052 = vmatmul.bf16.vlgmr.msrb.gmra.mxu2 %v16183_v25  ;;  %v10822_v51 = vor.u32 %v14850_v43, %v10819_v45 }
 0x102   :  { %3070 = vmatpush.bf16.msra.mxu0 %v10630_v20  ;;  %3096 = vmatpush.bf16.msra.mxu2 %v11142_v23  ;;  %v11075_v47 = vld [vmem:[%s23798_s1 + $0xb68] sm:$0xf0] }
 0x103   :  { %v14978_v48 = vld [vmem:[%s23798_s1 + $0xd4c] sm:$0xf]  ;;  %3065 = vmatmul.bf16.vlgmr.msrb.gmra.mxu3 %v16144_v8  ;;  %v11078_v52 = vor.u32 %v14914_v46, %v11075_v47 }
 0x104   :  { %3109 = vmatpush.bf16.msra.mxu3 %v11398_v29  ;;  %3084 = vmatpush.bf16.msra.mxu1 %v10854_v39  ;;  %v14778_v53 = vld [vmem:[%s23798_s1 + $0x70c] sm:$0xf]  ;;  %v11334_v56 = vor.u32 %v14978_v48, %v11331_v49  ;;  %v2834_v39 = vpop.f32.mrf.mxu1 }
 0x105   :  { %v10531_v54 = vld [vmem:[%s23798_s1 + $0x728] sm:$0xf0]  ;;  %v14599_v39 = vld [vmem:[%s23798_s1 + $0x16c] sm:$0xf0] }
 0x106   :  { %3071 = vmatpush.bf16.msra.mxu0 %v10598_v38  ;;  %3097 = vmatpush.bf16.msra.mxu2 %v11110_v40  ;;  %v14842_v55 = vld [vmem:[%s23798_s1 + $0x90c] sm:$0xf]  ;;  %v10534_v0 = vor.u32 %v14778_v53, %v10531_v54  ;;  %v2821_v38 = vpop.f32.mrf.mxu0 }
 0x107   :  { %v10787_v57 = vld [vmem:[%s23798_s1 + $0x928] sm:$0xf0] }
 0x108   :  { %3110 = vmatpush.bf16.msra.mxu3 %v11366_v44  ;;  %v14906_v58 = vld [vmem:[%s23798_s1 + $0xb0c] sm:$0xf]  ;;  %3085 = vmatpush.bf16.msra.mxu1 %v10822_v51  ;;  %v10790_v3 = vor.u32 %v14842_v55, %v10787_v57 }
 0x109   :  { %v11043_v59 = vld [vmem:[%s23798_s1 + $0xb28] sm:$0xf0] }
 0x10a   :  { %v14970_v60 = vld [vmem:[%s23798_s1 + $0xd0c] sm:$0xf]  ;;  %3072 = vmatpush.bf16.msra.mxu0 %v10566_v50  ;;  %3098 = vmatpush.bf16.msra.mxu2 %v11078_v52  ;;  %v11046_v4 = vor.u32 %v14906_v58, %v11043_v59  ;;  %v2847_v59 = vpop.f32.mrf.mxu2 }
 0x10b   :  { %v11299_v61 = vld [vmem:[%s23798_s1 + $0xd28] sm:$0xf0]  ;;  %v14783_v59 = vld [vmem:[%s23798_s1 + $0x72c] sm:$0xf0] }
 0x10c   :  { %v14770_v5 = vld [vmem:[%s23798_s1 + $0x6cc] sm:$0xf]  ;;  %3111 = vmatpush.bf16.msra.mxu3 %v11334_v56  ;;  %v11302_v11 = vor.u32 %v14970_v60, %v11299_v61  ;;  %3086 = vmatpush.bf16.msra.mxu1 %v10790_v3  ;;  %v14615_v3 = vld [vmem:[%s23798_s1 + $0x1ec] sm:$0xf0] }
 0x10d   :  { %v10499_v6 = vld [vmem:[%s23798_s1 + $0x6e8] sm:$0xf0]  ;;  %v9866_v17 = vor.u32 %v14615_v3, %v9865_v2  ;;  %v9737_v2 = vld [vmem:[%s23798_s1 + $0xd0] sm:$0xf] }
 0x10e   :  { %v14834_v7 = vld [vmem:[%s23798_s1 + $0x8cc] sm:$0xf]  ;;  %3073 = vmatpush.bf16.msra.mxu0 %v10534_v0  ;;  %v10502_v18 = vor.u32 %v14770_v5, %v10499_v6  ;;  %3099 = vmatpush.bf16.msra.mxu2 %v11046_v4  ;;  %v10121_v4 = vld [vmem:[%s23798_s1 + $0x3d0] sm:$0xf]  ;;  %v2860_v5 = vpop.f32.mrf.mxu3 }
 0x10f   :  { %v10755_v12 = vld [vmem:[%s23798_s1 + $0x8e8] sm:$0xf0]  ;;  %v14583_v3 = vld [vmem:[%s23798_s1 + $0xec] sm:$0xf0] }
 0x110   :  { %v14898_v13 = vld [vmem:[%s23798_s1 + $0xacc] sm:$0xf]  ;;  %v10758_v19 = vor.u32 %v14834_v7, %v10755_v12  ;;  %3112 = vmatpush.bf16.msra.mxu3 %v11302_v11  ;;  %v14679_v7 = vld [vmem:[%s23798_s1 + $0x3ec] sm:$0xf0] }
 0x111   :  { %v11011_v14 = vld [vmem:[%s23798_s1 + $0xae8] sm:$0xf0]  ;;  %v14743_v11 = vld [vmem:[%s23798_s1 + $0x5ec] sm:$0xf0] }
 0x112   :  { %v14962_v16 = vld [vmem:[%s23798_s1 + $0xccc] sm:$0xf]  ;;  %v11014_v20 = vor.u32 %v14898_v13, %v11011_v14  ;;  %3074 = vmatpush.bf16.msra.mxu0 %v10502_v18  ;;  %3087 = vmatpush.bf16.msra.mxu1 %v10758_v19  ;;  %v10633_v14 = vld [vmem:[%s23798_s1 + $0x7d0] sm:$0xf]  ;;  %v10122_v18 = vor.u32 %v14679_v7, %v10121_v4  ;;  %v10378_v19 = vor.u32 %v14743_v11, %v10377_v10 }
 0x113   :  { %v11267_v62 = vld [vmem:[%s23798_s1 + $0xce8] sm:$0xf0]  ;;  %v9993_v4 = vld [vmem:[%s23798_s1 + $0x2d0] sm:$0xf] }
 0x114   :  { %v14762_v21 = vld [vmem:[%s23798_s1 + $0x68c] sm:$0xf]  ;;  %v11270_v26 = vor.u32 %v14962_v16, %v11267_v62  ;;  %3100 = vmatpush.bf16.msra.mxu2 %v11014_v20  ;;  %v14807_v16 = vld [vmem:[%s23798_s1 + $0x7ec] sm:$0xf0] }
 0x115   :  { %v10467_v22 = vld [vmem:[%s23798_s1 + $0x6a8] sm:$0xf0]  ;;  %v9833_v20 = vld [vmem:[%s23798_s1 + $0x190] sm:$0xf] }
 0x116   :  { %v14826_v23 = vld [vmem:[%s23798_s1 + $0x88c] sm:$0xf]  ;;  %v10470_v35 = vor.u32 %v14762_v21, %v10467_v22  ;;  %3113 = vmatpush.bf16.msra.mxu3 %v11270_v26  ;;  %v14607_v21 = vld [vmem:[%s23798_s1 + $0x1ac] sm:$0xf0] }
 0x117   :  { %v10723_v27 = vld [vmem:[%s23798_s1 + $0x8a8] sm:$0xf0]  ;;  %v10089_v22 = vld [vmem:[%s23798_s1 + $0x390] sm:$0xf] }
 0x118   :  { %v14890_v28 = vld [vmem:[%s23798_s1 + $0xa8c] sm:$0xf]  ;;  %v10726_v40 = vor.u32 %v14826_v23, %v10723_v27  ;;  %3075 = vmatpush.bf16.msra.mxu0 %v10470_v35  ;;  %v10634_v23 = vor.u32 %v14807_v16, %v10633_v14  ;;  %v10345_v26 = vld [vmem:[%s23798_s1 + $0x590] sm:$0xf]  ;;  %v10090_v35 = vor.u32 %v14671_v24, %v10089_v22 }
 0x119   :  { %v10979_v29 = vld [vmem:[%s23798_s1 + $0xaa8] sm:$0xf0]  ;;  %v14735_v27 = vld [vmem:[%s23798_s1 + $0x5ac] sm:$0xf0] }
 0x11a   :  { %v14954_v31 = vld [vmem:[%s23798_s1 + $0xc8c] sm:$0xf]  ;;  %v10982_v41 = vor.u32 %v14890_v28, %v10979_v29  ;;  %3088 = vmatpush.bf16.msra.mxu1 %v10726_v40  ;;  %v10601_v28 = vld [vmem:[%s23798_s1 + $0x790] sm:$0xf]  ;;  %v10346_v38 = vor.u32 %v14735_v27, %v10345_v26  ;;  %v2897_v22 = vpop.f32.mrf.mxu2 }
 0x11b   :  { %v11235_v32 = vld [vmem:[%s23798_s1 + $0xca8] sm:$0xf0]  ;;  %v14799_v29 = vld [vmem:[%s23798_s1 + $0x7ac] sm:$0xf0] }
 0x11c   :  { %v14754_v42 = vld [vmem:[%s23798_s1 + $0x64c] sm:$0xf]  ;;  %v11238_v45 = vor.u32 %v14954_v31, %v11235_v32  ;;  %3101 = vmatpush.bf16.msra.mxu2 %v10982_v41  ;;  %v9834_v31 = vor.u32 %v14607_v21, %v9833_v20  ;;  %v9801_v32 = vld [vmem:[%s23798_s1 + $0x150] sm:$0xf]  ;;  %v503_v41 = vperm.slane %v16973_v63, 1 }
 0x11d   :  { %v10435_v43 = vld [vmem:[%s23798_s1 + $0x668] sm:$0xf0]  ;;  %v10057_v40 = vld [vmem:[%s23798_s1 + $0x350] sm:$0xf] }
 0x11e   :  { %v14818_v44 = vld [vmem:[%s23798_s1 + $0x84c] sm:$0xf]  ;;  %v10438_v51 = vor.u32 %v14754_v42, %v10435_v43  ;;  %3114 = vmatpush.bf16.msra.mxu3 %v11238_v45  ;;  %v10602_v42 = vor.u32 %v14799_v29, %v10601_v28  ;;  %v14663_v43 = vld [vmem:[%s23798_s1 + $0x36c] sm:$0xf0]  ;;  %v2910_v29 = vpop.f32.mrf.mxu3 }
 0x11f   :  { %v10691_v46 = vld [vmem:[%s23798_s1 + $0x868] sm:$0xf0]  ;;  %v14727_v45 = vld [vmem:[%s23798_s1 + $0x56c] sm:$0xf0] }
 0x120   :  { %v14882_v47 = vld [vmem:[%s23798_s1 + $0xa4c] sm:$0xf]  ;;  %v10694_v54 = vor.u32 %v14818_v44, %v10691_v46  ;;  %3076 = vmatpush.bf16.msra.mxu0 %v10438_v51  ;;  %v10313_v44 = vld [vmem:[%s23798_s1 + $0x550] sm:$0xf]  ;;  %v2859_v51 = vadd.f32 %v17231_v34, %v503_v41 }
 0x121   :  { %v10947_v48 = vld [vmem:[%s23798_s1 + $0xa68] sm:$0xf0]  ;;  %v10569_v46 = vld [vmem:[%s23798_s1 + $0x750] sm:$0xf] }
 0x122   :  { %v14946_v49 = vld [vmem:[%s23798_s1 + $0xc4c] sm:$0xf]  ;;  %v10950_v55 = vor.u32 %v14882_v47, %v10947_v48  ;;  %3089 = vmatpush.bf16.msra.mxu1 %v10694_v54  ;;  %v14791_v47 = vld [vmem:[%s23798_s1 + $0x76c] sm:$0xf0]  ;;  %v9802_v48 = vor.u32 %v14599_v39, %v9801_v32 }
 0x123   :  { %v11203_v50 = vld [vmem:[%s23798_s1 + $0xc68] sm:$0xf0]  ;;  %v10025_v54 = vld [vmem:[%s23798_s1 + $0x310] sm:$0xf] }
 0x124   :  { %v14746_v52 = vld [vmem:[%s23798_s1 + $0x60c] sm:$0xf]  ;;  %v11206_v60 = vor.u32 %v14946_v49, %v11203_v50  ;;  %3102 = vmatpush.bf16.msra.mxu2 %v10950_v55  ;;  %v10058_v49 = vor.u32 %v14663_v43, %v10057_v40  ;;  %v10314_v50 = vor.u32 %v14727_v45, %v10313_v44  ;;  %v10570_v55 = vor.u32 %v14791_v47, %v10569_v46  ;;  %v10281_v34 = vld [vmem:[%s23798_s1 + $0x510] sm:$0xf] }
 0x125   :  { %v10403_v53 = vld [vmem:[%s23798_s1 + $0x628] sm:$0xf0]  ;;  %v14647_v10 = vld [vmem:[%s23798_s1 + $0x2ec] sm:$0xf0] }
 0x126   :  { %v14810_v56 = vld [vmem:[%s23798_s1 + $0x80c] sm:$0xf]  ;;  %v10406_v6 = vor.u32 %v14746_v52, %v10403_v53  ;;  %3115 = vmatpush.bf16.msra.mxu3 %v11206_v60  ;;  %v9769_v52 = vld [vmem:[%s23798_s1 + $0x110] sm:$0xf] }
 0x127   :  { %v10659_v57 = vld [vmem:[%s23798_s1 + $0x828] sm:$0xf0]  ;;  %v14591_v53 = vld [vmem:[%s23798_s1 + $0x12c] sm:$0xf0] }
 0x128   :  { %v14874_v58 = vld [vmem:[%s23798_s1 + $0xa0c] sm:$0xf]  ;;  %v10662_v12 = vor.u32 %v14810_v56, %v10659_v57  ;;  %3077 = vmatpush.bf16.msra.mxu0 %v10406_v6  ;;  %v14655_v56 = vld [vmem:[%s23798_s1 + $0x32c] sm:$0xf0]  ;;  %v9770_v60 = vor.u32 %v14591_v53, %v9769_v52  ;;  %v2884_v6 = vpop.f32.mrf.mxu1 }
 0x129   :  { %v10915_v61 = vld [vmem:[%s23798_s1 + $0xa28] sm:$0xf0]  ;;  %v14719_v57 = vld [vmem:[%s23798_s1 + $0x52c] sm:$0xf0] }
 0x12a   :  { %v14938_v0 = vld [vmem:[%s23798_s1 + $0xc0c] sm:$0xf]  ;;  %v10918_v13 = vor.u32 %v14874_v58, %v10915_v61  ;;  %3090 = vmatpush.bf16.msra.mxu1 %v10662_v12  ;;  %v10537_v58 = vld [vmem:[%s23798_s1 + $0x710] sm:$0xf]  ;;  %v2871_v61 = vpop.f32.mrf.mxu0 }
 0x12b   :  { %v11171_v1 = vld [vmem:[%s23798_s1 + $0xc28] sm:$0xf0]  ;;  %3078 = vmatmul.bf16.vlgmr.msra.gmra.mxu0 %v16160_v15  ;;  %v2872_v5 = vadd.f32 %v2871_v61, %v2859_v51  ;;  %v10538_v7 = vor.u32 %v14783_v59, %v10537_v58  ;;  %v10249_v11 = vld [vmem:[%s23798_s1 + $0x4d0] sm:$0xf]  ;;  %v2899_v59 = vpop.f32.mrf.mxu2 }
 0x12c   :  { %v11174_v62 = vor.u32 %v14938_v0, %v11171_v1  ;;  %3103 = vmatpush.bf16.msra.mxu2 %v10918_v13  ;;  %3122 = vmatpush.bf16.msrb.mxu0 %v9866_v17  ;;  %v10026_v0 = vor.u32 %v14655_v56, %v10025_v54  ;;  %v10282_v1 = vor.u32 %v14719_v57, %v10281_v34  ;;  %v14711_v12 = vld [vmem:[%s23798_s1 + $0x4ec] sm:$0xf0]  ;;  %v9771_v59 = vld [vmem:[%s23798_s1 + $0x130] sm:$0xf0] }
 0x12d   :  { %3091 = vmatmul.bf16.vlgmr.msra.gmra.mxu1 %v16332_v36  ;;  %v10505_v13 = vld [vmem:[%s23798_s1 + $0x6d0] sm:$0xf]  ;;  %v2885_v16 = vadd.f32 %v2884_v6, %v2872_v5  ;;  %v9994_v17 = vor.u32 %v14647_v10, %v9993_v4 }
 0x12e   :  { %3116 = vmatpush.bf16.msra.mxu3 %v11174_v62  ;;  %3135 = vmatpush.bf16.msrb.mxu1 %v10122_v18  ;;  %v14775_v14 = vld [vmem:[%s23798_s1 + $0x6ec] sm:$0xf0]  ;;  %v9738_v62 = vor.u32 %v14583_v3, %v9737_v2  ;;  %v10250_v18 = vor.u32 %v14711_v12, %v10249_v11  ;;  %v2912_v2 = vpop.f32.mrf.mxu3 }
 0x12f   :  { %3104 = vmatmul.bf16.vlgmr.msra.gmra.mxu2 %v16334_v37  ;;  %v14575_v20 = vld [vmem:[%s23798_s1 + $0xac] sm:$0xf0]  ;;  %v2898_v28 = vadd.f32 %v2897_v22, %v2885_v16  ;;  %v9867_v16 = vld [vmem:[%s23798_s1 + $0x1f0] sm:$0xf0] }
 0x130   :  { %3148 = vmatpush.bf16.msrb.mxu2 %v10378_v19  ;;  %3123 = vmatpush.bf16.msrb.mxu0 %v9834_v31  ;;  %v9705_v19 = vld [vmem:[%s23798_s1 + $0x90] sm:$0xf]  ;;  %v2886_v45 = vpop.f32.mrf.mxu1 }
 0x131   :  { %3117 = vmatmul.bf16.vlgmr.msra.gmra.mxu3 %v16324_v33  ;;  %v9961_v21 = vld [vmem:[%s23798_s1 + $0x290] sm:$0xf] }
 0x132   :  { %3161 = vmatpush.bf16.msrb.mxu3 %v10634_v23  ;;  %3136 = vmatpush.bf16.msrb.mxu1 %v10090_v35  ;;  %v10506_v23 = vor.u32 %v14775_v14, %v10505_v13  ;;  %v14639_v24 = vld [vmem:[%s23798_s1 + $0x2ac] sm:$0xf0]  ;;  %v9706_v35 = vor.u32 %v14575_v20, %v9705_v19  ;;  %v2873_v39 = vpop.f32.mrf.mxu0  ;;  %v14611_v14 = vld [vmem:[%s23798_s1 + $0x1d4] sm:$0xf] }
 0x133   :  { %v10217_v26 = vld [vmem:[%s23798_s1 + $0x490] sm:$0xf]  ;;  %v9962_v40 = vor.u32 %v14639_v24, %v9961_v21 }
 0x134   :  { %3149 = vmatpush.bf16.msrb.mxu2 %v10346_v38  ;;  %3124 = vmatpush.bf16.msrb.mxu0 %v9802_v48  ;;  %v14703_v27 = vld [vmem:[%s23798_s1 + $0x4ac] sm:$0xf0]  ;;  %v17431_v38 = vadd.f32 %v2910_v29, %v2898_v28  ;;  %v14603_v28 = vld [vmem:[%s23798_s1 + $0x194] sm:$0xf] }
 0x135   :  { %v10473_v31 = vld [vmem:[%s23798_s1 + $0x690] sm:$0xf]  ;;  %v10218_v41 = vor.u32 %v14703_v27, %v10217_v26  ;;  %v9835_v29 = vld [vmem:[%s23798_s1 + $0x1b0] sm:$0xf0] }
 0x136   :  { %3162 = vmatpush.bf16.msrb.mxu3 %v10602_v42  ;;  %3137 = vmatpush.bf16.msrb.mxu1 %v10058_v49  ;;  %v14767_v32 = vld [vmem:[%s23798_s1 + $0x6ac] sm:$0xf0] }
 0x137   :  { %v9673_v42 = vld [vmem:[%s23798_s1 + $0x50] sm:$0xf]  ;;  %v10474_v46 = vor.u32 %v14767_v32, %v10473_v31 }
 0x138   :  { %3150 = vmatpush.bf16.msrb.mxu2 %v10314_v50  ;;  %3125 = vmatpush.bf16.msrb.mxu0 %v9770_v60  ;;  %v14567_v43 = vld [vmem:[%s23798_s1 + $0x6c] sm:$0xf0] }
 0x139   :  { %v9929_v44 = vld [vmem:[%s23798_s1 + $0x250] sm:$0xf]  ;;  %v9674_v52 = vor.u32 %v14567_v43, %v9673_v42  ;;  %v9838_v42 = vor.u32 %v14603_v28, %v9835_v29  ;;  %v2962_v29 = vpop.f32.mrf.mxu3 }
 0x13a   :  { %3163 = vmatpush.bf16.msrb.mxu3 %v10570_v55  ;;  %3138 = vmatpush.bf16.msrb.mxu1 %v10026_v0  ;;  %v14631_v47 = vld [vmem:[%s23798_s1 + $0x26c] sm:$0xf0] }
 0x13b   :  { %v10185_v48 = vld [vmem:[%s23798_s1 + $0x450] sm:$0xf]  ;;  %v9930_v55 = vor.u32 %v14631_v47, %v9929_v44  ;;  %v9803_v47 = vld [vmem:[%s23798_s1 + $0x170] sm:$0xf0] }
 0x13c   :  { %3151 = vmatpush.bf16.msrb.mxu2 %v10282_v1  ;;  %3126 = vmatpush.bf16.msrb.mxu0 %v9738_v62  ;;  %v14695_v49 = vld [vmem:[%s23798_s1 + $0x46c] sm:$0xf0] }
 0x13d   :  { %v10441_v50 = vld [vmem:[%s23798_s1 + $0x650] sm:$0xf]  ;;  %v10186_v56 = vor.u32 %v14695_v49, %v10185_v48 }
 0x13e   :  { %3164 = vmatpush.bf16.msrb.mxu3 %v10538_v7  ;;  %3139 = vmatpush.bf16.msrb.mxu1 %v9994_v17  ;;  %v14759_v51 = vld [vmem:[%s23798_s1 + $0x66c] sm:$0xf0] }
 0x13f   :  { %v9641_v53 = vld [vmem:[%s23798_s1 + $0x10] sm:$0xf]  ;;  %v10442_v60 = vor.u32 %v14759_v51, %v10441_v50 }
 0x140   :  { %3152 = vmatpush.bf16.msrb.mxu2 %v10250_v18  ;;  %3127 = vmatpush.bf16.msrb.mxu0 %v9706_v35  ;;  %v14559_v54 = vld [vmem:[%s23798_s1 + $0x2c] sm:$0xf0] }
 0x141   :  { %v9897_v34 = vld [vmem:[%s23798_s1 + $0x210] sm:$0xf]  ;;  %v9642_v6 = vor.u32 %v14559_v54, %v9641_v53 }
 0x142   :  { %3165 = vmatpush.bf16.msrb.mxu3 %v10506_v23  ;;  %3140 = vmatpush.bf16.msrb.mxu1 %v9962_v40  ;;  %v14623_v57 = vld [vmem:[%s23798_s1 + $0x22c] sm:$0xf0]  ;;  %v9870_v23 = vor.u32 %v14611_v14, %v9867_v16  ;;  %v504_v14 = vperm.slane %v16973_v63, 2 }
 0x143   :  { %v10153_v58 = vld [vmem:[%s23798_s1 + $0x410] sm:$0xf]  ;;  %v9898_v12 = vor.u32 %v14623_v57, %v9897_v34  ;;  %v2923_v57 = vpop.f32.mrf.mxu0 }
 0x144   :  { %3153 = vmatpush.bf16.msrb.mxu2 %v10218_v41  ;;  %v14687_v61 = vld [vmem:[%s23798_s1 + $0x42c] sm:$0xf0]  ;;  %3128 = vmatpush.bf16.msrb.mxu0 %v9674_v52 }
 0x145   :  { %v10409_v0 = vld [vmem:[%s23798_s1 + $0x610] sm:$0xf]  ;;  %v10154_v13 = vor.u32 %v14687_v61, %v10153_v58  ;;  %v14587_v58 = vld [vmem:[%s23798_s1 + $0x114] sm:$0xf] }
 0x146   :  { %3166 = vmatpush.bf16.msrb.mxu3 %v10474_v46  ;;  %v14751_v1 = vld [vmem:[%s23798_s1 + $0x62c] sm:$0xf0]  ;;  %3141 = vmatpush.bf16.msrb.mxu1 %v9930_v55  ;;  %v14595_v46 = vld [vmem:[%s23798_s1 + $0x154] sm:$0xf] }
 0x147   :  { %v10889_v3 = vld [vmem:[%s23798_s1 + $0x9d0] sm:$0xf]  ;;  %v10410_v62 = vor.u32 %v14751_v1, %v10409_v0  ;;  %v9806_v54 = vor.u32 %v14595_v46, %v9803_v47  ;;  %v2936_v0 = vpop.f32.mrf.mxu1 }
 0x148   :  { %v14871_v4 = vld [vmem:[%s23798_s1 + $0x9ec] sm:$0xf0]  ;;  %3154 = vmatpush.bf16.msrb.mxu2 %v10186_v56  ;;  %3129 = vmatpush.bf16.msrb.mxu0 %v9642_v6 }
 0x149   :  { %v11145_v5 = vld [vmem:[%s23798_s1 + $0xbd0] sm:$0xf]  ;;  %v10890_v17 = vor.u32 %v14871_v4, %v10889_v3 }
 0x14a   :  { %v14935_v7 = vld [vmem:[%s23798_s1 + $0xbec] sm:$0xf0]  ;;  %3167 = vmatpush.bf16.msrb.mxu3 %v10442_v60  ;;  %3142 = vmatpush.bf16.msrb.mxu1 %v9898_v12  ;;  %v2924_v60 = vadd.f32 %v2923_v57, %v17431_v38  ;;  %v9774_v38 = vor.u32 %v14587_v58, %v9771_v59  ;;  %v14579_v12 = vld [vmem:[%s23798_s1 + $0xd4] sm:$0xf] }
 0x14b   :  { %v11401_v10 = vld [vmem:[%s23798_s1 + $0xdd0] sm:$0xf]  ;;  %v11146_v18 = vor.u32 %v14935_v7, %v11145_v5  ;;  %3130 = vmatmul.bf16.vlgmr.msrb.gmra.mxu0 %v16146_v9 }
 0x14c   :  { %v14999_v11 = vld [vmem:[%s23798_s1 + $0xdec] sm:$0xf0]  ;;  %3155 = vmatpush.bf16.msrb.mxu2 %v10154_v13  ;;  %3174 = vmatpush.bf16.msra.mxu0 %v10890_v17  ;;  %v17591_v6 = vadd.f32 %v2936_v0, %v2924_v60  ;;  %v9739_v13 = vld [vmem:[%s23798_s1 + $0xf0] sm:$0xf0] }
 0x14d   :  { %v11402_v19 = vor.u32 %v14999_v11, %v11401_v10  ;;  %v10857_v20 = vld [vmem:[%s23798_s1 + $0x990] sm:$0xf]  ;;  %3143 = vmatmul.bf16.vlgmr.msrb.gmra.mxu1 %v16183_v25  ;;  %v9742_v63 = vor.u32 %v14579_v12, %v9739_v13  ;;  %v14555_v60 = vld [vmem:[%s23798_s1 + $0x14] sm:$0xf] }
 0x14e   :  { %v14863_v21 = vld [vmem:[%s23798_s1 + $0x9ac] sm:$0xf0]  ;;  %3168 = vmatpush.bf16.msrb.mxu3 %v10410_v62  ;;  %3187 = vmatpush.bf16.msra.mxu1 %v11146_v18  ;;  %v14867_v13 = vld [vmem:[%s23798_s1 + $0x9d4] sm:$0xf] }
 0x14f   :  { %v11113_v22 = vld [vmem:[%s23798_s1 + $0xb90] sm:$0xf]  ;;  %v10858_v31 = vor.u32 %v14863_v21, %v10857_v20  ;;  %3156 = vmatmul.bf16.vlgmr.msrb.gmra.mxu2 %v16144_v8 }
 0x150   :  { %v14927_v24 = vld [vmem:[%s23798_s1 + $0xbac] sm:$0xf0]  ;;  %3200 = vmatpush.bf16.msra.mxu2 %v11402_v19 }
 0x151   :  { %v11369_v26 = vld [vmem:[%s23798_s1 + $0xd90] sm:$0xf]  ;;  %v11114_v32 = vor.u32 %v14927_v24, %v11113_v22  ;;  %3169 = vmatmul.bf16.vlgmr.msrb.gmra.mxu3 %v16160_v15  ;;  %3175 = vmatpush.bf16.msra.mxu0 %v10858_v31  ;;  %v2949_v24 = vpop.f32.mrf.mxu2  ;;  %v2925_v31 = vpop.f32.mrf.mxu0 }
 0x152   :  { %v14991_v27 = vld [vmem:[%s23798_s1 + $0xdac] sm:$0xf0]  ;;  %3213 = vmatpush.bf16.msra.mxu3 %v9870_v23  ;;  %v2950_v28 = vadd.f32 %v2949_v24, %v504_v14  ;;  %v10891_v14 = vld [vmem:[%s23798_s1 + $0x9f0] sm:$0xf0] }
 0x153   :  { %v11370_v35 = vor.u32 %v14991_v27, %v11369_v26  ;;  %v10825_v39 = vld [vmem:[%s23798_s1 + $0x950] sm:$0xf]  ;;  %3188 = vmatpush.bf16.msra.mxu1 %v11114_v32  ;;  %v14571_v26 = vld [vmem:[%s23798_s1 + $0x94] sm:$0xf] }
 0x154   :  { %v14855_v40 = vld [vmem:[%s23798_s1 + $0x96c] sm:$0xf0]  ;;  %v9707_v27 = vld [vmem:[%s23798_s1 + $0xb0] sm:$0xf0] }
 0x155   :  { %v11081_v41 = vld [vmem:[%s23798_s1 + $0xb50] sm:$0xf]  ;;  %v10826_v48 = vor.u32 %v14855_v40, %v10825_v39  ;;  %3201 = vmatpush.bf16.msra.mxu2 %v11370_v35  ;;  %v2938_v35 = vpop.f32.mrf.mxu1  ;;  %v10603_v24 = vld [vmem:[%s23798_s1 + $0x7b0] sm:$0xf0] }
 0x156   :  { %v14919_v43 = vld [vmem:[%s23798_s1 + $0xb6c] sm:$0xf0]  ;;  %3214 = vmatpush.bf16.msra.mxu3 %v9838_v42  ;;  %v10059_v35 = vld [vmem:[%s23798_s1 + $0x370] sm:$0xf0] }
 0x157   :  { %v11337_v44 = vld [vmem:[%s23798_s1 + $0xd50] sm:$0xf]  ;;  %v11082_v49 = vor.u32 %v14919_v43, %v11081_v41  ;;  %3176 = vmatpush.bf16.msra.mxu0 %v10826_v48 }
 0x158   :  { %v14983_v45 = vld [vmem:[%s23798_s1 + $0xd6c] sm:$0xf0] }
 0x159   :  { %v11338_v50 = vor.u32 %v14983_v45, %v11337_v44  ;;  %v10793_v51 = vld [vmem:[%s23798_s1 + $0x910] sm:$0xf]  ;;  %3189 = vmatpush.bf16.msra.mxu1 %v11082_v49  ;;  %v17642_v44 = vadd.f32 %v2962_v29, %v2950_v28  ;;  %v9710_v45 = vor.u32 %v14571_v26, %v9707_v27  ;;  %v14563_v49 = vld [vmem:[%s23798_s1 + $0x54] sm:$0xf]  ;;  %v2951_v0 = vpop.f32.mrf.mxu2 }
 0x15a   :  { %v14847_v52 = vld [vmem:[%s23798_s1 + $0x92c] sm:$0xf0]  ;;  %3215 = vmatpush.bf16.msra.mxu3 %v9806_v54  ;;  %v14859_v26 = vld [vmem:[%s23798_s1 + $0x994] sm:$0xf] }
 0x15b   :  { %v11049_v53 = vld [vmem:[%s23798_s1 + $0xb10] sm:$0xf]  ;;  %v10794_v61 = vor.u32 %v14847_v52, %v10793_v51  ;;  %3202 = vmatpush.bf16.msra.mxu2 %v11338_v50  ;;  %v9675_v50 = vld [vmem:[%s23798_s1 + $0x70] sm:$0xf0] }
 0x15c   :  { %v14911_v55 = vld [vmem:[%s23798_s1 + $0xb2c] sm:$0xf0]  ;;  %v9678_v58 = vor.u32 %v14563_v49, %v9675_v50  ;;  %v10859_v27 = vld [vmem:[%s23798_s1 + $0x9b0] sm:$0xf0] }
 0x15d   :  { %v11305_v56 = vld [vmem:[%s23798_s1 + $0xd10] sm:$0xf]  ;;  %v11050_v1 = vor.u32 %v14911_v55, %v11049_v53  ;;  %3177 = vmatpush.bf16.msra.mxu0 %v10794_v61  ;;  %v9643_v61 = vld [vmem:[%s23798_s1 + $0x30] sm:$0xf0] }
 0x15e   :  { %v14975_v34 = vld [vmem:[%s23798_s1 + $0xd2c] sm:$0xf0]  ;;  %3216 = vmatpush.bf16.msra.mxu3 %v9774_v38  ;;  %v10379_v38 = vld [vmem:[%s23798_s1 + $0x5f0] sm:$0xf0] }
 0x15f   :  { %v11306_v2 = vor.u32 %v14975_v34, %v11305_v56  ;;  %v10761_v3 = vld [vmem:[%s23798_s1 + $0x8d0] sm:$0xf]  ;;  %3190 = vmatpush.bf16.msra.mxu1 %v11050_v1  ;;  %v14675_v1 = vld [vmem:[%s23798_s1 + $0x3d4] sm:$0xf] }
 0x160   :  { %v14839_v4 = vld [vmem:[%s23798_s1 + $0x8ec] sm:$0xf0]  ;;  %v14651_v50 = vld [vmem:[%s23798_s1 + $0x314] sm:$0xf] }
 0x161   :  { %v11017_v5 = vld [vmem:[%s23798_s1 + $0xad0] sm:$0xf]  ;;  %v10762_v16 = vor.u32 %v14839_v4, %v10761_v3  ;;  %3203 = vmatpush.bf16.msra.mxu2 %v11306_v2  ;;  %v10123_v2 = vld [vmem:[%s23798_s1 + $0x3f0] sm:$0xf0]  ;;  %v2964_v4 = vpop.f32.mrf.mxu3 }
 0x162   :  { %v14903_v7 = vld [vmem:[%s23798_s1 + $0xaec] sm:$0xf0]  ;;  %3217 = vmatpush.bf16.msra.mxu3 %v9742_v63  ;;  %v14739_v3 = vld [vmem:[%s23798_s1 + $0x5d4] sm:$0xf]  ;;  %v2988_v4 = vpop.f32.mrf.mxu1 }
 0x163   :  { %v11273_v10 = vld [vmem:[%s23798_s1 + $0xcd0] sm:$0xf]  ;;  %v11018_v62 = vor.u32 %v14903_v7, %v11017_v5  ;;  %3178 = vmatpush.bf16.msra.mxu0 %v10762_v16  ;;  %v14803_v7 = vld [vmem:[%s23798_s1 + $0x7d4] sm:$0xf]  ;;  %v9646_v16 = vor.u32 %v14555_v60, %v9643_v61 }
 0x164   :  { %v14967_v11 = vld [vmem:[%s23798_s1 + $0xcec] sm:$0xf0]  ;;  %v14731_v63 = vld [vmem:[%s23798_s1 + $0x594] sm:$0xf] }
 0x165   :  { %v11274_v17 = vor.u32 %v14967_v11, %v11273_v10  ;;  %v10729_v18 = vld [vmem:[%s23798_s1 + $0x890] sm:$0xf]  ;;  %3191 = vmatpush.bf16.msra.mxu1 %v11018_v62  ;;  %v10635_v10 = vld [vmem:[%s23798_s1 + $0x7f0] sm:$0xf0]  ;;  %v10126_v62 = vor.u32 %v14675_v1, %v10123_v2 }
 0x166   :  { %v14831_v19 = vld [vmem:[%s23798_s1 + $0x8ac] sm:$0xf0]  ;;  %3218 = vmatpush.bf16.msra.mxu3 %v9710_v45  ;;  %v14851_v45 = vld [vmem:[%s23798_s1 + $0x954] sm:$0xf] }
 0x167   :  { %v10985_v20 = vld [vmem:[%s23798_s1 + $0xa90] sm:$0xf]  ;;  %v10730_v32 = vor.u32 %v14831_v19, %v10729_v18  ;;  %3204 = vmatpush.bf16.msra.mxu2 %v11274_v17  ;;  %v10382_v17 = vor.u32 %v14739_v3, %v10379_v38  ;;  %v10638_v18 = vor.u32 %v14803_v7, %v10635_v10  ;;  %v14667_v19 = vld [vmem:[%s23798_s1 + $0x394] sm:$0xf] }
 0x168   :  { %v14895_v21 = vld [vmem:[%s23798_s1 + $0xaac] sm:$0xf0]  ;;  %v14643_v0 = vld [vmem:[%s23798_s1 + $0x2d4] sm:$0xf] }
 0x169   :  { %v11241_v22 = vld [vmem:[%s23798_s1 + $0xc90] sm:$0xf]  ;;  %v10986_v39 = vor.u32 %v14895_v21, %v10985_v20  ;;  %3179 = vmatpush.bf16.msra.mxu0 %v10730_v32  ;;  %v10091_v20 = vld [vmem:[%s23798_s1 + $0x3b0] sm:$0xf0]  ;;  %v10894_v21 = vor.u32 %v14867_v13, %v10891_v14 }
 0x16a   :  { %v14959_v23 = vld [vmem:[%s23798_s1 + $0xcac] sm:$0xf0]  ;;  %3219 = vmatpush.bf16.msra.mxu3 %v9678_v58  ;;  %v10094_v28 = vor.u32 %v14667_v19, %v10091_v20  ;;  %v14659_v32 = vld [vmem:[%s23798_s1 + $0x354] sm:$0xf]  ;;  %v3001_v19 = vpop.f32.mrf.mxu2 }
 0x16b   :  { %v11242_v40 = vor.u32 %v14959_v23, %v11241_v22  ;;  %v10697_v41 = vld [vmem:[%s23798_s1 + $0x850] sm:$0xf]  ;;  %3192 = vmatpush.bf16.msra.mxu1 %v10986_v39  ;;  %v10347_v22 = vld [vmem:[%s23798_s1 + $0x5b0] sm:$0xf0] }
 0x16c   :  { %v14823_v42 = vld [vmem:[%s23798_s1 + $0x86c] sm:$0xf0]  ;;  %v14795_v23 = vld [vmem:[%s23798_s1 + $0x794] sm:$0xf]  ;;  %v10350_v29 = vor.u32 %v14731_v63, %v10347_v22 }
 0x16d   :  { %v10953_v43 = vld [vmem:[%s23798_s1 + $0xa50] sm:$0xf]  ;;  %v10698_v51 = vor.u32 %v14823_v42, %v10697_v41  ;;  %3205 = vmatpush.bf16.msra.mxu2 %v11242_v40  ;;  %v10606_v31 = vor.u32 %v14795_v23, %v10603_v24  ;;  %v14723_v39 = vld [vmem:[%s23798_s1 + $0x554] sm:$0xf]  ;;  %v10862_v40 = vor.u32 %v14859_v26, %v10859_v27  ;;  %v3014_v24 = vpop.f32.mrf.mxu3 }
 0x16e   :  { %v14887_v46 = vld [vmem:[%s23798_s1 + $0xa6c] sm:$0xf0]  ;;  %3220 = vmatpush.bf16.msra.mxu3 %v9646_v16  ;;  %v10315_v41 = vld [vmem:[%s23798_s1 + $0x570] sm:$0xf0] }
 0x16f   :  { %v11209_v47 = vld [vmem:[%s23798_s1 + $0xc50] sm:$0xf]  ;;  %v10954_v54 = vor.u32 %v14887_v46, %v10953_v43  ;;  %3180 = vmatpush.bf16.msra.mxu0 %v10698_v51  ;;  %v14787_v42 = vld [vmem:[%s23798_s1 + $0x754] sm:$0xf] }
 0x170   :  { %v14951_v48 = vld [vmem:[%s23798_s1 + $0xc6c] sm:$0xf0]  ;;  %v10571_v43 = vld [vmem:[%s23798_s1 + $0x770] sm:$0xf0] }
 0x171   :  { %v10665_v52 = vld [vmem:[%s23798_s1 + $0x810] sm:$0xf]  ;;  %v11210_v55 = vor.u32 %v14951_v48, %v11209_v47  ;;  %3193 = vmatpush.bf16.msra.mxu1 %v10954_v54  ;;  %v10827_v46 = vld [vmem:[%s23798_s1 + $0x970] sm:$0xf0]  ;;  %v10062_v47 = vor.u32 %v14659_v32, %v10059_v35  ;;  %3221 = vmatmul.bf16.vlgmr.msra.gmra.mxu3 %v16146_v9  ;;  %v10318_v48 = vor.u32 %v14723_v39, %v10315_v41 }
 0x172   :  { %v14815_v53 = vld [vmem:[%s23798_s1 + $0x82c] sm:$0xf0]  ;;  %3265 = vmatpush.bf16.msrb.mxu3 %v10894_v21  ;;  %v10574_v49 = vor.u32 %v14787_v42, %v10571_v43  ;;  %v10027_v51 = vld [vmem:[%s23798_s1 + $0x330] sm:$0xf0]  ;;  %v2990_v42 = vpop.f32.mrf.mxu1 }
 0x173   :  { %v10921_v56 = vld [vmem:[%s23798_s1 + $0xa10] sm:$0xf]  ;;  %v10666_v5 = vor.u32 %v14815_v53, %v10665_v52  ;;  %3206 = vmatpush.bf16.msra.mxu2 %v11210_v55  ;;  %v14715_v52 = vld [vmem:[%s23798_s1 + $0x514] sm:$0xf]  ;;  %v10830_v53 = vor.u32 %v14851_v45, %v10827_v46  ;;  %v10030_v58 = vor.u32 %v14651_v50, %v10027_v51  ;;  %v14600_v42 = vld [vmem:[%s23798_s1 + $0x174] sm:$0xf0] }
 0x174   :  { %v14879_v34 = vld [vmem:[%s23798_s1 + $0xa2c] sm:$0xf0]  ;;  %v10283_v54 = vld [vmem:[%s23798_s1 + $0x530] sm:$0xf0] }
 0x175   :  { %v11177_v57 = vld [vmem:[%s23798_s1 + $0xc10] sm:$0xf]  ;;  %v10922_v11 = vor.u32 %v14879_v34, %v10921_v56  ;;  %3181 = vmatpush.bf16.msra.mxu0 %v10666_v5  ;;  %v14779_v55 = vld [vmem:[%s23798_s1 + $0x714] sm:$0xf]  ;;  %v10286_v60 = vor.u32 %v14715_v52, %v10283_v54 }
 0x176   :  { %v14943_v59 = vld [vmem:[%s23798_s1 + $0xc2c] sm:$0xf0]  ;;  %3266 = vmatpush.bf16.msrb.mxu3 %v10862_v40  ;;  %v10539_v56 = vld [vmem:[%s23798_s1 + $0x730] sm:$0xf0] }
 0x177   :  { %v11178_v12 = vor.u32 %v14943_v59, %v11177_v57  ;;  %3194 = vmatpush.bf16.msra.mxu1 %v10922_v11  ;;  %v14843_v34 = vld [vmem:[%s23798_s1 + $0x914] sm:$0xf]  ;;  %v2975_v59 = vpop.f32.mrf.mxu0  ;;  %v10542_v61 = vor.u32 %v14779_v55, %v10539_v56 }
 0x178   :  { %3182 = vmatmul.bf16.vlgmr.msra.gmra.mxu0 %v16332_v36  ;;  %v10795_v57 = vld [vmem:[%s23798_s1 + $0x930] sm:$0xf0]  ;;  %v2976_v3 = vadd.f32 %v2975_v59, %v17642_v44 }
 0x179   :  { %3207 = vmatpush.bf16.msra.mxu2 %v11178_v12  ;;  %3226 = vmatpush.bf16.msrb.mxu0 %v10126_v62  ;;  %v9995_v1 = vld [vmem:[%s23798_s1 + $0x2f0] sm:$0xf0]  ;;  %v10798_v5 = vor.u32 %v14843_v34, %v10795_v57  ;;  %v3003_v57 = vpop.f32.mrf.mxu2 }
 0x17a   :  { %3195 = vmatmul.bf16.vlgmr.msra.gmra.mxu1 %v16334_v37  ;;  %v14707_v2 = vld [vmem:[%s23798_s1 + $0x4d4] sm:$0xf]  ;;  %3267 = vmatpush.bf16.msrb.mxu3 %v10830_v53  ;;  %v2989_v12 = vadd.f32 %v2988_v4, %v2976_v3  ;;  %v9998_v13 = vor.u32 %v14643_v0, %v9995_v1  ;;  %v3016_v0 = vpop.f32.mrf.mxu3  ;;  %v14656_v57 = vld [vmem:[%s23798_s1 + $0x334] sm:$0xf0] }
 0x17b   :  { %3239 = vmatpush.bf16.msrb.mxu1 %v10382_v17  ;;  %v10251_v38 = vld [vmem:[%s23798_s1 + $0x4f0] sm:$0xf0] }
 0x17c   :  { %3208 = vmatmul.bf16.vlgmr.msra.gmra.mxu2 %v16324_v33  ;;  %v14771_v7 = vld [vmem:[%s23798_s1 + $0x6d4] sm:$0xf]  ;;  %v10254_v14 = vor.u32 %v14707_v2, %v10251_v38  ;;  %v3002_v23 = vadd.f32 %v3001_v19, %v2989_v12  ;;  %v9873_v38 = vld [vmem:[%s23798_s1 + $0x1d8] sm:$0xf] }
 0x17d   :  { %3252 = vmatpush.bf16.msrb.mxu2 %v10638_v18  ;;  %3227 = vmatpush.bf16.msrb.mxu0 %v10094_v28  ;;  %v10507_v10 = vld [vmem:[%s23798_s1 + $0x6f0] sm:$0xf0]  ;;  %v14680_v12 = vld [vmem:[%s23798_s1 + $0x3f4] sm:$0xf0] }
 0x17e   :  { %v14835_v11 = vld [vmem:[%s23798_s1 + $0x8d4] sm:$0xf]  ;;  %v10510_v16 = vor.u32 %v14771_v7, %v10507_v10  ;;  %3268 = vmatpush.bf16.msrb.mxu3 %v10798_v5  ;;  %v14616_v7 = vld [vmem:[%s23798_s1 + $0x1f4] sm:$0xf0] }
 0x17f   :  { %3240 = vmatpush.bf16.msrb.mxu1 %v10350_v29  ;;  %v10763_v44 = vld [vmem:[%s23798_s1 + $0x8f0] sm:$0xf0]  ;;  %v17832_v29 = vadd.f32 %v3014_v24, %v3002_v23  ;;  %v10097_v23 = vld [vmem:[%s23798_s1 + $0x398] sm:$0xf] }
 0x180   :  { %v14635_v62 = vld [vmem:[%s23798_s1 + $0x294] sm:$0xf]  ;;  %v10766_v20 = vor.u32 %v14835_v11, %v10763_v44  ;;  %v10129_v44 = vld [vmem:[%s23798_s1 + $0x3d8] sm:$0xf] }
 0x181   :  { %3253 = vmatpush.bf16.msrb.mxu2 %v10606_v31  ;;  %3228 = vmatpush.bf16.msrb.mxu0 %v10062_v47  ;;  %v9963_v17 = vld [vmem:[%s23798_s1 + $0x2b0] sm:$0xf0]  ;;  %v2977_v31 = vpop.f32.mrf.mxu0  ;;  %v14672_v24 = vld [vmem:[%s23798_s1 + $0x3b4] sm:$0xf0] }
 0x182   :  { %v14699_v18 = vld [vmem:[%s23798_s1 + $0x494] sm:$0xf]  ;;  %v9966_v28 = vor.u32 %v14635_v62, %v9963_v17  ;;  %3269 = vmatpush.bf16.msrb.mxu3 %v10766_v20  ;;  %v9874_v62 = vor.u32 %v14616_v7, %v9873_v38  ;;  %v10130_v20 = vor.u32 %v14680_v12, %v10129_v44  ;;  %v9745_v7 = vld [vmem:[%s23798_s1 + $0xd8] sm:$0xf] }
 0x183   :  { %3241 = vmatpush.bf16.msrb.mxu1 %v10318_v48  ;;  %v10219_v63 = vld [vmem:[%s23798_s1 + $0x4b0] sm:$0xf0]  ;;  %v14648_v44 = vld [vmem:[%s23798_s1 + $0x2f4] sm:$0xf0] }
 0x184   :  { %v14763_v21 = vld [vmem:[%s23798_s1 + $0x694] sm:$0xf]  ;;  %v10222_v32 = vor.u32 %v14699_v18, %v10219_v63 }
 0x185   :  { %3254 = vmatpush.bf16.msrb.mxu2 %v10574_v49  ;;  %3229 = vmatpush.bf16.msrb.mxu0 %v10030_v58  ;;  %v10475_v22 = vld [vmem:[%s23798_s1 + $0x6b0] sm:$0xf0] }
 0x186   :  { %v14827_v26 = vld [vmem:[%s23798_s1 + $0x894] sm:$0xf]  ;;  %v10478_v35 = vor.u32 %v14763_v21, %v10475_v22  ;;  %v9841_v21 = vld [vmem:[%s23798_s1 + $0x198] sm:$0xf] }
 0x187   :  { %3242 = vmatpush.bf16.msrb.mxu1 %v10286_v60  ;;  %v10731_v27 = vld [vmem:[%s23798_s1 + $0x8b0] sm:$0xf0]  ;;  %v14608_v22 = vld [vmem:[%s23798_s1 + $0x1b4] sm:$0xf0] }
 0x188   :  { %v14627_v39 = vld [vmem:[%s23798_s1 + $0x254] sm:$0xf]  ;;  %v10734_v43 = vor.u32 %v14827_v26, %v10731_v27 }
 0x189   :  { %3255 = vmatpush.bf16.msrb.mxu2 %v10542_v61  ;;  %3230 = vmatpush.bf16.msrb.mxu0 %v9998_v13  ;;  %v9931_v40 = vld [vmem:[%s23798_s1 + $0x270] sm:$0xf0] }
 0x18a   :  { %v14691_v41 = vld [vmem:[%s23798_s1 + $0x454] sm:$0xf]  ;;  %v9934_v50 = vor.u32 %v14627_v39, %v9931_v40  ;;  %3270 = vmatpush.bf16.msrb.mxu3 %v10734_v43  ;;  %v10098_v39 = vor.u32 %v14672_v24, %v10097_v23  ;;  %v10065_v43 = vld [vmem:[%s23798_s1 + $0x358] sm:$0xf]  ;;  %v3066_v23 = vpop.f32.mrf.mxu3 }
 0x18b   :  { %3243 = vmatpush.bf16.msrb.mxu1 %v10254_v14  ;;  %v10187_v45 = vld [vmem:[%s23798_s1 + $0x470] sm:$0xf0]  ;;  %v9969_v24 = vld [vmem:[%s23798_s1 + $0x298] sm:$0xf] }
 0x18c   :  { %v14755_v46 = vld [vmem:[%s23798_s1 + $0x654] sm:$0xf]  ;;  %v10190_v53 = vor.u32 %v14691_v41, %v10187_v45  ;;  %v9809_v41 = vld [vmem:[%s23798_s1 + $0x158] sm:$0xf] }
 0x18d   :  { %3256 = vmatpush.bf16.msrb.mxu2 %v10510_v16  ;;  %v10443_v47 = vld [vmem:[%s23798_s1 + $0x670] sm:$0xf0]  ;;  %3231 = vmatpush.bf16.msrb.mxu0 %v9966_v28  ;;  %v9842_v28 = vor.u32 %v14608_v22, %v9841_v21  ;;  %v14664_v45 = vld [vmem:[%s23798_s1 + $0x374] sm:$0xf0]  ;;  %v3053_v22 = vpop.f32.mrf.mxu2 }
 0x18e   :  { %v14819_v48 = vld [vmem:[%s23798_s1 + $0x854] sm:$0xf]  ;;  %v10446_v54 = vor.u32 %v14755_v46, %v10443_v47  ;;  %v14576_v21 = vld [vmem:[%s23798_s1 + $0xb4] sm:$0xf0] }
 0x18f   :  { %v10699_v49 = vld [vmem:[%s23798_s1 + $0x870] sm:$0xf0]  ;;  %3244 = vmatpush.bf16.msrb.mxu1 %v10222_v32 }
 0x190   :  { %v14619_v51 = vld [vmem:[%s23798_s1 + $0x214] sm:$0xf]  ;;  %v10702_v58 = vor.u32 %v14819_v48, %v10699_v49  ;;  %v9810_v48 = vor.u32 %v14600_v42, %v9809_v41 }
 0x191   :  { %v9899_v52 = vld [vmem:[%s23798_s1 + $0x230] sm:$0xf0]  ;;  %3257 = vmatpush.bf16.msrb.mxu2 %v10478_v35  ;;  %3232 = vmatpush.bf16.msrb.mxu0 %v9934_v50 }
 0x192   :  { %v14683_v55 = vld [vmem:[%s23798_s1 + $0x414] sm:$0xf]  ;;  %v9902_v4 = vor.u32 %v14619_v51, %v9899_v52  ;;  %3271 = vmatpush.bf16.msrb.mxu3 %v10702_v58  ;;  %v10066_v52 = vor.u32 %v14664_v45, %v10065_v43  ;;  %v17985_v58 = vld [vmem:[%s23800_s2] sm:$0xff] }
 0x193   :  { %v10155_v56 = vld [vmem:[%s23798_s1 + $0x430] sm:$0xf0]  ;;  %3245 = vmatpush.bf16.msrb.mxu1 %v10190_v53 }
 0x194   :  { %v14747_v34 = vld [vmem:[%s23798_s1 + $0x614] sm:$0xf]  ;;  %v10158_v10 = vor.u32 %v14683_v55, %v10155_v56  ;;  %v14592_v55 = vld [vmem:[%s23798_s1 + $0x134] sm:$0xf0]  ;;  %v3027_v56 = vpop.f32.mrf.mxu0 }
 0x195   :  { %v10411_v59 = vld [vmem:[%s23798_s1 + $0x630] sm:$0xf0]  ;;  %3258 = vmatpush.bf16.msrb.mxu2 %v10446_v54  ;;  %3233 = vmatpush.bf16.msrb.mxu0 %v9902_v4  ;;  %v9777_v54 = vld [vmem:[%s23798_s1 + $0x118] sm:$0xf] }
 0x196   :  { %v14811_v60 = vld [vmem:[%s23798_s1 + $0x814] sm:$0xf]  ;;  %v10414_v11 = vor.u32 %v14747_v34, %v10411_v59  ;;  %v10033_v34 = vld [vmem:[%s23798_s1 + $0x318] sm:$0xf]  ;;  %v505_v59 = vperm.slane %v17985_v58, 3 }
 0x197   :  { %v10667_v61 = vld [vmem:[%s23798_s1 + $0x830] sm:$0xf0]  ;;  %3246 = vmatpush.bf16.msrb.mxu1 %v10158_v10  ;;  %v14584_v10 = vld [vmem:[%s23798_s1 + $0xf4] sm:$0xf0] }
 0x198   :  { %v14931_v1 = vld [vmem:[%s23798_s1 + $0xbd4] sm:$0xf]  ;;  %v10670_v13 = vor.u32 %v14811_v60, %v10667_v61  ;;  %3234 = vmatmul.bf16.vlgmr.msrb.gmra.mxu0 %v16183_v25  ;;  %v17989_v60 = vadd.f32 %v3027_v56, %v17832_v29  ;;  %v10034_v29 = vor.u32 %v14656_v57, %v10033_v34  ;;  %v9649_v57 = vld [vmem:[%s23798_s1 + $0x18] sm:$0xf] }
 0x199   :  { %v11147_v2 = vld [vmem:[%s23798_s1 + $0xbf0] sm:$0xf0]  ;;  %3259 = vmatpush.bf16.msrb.mxu2 %v10414_v11  ;;  %v10001_v11 = vld [vmem:[%s23798_s1 + $0x2d8] sm:$0xf] }
 0x19a   :  { %v14995_v3 = vld [vmem:[%s23798_s1 + $0xdd4] sm:$0xf]  ;;  %v11150_v14 = vor.u32 %v14931_v1, %v11147_v2  ;;  %3272 = vmatpush.bf16.msrb.mxu3 %v10670_v13  ;;  %3247 = vmatmul.bf16.vlgmr.msrb.gmra.mxu1 %v16144_v8  ;;  %v9778_v1 = vor.u32 %v14592_v55, %v9777_v54 }
 0x19b   :  { %v11403_v5 = vld [vmem:[%s23798_s1 + $0xdf0] sm:$0xf0] }
 0x19c   :  { %v11406_v16 = vor.u32 %v14995_v3, %v11403_v5  ;;  %v14923_v17 = vld [vmem:[%s23798_s1 + $0xb94] sm:$0xf]  ;;  %3278 = vmatpush.bf16.msra.mxu0 %v11150_v14  ;;  %3260 = vmatmul.bf16.vlgmr.msrb.gmra.mxu2 %v16160_v15  ;;  %v3040_v5 = vpop.f32.mrf.mxu1 }
 0x19d   :  { %v11115_v18 = vld [vmem:[%s23798_s1 + $0xbb0] sm:$0xf0]  ;;  %3304 = vmatpush.bf16.msra.mxu2 %v9874_v62  ;;  %3273 = vmatmul.bf16.vlgmr.msrb.gmra.mxu3 %v16332_v36  ;;  %v3041_v12 = vadd.f32 %v3040_v5, %v505_v59  ;;  %v14744_v5 = vld [vmem:[%s23798_s1 + $0x5f4] sm:$0xf0] }
 0x19e   :  { %v14987_v19 = vld [vmem:[%s23798_s1 + $0xd94] sm:$0xf]  ;;  %v11118_v26 = vor.u32 %v14923_v17, %v11115_v18  ;;  %3291 = vmatpush.bf16.msra.mxu1 %v11406_v16  ;;  %3317 = vmatpush.bf16.msra.mxu3 %v10130_v20  ;;  %v9746_v16 = vor.u32 %v14584_v10, %v9745_v7  ;;  %v14808_v7 = vld [vmem:[%s23798_s1 + $0x7f4] sm:$0xf0] }
 0x19f   :  { %v11371_v63 = vld [vmem:[%s23798_s1 + $0xdb0] sm:$0xf0]  ;;  %v10897_v10 = vld [vmem:[%s23798_s1 + $0x9d8] sm:$0xf] }
 0x1a0   :  { %v11374_v27 = vor.u32 %v14987_v19, %v11371_v63  ;;  %v14915_v31 = vld [vmem:[%s23798_s1 + $0xb54] sm:$0xf]  ;;  %3279 = vmatpush.bf16.msra.mxu0 %v11118_v26  ;;  %v10002_v19 = vor.u32 %v14648_v44, %v10001_v11  ;;  %v9713_v63 = vld [vmem:[%s23798_s1 + $0x98] sm:$0xf] }
 0x1a1   :  { %v11083_v32 = vld [vmem:[%s23798_s1 + $0xb70] sm:$0xf0]  ;;  %3305 = vmatpush.bf16.msra.mxu2 %v9842_v28  ;;  %v14640_v26 = vld [vmem:[%s23798_s1 + $0x2b4] sm:$0xf0]  ;;  %v3029_v28 = vpop.f32.mrf.mxu0 }
 0x1a2   :  { %v14979_v35 = vld [vmem:[%s23798_s1 + $0xd54] sm:$0xf]  ;;  %v11086_v46 = vor.u32 %v14915_v31, %v11083_v32  ;;  %3292 = vmatpush.bf16.msra.mxu1 %v11374_v27  ;;  %3318 = vmatpush.bf16.msra.mxu3 %v10098_v39  ;;  %v3054_v27 = vadd.f32 %v3053_v22, %v3041_v12  ;;  %v9970_v45 = vor.u32 %v14640_v26, %v9969_v24  ;;  %v14872_v11 = vld [vmem:[%s23798_s1 + $0x9f4] sm:$0xf0] }
 0x1a3   :  { %v11339_v40 = vld [vmem:[%s23798_s1 + $0xd70] sm:$0xf0]  ;;  %v14800_v22 = vld [vmem:[%s23798_s1 + $0x7b4] sm:$0xf0] }
 0x1a4   :  { %v11342_v47 = vor.u32 %v14979_v35, %v11339_v40  ;;  %v14907_v49 = vld [vmem:[%s23798_s1 + $0xb14] sm:$0xf]  ;;  %3280 = vmatpush.bf16.msra.mxu0 %v11086_v46  ;;  %v9714_v35 = vor.u32 %v14576_v21, %v9713_v63  ;;  %v18048_v42 = vadd.f32 %v3066_v23, %v3054_v27  ;;  %v3042_v43 = vpop.f32.mrf.mxu1  ;;  %v10609_v63 = vld [vmem:[%s23798_s1 + $0x798] sm:$0xf] }
 0x1a5   :  { %v11051_v50 = vld [vmem:[%s23798_s1 + $0xb30] sm:$0xf0]  ;;  %3306 = vmatpush.bf16.msra.mxu2 %v9810_v48  ;;  %v14568_v48 = vld [vmem:[%s23798_s1 + $0x74] sm:$0xf0] }
 0x1a6   :  { %v14971_v51 = vld [vmem:[%s23798_s1 + $0xd14] sm:$0xf]  ;;  %v11054_v61 = vor.u32 %v14907_v49, %v11051_v50  ;;  %3293 = vmatpush.bf16.msra.mxu1 %v11342_v47  ;;  %3319 = vmatpush.bf16.msra.mxu3 %v10066_v52  ;;  %v9681_v47 = vld [vmem:[%s23798_s1 + $0x58] sm:$0xf] }
 0x1a7   :  { %v11307_v53 = vld [vmem:[%s23798_s1 + $0xd30] sm:$0xf0]  ;;  %v9937_v49 = vld [vmem:[%s23798_s1 + $0x258] sm:$0xf]  ;;  %v9682_v55 = vor.u32 %v14568_v48, %v9681_v47 }
 0x1a8   :  { %v11310_v0 = vor.u32 %v14971_v51, %v11307_v53  ;;  %v14899_v2 = vld [vmem:[%s23798_s1 + $0xad4] sm:$0xf]  ;;  %3281 = vmatpush.bf16.msra.mxu0 %v11054_v61  ;;  %v14632_v50 = vld [vmem:[%s23798_s1 + $0x274] sm:$0xf0] }
 0x1a9   :  { %v11019_v3 = vld [vmem:[%s23798_s1 + $0xaf0] sm:$0xf0]  ;;  %3307 = vmatpush.bf16.msra.mxu2 %v9778_v1  ;;  %v9938_v59 = vor.u32 %v14632_v50, %v9937_v49  ;;  %v14560_v61 = vld [vmem:[%s23798_s1 + $0x34] sm:$0xf0] }
 0x1aa   :  { %v14963_v4 = vld [vmem:[%s23798_s1 + $0xcd4] sm:$0xf]  ;;  %v11022_v13 = vor.u32 %v14899_v2, %v11019_v3  ;;  %3294 = vmatpush.bf16.msra.mxu1 %v11310_v0  ;;  %3320 = vmatpush.bf16.msra.mxu3 %v10034_v29  ;;  %v9905_v0 = vld [vmem:[%s23798_s1 + $0x218] sm:$0xf]  ;;  %v3055_v2 = vpop.f32.mrf.mxu2  ;;  %v3068_v3 = vpop.f32.mrf.mxu3  ;;  %v9650_v12 = vor.u32 %v14560_v61, %v9649_v57 }
 0x1ab   :  { %v11275_v38 = vld [vmem:[%s23798_s1 + $0xcf0] sm:$0xf0]  ;;  %v14624_v1 = vld [vmem:[%s23798_s1 + $0x234] sm:$0xf0] }
 0x1ac   :  { %v11278_v14 = vor.u32 %v14963_v4, %v11275_v38  ;;  %v14891_v62 = vld [vmem:[%s23798_s1 + $0xa94] sm:$0xf]  ;;  %3282 = vmatpush.bf16.msra.mxu0 %v11022_v13  ;;  %v10385_v4 = vld [vmem:[%s23798_s1 + $0x5d8] sm:$0xf] }
 0x1ad   :  { %v10987_v17 = vld [vmem:[%s23798_s1 + $0xab0] sm:$0xf0]  ;;  %3308 = vmatpush.bf16.msra.mxu2 %v9746_v16  ;;  %v10641_v29 = vld [vmem:[%s23798_s1 + $0x7d8] sm:$0xf]  ;;  %v9906_v16 = vor.u32 %v14624_v1, %v9905_v0  ;;  %v3079_v1 = vpop.f32.mrf.mxu0 }
 0x1ae   :  { %v14955_v18 = vld [vmem:[%s23798_s1 + $0xc94] sm:$0xf]  ;;  %v10990_v31 = vor.u32 %v14891_v62, %v10987_v17  ;;  %3295 = vmatpush.bf16.msra.mxu1 %v11278_v14  ;;  %3321 = vmatpush.bf16.msra.mxu3 %v10002_v19  ;;  %v11153_v13 = vld [vmem:[%s23798_s1 + $0xbd8] sm:$0xf]  ;;  %v10386_v62 = vor.u32 %v14744_v5, %v10385_v4  ;;  %v10642_v17 = vor.u32 %v14808_v7, %v10641_v29  ;;  %v3092_v7 = vpop.f32.mrf.mxu1 }
 0x1af   :  { %v11243_v20 = vld [vmem:[%s23798_s1 + $0xcb0] sm:$0xf0]  ;;  %v14936_v14 = vld [vmem:[%s23798_s1 + $0xbf4] sm:$0xf0] }
 0x1b0   :  { %v11246_v32 = vor.u32 %v14955_v18, %v11243_v20  ;;  %v14883_v39 = vld [vmem:[%s23798_s1 + $0xa54] sm:$0xf]  ;;  %3283 = vmatpush.bf16.msra.mxu0 %v10990_v31  ;;  %v10898_v18 = vor.u32 %v14872_v11, %v10897_v10  ;;  %v10353_v19 = vld [vmem:[%s23798_s1 + $0x598] sm:$0xf]  ;;  %v11154_v21 = vor.u32 %v14936_v14, %v11153_v13  ;;  %v10610_v31 = vor.u32 %v14800_v22, %v10609_v63 }
 0x1b1   :  { %v10955_v40 = vld [vmem:[%s23798_s1 + $0xa70] sm:$0xf0]  ;;  %3309 = vmatpush.bf16.msra.mxu2 %v9714_v35  ;;  %v14736_v20 = vld [vmem:[%s23798_s1 + $0x5b4] sm:$0xf0] }
 0x1b2   :  { %v14947_v41 = vld [vmem:[%s23798_s1 + $0xc54] sm:$0xf]  ;;  %v10958_v51 = vor.u32 %v14883_v39, %v10955_v40  ;;  %3296 = vmatpush.bf16.msra.mxu1 %v11246_v32  ;;  %3322 = vmatpush.bf16.msra.mxu3 %v9970_v45  ;;  %v10865_v23 = vld [vmem:[%s23798_s1 + $0x998] sm:$0xf]  ;;  %v10354_v28 = vor.u32 %v14736_v20, %v10353_v19  ;;  %v3105_v63 = vpop.f32.mrf.mxu2 }
 0x1b3   :  { %v11211_v46 = vld [vmem:[%s23798_s1 + $0xc70] sm:$0xf0]  ;;  %v14864_v24 = vld [vmem:[%s23798_s1 + $0x9b4] sm:$0xf0] }
 0x1b4   :  { %v14875_v52 = vld [vmem:[%s23798_s1 + $0xa14] sm:$0xf]  ;;  %v11214_v54 = vor.u32 %v14947_v41, %v11211_v46  ;;  %3284 = vmatpush.bf16.msra.mxu0 %v10958_v51  ;;  %v11121_v26 = vld [vmem:[%s23798_s1 + $0xb98] sm:$0xf]  ;;  %v10866_v32 = vor.u32 %v14864_v24, %v10865_v23 }
 0x1b5   :  { %v10923_v53 = vld [vmem:[%s23798_s1 + $0xa30] sm:$0xf0]  ;;  %3310 = vmatpush.bf16.msra.mxu2 %v9682_v55  ;;  %v14928_v27 = vld [vmem:[%s23798_s1 + $0xbb4] sm:$0xf0] }
 0x1b6   :  { %v14939_v56 = vld [vmem:[%s23798_s1 + $0xc14] sm:$0xf]  ;;  %v10926_v38 = vor.u32 %v14875_v52, %v10923_v53  ;;  %3297 = vmatpush.bf16.msra.mxu1 %v11214_v54  ;;  %3323 = vmatpush.bf16.msra.mxu3 %v9938_v59  ;;  %v10321_v35 = vld [vmem:[%s23798_s1 + $0x558] sm:$0xf]  ;;  %v11122_v41 = vor.u32 %v14928_v27, %v11121_v26  ;;  %v3118_v27 = vpop.f32.mrf.mxu3 }
 0x1b7   :  { %v11179_v34 = vld [vmem:[%s23798_s1 + $0xc30] sm:$0xf0]  ;;  %v14728_v39 = vld [vmem:[%s23798_s1 + $0x574] sm:$0xf0] }
 0x1b8   :  { %v11182_v44 = vor.u32 %v14939_v56, %v11179_v34  ;;  %3285 = vmatpush.bf16.msra.mxu0 %v10926_v38  ;;  %v10577_v40 = vld [vmem:[%s23798_s1 + $0x758] sm:$0xf]  ;;  %v10322_v49 = vor.u32 %v14728_v39, %v10321_v35  ;;  %v3080_v38 = vadd.f32 %v3079_v1, %v18048_v42  ;;  %v3081_v39 = vpop.f32.mrf.mxu0 }
 0x1b9   :  { %3311 = vmatpush.bf16.msra.mxu2 %v9650_v12  ;;  %v14792_v43 = vld [vmem:[%s23798_s1 + $0x774] sm:$0xf0] }
 0x1ba   :  { %3298 = vmatpush.bf16.msra.mxu1 %v11182_v44  ;;  %3324 = vmatpush.bf16.msra.mxu3 %v9906_v16  ;;  %v10833_v45 = vld [vmem:[%s23798_s1 + $0x958] sm:$0xf]  ;;  %v10578_v50 = vor.u32 %v14792_v43, %v10577_v40  ;;  %v3093_v14 = vadd.f32 %v3092_v7, %v3080_v38  ;;  %v3107_v1 = vpop.f32.mrf.mxu2 }
 0x1bb   :  { %3286 = vmatmul.bf16.vlgmr.msra.gmra.mxu0 %v16334_v37  ;;  %v14856_v46 = vld [vmem:[%s23798_s1 + $0x974] sm:$0xf0]  ;;  %v10035_v1 = vld [vmem:[%s23798_s1 + $0x338] sm:$0xf0] }
 0x1bc   :  { %3330 = vmatpush.bf16.msrb.mxu0 %v10386_v62  ;;  %v11089_v47 = vld [vmem:[%s23798_s1 + $0xb58] sm:$0xf]  ;;  %3312 = vmatmul.bf16.vlgmr.msra.gmra.mxu2 %v16146_v9  ;;  %v10834_v51 = vor.u32 %v14856_v46, %v10833_v45  ;;  %v3106_v26 = vadd.f32 %v3105_v63, %v3093_v14 }
 0x1bd   :  { %3356 = vmatpush.bf16.msrb.mxu2 %v10898_v18  ;;  %3299 = vmatmul.bf16.vlgmr.msra.gmra.mxu1 %v16324_v33  ;;  %v14920_v48 = vld [vmem:[%s23798_s1 + $0xb74] sm:$0xf0] }
 0x1be   :  { %3343 = vmatpush.bf16.msrb.mxu1 %v10642_v17  ;;  %3369 = vmatpush.bf16.msrb.mxu3 %v11154_v21  ;;  %v10289_v52 = vld [vmem:[%s23798_s1 + $0x518] sm:$0xf]  ;;  %v11090_v55 = vor.u32 %v14920_v48, %v11089_v47  ;;  %v18238_v35 = vadd.f32 %v3118_v27, %v3106_v26  ;;  %v3094_v47 = vpop.f32.mrf.mxu1  ;;  %v14668_v26 = vld [vmem:[%s23798_s1 + $0x39c] sm:$0xf] }
 0x1bf   :  { %3325 = vmatmul.bf16.vlgmr.msra.gmra.mxu3 %v16183_v25  ;;  %v14720_v53 = vld [vmem:[%s23798_s1 + $0x534] sm:$0xf0]  ;;  %v10099_v27 = vld [vmem:[%s23798_s1 + $0x3b8] sm:$0xf0] }
 0x1c0   :  { %3331 = vmatpush.bf16.msrb.mxu0 %v10354_v28  ;;  %v10545_v54 = vld [vmem:[%s23798_s1 + $0x718] sm:$0xf]  ;;  %v10290_v0 = vor.u32 %v14720_v53, %v10289_v52  ;;  %v9811_v47 = vld [vmem:[%s23798_s1 + $0x178] sm:$0xf0] }
 0x1c1   :  { %3357 = vmatpush.bf16.msrb.mxu2 %v10866_v32  ;;  %v14784_v56 = vld [vmem:[%s23798_s1 + $0x734] sm:$0xf0] }
 0x1c2   :  { %3344 = vmatpush.bf16.msrb.mxu1 %v10610_v31  ;;  %3370 = vmatpush.bf16.msrb.mxu3 %v11122_v41  ;;  %v10801_v34 = vld [vmem:[%s23798_s1 + $0x918] sm:$0xf]  ;;  %v10546_v2 = vor.u32 %v14784_v56, %v10545_v54 }
 0x1c3   :  { %v14848_v57 = vld [vmem:[%s23798_s1 + $0x934] sm:$0xf0] }
 0x1c4   :  { %v11057_v59 = vld [vmem:[%s23798_s1 + $0xb18] sm:$0xf]  ;;  %3332 = vmatpush.bf16.msrb.mxu0 %v10322_v49  ;;  %v10802_v3 = vor.u32 %v14848_v57, %v10801_v34 }
 0x1c5   :  { %v14912_v61 = vld [vmem:[%s23798_s1 + $0xb34] sm:$0xf0]  ;;  %3358 = vmatpush.bf16.msrb.mxu2 %v10834_v51 }
 0x1c6   :  { %3345 = vmatpush.bf16.msrb.mxu1 %v10578_v50  ;;  %v10257_v4 = vld [vmem:[%s23798_s1 + $0x4d8] sm:$0xf]  ;;  %3371 = vmatpush.bf16.msrb.mxu3 %v11090_v55  ;;  %v11058_v10 = vor.u32 %v14912_v61, %v11057_v59 }
 0x1c7   :  { %v14712_v5 = vld [vmem:[%s23798_s1 + $0x4f4] sm:$0xf0] }
 0x1c8   :  { %v10513_v29 = vld [vmem:[%s23798_s1 + $0x6d8] sm:$0xf]  ;;  %3333 = vmatpush.bf16.msrb.mxu0 %v10290_v0  ;;  %v10258_v16 = vor.u32 %v14712_v5, %v10257_v4 }
 0x1c9   :  { %v14776_v11 = vld [vmem:[%s23798_s1 + $0x6f4] sm:$0xf0]  ;;  %3359 = vmatpush.bf16.msrb.mxu2 %v10802_v3 }
 0x1ca   :  { %v10769_v44 = vld [vmem:[%s23798_s1 + $0x8d8] sm:$0xf]  ;;  %3346 = vmatpush.bf16.msrb.mxu1 %v10546_v2  ;;  %v10514_v62 = vor.u32 %v14776_v11, %v10513_v29  ;;  %3372 = vmatpush.bf16.msrb.mxu3 %v11058_v10  ;;  %v3120_v29 = vpop.f32.mrf.mxu3  ;;  %v14612_v10 = vld [vmem:[%s23798_s1 + $0x1dc] sm:$0xf] }
 0x1cb   :  { %v14840_v12 = vld [vmem:[%s23798_s1 + $0x8f4] sm:$0xf0] }
 0x1cc   :  { %v11025_v13 = vld [vmem:[%s23798_s1 + $0xad8] sm:$0xf]  ;;  %v10770_v17 = vor.u32 %v14840_v12, %v10769_v44  ;;  %3334 = vmatpush.bf16.msrb.mxu0 %v10258_v16  ;;  %v9875_v44 = vld [vmem:[%s23798_s1 + $0x1f8] sm:$0xf0] }
 0x1cd   :  { %v14904_v42 = vld [vmem:[%s23798_s1 + $0xaf4] sm:$0xf0]  ;;  %v14676_v12 = vld [vmem:[%s23798_s1 + $0x3dc] sm:$0xf] }
 0x1ce   :  { %v10225_v18 = vld [vmem:[%s23798_s1 + $0x498] sm:$0xf]  ;;  %v11026_v21 = vor.u32 %v14904_v42, %v11025_v13  ;;  %3347 = vmatpush.bf16.msrb.mxu1 %v10514_v62  ;;  %3360 = vmatpush.bf16.msrb.mxu2 %v10770_v17  ;;  %v10131_v13 = vld [vmem:[%s23798_s1 + $0x3f8] sm:$0xf0] }
 0x1cf   :  { %v14704_v19 = vld [vmem:[%s23798_s1 + $0x4b4] sm:$0xf0]  ;;  %v14740_v16 = vld [vmem:[%s23798_s1 + $0x5dc] sm:$0xf] }
 0x1d0   :  { %v10481_v20 = vld [vmem:[%s23798_s1 + $0x698] sm:$0xf]  ;;  %v10226_v32 = vor.u32 %v14704_v19, %v10225_v18  ;;  %3373 = vmatpush.bf16.msrb.mxu3 %v11026_v21  ;;  %v10387_v62 = vld [vmem:[%s23798_s1 + $0x5f8] sm:$0xf0]  ;;  %v9878_v19 = vor.u32 %v14612_v10, %v9875_v44  ;;  %v3144_v44 = vpop.f32.mrf.mxu1 }
 0x1d1   :  { %v14768_v22 = vld [vmem:[%s23798_s1 + $0x6b4] sm:$0xf0]  ;;  %v14580_v10 = vld [vmem:[%s23798_s1 + $0xdc] sm:$0xf] }
 0x1d2   :  { %v10737_v23 = vld [vmem:[%s23798_s1 + $0x898] sm:$0xf]  ;;  %v10482_v40 = vor.u32 %v14768_v22, %v10481_v20  ;;  %3335 = vmatpush.bf16.msrb.mxu0 %v10226_v32  ;;  %v10134_v20 = vor.u32 %v14676_v12, %v10131_v13  ;;  %v14604_v22 = vld [vmem:[%s23798_s1 + $0x19c] sm:$0xf] }
 0x1d3   :  { %v14832_v24 = vld [vmem:[%s23798_s1 + $0x8b4] sm:$0xf0]  ;;  %v9747_v13 = vld [vmem:[%s23798_s1 + $0xf8] sm:$0xf0] }
 0x1d4   :  { %v10993_v28 = vld [vmem:[%s23798_s1 + $0xa98] sm:$0xf]  ;;  %v10738_v41 = vor.u32 %v14832_v24, %v10737_v23  ;;  %3348 = vmatpush.bf16.msrb.mxu1 %v10482_v40  ;;  %v10390_v23 = vor.u32 %v14740_v16, %v10387_v62  ;;  %v9843_v24 = vld [vmem:[%s23798_s1 + $0x1b8] sm:$0xf0]  ;;  %v10102_v40 = vor.u32 %v14668_v26, %v10099_v27 }
 0x1d5   :  { %v14896_v31 = vld [vmem:[%s23798_s1 + $0xab4] sm:$0xf0]  ;;  %v9846_v39 = vor.u32 %v14604_v22, %v9843_v24  ;;  %v14708_v16 = vld [vmem:[%s23798_s1 + $0x4dc] sm:$0xf] }
 0x1d6   :  { %v10193_v43 = vld [vmem:[%s23798_s1 + $0x458] sm:$0xf]  ;;  %v10994_v48 = vor.u32 %v14896_v31, %v10993_v28  ;;  %3361 = vmatpush.bf16.msrb.mxu2 %v10738_v41  ;;  %v14732_v28 = vld [vmem:[%s23798_s1 + $0x59c] sm:$0xf] }
 0x1d7   :  { %v14696_v45 = vld [vmem:[%s23798_s1 + $0x474] sm:$0xf0]  ;;  %v10355_v31 = vld [vmem:[%s23798_s1 + $0x5b8] sm:$0xf0] }
 0x1d8   :  { %v10449_v46 = vld [vmem:[%s23798_s1 + $0x658] sm:$0xf]  ;;  %v10194_v54 = vor.u32 %v14696_v45, %v10193_v43  ;;  %3374 = vmatpush.bf16.msrb.mxu3 %v10994_v48  ;;  %v14596_v45 = vld [vmem:[%s23798_s1 + $0x15c] sm:$0xf] }
 0x1d9   :  { %v14760_v49 = vld [vmem:[%s23798_s1 + $0x674] sm:$0xf0]  ;;  %v14660_v48 = vld [vmem:[%s23798_s1 + $0x35c] sm:$0xf] }
 0x1da   :  { %v10705_v50 = vld [vmem:[%s23798_s1 + $0x858] sm:$0xf]  ;;  %v10450_v34 = vor.u32 %v14760_v49, %v10449_v46  ;;  %3336 = vmatpush.bf16.msrb.mxu0 %v10194_v54  ;;  %v10358_v46 = vor.u32 %v14732_v28, %v10355_v31  ;;  %v10067_v49 = vld [vmem:[%s23798_s1 + $0x378] sm:$0xf0]  ;;  %v9814_v54 = vor.u32 %v14596_v45, %v9811_v47 }
 0x1db   :  { %v14824_v51 = vld [vmem:[%s23798_s1 + $0x874] sm:$0xf0]  ;;  %v10259_v62 = vld [vmem:[%s23798_s1 + $0x4f8] sm:$0xf0] }
 0x1dc   :  { %v10961_v52 = vld [vmem:[%s23798_s1 + $0xa58] sm:$0xf]  ;;  %v10706_v57 = vor.u32 %v14824_v51, %v10705_v50  ;;  %3349 = vmatpush.bf16.msrb.mxu1 %v10450_v34  ;;  %v14724_v50 = vld [vmem:[%s23798_s1 + $0x55c] sm:$0xf]  ;;  %v10262_v24 = vor.u32 %v14708_v16, %v10259_v62 }
 0x1dd   :  { %v14888_v53 = vld [vmem:[%s23798_s1 + $0xa74] sm:$0xf0]  ;;  %v10323_v51 = vld [vmem:[%s23798_s1 + $0x578] sm:$0xf0] }
 0x1de   :  { %v10161_v55 = vld [vmem:[%s23798_s1 + $0x418] sm:$0xf]  ;;  %v10962_v2 = vor.u32 %v14888_v53, %v10961_v52  ;;  %3362 = vmatpush.bf16.msrb.mxu2 %v10706_v57  ;;  %v14588_v34 = vld [vmem:[%s23798_s1 + $0x11c] sm:$0xf]  ;;  %v506_v57 = vperm.slane %v17985_v58, 4 }
 0x1df   :  { %v14688_v56 = vld [vmem:[%s23798_s1 + $0x434] sm:$0xf0]  ;;  %v10291_v58 = vld [vmem:[%s23798_s1 + $0x538] sm:$0xf0] }
 0x1e0   :  { %v10417_v59 = vld [vmem:[%s23798_s1 + $0x618] sm:$0xf]  ;;  %v10162_v11 = vor.u32 %v14688_v56, %v10161_v55  ;;  %3375 = vmatpush.bf16.msrb.mxu3 %v10962_v2  ;;  %v10070_v55 = vor.u32 %v14660_v48, %v10067_v49  ;;  %v14716_v2 = vld [vmem:[%s23798_s1 + $0x51c] sm:$0xf] }
 0x1e1   :  { %v14752_v61 = vld [vmem:[%s23798_s1 + $0x634] sm:$0xf0]  ;;  %v10294_v12 = vor.u32 %v14716_v2, %v10291_v58  ;;  %v14572_v22 = vld [vmem:[%s23798_s1 + $0x9c] sm:$0xf] }
 0x1e2   :  { %v10673_v0 = vld [vmem:[%s23798_s1 + $0x818] sm:$0xf]  ;;  %v10418_v42 = vor.u32 %v14752_v61, %v10417_v59  ;;  %3337 = vmatpush.bf16.msrb.mxu0 %v10162_v11  ;;  %v10326_v59 = vor.u32 %v14724_v50, %v10323_v51  ;;  %v9779_v61 = vld [vmem:[%s23798_s1 + $0x138] sm:$0xf0]  ;;  %v3146_v51 = vpop.f32.mrf.mxu1 }
 0x1e3   :  { %v14816_v3 = vld [vmem:[%s23798_s1 + $0x834] sm:$0xf0]  ;;  %v9715_v26 = vld [vmem:[%s23798_s1 + $0xb8] sm:$0xf0] }
 0x1e4   :  { %v10929_v4 = vld [vmem:[%s23798_s1 + $0xa18] sm:$0xf]  ;;  %v10674_v14 = vor.u32 %v14816_v3, %v10673_v0  ;;  %3350 = vmatpush.bf16.msrb.mxu1 %v10418_v42  ;;  %v14652_v0 = vld [vmem:[%s23798_s1 + $0x31c] sm:$0xf] }
 0x1e5   :  { %v14880_v5 = vld [vmem:[%s23798_s1 + $0xa34] sm:$0xf0]  ;;  %3338 = vmatmul.bf16.vlgmr.msrb.gmra.mxu0 %v16144_v8  ;;  %v10038_v29 = vor.u32 %v14652_v0, %v10035_v1  ;;  %v14644_v42 = vld [vmem:[%s23798_s1 + $0x2dc] sm:$0xf] }
 0x1e6   :  { %v11409_v38 = vld [vmem:[%s23798_s1 + $0xdd8] sm:$0xf]  ;;  %v10930_v17 = vor.u32 %v14880_v5, %v10929_v4  ;;  %3363 = vmatpush.bf16.msrb.mxu2 %v10674_v14  ;;  %v3131_v4 = vpop.f32.mrf.mxu0  ;;  %v9782_v5 = vor.u32 %v14588_v34, %v9779_v61  ;;  %v10003_v14 = vld [vmem:[%s23798_s1 + $0x2f8] sm:$0xf0] }
 0x1e7   :  { %v15000_v7 = vld [vmem:[%s23798_s1 + $0xdf4] sm:$0xf0]  ;;  %3351 = vmatmul.bf16.vlgmr.msrb.gmra.mxu1 %v16160_v15  ;;  %v3132_v11 = vadd.f32 %v3131_v4, %v506_v57  ;;  %v14636_v27 = vld [vmem:[%s23798_s1 + $0x29c] sm:$0xf] }
 0x1e8   :  { %v11410_v18 = vor.u32 %v15000_v7, %v11409_v38  ;;  %v11377_v63 = vld [vmem:[%s23798_s1 + $0xd98] sm:$0xf]  ;;  %3376 = vmatpush.bf16.msrb.mxu3 %v10930_v17  ;;  %3395 = vmatpush.bf16.msra.mxu1 %v9878_v19  ;;  %v9750_v19 = vor.u32 %v14580_v10, %v9747_v13  ;;  %v9971_v28 = vld [vmem:[%s23798_s1 + $0x2b8] sm:$0xf0] }
 0x1e9   :  { %v14992_v21 = vld [vmem:[%s23798_s1 + $0xdb4] sm:$0xf0]  ;;  %3364 = vmatmul.bf16.vlgmr.msrb.gmra.mxu2 %v16332_v36  ;;  %v3145_v17 = vadd.f32 %v3144_v44, %v3132_v11  ;;  %v9974_v47 = vor.u32 %v14636_v27, %v9971_v28  ;;  %v14564_v50 = vld [vmem:[%s23798_s1 + $0x5c] sm:$0xf] }
 0x1ea   :  { %3382 = vmatpush.bf16.msra.mxu0 %v11410_v18  ;;  %v11378_v32 = vor.u32 %v14992_v21, %v11377_v63  ;;  %3408 = vmatpush.bf16.msra.mxu2 %v10134_v20  ;;  %v11345_v41 = vld [vmem:[%s23798_s1 + $0xd58] sm:$0xf]  ;;  %v10006_v20 = vor.u32 %v14644_v42, %v10003_v14  ;;  %v10195_v34 = vld [vmem:[%s23798_s1 + $0x478] sm:$0xf0] }
 0x1eb   :  { %v14984_v43 = vld [vmem:[%s23798_s1 + $0xd74] sm:$0xf0]  ;;  %3377 = vmatmul.bf16.vlgmr.msrb.gmra.mxu3 %v16334_v37  ;;  %v14556_v2 = vld [vmem:[%s23798_s1 + $0x1c] sm:$0xf] }
 0x1ec   :  { %3421 = vmatpush.bf16.msra.mxu3 %v10390_v23  ;;  %v11346_v52 = vor.u32 %v14984_v43, %v11345_v41  ;;  %v11313_v53 = vld [vmem:[%s23798_s1 + $0xd18] sm:$0xf]  ;;  %3396 = vmatpush.bf16.msra.mxu1 %v9846_v39  ;;  %v3157_v23 = vpop.f32.mrf.mxu2  ;;  %v14700_v39 = vld [vmem:[%s23798_s1 + $0x49c] sm:$0xf] }
 0x1ed   :  { %v14976_v56 = vld [vmem:[%s23798_s1 + $0xd34] sm:$0xf0]  ;;  %v3158_v31 = vadd.f32 %v3157_v23, %v3145_v17  ;;  %v9651_v58 = vld [vmem:[%s23798_s1 + $0x38] sm:$0xf0] }
 0x1ee   :  { %3383 = vmatpush.bf16.msra.mxu0 %v11378_v32  ;;  %3409 = vmatpush.bf16.msra.mxu2 %v10102_v40  ;;  %v11314_v3 = vor.u32 %v14976_v56, %v11313_v53  ;;  %v11281_v38 = vld [vmem:[%s23798_s1 + $0xcd8] sm:$0xf]  ;;  %v3170_v32 = vpop.f32.mrf.mxu3  ;;  %v10227_v40 = vld [vmem:[%s23798_s1 + $0x4b8] sm:$0xf0]  ;;  %v3133_v45 = vpop.f32.mrf.mxu0  ;;  %v9654_v62 = vor.u32 %v14556_v2, %v9651_v58 }
 0x1ef   :  { %v14968_v7 = vld [vmem:[%s23798_s1 + $0xcf4] sm:$0xf0]  ;;  %v18437_v43 = vadd.f32 %v3170_v32, %v3158_v31  ;;  %v9683_v53 = vld [vmem:[%s23798_s1 + $0x78] sm:$0xf0] }
 0x1f0   :  { %3422 = vmatpush.bf16.msra.mxu3 %v10358_v46  ;;  %3397 = vmatpush.bf16.msra.mxu1 %v9814_v54  ;;  %v11282_v18 = vor.u32 %v14968_v7, %v11281_v38  ;;  %v11249_v63 = vld [vmem:[%s23798_s1 + $0xc98] sm:$0xf]  ;;  %v9718_v46 = vor.u32 %v14572_v22, %v9715_v26  ;;  %v14628_v54 = vld [vmem:[%s23798_s1 + $0x25c] sm:$0xf]  ;;  %v9686_v0 = vor.u32 %v14564_v50, %v9683_v53 }
 0x1f1   :  { %v14960_v21 = vld [vmem:[%s23798_s1 + $0xcb4] sm:$0xf0]  ;;  %v14692_v56 = vld [vmem:[%s23798_s1 + $0x45c] sm:$0xf] }
 0x1f2   :  { %3384 = vmatpush.bf16.msra.mxu0 %v11346_v52  ;;  %3410 = vmatpush.bf16.msra.mxu2 %v10070_v55  ;;  %v11250_v41 = vor.u32 %v14960_v21, %v11249_v63  ;;  %v11217_v48 = vld [vmem:[%s23798_s1 + $0xc58] sm:$0xf]  ;;  %v10230_v52 = vor.u32 %v14700_v39, %v10227_v40  ;;  %v9939_v55 = vld [vmem:[%s23798_s1 + $0x278] sm:$0xf0] }
 0x1f3   :  { %v14952_v49 = vld [vmem:[%s23798_s1 + $0xc74] sm:$0xf0]  ;;  %v9942_v1 = vor.u32 %v14628_v54, %v9939_v55  ;;  %v14684_v38 = vld [vmem:[%s23798_s1 + $0x41c] sm:$0xf] }
 0x1f4   :  { %3423 = vmatpush.bf16.msra.mxu3 %v10326_v59  ;;  %3398 = vmatpush.bf16.msra.mxu1 %v9782_v5  ;;  %v11218_v57 = vor.u32 %v14952_v49, %v11217_v48  ;;  %v11185_v59 = vld [vmem:[%s23798_s1 + $0xc18] sm:$0xf]  ;;  %v3159_v4 = vpop.f32.mrf.mxu2  ;;  %v10198_v5 = vor.u32 %v14692_v56, %v10195_v34  ;;  %v10163_v7 = vld [vmem:[%s23798_s1 + $0x438] sm:$0xf0] }
 0x1f5   :  { %v14944_v61 = vld [vmem:[%s23798_s1 + $0xc34] sm:$0xf0]  ;;  %v14804_v11 = vld [vmem:[%s23798_s1 + $0x7dc] sm:$0xf] }
 0x1f6   :  { %3385 = vmatpush.bf16.msra.mxu0 %v11314_v3  ;;  %3411 = vmatpush.bf16.msra.mxu2 %v10038_v29  ;;  %v14620_v3 = vld [vmem:[%s23798_s1 + $0x21c] sm:$0xf]  ;;  %v3172_v10 = vpop.f32.mrf.mxu3  ;;  %v11186_v13 = vor.u32 %v14944_v61, %v11185_v59  ;;  %v3183_v4 = vpop.f32.mrf.mxu0 }
 0x1f7   :  { %v9907_v29 = vld [vmem:[%s23798_s1 + $0x238] sm:$0xf0] }
 0x1f8   :  { %3424 = vmatpush.bf16.msra.mxu3 %v10294_v12  ;;  %3399 = vmatpush.bf16.msra.mxu1 %v9750_v19  ;;  %v10643_v44 = vld [vmem:[%s23798_s1 + $0x7f8] sm:$0xf0]  ;;  %v9910_v17 = vor.u32 %v14620_v3, %v9907_v29 }
 0x1f9   :  { %v14868_v12 = vld [vmem:[%s23798_s1 + $0x9dc] sm:$0xf]  ;;  %v10646_v63 = vor.u32 %v14804_v11, %v10643_v44  ;;  %v3184_v44 = vadd.f32 %v3183_v4, %v18437_v43 }
 0x1fa   :  { %3386 = vmatpush.bf16.msra.mxu0 %v11282_v18  ;;  %3412 = vmatpush.bf16.msra.mxu2 %v10006_v20  ;;  %v10899_v42 = vld [vmem:[%s23798_s1 + $0x9f8] sm:$0xf0]  ;;  %v10166_v20 = vor.u32 %v14684_v38, %v10163_v7 }
 0x1fb   :  { %v14932_v14 = vld [vmem:[%s23798_s1 + $0xbdc] sm:$0xf]  ;;  %v10902_v21 = vor.u32 %v14868_v12, %v10899_v42 }
 0x1fc   :  { %3425 = vmatpush.bf16.msra.mxu3 %v10262_v24  ;;  %3400 = vmatpush.bf16.msra.mxu1 %v9718_v46  ;;  %v11155_v16 = vld [vmem:[%s23798_s1 + $0xbf8] sm:$0xf0] }
 0x1fd   :  { %v14996_v18 = vld [vmem:[%s23798_s1 + $0xddc] sm:$0xf]  ;;  %v11158_v22 = vor.u32 %v14932_v14, %v11155_v16 }
 0x1fe   :  { %3387 = vmatpush.bf16.msra.mxu0 %v11250_v41  ;;  %3413 = vmatpush.bf16.msra.mxu2 %v9974_v47  ;;  %v11411_v19 = vld [vmem:[%s23798_s1 + $0xdf8] sm:$0xf0] }
 0x1ff   :  { %v14796_v23 = vld [vmem:[%s23798_s1 + $0x79c] sm:$0xf]  ;;  %v11414_v27 = vor.u32 %v14996_v18, %v11411_v19 }
 0x200   :  { %3426 = vmatpush.bf16.msra.mxu3 %v10230_v52  ;;  %3401 = vmatpush.bf16.msra.mxu1 %v9686_v0  ;;  %v10611_v24 = vld [vmem:[%s23798_s1 + $0x7b8] sm:$0xf0] }
 0x201   :  { %v14860_v26 = vld [vmem:[%s23798_s1 + $0x99c] sm:$0xf]  ;;  %v10614_v41 = vor.u32 %v14796_v23, %v10611_v24 }
 0x202   :  { %3388 = vmatpush.bf16.msra.mxu0 %v11218_v57  ;;  %3414 = vmatpush.bf16.msra.mxu2 %v9942_v1  ;;  %v10867_v28 = vld [vmem:[%s23798_s1 + $0x9b8] sm:$0xf0] }
 0x203   :  { %v14924_v31 = vld [vmem:[%s23798_s1 + $0xb9c] sm:$0xf]  ;;  %v10870_v45 = vor.u32 %v14860_v26, %v10867_v28 }
 0x204   :  { %3427 = vmatpush.bf16.msra.mxu3 %v10198_v5  ;;  %v11123_v32 = vld [vmem:[%s23798_s1 + $0xbb8] sm:$0xf0]  ;;  %3402 = vmatpush.bf16.msra.mxu1 %v9654_v62  ;;  %v3196_v5 = vpop.f32.mrf.mxu1 }
 0x205   :  { %v14988_v39 = vld [vmem:[%s23798_s1 + $0xd9c] sm:$0xf]  ;;  %v11126_v46 = vor.u32 %v14924_v31, %v11123_v32  ;;  %v3197_v62 = vadd.f32 %v3196_v5, %v3184_v44  ;;  %v11641_v5 = vld [vmem:[%s23801_s3 + $0x1c0] sm:$0xf] }
 0x206   :  { %3389 = vmatpush.bf16.msra.mxu0 %v11186_v13  ;;  %3415 = vmatpush.bf16.msra.mxu2 %v9910_v17  ;;  %v11379_v40 = vld [vmem:[%s23798_s1 + $0xdb8] sm:$0xf0]  ;;  %v12153_v44 = vld [vmem:[%s23801_s3 + $0x5c0] sm:$0xf] }
 0x207   :  { %v14788_v47 = vld [vmem:[%s23798_s1 + $0x75c] sm:$0xf]  ;;  %v11382_v50 = vor.u32 %v14988_v39, %v11379_v40  ;;  %3403 = vmatmul.bf16.vlgmr.msra.gmra.mxu1 %v16146_v9  ;;  %v18638_v39 = vpop.f32.mrf.mxu3 }
 0x208   :  { %3428 = vmatpush.bf16.msra.mxu3 %v10166_v20  ;;  %3447 = vmatpush.bf16.msrb.mxu1 %v10902_v21  ;;  %v10579_v48 = vld [vmem:[%s23798_s1 + $0x778] sm:$0xf0] }
 0x209   :  { %v14852_v49 = vld [vmem:[%s23798_s1 + $0x95c] sm:$0xf]  ;;  %3390 = vmatmul.bf16.vlgmr.msra.gmra.mxu0 %v16324_v33  ;;  %3416 = vmatmul.bf16.vlgmr.msra.gmra.mxu2 %v16183_v25  ;;  %v10582_v56 = vor.u32 %v14788_v47, %v10579_v48 }
 0x20a   :  { %3434 = vmatpush.bf16.msrb.mxu0 %v10646_v63  ;;  %3460 = vmatpush.bf16.msrb.mxu2 %v11158_v22  ;;  %v10835_v51 = vld [vmem:[%s23798_s1 + $0x978] sm:$0xf0]  ;;  %v3209_v22 = vpop.f32.mrf.mxu2 }
 0x20b   :  { %v14916_v52 = vld [vmem:[%s23798_s1 + $0xb5c] sm:$0xf]  ;;  %3429 = vmatmul.bf16.vlgmr.msra.gmra.mxu3 %v16144_v8  ;;  %v10838_v34 = vor.u32 %v14852_v49, %v10835_v51  ;;  %v18630_v28 = vadd.f32 %v3209_v22, %v3197_v62  ;;  %v15117_v22 = vld [vmem:[%s23801_s3 + $0x39c] sm:$0xf0] }
 0x20c   :  { %3473 = vmatpush.bf16.msrb.mxu3 %v11414_v27  ;;  %v11091_v53 = vld [vmem:[%s23798_s1 + $0xb78] sm:$0xf0]  ;;  %3448 = vmatpush.bf16.msrb.mxu1 %v10870_v45  ;;  %v3198_v45 = vpop.f32.mrf.mxu1 }
 0x20d   :  { %v14980_v54 = vld [vmem:[%s23798_s1 + $0xd5c] sm:$0xf]  ;;  %v11094_v57 = vor.u32 %v14916_v52, %v11091_v53  ;;  %v15045_v45 = vld [vmem:[%s23801_s3 + $0x15c] sm:$0xf0] }
 0x20e   :  { %v11347_v55 = vld [vmem:[%s23798_s1 + $0xd78] sm:$0xf0]  ;;  %3435 = vmatpush.bf16.msrb.mxu0 %v10614_v41  ;;  %3461 = vmatpush.bf16.msrb.mxu2 %v11126_v46  ;;  %v3185_v41 = vpop.f32.mrf.mxu0 }
 0x20f   :  { %v14780_v25 = vld [vmem:[%s23798_s1 + $0x71c] sm:$0xf]  ;;  %v11350_v61 = vor.u32 %v14980_v54, %v11347_v55  ;;  %v11577_v41 = vld [vmem:[%s23801_s3 + $0x140] sm:$0xf] }
 0x210   :  { %v10547_v59 = vld [vmem:[%s23798_s1 + $0x738] sm:$0xf0]  ;;  %3474 = vmatpush.bf16.msrb.mxu3 %v11382_v50  ;;  %3449 = vmatpush.bf16.msrb.mxu1 %v10838_v34 }
 0x211   :  { %v14844_v8 = vld [vmem:[%s23798_s1 + $0x91c] sm:$0xf]  ;;  %v10550_v3 = vor.u32 %v14780_v25, %v10547_v59 }
 0x212   :  { %v10803_v9 = vld [vmem:[%s23798_s1 + $0x938] sm:$0xf0]  ;;  %3436 = vmatpush.bf16.msrb.mxu0 %v10582_v56  ;;  %3462 = vmatpush.bf16.msrb.mxu2 %v11094_v57 }
 0x213   :  { %v14908_v0 = vld [vmem:[%s23798_s1 + $0xb1c] sm:$0xf]  ;;  %v10806_v29 = vor.u32 %v14844_v8, %v10803_v9 }
 0x214   :  { %v11059_v1 = vld [vmem:[%s23798_s1 + $0xb38] sm:$0xf0]  ;;  %3475 = vmatpush.bf16.msrb.mxu3 %v11350_v61 }
 0x215   :  { %v14972_v2 = vld [vmem:[%s23798_s1 + $0xd1c] sm:$0xf]  ;;  %v11062_v38 = vor.u32 %v14908_v0, %v11059_v1  ;;  %3450 = vmatpush.bf16.msrb.mxu1 %v10806_v29  ;;  %v3211_v1 = vpop.f32.mrf.mxu2  ;;  %v15061_v29 = vld [vmem:[%s23801_s3 + $0x1dc] sm:$0xf0] }
 0x216   :  { %v11315_v58 = vld [vmem:[%s23798_s1 + $0xd38] sm:$0xf0]  ;;  %3437 = vmatpush.bf16.msrb.mxu0 %v10550_v3  ;;  %v11642_v62 = vor.u32 %v15061_v29, %v11641_v5  ;;  %v11513_v1 = vld [vmem:[%s23801_s3 + $0xc0] sm:$0xf] }
 0x217   :  { %v14772_v7 = vld [vmem:[%s23798_s1 + $0x6dc] sm:$0xf]  ;;  %v11318_v12 = vor.u32 %v14972_v2, %v11315_v58  ;;  %3463 = vmatpush.bf16.msrb.mxu2 %v11062_v38  ;;  %v11897_v38 = vld [vmem:[%s23801_s3 + $0x3c0] sm:$0xf] }
 0x218   :  { %v10515_v10 = vld [vmem:[%s23798_s1 + $0x6f8] sm:$0xf0]  ;;  %v15093_v5 = vld [vmem:[%s23801_s3 + $0x2dc] sm:$0xf0] }
 0x219   :  { %v14836_v11 = vld [vmem:[%s23798_s1 + $0x8dc] sm:$0xf]  ;;  %v10518_v17 = vor.u32 %v14772_v7, %v10515_v10  ;;  %3476 = vmatpush.bf16.msrb.mxu3 %v11318_v12  ;;  %v3224_v7 = vpop.f32.mrf.mxu3  ;;  %v15189_v12 = vld [vmem:[%s23801_s3 + $0x5dc] sm:$0xf0] }
 0x21a   :  { %v10771_v13 = vld [vmem:[%s23798_s1 + $0x8f8] sm:$0xf0]  ;;  %v12025_v29 = vld [vmem:[%s23801_s3 + $0x4c0] sm:$0xf] }
 0x21b   :  { %v14900_v42 = vld [vmem:[%s23798_s1 + $0xadc] sm:$0xf]  ;;  %v10774_v18 = vor.u32 %v14836_v11, %v10771_v13  ;;  %3438 = vmatpush.bf16.msrb.mxu0 %v10518_v17  ;;  %v15125_v11 = vld [vmem:[%s23801_s3 + $0x3dc] sm:$0xf0] }
 0x21c   :  { %v11027_v14 = vld [vmem:[%s23798_s1 + $0xaf8] sm:$0xf0]  ;;  %v11898_v17 = vor.u32 %v15125_v11, %v11897_v38  ;;  %v15157_v38 = vld [vmem:[%s23801_s3 + $0x4dc] sm:$0xf0] }
 0x21d   :  { %v14964_v16 = vld [vmem:[%s23798_s1 + $0xcdc] sm:$0xf]  ;;  %v11030_v19 = vor.u32 %v14900_v42, %v11027_v14  ;;  %3451 = vmatpush.bf16.msrb.mxu1 %v10774_v18  ;;  %v12409_v14 = vld [vmem:[%s23801_s3 + $0x7c0] sm:$0xf]  ;;  %v12154_v18 = vor.u32 %v15189_v12, %v12153_v44  ;;  %v12026_v12 = vor.u32 %v15157_v38, %v12025_v29 }
 0x21e   :  { %v11283_v43 = vld [vmem:[%s23798_s1 + $0xcf8] sm:$0xf0]  ;;  %v12281_v7 = vld [vmem:[%s23801_s3 + $0x6c0] sm:$0xf] }
 0x21f   :  { %v14764_v20 = vld [vmem:[%s23798_s1 + $0x69c] sm:$0xf]  ;;  %v11286_v23 = vor.u32 %v14964_v16, %v11283_v43  ;;  %3464 = vmatpush.bf16.msrb.mxu2 %v11030_v19  ;;  %v15253_v16 = vld [vmem:[%s23801_s3 + $0x7dc] sm:$0xf0] }
 0x220   :  { %v10483_v63 = vld [vmem:[%s23798_s1 + $0x6b8] sm:$0xf0]  ;;  %v11609_v19 = vld [vmem:[%s23801_s3 + $0x180] sm:$0xf] }
 0x221   :  { %v14828_v21 = vld [vmem:[%s23798_s1 + $0x89c] sm:$0xf]  ;;  %v10486_v40 = vor.u32 %v14764_v20, %v10483_v63  ;;  %3477 = vmatpush.bf16.msrb.mxu3 %v11286_v23  ;;  %v15053_v20 = vld [vmem:[%s23801_s3 + $0x19c] sm:$0xf0] }
 0x222   :  { %v10739_v24 = vld [vmem:[%s23798_s1 + $0x8b8] sm:$0xf0]  ;;  %v11865_v63 = vld [vmem:[%s23801_s3 + $0x380] sm:$0xf] }
 0x223   :  { %v14892_v26 = vld [vmem:[%s23798_s1 + $0xa9c] sm:$0xf]  ;;  %v10742_v46 = vor.u32 %v14828_v21, %v10739_v24  ;;  %3439 = vmatpush.bf16.msrb.mxu0 %v10486_v40  ;;  %v12410_v21 = vor.u32 %v15253_v16, %v12409_v14  ;;  %v12121_v23 = vld [vmem:[%s23801_s3 + $0x580] sm:$0xf]  ;;  %v18825_v16 = vpop.f32.mrf.mxu2 }
 0x224   :  { %v10995_v27 = vld [vmem:[%s23798_s1 + $0xab8] sm:$0xf0]  ;;  %v15181_v24 = vld [vmem:[%s23801_s3 + $0x59c] sm:$0xf0] }
 0x225   :  { %v14956_v31 = vld [vmem:[%s23798_s1 + $0xc9c] sm:$0xf]  ;;  %v10998_v47 = vor.u32 %v14892_v26, %v10995_v27  ;;  %3452 = vmatpush.bf16.msrb.mxu1 %v10742_v46  ;;  %v12377_v26 = vld [vmem:[%s23801_s3 + $0x780] sm:$0xf]  ;;  %v12122_v40 = vor.u32 %v15181_v24, %v12121_v23 }
 0x226   :  { %v11251_v32 = vld [vmem:[%s23798_s1 + $0xcb8] sm:$0xf0]  ;;  %v15245_v27 = vld [vmem:[%s23801_s3 + $0x79c] sm:$0xf0] }
 0x227   :  { %v14756_v48 = vld [vmem:[%s23798_s1 + $0x65c] sm:$0xf]  ;;  %v11254_v51 = vor.u32 %v14956_v31, %v11251_v32  ;;  %3465 = vmatpush.bf16.msrb.mxu2 %v10998_v47  ;;  %v11610_v31 = vor.u32 %v15053_v20, %v11609_v19  ;;  %v11866_v32 = vor.u32 %v15117_v22, %v11865_v63  ;;  %v11833_v46 = vld [vmem:[%s23801_s3 + $0x340] sm:$0xf]  ;;  %v12378_v47 = vor.u32 %v15245_v27, %v12377_v26  ;;  %v18836_v19 = vpop.f32.mrf.mxu3 }
 0x228   :  { %v10451_v49 = vld [vmem:[%s23798_s1 + $0x678] sm:$0xf0]  ;;  %v11737_v14 = vld [vmem:[%s23801_s3 + $0x280] sm:$0xf] }
 0x229   :  { %v14820_v50 = vld [vmem:[%s23798_s1 + $0x85c] sm:$0xf]  ;;  %v10454_v34 = vor.u32 %v14756_v48, %v10451_v49  ;;  %3478 = vmatpush.bf16.msrb.mxu3 %v11254_v51  ;;  %v15109_v48 = vld [vmem:[%s23801_s3 + $0x35c] sm:$0xf0] }
 0x22a   :  { %v10707_v52 = vld [vmem:[%s23798_s1 + $0x878] sm:$0xf0]  ;;  %v12089_v49 = vld [vmem:[%s23801_s3 + $0x540] sm:$0xf] }
 0x22b   :  { %v14884_v53 = vld [vmem:[%s23798_s1 + $0xa5c] sm:$0xf]  ;;  %v10710_v59 = vor.u32 %v14820_v50, %v10707_v52  ;;  %3440 = vmatpush.bf16.msrb.mxu0 %v10454_v34  ;;  %v15173_v50 = vld [vmem:[%s23801_s3 + $0x55c] sm:$0xf0]  ;;  %v11578_v52 = vor.u32 %v15045_v45, %v11577_v41 }
 0x22c   :  { %v10963_v54 = vld [vmem:[%s23798_s1 + $0xa78] sm:$0xf0]  ;;  %v15237_v51 = vld [vmem:[%s23801_s3 + $0x75c] sm:$0xf0] }
 0x22d   :  { %v14948_v55 = vld [vmem:[%s23798_s1 + $0xc5c] sm:$0xf]  ;;  %v10966_v8 = vor.u32 %v14884_v53, %v10963_v54  ;;  %3453 = vmatpush.bf16.msrb.mxu1 %v10710_v59  ;;  %v11834_v53 = vor.u32 %v15109_v48, %v11833_v46  ;;  %v12090_v54 = vor.u32 %v15173_v50, %v12089_v49  ;;  %v12057_v34 = vld [vmem:[%s23801_s3 + $0x500] sm:$0xf] }
 0x22e   :  { %v11219_v56 = vld [vmem:[%s23798_s1 + $0xc78] sm:$0xf0]  ;;  %v15229_v59 = vld [vmem:[%s23801_s3 + $0x71c] sm:$0xf0] }
 0x22f   :  { %v14748_v57 = vld [vmem:[%s23798_s1 + $0x61c] sm:$0xf]  ;;  %v11222_v2 = vor.u32 %v14948_v55, %v11219_v56  ;;  %3466 = vmatpush.bf16.msrb.mxu2 %v10966_v8  ;;  %v11801_v55 = vld [vmem:[%s23801_s3 + $0x300] sm:$0xf] }
 0x230   :  { %v10419_v25 = vld [vmem:[%s23798_s1 + $0x638] sm:$0xf0]  ;;  %v15101_v56 = vld [vmem:[%s23801_s3 + $0x31c] sm:$0xf0] }
 0x231   :  { %v14812_v61 = vld [vmem:[%s23798_s1 + $0x81c] sm:$0xf]  ;;  %v10422_v10 = vor.u32 %v14748_v57, %v10419_v25  ;;  %3479 = vmatpush.bf16.msrb.mxu3 %v11222_v2  ;;  %v15165_v57 = vld [vmem:[%s23801_s3 + $0x51c] sm:$0xf0] }
 0x232   :  { %v10675_v9 = vld [vmem:[%s23798_s1 + $0x838] sm:$0xf0]  ;;  %v12313_v25 = vld [vmem:[%s23801_s3 + $0x700] sm:$0xf] }
 0x233   :  { %v14876_v0 = vld [vmem:[%s23798_s1 + $0xa1c] sm:$0xf]  ;;  %v10678_v13 = vor.u32 %v14812_v61, %v10675_v9  ;;  %3441 = vmatpush.bf16.msrb.mxu0 %v10422_v10  ;;  %v18788_v61 = vpop.f32.mrf.mxu0  ;;  %v11802_v9 = vor.u32 %v15101_v56, %v11801_v55  ;;  %v15029_v2 = vld [vmem:[%s23801_s3 + $0xdc] sm:$0xf0] }
 0x234   :  { %v10931_v58 = vld [vmem:[%s23798_s1 + $0xa38] sm:$0xf0]  ;;  %v15221_v10 = vld [vmem:[%s23801_s3 + $0x6dc] sm:$0xf0]  ;;  %v11514_v11 = vor.u32 %v15029_v2, %v11513_v1  ;;  %v3486_v1 = vmax.f32 %v17223_v30, 0.0  ;;  %v3487_v2 = vmax.f32 %v17591_v6, 0.0 }
 0x235   :  { %v14940_v3 = vld [vmem:[%s23798_s1 + $0xc1c] sm:$0xf]  ;;  %v10934_v42 = vor.u32 %v14876_v0, %v10931_v58  ;;  %3454 = vmatpush.bf16.msrb.mxu1 %v10678_v13  ;;  %v12058_v0 = vor.u32 %v15165_v57, %v12057_v34  ;;  %v11769_v58 = vld [vmem:[%s23801_s3 + $0x2c0] sm:$0xf]  ;;  %v3276_v34 = vpop.f32.mrf.mxu3 }
 0x236   :  { %v11187_v4 = vld [vmem:[%s23798_s1 + $0xc38] sm:$0xf0]  ;;  %3442 = vmatmul.bf16.vlgmr.msrb.gmra.mxu0 %v16160_v15  ;;  %v12345_v15 = vld [vmem:[%s23801_s3 + $0x740] sm:$0xf]  ;;  %v11770_v44 = vor.u32 %v15093_v5, %v11769_v58  ;;  %v3488_v5 = vmax.f32 %v17989_v60, 0.0  ;;  %v3489_v60 = vmax.f32 %v18238_v35, 0.0  ;;  %v18934_v35 = vpack.c.bf16 %v3487_v2, %v3487_v2 }
 0x237   :  { %v11190_v43 = vor.u32 %v14940_v3, %v11187_v4  ;;  %3467 = vmatpush.bf16.msrb.mxu2 %v10934_v42  ;;  %6592 = vmatpush.bf16.msra.mxu0 %v11642_v62  ;;  %v18799_v3 = vpop.f32.mrf.mxu1  ;;  %v12314_v4 = vor.u32 %v15229_v59, %v12313_v25  ;;  %v11481_v13 = vld [vmem:[%s23801_s3 + $0x80] sm:$0xf] }
 0x238   :  { %3455 = vmatmul.bf16.vlgmr.msrb.gmra.mxu1 %v16332_v36  ;;  %v11545_v36 = vld [vmem:[%s23801_s3 + $0x100] sm:$0xf] }
 0x239   :  { %3480 = vmatpush.bf16.msrb.mxu3 %v11190_v43  ;;  %6605 = vmatpush.bf16.msra.mxu1 %v11898_v17  ;;  %v15021_v42 = vld [vmem:[%s23801_s3 + $0x9c] sm:$0xf0]  ;;  %v12282_v43 = vor.u32 %v15221_v10, %v12281_v7 }
 0x23a   :  { %3468 = vmatmul.bf16.vlgmr.msrb.gmra.mxu2 %v16334_v37  ;;  %v15037_v37 = vld [vmem:[%s23801_s3 + $0x11c] sm:$0xf0] }
 0x23b   :  { %6618 = vmatpush.bf16.msra.mxu2 %v12154_v18  ;;  %6593 = vmatpush.bf16.msra.mxu0 %v11610_v31  ;;  %v11546_v8 = vor.u32 %v15037_v37, %v11545_v36  ;;  %v15085_v62 = vld [vmem:[%s23801_s3 + $0x29c] sm:$0xf0]  ;;  %v3237_v22 = vpop.f32.mrf.mxu0  ;;  %v3263_v36 = vpop.f32.mrf.mxu2 }
 0x23c   :  { %3481 = vmatmul.bf16.vlgmr.msrb.gmra.mxu3 %v16324_v33  ;;  %v12346_v33 = vor.u32 %v15237_v51, %v12345_v15  ;;  %v11993_v17 = vld [vmem:[%s23801_s3 + $0x480] sm:$0xf]  ;;  %v11738_v23 = vor.u32 %v15085_v62, %v11737_v14  ;;  %v18932_v14 = vpack.c.bf16 %v3486_v1, %v3486_v1  ;;  %v18936_v62 = vpack.c.bf16 %v3488_v5, %v3488_v5 }
 0x23d   :  { %6631 = vmatpush.bf16.msra.mxu3 %v12410_v21  ;;  %6606 = vmatpush.bf16.msra.mxu1 %v11866_v32  ;;  %v15149_v18 = vld [vmem:[%s23801_s3 + $0x49c] sm:$0xf0]  ;;  %v11482_v21 = vor.u32 %v15021_v42, %v11481_v13 }
 0x23e   :  { %v12249_v20 = vld [vmem:[%s23801_s3 + $0x680] sm:$0xf]  ;;  %v11994_v24 = vor.u32 %v15149_v18, %v11993_v17 }
 0x23f   :  { %6619 = vmatpush.bf16.msra.mxu2 %v12122_v40  ;;  %6594 = vmatpush.bf16.msra.mxu0 %v11578_v52  ;;  %v15213_v63 = vld [vmem:[%s23801_s3 + $0x69c] sm:$0xf0]  ;;  %v3250_v32 = vpop.f32.mrf.mxu1 }
 0x240   :  { %v11449_v26 = vld [vmem:[%s23801_s3 + $0x40] sm:$0xf]  ;;  %v12250_v40 = vor.u32 %v15213_v63, %v12249_v20 }
 0x241   :  { %6632 = vmatpush.bf16.msra.mxu3 %v12378_v47  ;;  %6607 = vmatpush.bf16.msra.mxu1 %v11834_v53  ;;  %v15013_v27 = vld [vmem:[%s23801_s3 + $0x5c] sm:$0xf0] }
 0x242   :  { %v11705_v31 = vld [vmem:[%s23801_s3 + $0x240] sm:$0xf]  ;;  %v11450_v49 = vor.u32 %v15013_v27, %v11449_v26 }
 0x243   :  { %6620 = vmatpush.bf16.msra.mxu2 %v12090_v54  ;;  %6595 = vmatpush.bf16.msra.mxu0 %v11546_v8  ;;  %v15077_v41 = vld [vmem:[%s23801_s3 + $0x25c] sm:$0xf0]  ;;  %v19020_v2 = vpop.f32.mrf.mxu2 }
 0x244   :  { %v11961_v45 = vld [vmem:[%s23801_s3 + $0x440] sm:$0xf]  ;;  %v11706_v15 = vor.u32 %v15077_v41, %v11705_v31 }
 0x245   :  { %6633 = vmatpush.bf16.msra.mxu3 %v12346_v33  ;;  %6608 = vmatpush.bf16.msra.mxu1 %v11802_v9  ;;  %v15141_v46 = vld [vmem:[%s23801_s3 + $0x45c] sm:$0xf0] }
 0x246   :  { %v12217_v47 = vld [vmem:[%s23801_s3 + $0x640] sm:$0xf]  ;;  %v11962_v51 = vor.u32 %v15141_v46, %v11961_v45 }
 0x247   :  { %6621 = vmatpush.bf16.msra.mxu2 %v12058_v0  ;;  %6596 = vmatpush.bf16.msra.mxu0 %v11514_v11  ;;  %v15205_v48 = vld [vmem:[%s23801_s3 + $0x65c] sm:$0xf0] }
 0x248   :  { %v11417_v50 = vld [vmem:[%s23801_s3] sm:$0xf]  ;;  %v12218_v37 = vor.u32 %v15205_v48, %v12217_v47 }
 0x249   :  { %6634 = vmatpush.bf16.msra.mxu3 %v12314_v4  ;;  %6609 = vmatpush.bf16.msra.mxu1 %v11770_v44  ;;  %v15005_v52 = vld [vmem:[%s23801_s3 + $0x1c] sm:$0xf0] }
 0x24a   :  { %v11673_v53 = vld [vmem:[%s23801_s3 + $0x200] sm:$0xf]  ;;  %v11418_v8 = vor.u32 %v15005_v52, %v11417_v50  ;;  %v3300_v52 = vpop.f32.mrf.mxu1 }
 0x24b   :  { %6622 = vmatpush.bf16.msra.mxu2 %v12026_v12  ;;  %6597 = vmatpush.bf16.msra.mxu0 %v11482_v21  ;;  %v15069_v54 = vld [vmem:[%s23801_s3 + $0x21c] sm:$0xf0]  ;;  %v18945_v21 = vpack.c.bf16 %v3489_v60, %v3489_v60 }
 0x24c   :  { %v11929_v55 = vld [vmem:[%s23801_s3 + $0x400] sm:$0xf]  ;;  %v11674_v58 = vor.u32 %v15069_v54, %v11673_v53 }
 0x24d   :  { %6635 = vmatpush.bf16.msra.mxu3 %v12282_v43  ;;  %6610 = vmatpush.bf16.msra.mxu1 %v11738_v23  ;;  %v15133_v33 = vld [vmem:[%s23801_s3 + $0x41c] sm:$0xf0] }
 0x24e   :  { %v12185_v56 = vld [vmem:[%s23801_s3 + $0x600] sm:$0xf]  ;;  %v11930_v4 = vor.u32 %v15133_v33, %v11929_v55 }
 0x24f   :  { %6623 = vmatpush.bf16.msra.mxu2 %v11994_v24  ;;  %v15197_v57 = vld [vmem:[%s23801_s3 + $0x61c] sm:$0xf0]  ;;  %6598 = vmatpush.bf16.msra.mxu0 %v11450_v49  ;;  %v3287_v49 = vpop.f32.mrf.mxu0 }
 0x250   :  { %v12665_v25 = vld [vmem:[%s23801_s3 + $0x9c0] sm:$0xf]  ;;  %v12186_v7 = vor.u32 %v15197_v57, %v12185_v56 }
 0x251   :  { %6636 = vmatpush.bf16.msra.mxu3 %v12250_v40  ;;  %v15317_v59 = vld [vmem:[%s23801_s3 + $0x9dc] sm:$0xf0]  ;;  %6611 = vmatpush.bf16.msra.mxu1 %v11706_v15 }
 0x252   :  { %v12921_v9 = vld [vmem:[%s23801_s3 + $0xbc0] sm:$0xf]  ;;  %v12666_v10 = vor.u32 %v15317_v59, %v12665_v25 }
 0x253   :  { %v15381_v0 = vld [vmem:[%s23801_s3 + $0xbdc] sm:$0xf0]  ;;  %6624 = vmatpush.bf16.msra.mxu2 %v11962_v51  ;;  %6599 = vmatpush.bf16.msra.mxu0 %v11418_v8 }
 0x254   :  { %v18910_v29 = vld [vmem:[%s23800_s2] sm:$0xff]  ;;  %v12922_v11 = vor.u32 %v15381_v0, %v12921_v9 }
 0x255   :  { %v507_v38 = vperm.slane %v18910_v29, 5  ;;  %6637 = vmatpush.bf16.msra.mxu3 %v12218_v37  ;;  %v13177_v30 = vld [vmem:[%s23801_s3 + $0xdc0] sm:$0xf]  ;;  %6612 = vmatpush.bf16.msra.mxu1 %v11674_v58 }
 0x256   :  { %v15445_v6 = vld [vmem:[%s23801_s3 + $0xddc] sm:$0xf0]  ;;  %6600 = vmatmul.bf16.vlgmr.msra.gmra.mxu0 %v18932_v14 }
 0x257   :  { %v12633_v44 = vld [vmem:[%s23801_s3 + $0x980] sm:$0xf]  ;;  %6625 = vmatpush.bf16.msra.mxu2 %v11930_v4  ;;  %v13178_v43 = vor.u32 %v15445_v6, %v13177_v30  ;;  %v3223_v17 = vadd.f32 %v18638_v39, %v507_v38  ;;  %6644 = vmatpush.bf16.msrb.mxu0 %v12666_v10  ;;  %v19022_v4 = vpop.f32.mrf.mxu3  ;;  %v3289_v5 = vpop.f32.mrf.mxu0 }
 0x258   :  { %v15309_v12 = vld [vmem:[%s23801_s3 + $0x99c] sm:$0xf0]  ;;  %6613 = vmatmul.bf16.vlgmr.msra.gmra.mxu1 %v18934_v35  ;;  %v3302_v6 = vpop.f32.mrf.mxu1 }
 0x259   :  { %v12889_v13 = vld [vmem:[%s23801_s3 + $0xb80] sm:$0xf]  ;;  %6638 = vmatpush.bf16.msra.mxu3 %v12186_v7  ;;  %v12634_v18 = vor.u32 %v15309_v12, %v12633_v44  ;;  %6657 = vmatpush.bf16.msrb.mxu1 %v12922_v11  ;;  %v3236_v31 = vadd.f32 %v18788_v61, %v3223_v17  ;;  %v15105_v6 = vld [vmem:[%s23801_s3 + $0x344] sm:$0xf] }
 0x25a   :  { %v15373_v42 = vld [vmem:[%s23801_s3 + $0xb9c] sm:$0xf0]  ;;  %6626 = vmatmul.bf16.vlgmr.msra.gmra.mxu2 %v18936_v62 }
 0x25b   :  { %v13145_v20 = vld [vmem:[%s23801_s3 + $0xd80] sm:$0xf]  ;;  %v12890_v22 = vor.u32 %v15373_v42, %v12889_v13  ;;  %6670 = vmatpush.bf16.msrb.mxu2 %v13178_v43  ;;  %6645 = vmatpush.bf16.msrb.mxu0 %v12634_v18  ;;  %v3249_v15 = vadd.f32 %v18799_v3, %v3236_v31  ;;  %v15057_v31 = vld [vmem:[%s23801_s3 + $0x1c4] sm:$0xf] }
 0x25c   :  { %v15437_v63 = vld [vmem:[%s23801_s3 + $0xd9c] sm:$0xf0]  ;;  %6639 = vmatmul.bf16.vlgmr.msra.gmra.mxu3 %v18945_v21 }
 0x25d   :  { %v12601_v39 = vld [vmem:[%s23801_s3 + $0x940] sm:$0xf]  ;;  %v13146_v27 = vor.u32 %v15437_v63, %v13145_v20  ;;  %6658 = vmatpush.bf16.msrb.mxu1 %v12890_v22  ;;  %v3262_v34 = vadd.f32 %v18825_v16, %v3249_v15  ;;  %v15185_v15 = vld [vmem:[%s23801_s3 + $0x5c4] sm:$0xf] }
 0x25e   :  { %v15301_v23 = vld [vmem:[%s23801_s3 + $0x95c] sm:$0xf0] }
 0x25f   :  { %v12857_v24 = vld [vmem:[%s23801_s3 + $0xb40] sm:$0xf]  ;;  %v12602_v32 = vor.u32 %v15301_v23, %v12601_v39  ;;  %6671 = vmatpush.bf16.msrb.mxu2 %v13146_v27  ;;  %v3275_v38 = vadd.f32 %v18836_v19, %v3262_v34  ;;  %v15113_v34 = vld [vmem:[%s23801_s3 + $0x384] sm:$0xf] }
 0x260   :  { %v15365_v26 = vld [vmem:[%s23801_s3 + $0xb5c] sm:$0xf0] }
 0x261   :  { %v13113_v40 = vld [vmem:[%s23801_s3 + $0xd40] sm:$0xf]  ;;  %v12858_v45 = vor.u32 %v15365_v26, %v12857_v24  ;;  %6646 = vmatpush.bf16.msrb.mxu0 %v12602_v32  ;;  %v3288_v44 = vadd.f32 %v3287_v49, %v3275_v38  ;;  %v11643_v32 = vld [vmem:[%s23801_s3 + $0x1e0] sm:$0xf0] }
 0x262   :  { %v15429_v41 = vld [vmem:[%s23801_s3 + $0xd5c] sm:$0xf0] }
 0x263   :  { %v12569_v46 = vld [vmem:[%s23801_s3 + $0x900] sm:$0xf]  ;;  %v13114_v50 = vor.u32 %v15429_v41, %v13113_v40  ;;  %6659 = vmatpush.bf16.msrb.mxu1 %v12858_v45  ;;  %v3301_v26 = vadd.f32 %v3300_v52, %v3288_v44  ;;  %v3315_v40 = vpop.f32.mrf.mxu2  ;;  %v3490_v45 = vmax.f32 %v18630_v28, 0.0  ;;  %v11646_v52 = vor.u32 %v15057_v31, %v11643_v32 }
 0x264   :  { %v15293_v61 = vld [vmem:[%s23801_s3 + $0x91c] sm:$0xf0]  ;;  %v15025_v40 = vld [vmem:[%s23801_s3 + $0xc4] sm:$0xf] }
 0x265   :  { %v12825_v47 = vld [vmem:[%s23801_s3 + $0xb00] sm:$0xf]  ;;  %v12570_v51 = vor.u32 %v15293_v61, %v12569_v46  ;;  %6672 = vmatpush.bf16.msrb.mxu2 %v13114_v50  ;;  %v15121_v46 = vld [vmem:[%s23801_s3 + $0x3c4] sm:$0xf] }
 0x266   :  { %v15357_v48 = vld [vmem:[%s23801_s3 + $0xb1c] sm:$0xf0]  ;;  %v11899_v61 = vld [vmem:[%s23801_s3 + $0x3e0] sm:$0xf0] }
 0x267   :  { %v13081_v53 = vld [vmem:[%s23801_s3 + $0xd00] sm:$0xf]  ;;  %v12826_v36 = vor.u32 %v15357_v48, %v12825_v47  ;;  %6647 = vmatpush.bf16.msrb.mxu0 %v12570_v51  ;;  %v3328_v48 = vpop.f32.mrf.mxu3 }
 0x268   :  { %v15421_v54 = vld [vmem:[%s23801_s3 + $0xd1c] sm:$0xf0]  ;;  %v19190_v48 = vpop.f32.mrf.mxu1 }
 0x269   :  { %v12537_v37 = vld [vmem:[%s23801_s3 + $0x8c0] sm:$0xf]  ;;  %v13082_v56 = vor.u32 %v15421_v54, %v13081_v53  ;;  %6660 = vmatpush.bf16.msrb.mxu1 %v12826_v36  ;;  %v12155_v53 = vld [vmem:[%s23801_s3 + $0x5e0] sm:$0xf0] }
 0x26a   :  { %v15285_v3 = vld [vmem:[%s23801_s3 + $0x8dc] sm:$0xf0] }
 0x26b   :  { %v12793_v55 = vld [vmem:[%s23801_s3 + $0xac0] sm:$0xf]  ;;  %v12538_v57 = vor.u32 %v15285_v3, %v12537_v37  ;;  %6673 = vmatpush.bf16.msrb.mxu2 %v13082_v56  ;;  %v3491_v37 = vmax.f32 %v3301_v26, 0.0  ;;  %v11902_v3 = vor.u32 %v15121_v46, %v11899_v61  ;;  %v12059_v26 = vld [vmem:[%s23801_s3 + $0x520] sm:$0xf0] }
 0x26c   :  { %v15349_v33 = vld [vmem:[%s23801_s3 + $0xadc] sm:$0xf0]  ;;  %v15089_v61 = vld [vmem:[%s23801_s3 + $0x2c4] sm:$0xf] }
 0x26d   :  { %v13049_v25 = vld [vmem:[%s23801_s3 + $0xcc0] sm:$0xf]  ;;  %v12794_v8 = vor.u32 %v15349_v33, %v12793_v55  ;;  %6648 = vmatpush.bf16.msrb.mxu0 %v12538_v57  ;;  %v15049_v55 = vld [vmem:[%s23801_s3 + $0x184] sm:$0xf]  ;;  %v19124_v5 = vpack.c.bf16 %v3491_v37, %v3491_v37 }
 0x26e   :  { %v15413_v59 = vld [vmem:[%s23801_s3 + $0xcdc] sm:$0xf0]  ;;  %v11611_v33 = vld [vmem:[%s23801_s3 + $0x1a0] sm:$0xf0] }
 0x26f   :  { %v12505_v9 = vld [vmem:[%s23801_s3 + $0x880] sm:$0xf]  ;;  %v13050_v58 = vor.u32 %v15413_v59, %v13049_v25  ;;  %6661 = vmatpush.bf16.msrb.mxu1 %v12794_v8  ;;  %v11867_v57 = vld [vmem:[%s23801_s3 + $0x3a0] sm:$0xf0]  ;;  %v12158_v59 = vor.u32 %v15185_v15, %v12155_v53  ;;  %v508_v53 = vperm.slane %v18910_v29, 6 }
 0x270   :  { %v15277_v16 = vld [vmem:[%s23801_s3 + $0x89c] sm:$0xf0]  ;;  %v15177_v8 = vld [vmem:[%s23801_s3 + $0x584] sm:$0xf]  ;;  %v11870_v38 = vor.u32 %v15113_v34, %v11867_v57  ;;  %v19219_v34 = vpop.f32.mrf.mxu3 }
 0x271   :  { %v12761_v0 = vld [vmem:[%s23801_s3 + $0xa80] sm:$0xf]  ;;  %v12506_v7 = vor.u32 %v15277_v16, %v12505_v9  ;;  %6674 = vmatpush.bf16.msrb.mxu2 %v13050_v58  ;;  %v19113_v9 = vpack.c.bf16 %v3490_v45, %v3490_v45  ;;  %v11614_v16 = vor.u32 %v15049_v55, %v11611_v33  ;;  %v19182_v45 = vpop.f32.mrf.mxu0  ;;  %v12027_v15 = vld [vmem:[%s23801_s3 + $0x4e0] sm:$0xf0] }
 0x272   :  { %v15341_v1 = vld [vmem:[%s23801_s3 + $0xa9c] sm:$0xf0]  ;;  %v11483_v37 = vld [vmem:[%s23801_s3 + $0xa0] sm:$0xf0] }
 0x273   :  { %v13017_v10 = vld [vmem:[%s23801_s3 + $0xc80] sm:$0xf]  ;;  %v12762_v60 = vor.u32 %v15341_v1, %v12761_v0  ;;  %6649 = vmatpush.bf16.msrb.mxu0 %v12506_v7  ;;  %v12123_v0 = vld [vmem:[%s23801_s3 + $0x5a0] sm:$0xf0] }
 0x274   :  { %v15405_v30 = vld [vmem:[%s23801_s3 + $0xc9c] sm:$0xf0]  ;;  %v15041_v7 = vld [vmem:[%s23801_s3 + $0x144] sm:$0xf] }
 0x275   :  { %v12473_v11 = vld [vmem:[%s23801_s3 + $0x840] sm:$0xf]  ;;  %v13018_v43 = vor.u32 %v15405_v30, %v13017_v10  ;;  %6662 = vmatpush.bf16.msrb.mxu1 %v12762_v60  ;;  %v11579_v10 = vld [vmem:[%s23801_s3 + $0x160] sm:$0xf0] }
 0x276   :  { %v15269_v19 = vld [vmem:[%s23801_s3 + $0x85c] sm:$0xf0]  ;;  %v11835_v60 = vld [vmem:[%s23801_s3 + $0x360] sm:$0xf0]  ;;  %v11582_v44 = vor.u32 %v15041_v7, %v11579_v10 }
 0x277   :  { %v12729_v12 = vld [vmem:[%s23801_s3 + $0xa40] sm:$0xf]  ;;  %v12474_v17 = vor.u32 %v15269_v19, %v12473_v11  ;;  %6675 = vmatpush.bf16.msrb.mxu2 %v13018_v43  ;;  %v12126_v11 = vor.u32 %v15177_v8, %v12123_v0  ;;  %v15169_v19 = vld [vmem:[%s23801_s3 + $0x544] sm:$0xf]  ;;  %v11838_v43 = vor.u32 %v15105_v6, %v11835_v60  ;;  %v3354_v60 = vpop.f32.mrf.mxu1 }
 0x278   :  { %v15333_v13 = vld [vmem:[%s23801_s3 + $0xa5c] sm:$0xf0]  ;;  %v15081_v55 = vld [vmem:[%s23801_s3 + $0x284] sm:$0xf] }
 0x279   :  { %v12441_v42 = vld [vmem:[%s23801_s3 + $0x800] sm:$0xf]  ;;  %v12730_v22 = vor.u32 %v15333_v13, %v12729_v12  ;;  %6650 = vmatpush.bf16.msrb.mxu0 %v12474_v17  ;;  %v12091_v12 = vld [vmem:[%s23801_s3 + $0x560] sm:$0xf0]  ;;  %v3341_v10 = vpop.f32.mrf.mxu0 }
 0x27a   :  { %v15261_v18 = vld [vmem:[%s23801_s3 + $0x81c] sm:$0xf0]  ;;  %v15033_v17 = vld [vmem:[%s23801_s3 + $0x104] sm:$0xf] }
 0x27b   :  { %v12985_v20 = vld [vmem:[%s23801_s3 + $0xc40] sm:$0xf]  ;;  %v12442_v49 = vor.u32 %v15261_v18, %v12441_v42  ;;  %6663 = vmatpush.bf16.msrb.mxu1 %v12730_v22  ;;  %v11547_v18 = vld [vmem:[%s23801_s3 + $0x120] sm:$0xf0] }
 0x27c   :  { %v15397_v63 = vld [vmem:[%s23801_s3 + $0xc5c] sm:$0xf0]  ;;  %v11803_v22 = vld [vmem:[%s23801_s3 + $0x320] sm:$0xf0] }
 0x27d   :  { %v12697_v39 = vld [vmem:[%s23801_s3 + $0xa00] sm:$0xf]  ;;  %v12986_v47 = vor.u32 %v15397_v63, %v12985_v20  ;;  %6651 = vmatpush.bf16.msrb.mxu0 %v12442_v49  ;;  %v15097_v63 = vld [vmem:[%s23801_s3 + $0x304] sm:$0xf] }
 0x27e   :  { %v13433_v23 = vld [vmem:[%s23801_s3 + $0xfc0] sm:$0xf]  ;;  %v11806_v32 = vor.u32 %v15097_v63, %v11803_v22  ;;  %v11739_v33 = vld [vmem:[%s23801_s3 + $0x2a0] sm:$0xf0] }
 0x27f   :  { %v15509_v24 = vld [vmem:[%s23801_s3 + $0xfdc] sm:$0xf0]  ;;  %6676 = vmatpush.bf16.msrb.mxu2 %v12986_v47  ;;  %v11771_v47 = vld [vmem:[%s23801_s3 + $0x2e0] sm:$0xf0] }
 0x280   :  { %v15325_v27 = vld [vmem:[%s23801_s3 + $0xa1c] sm:$0xf0]  ;;  %v13434_v41 = vor.u32 %v15509_v24, %v13433_v23  ;;  %6652 = vmatmul.bf16.vlgmr.msrb.gmra.mxu0 %v19113_v9  ;;  %v15161_v23 = vld [vmem:[%s23801_s3 + $0x504] sm:$0xf]  ;;  %v11550_v24 = vor.u32 %v15033_v17, %v11547_v18 }
 0x281   :  { %v12953_v50 = vld [vmem:[%s23801_s3 + $0xc00] sm:$0xf]  ;;  %v12698_v51 = vor.u32 %v15325_v27, %v12697_v39  ;;  %6696 = vmatpush.bf16.msra.mxu0 %v11646_v52  ;;  %v12094_v39 = vor.u32 %v15169_v19, %v12091_v12  ;;  %v12062_v49 = vor.u32 %v15161_v23, %v12059_v26  ;;  %v11995_v8 = vld [vmem:[%s23801_s3 + $0x4a0] sm:$0xf0] }
 0x282   :  { %v15389_v28 = vld [vmem:[%s23801_s3 + $0xc1c] sm:$0xf0]  ;;  %6683 = vmatpush.bf16.msrb.mxu3 %v13434_v41  ;;  %v11515_v41 = vld [vmem:[%s23801_s3 + $0xe0] sm:$0xf0] }
 0x283   :  { %v13401_v54 = vld [vmem:[%s23801_s3 + $0xf80] sm:$0xf]  ;;  %v12954_v25 = vor.u32 %v15389_v28, %v12953_v50  ;;  %6664 = vmatpush.bf16.msrb.mxu1 %v12698_v51  ;;  %v15153_v50 = vld [vmem:[%s23801_s3 + $0x4c4] sm:$0xf]  ;;  %v11518_v28 = vor.u32 %v15025_v40, %v11515_v41 }
 0x284   :  { %v15501_v36 = vld [vmem:[%s23801_s3 + $0xf9c] sm:$0xf0]  ;;  %v12030_v57 = vor.u32 %v15153_v50, %v12027_v15  ;;  %v11451_v7 = vld [vmem:[%s23801_s3 + $0x60] sm:$0xf0] }
 0x285   :  { %v13402_v56 = vor.u32 %v15501_v36, %v13401_v54  ;;  %v13369_v1 = vld [vmem:[%s23801_s3 + $0xf40] sm:$0xf]  ;;  %6677 = vmatpush.bf16.msrb.mxu2 %v12954_v25  ;;  %6697 = vmatpush.bf16.msra.mxu0 %v11614_v16  ;;  %v11774_v54 = vor.u32 %v15089_v61, %v11771_v47  ;;  %v15017_v36 = vld [vmem:[%s23801_s3 + $0x84] sm:$0xf] }
 0x286   :  { %v15493_v58 = vld [vmem:[%s23801_s3 + $0xf5c] sm:$0xf0]  ;;  %6665 = vmatmul.bf16.vlgmr.msrb.gmra.mxu1 %v19124_v5  ;;  %v15145_v25 = vld [vmem:[%s23801_s3 + $0x484] sm:$0xf] }
 0x287   :  { %6684 = vmatpush.bf16.msrb.mxu3 %v13402_v56  ;;  %6709 = vmatpush.bf16.msra.mxu1 %v11902_v3  ;;  %v13370_v30 = vor.u32 %v15493_v58, %v13369_v1  ;;  %v13337_v13 = vld [vmem:[%s23801_s3 + $0xf00] sm:$0xf]  ;;  %v19217_v56 = vpop.f32.mrf.mxu2  ;;  %v3314_v1 = vadd.f32 %v19020_v2, %v508_v53  ;;  %v11742_v58 = vor.u32 %v15081_v55, %v11739_v33  ;;  %v15073_v6 = vld [vmem:[%s23801_s3 + $0x244] sm:$0xf] }
 0x288   :  { %v15485_v42 = vld [vmem:[%s23801_s3 + $0xf1c] sm:$0xf0]  ;;  %v11707_v2 = vld [vmem:[%s23801_s3 + $0x260] sm:$0xf0] }
 0x289   :  { %6722 = vmatpush.bf16.msra.mxu2 %v12158_v59  ;;  %v13338_v20 = vor.u32 %v15485_v42, %v13337_v13  ;;  %6698 = vmatpush.bf16.msra.mxu0 %v11582_v44  ;;  %v13305_v27 = vld [vmem:[%s23801_s3 + $0xec0] sm:$0xf]  ;;  %v11486_v59 = vor.u32 %v15017_v36, %v11483_v37  ;;  %v11419_v19 = vld [vmem:[%s23801_s3 + $0x20] sm:$0xf0]  ;;  %v11998_v44 = vor.u32 %v15145_v25, %v11995_v8 }
 0x28a   :  { %v15477_v31 = vld [vmem:[%s23801_s3 + $0xedc] sm:$0xf0]  ;;  %v15137_v12 = vld [vmem:[%s23801_s3 + $0x444] sm:$0xf]  ;;  %v3327_v18 = vadd.f32 %v19022_v4, %v3314_v1 }
 0x28b   :  { %6685 = vmatpush.bf16.msrb.mxu3 %v13370_v30  ;;  %6710 = vmatpush.bf16.msra.mxu1 %v11870_v38  ;;  %v13306_v46 = vor.u32 %v15477_v31, %v13305_v27  ;;  %v13273_v51 = vld [vmem:[%s23801_s3 + $0xe80] sm:$0xf]  ;;  %v15009_v38 = vld [vmem:[%s23801_s3 + $0x44] sm:$0xf] }
 0x28c   :  { %v15469_v52 = vld [vmem:[%s23801_s3 + $0xe9c] sm:$0xf0]  ;;  %v11454_v13 = vor.u32 %v15009_v38, %v11451_v7  ;;  %v11963_v42 = vld [vmem:[%s23801_s3 + $0x460] sm:$0xf0]  ;;  %v3340_v50 = vadd.f32 %v19182_v45, %v3327_v18 }
 0x28d   :  { %6723 = vmatpush.bf16.msra.mxu2 %v12126_v11  ;;  %6699 = vmatpush.bf16.msra.mxu0 %v11550_v24  ;;  %v13274_v3 = vor.u32 %v15469_v52, %v13273_v51  ;;  %v13241_v16 = vld [vmem:[%s23801_s3 + $0xe40] sm:$0xf]  ;;  %v15001_v11 = vld [vmem:[%s23801_s3 + $0x4] sm:$0xf]  ;;  %v11966_v41 = vor.u32 %v15137_v12, %v11963_v42 }
 0x28e   :  { %v15461_v0 = vld [vmem:[%s23801_s3 + $0xe5c] sm:$0xf0]  ;;  %v15065_v63 = vld [vmem:[%s23801_s3 + $0x204] sm:$0xf]  ;;  %v11422_v61 = vor.u32 %v15001_v11, %v11419_v19  ;;  %v3353_v33 = vadd.f32 %v19190_v48, %v3340_v50 }
 0x28f   :  { %6686 = vmatpush.bf16.msrb.mxu3 %v13338_v20  ;;  %6711 = vmatpush.bf16.msra.mxu1 %v11838_v43  ;;  %v13242_v30 = vor.u32 %v15461_v0, %v13241_v16  ;;  %v13209_v43 = vld [vmem:[%s23801_s3 + $0xe00] sm:$0xf]  ;;  %v11710_v20 = vor.u32 %v15073_v6, %v11707_v2  ;;  %v12411_v23 = vld [vmem:[%s23801_s3 + $0x7e0] sm:$0xf0]  ;;  %v3367_v27 = vpop.f32.mrf.mxu2 }
 0x290   :  { %v15453_v17 = vld [vmem:[%s23801_s3 + $0xe1c] sm:$0xf0]  ;;  %v11675_v24 = vld [vmem:[%s23801_s3 + $0x220] sm:$0xf0]  ;;  %v3366_v38 = vadd.f32 %v19217_v56, %v3353_v33 }
 0x291   :  { %6724 = vmatpush.bf16.msra.mxu2 %v12094_v39  ;;  %6700 = vmatpush.bf16.msra.mxu0 %v11518_v28  ;;  %v13210_v22 = vor.u32 %v15453_v17, %v13209_v43  ;;  %v15249_v39 = vld [vmem:[%s23801_s3 + $0x7c4] sm:$0xf]  ;;  %v11678_v28 = vor.u32 %v15065_v63, %v11675_v24  ;;  %v3391_v43 = vpop.f32.mrf.mxu0 }
 0x292   :  { %v15313_v4 = vld [vmem:[%s23801_s3 + $0x9c4] sm:$0xf]  ;;  %v12414_v31 = vor.u32 %v15249_v39, %v12411_v23 }
 0x293   :  { %6687 = vmatpush.bf16.msrb.mxu3 %v13306_v46  ;;  %6712 = vmatpush.bf16.msra.mxu1 %v11806_v32  ;;  %v12667_v26 = vld [vmem:[%s23801_s3 + $0x9e0] sm:$0xf0]  ;;  %v3380_v46 = vpop.f32.mrf.mxu3 }
 0x294   :  { %v15377_v32 = vld [vmem:[%s23801_s3 + $0xbc4] sm:$0xf]  ;;  %v12670_v15 = vor.u32 %v15313_v4, %v12667_v26  ;;  %v19379_v4 = vpop.f32.mrf.mxu1 }
 0x295   :  { %6725 = vmatpush.bf16.msra.mxu2 %v12062_v49  ;;  %6701 = vmatpush.bf16.msra.mxu0 %v11486_v59  ;;  %v12923_v40 = vld [vmem:[%s23801_s3 + $0xbe0] sm:$0xf0] }
 0x296   :  { %v15129_v47 = vld [vmem:[%s23801_s3 + $0x404] sm:$0xf]  ;;  %v12926_v53 = vor.u32 %v15377_v32, %v12923_v40 }
 0x297   :  { %6688 = vmatpush.bf16.msrb.mxu3 %v13274_v3  ;;  %6713 = vmatpush.bf16.msra.mxu1 %v11774_v54  ;;  %v11931_v49 = vld [vmem:[%s23801_s3 + $0x420] sm:$0xf0] }
 0x298   :  { %v15241_v51 = vld [vmem:[%s23801_s3 + $0x784] sm:$0xf]  ;;  %v11934_v55 = vor.u32 %v15129_v47, %v11931_v49 }
 0x299   :  { %6726 = vmatpush.bf16.msra.mxu2 %v12030_v57  ;;  %6702 = vmatpush.bf16.msra.mxu0 %v11454_v13  ;;  %v12379_v52 = vld [vmem:[%s23801_s3 + $0x7a0] sm:$0xf0] }
 0x29a   :  { %v15305_v54 = vld [vmem:[%s23801_s3 + $0x984] sm:$0xf]  ;;  %v12382_v36 = vor.u32 %v15241_v51, %v12379_v52 }
 0x29b   :  { %6689 = vmatpush.bf16.msrb.mxu3 %v13242_v30  ;;  %6714 = vmatpush.bf16.msra.mxu1 %v11742_v58  ;;  %v12635_v45 = vld [vmem:[%s23801_s3 + $0x9a0] sm:$0xf0] }
 0x29c   :  { %v15369_v37 = vld [vmem:[%s23801_s3 + $0xb84] sm:$0xf]  ;;  %v12638_v57 = vor.u32 %v15305_v54, %v12635_v45  ;;  %v19410_v54 = vpop.f32.mrf.mxu3 }
 0x29d   :  { %6727 = vmatpush.bf16.msra.mxu2 %v11998_v44  ;;  %v12891_v3 = vld [vmem:[%s23801_s3 + $0xba0] sm:$0xf0]  ;;  %6703 = vmatpush.bf16.msra.mxu0 %v11422_v61  ;;  %v3379_v44 = vadd.f32 %v19219_v34, %v3366_v38 }
 0x29e   :  { %v15233_v25 = vld [vmem:[%s23801_s3 + $0x744] sm:$0xf]  ;;  %v12894_v8 = vor.u32 %v15369_v37, %v12891_v3 }
 0x29f   :  { %6690 = vmatpush.bf16.msrb.mxu3 %v13210_v22  ;;  %6715 = vmatpush.bf16.msra.mxu1 %v11710_v20  ;;  %v12347_v59 = vld [vmem:[%s23801_s3 + $0x760] sm:$0xf0]  ;;  %v3392_v22 = vadd.f32 %v3391_v43, %v3379_v44 }
 0x2a0   :  { %v15297_v16 = vld [vmem:[%s23801_s3 + $0x944] sm:$0xf]  ;;  %v12350_v0 = vor.u32 %v15233_v25, %v12347_v59  ;;  %6704 = vmatmul.bf16.vlgmr.msra.gmra.mxu0 %v18932_v14  ;;  %v3393_v25 = vpop.f32.mrf.mxu0 }
 0x2a1   :  { %6728 = vmatpush.bf16.msra.mxu2 %v11966_v41  ;;  %6748 = vmatpush.bf16.msrb.mxu0 %v12670_v15  ;;  %v12603_v48 = vld [vmem:[%s23801_s3 + $0x960] sm:$0xf0]  ;;  %v3492_v26 = vmax.f32 %v3392_v22, 0.0 }
 0x2a2   :  { %v15361_v1 = vld [vmem:[%s23801_s3 + $0xb44] sm:$0xf]  ;;  %v12606_v7 = vor.u32 %v15297_v16, %v12603_v48 }
 0x2a3   :  { %6735 = vmatpush.bf16.msra.mxu3 %v12414_v31  ;;  %6716 = vmatpush.bf16.msra.mxu1 %v11678_v28  ;;  %v12859_v58 = vld [vmem:[%s23801_s3 + $0xb60] sm:$0xf0]  ;;  %v19396_v49 = vpack.c.bf16 %v3492_v26, %v3492_v26  ;;  %v11873_v26 = vld [vmem:[%s23801_s3 + $0x388] sm:$0xf] }
 0x2a4   :  { %v15225_v10 = vld [vmem:[%s23801_s3 + $0x704] sm:$0xf]  ;;  %v12862_v6 = vor.u32 %v15361_v1, %v12859_v58 }
 0x2a5   :  { %6729 = vmatpush.bf16.msra.mxu2 %v11934_v55  ;;  %6749 = vmatpush.bf16.msrb.mxu0 %v12638_v57  ;;  %v12315_v30 = vld [vmem:[%s23801_s3 + $0x720] sm:$0xf0] }
 0x2a6   :  { %6717 = vmatmul.bf16.vlgmr.msra.gmra.mxu1 %v18934_v35  ;;  %v15289_v2 = vld [vmem:[%s23801_s3 + $0x904] sm:$0xf]  ;;  %v12318_v60 = vor.u32 %v15225_v10, %v12315_v30  ;;  %6678 = vmatmul.bf16.vlgmr.msrb.gmra.mxu2 %v19396_v49 }
 0x2a7   :  { %6761 = vmatpush.bf16.msrb.mxu1 %v12926_v53  ;;  %6736 = vmatpush.bf16.msra.mxu3 %v12382_v36  ;;  %v12571_v56 = vld [vmem:[%s23801_s3 + $0x920] sm:$0xf0]  ;;  %v19408_v53 = vpop.f32.mrf.mxu2 }
 0x2a8   :  { %v15353_v11 = vld [vmem:[%s23801_s3 + $0xb04] sm:$0xf]  ;;  %v12574_v12 = vor.u32 %v15289_v2, %v12571_v56 }
 0x2a9   :  { %v12827_v19 = vld [vmem:[%s23801_s3 + $0xb20] sm:$0xf0]  ;;  %6750 = vmatpush.bf16.msrb.mxu0 %v12606_v7 }
 0x2aa   :  { %v15217_v13 = vld [vmem:[%s23801_s3 + $0x6c4] sm:$0xf]  ;;  %v12830_v17 = vor.u32 %v15353_v11, %v12827_v19  ;;  %v15062_v11 = vld [vmem:[%s23801_s3 + $0x1e4] sm:$0xf0] }
 0x2ab   :  { %6762 = vmatpush.bf16.msrb.mxu1 %v12894_v8  ;;  %6737 = vmatpush.bf16.msra.mxu3 %v12350_v0  ;;  %v12283_v42 = vld [vmem:[%s23801_s3 + $0x6e0] sm:$0xf0]  ;;  %v3406_v0 = vpop.f32.mrf.mxu1  ;;  %v11905_v19 = vld [vmem:[%s23801_s3 + $0x3c8] sm:$0xf] }
 0x2ac   :  { %v15281_v18 = vld [vmem:[%s23801_s3 + $0x8c4] sm:$0xf]  ;;  %v12286_v63 = vor.u32 %v15217_v13, %v12283_v42  ;;  %v11777_v0 = vld [vmem:[%s23801_s3 + $0x2c8] sm:$0xf] }
 0x2ad   :  { %v12539_v34 = vld [vmem:[%s23801_s3 + $0x8e0] sm:$0xf0]  ;;  %6751 = vmatpush.bf16.msrb.mxu0 %v12574_v12  ;;  %v15126_v12 = vld [vmem:[%s23801_s3 + $0x3e4] sm:$0xf0] }
 0x2ae   :  { %v15345_v20 = vld [vmem:[%s23801_s3 + $0xac4] sm:$0xf]  ;;  %v12542_v27 = vor.u32 %v15281_v18, %v12539_v34  ;;  %v3432_v18 = vpop.f32.mrf.mxu3  ;;  %v509_v34 = vperm.slane %v18910_v29, 7  ;;  %v11906_v22 = vor.u32 %v15126_v12, %v11905_v19  ;;  %v15118_v29 = vld [vmem:[%s23801_s3 + $0x3a4] sm:$0xf0] }
 0x2af   :  { %6763 = vmatpush.bf16.msrb.mxu1 %v12862_v6  ;;  %6738 = vmatpush.bf16.msra.mxu3 %v12318_v60  ;;  %v12795_v39 = vld [vmem:[%s23801_s3 + $0xae0] sm:$0xf0]  ;;  %v11649_v60 = vld [vmem:[%s23801_s3 + $0x1c8] sm:$0xf] }
 0x2b0   :  { %v15441_v23 = vld [vmem:[%s23801_s3 + $0xdc4] sm:$0xf]  ;;  %v12798_v40 = vor.u32 %v15345_v20, %v12795_v39  ;;  %v11489_v19 = vld [vmem:[%s23801_s3 + $0x88] sm:$0xf] }
 0x2b1   :  { %v13179_v24 = vld [vmem:[%s23801_s3 + $0xde0] sm:$0xf0]  ;;  %6752 = vmatpush.bf16.msrb.mxu0 %v12542_v27 }
 0x2b2   :  { %v15209_v31 = vld [vmem:[%s23801_s3 + $0x684] sm:$0xf]  ;;  %v13182_v41 = vor.u32 %v15441_v23, %v13179_v24  ;;  %v11617_v23 = vld [vmem:[%s23801_s3 + $0x188] sm:$0xf] }
 0x2b3   :  { %v12251_v32 = vld [vmem:[%s23801_s3 + $0x6a0] sm:$0xf0]  ;;  %6764 = vmatpush.bf16.msrb.mxu1 %v12830_v17  ;;  %6739 = vmatpush.bf16.msra.mxu3 %v12286_v63  ;;  %v3419_v17 = vpop.f32.mrf.mxu2  ;;  %v11650_v63 = vor.u32 %v15062_v11, %v11649_v60  ;;  %v15054_v24 = vld [vmem:[%s23801_s3 + $0x1a4] sm:$0xf0] }
 0x2b4   :  { %v15273_v46 = vld [vmem:[%s23801_s3 + $0x884] sm:$0xf]  ;;  %v12254_v51 = vor.u32 %v15209_v31, %v12251_v32  ;;  %6774 = vmatpush.bf16.msrb.mxu2 %v13182_v41  ;;  %v11618_v32 = vor.u32 %v15054_v24, %v11617_v23  ;;  %v15182_v17 = vld [vmem:[%s23801_s3 + $0x5a4] sm:$0xf0] }
 0x2b5   :  { %v12507_v61 = vld [vmem:[%s23801_s3 + $0x8a0] sm:$0xf0] }
 0x2b6   :  { %v15337_v47 = vld [vmem:[%s23801_s3 + $0xa84] sm:$0xf]  ;;  %v12510_v52 = vor.u32 %v15273_v46, %v12507_v61  ;;  %v11585_v46 = vld [vmem:[%s23801_s3 + $0x148] sm:$0xf]  ;;  %6730 = vmatmul.bf16.vlgmr.msra.gmra.mxu2 %v18936_v62 }
 0x2b7   :  { %v12763_v50 = vld [vmem:[%s23801_s3 + $0xaa0] sm:$0xf0]  ;;  %6765 = vmatpush.bf16.msrb.mxu1 %v12798_v40  ;;  %6740 = vmatpush.bf16.msra.mxu3 %v12254_v51  ;;  %v11874_v40 = vor.u32 %v15118_v29, %v11873_v26  ;;  %v15046_v61 = vld [vmem:[%s23801_s3 + $0x164] sm:$0xf0] }
 0x2b8   :  { %v15433_v28 = vld [vmem:[%s23801_s3 + $0xd84] sm:$0xf]  ;;  %v12766_v37 = vor.u32 %v15337_v47, %v12763_v50  ;;  %6753 = vmatpush.bf16.msrb.mxu0 %v12510_v52  ;;  %v11841_v47 = vld [vmem:[%s23801_s3 + $0x348] sm:$0xf]  ;;  %v3405_v50 = vadd.f32 %v19379_v4, %v509_v34  ;;  %v11586_v4 = vor.u32 %v15046_v61, %v11585_v46 }
 0x2b9   :  { %v13147_v15 = vld [vmem:[%s23801_s3 + $0xda0] sm:$0xf0]  ;;  %v15174_v46 = vld [vmem:[%s23801_s3 + $0x564] sm:$0xf0] }
 0x2ba   :  { %v15201_v45 = vld [vmem:[%s23801_s3 + $0x644] sm:$0xf]  ;;  %v13150_v3 = vor.u32 %v15433_v28, %v13147_v15  ;;  %v15110_v28 = vld [vmem:[%s23801_s3 + $0x364] sm:$0xf0] }
 0x2bb   :  { %v12219_v36 = vld [vmem:[%s23801_s3 + $0x660] sm:$0xf0]  ;;  %6766 = vmatpush.bf16.msrb.mxu1 %v12766_v37  ;;  %v11842_v52 = vor.u32 %v15110_v28, %v11841_v47  ;;  %v15038_v37 = vld [vmem:[%s23801_s3 + $0x124] sm:$0xf0] }
 0x2bc   :  { %v15265_v55 = vld [vmem:[%s23801_s3 + $0x844] sm:$0xf]  ;;  %v12222_v48 = vor.u32 %v15201_v45, %v12219_v36  ;;  %6775 = vmatpush.bf16.msrb.mxu2 %v13150_v3  ;;  %v11553_v36 = vld [vmem:[%s23801_s3 + $0x108] sm:$0xf] }
 0x2bd   :  { %v12475_v33 = vld [vmem:[%s23801_s3 + $0x860] sm:$0xf0]  ;;  %v11809_v3 = vld [vmem:[%s23801_s3 + $0x308] sm:$0xf] }
 0x2be   :  { %v15329_v57 = vld [vmem:[%s23801_s3 + $0xa44] sm:$0xf]  ;;  %v12478_v1 = vor.u32 %v15265_v55, %v12475_v33  ;;  %6741 = vmatpush.bf16.msra.mxu3 %v12222_v48  ;;  %v3418_v55 = vadd.f32 %v19408_v53, %v3405_v50  ;;  %v15102_v33 = vld [vmem:[%s23801_s3 + $0x324] sm:$0xf0] }
 0x2bf   :  { %v12731_v59 = vld [vmem:[%s23801_s3 + $0xa60] sm:$0xf0]  ;;  %v11521_v53 = vld [vmem:[%s23801_s3 + $0xc8] sm:$0xf]  ;;  %v3482_v24 = vpop.f32.mrf.mxu3 }
 0x2c0   :  { %v15425_v8 = vld [vmem:[%s23801_s3 + $0xd44] sm:$0xf]  ;;  %v12734_v10 = vor.u32 %v15329_v57, %v12731_v59  ;;  %6754 = vmatpush.bf16.msrb.mxu0 %v12478_v1  ;;  %v11554_v59 = vor.u32 %v15038_v37, %v11553_v36  ;;  %v15030_v48 = vld [vmem:[%s23801_s3 + $0xe4] sm:$0xf0]  ;;  %v3431_v1 = vadd.f32 %v19410_v54, %v3418_v55 }
 0x2c1   :  { %v13115_v16 = vld [vmem:[%s23801_s3 + $0xd60] sm:$0xf0]  ;;  %v15190_v54 = vld [vmem:[%s23801_s3 + $0x5e4] sm:$0xf0] }
 0x2c2   :  { %v15257_v58 = vld [vmem:[%s23801_s3 + $0x804] sm:$0xf]  ;;  %v13118_v30 = vor.u32 %v15425_v8, %v13115_v16  ;;  %6767 = vmatpush.bf16.msrb.mxu1 %v12734_v10  ;;  %v11810_v8 = vor.u32 %v15102_v33, %v11809_v3  ;;  %v11425_v28 = vld [vmem:[%s23801_s3 + $0x8] sm:$0xf] }
 0x2c3   :  { %v15193_v38 = vld [vmem:[%s23801_s3 + $0x604] sm:$0xf]  ;;  %v15318_v3 = vld [vmem:[%s23801_s3 + $0x9e4] sm:$0xf0] }
 0x2c4   :  { %v12187_v7 = vld [vmem:[%s23801_s3 + $0x620] sm:$0xf0]  ;;  %6776 = vmatpush.bf16.msrb.mxu2 %v13118_v30  ;;  %v3456_v30 = vpop.f32.mrf.mxu1  ;;  %v12929_v55 = vld [vmem:[%s23801_s3 + $0xbc8] sm:$0xf] }
 0x2c5   :  { %v12443_v6 = vld [vmem:[%s23801_s3 + $0x820] sm:$0xf0]  ;;  %v12190_v44 = vor.u32 %v15193_v38, %v12187_v7  ;;  %v15094_v38 = vld [vmem:[%s23801_s3 + $0x2e4] sm:$0xf0] }
 0x2c6   :  { %v15321_v2 = vld [vmem:[%s23801_s3 + $0xa04] sm:$0xf]  ;;  %v12446_v43 = vor.u32 %v15257_v58, %v12443_v6  ;;  %v3443_v58 = vpop.f32.mrf.mxu0  ;;  %v12161_v6 = vld [vmem:[%s23801_s3 + $0x5c8] sm:$0xf]  ;;  %v11778_v60 = vor.u32 %v15094_v38, %v11777_v0 }
 0x2c7   :  { %v12699_v56 = vld [vmem:[%s23801_s3 + $0xa20] sm:$0xf0]  ;;  %6742 = vmatpush.bf16.msra.mxu3 %v12190_v44  ;;  %v15022_v44 = vld [vmem:[%s23801_s3 + $0xa4] sm:$0xf0]  ;;  %v12162_v12 = vor.u32 %v15190_v54, %v12161_v6  ;;  %v3484_v38 = vpop.f32.mrf.mxu3 }
 0x2c8   :  { %v15417_v13 = vld [vmem:[%s23801_s3 + $0xd04] sm:$0xf]  ;;  %v12702_v20 = vor.u32 %v15321_v2, %v12699_v56  ;;  %6755 = vmatpush.bf16.msrb.mxu0 %v12446_v43  ;;  %v3444_v2 = vadd.f32 %v3443_v58, %v3431_v1  ;;  %v11522_v56 = vor.u32 %v15030_v48, %v11521_v53  ;;  %v12129_v43 = vld [vmem:[%s23801_s3 + $0x588] sm:$0xf]  ;;  %v11490_v34 = vor.u32 %v15022_v44, %v11489_v19 }
 0x2c9   :  { %v13083_v42 = vld [vmem:[%s23801_s3 + $0xd20] sm:$0xf0]  ;;  %v12130_v29 = vor.u32 %v15182_v17, %v12129_v43  ;;  %v15310_v6 = vld [vmem:[%s23801_s3 + $0x9a4] sm:$0xf0] }
 0x2ca   :  { %v13086_v39 = vor.u32 %v15417_v13, %v13083_v42  ;;  %v15409_v27 = vld [vmem:[%s23801_s3 + $0xcc4] sm:$0xf]  ;;  %6768 = vmatpush.bf16.msrb.mxu1 %v12702_v20  ;;  %v11745_v13 = vld [vmem:[%s23801_s3 + $0x288] sm:$0xf]  ;;  %v3457_v18 = vadd.f32 %v3456_v30, %v3444_v2  ;;  %v3469_v20 = vpop.f32.mrf.mxu2 }
 0x2cb   :  { %v13051_v31 = vld [vmem:[%s23801_s3 + $0xce0] sm:$0xf0]  ;;  %6756 = vmatmul.bf16.vlgmr.msrb.gmra.mxu0 %v19113_v9  ;;  %v15086_v42 = vld [vmem:[%s23801_s3 + $0x2a4] sm:$0xf0] }
 0x2cc   :  { %6800 = vmatpush.bf16.msra.mxu0 %v11650_v63  ;;  %6777 = vmatpush.bf16.msrb.mxu2 %v13086_v39  ;;  %v13054_v41 = vor.u32 %v15409_v27, %v13051_v31  ;;  %v15401_v15 = vld [vmem:[%s23801_s3 + $0xc84] sm:$0xf]  ;;  %v11746_v63 = vor.u32 %v15086_v42, %v11745_v13  ;;  %v15014_v39 = vld [vmem:[%s23801_s3 + $0x64] sm:$0xf0]  ;;  %v3470_v23 = vadd.f32 %v3469_v20, %v3457_v18 }
 0x2cd   :  { %v13019_v51 = vld [vmem:[%s23801_s3 + $0xca0] sm:$0xf0]  ;;  %6769 = vmatmul.bf16.vlgmr.msrb.gmra.mxu1 %v19124_v5  ;;  %v11713_v27 = vld [vmem:[%s23801_s3 + $0x248] sm:$0xf] }
 0x2ce   :  { %6813 = vmatpush.bf16.msra.mxu1 %v11906_v22  ;;  %v13022_v45 = vor.u32 %v15401_v15, %v13019_v51  ;;  %v15393_v57 = vld [vmem:[%s23801_s3 + $0xc44] sm:$0xf]  ;;  %v11457_v22 = vld [vmem:[%s23801_s3 + $0x48] sm:$0xf]  ;;  %v3445_v26 = vpop.f32.mrf.mxu0  ;;  %v3483_v61 = vadd.f32 %v3482_v24, %v3470_v23 }
 0x2cf   :  { %v12987_v25 = vld [vmem:[%s23801_s3 + $0xc60] sm:$0xf0]  ;;  %v15078_v31 = vld [vmem:[%s23801_s3 + $0x264] sm:$0xf0]  ;;  %v11458_v47 = vor.u32 %v15014_v39, %v11457_v22 }
 0x2d0   :  { %6801 = vmatpush.bf16.msra.mxu0 %v11618_v32  ;;  %6778 = vmatpush.bf16.msrb.mxu2 %v13054_v41  ;;  %v12990_v16 = vor.u32 %v15393_v57, %v12987_v25  ;;  %v15385_v7 = vld [vmem:[%s23801_s3 + $0xc04] sm:$0xf]  ;;  %v3458_v32 = vpop.f32.mrf.mxu1  ;;  %v12097_v41 = vld [vmem:[%s23801_s3 + $0x548] sm:$0xf]  ;;  %v11714_v51 = vor.u32 %v15078_v31, %v11713_v27  ;;  %v3493_v36 = vmax.f32 %v3483_v61, 0.0 }
 0x2d1   :  { %v12955_v10 = vld [vmem:[%s23801_s3 + $0xc20] sm:$0xf0]  ;;  %v15006_v15 = vld [vmem:[%s23801_s3 + $0x24] sm:$0xf0]  ;;  %v12098_v37 = vor.u32 %v15174_v46, %v12097_v41 }
 0x2d2   :  { %6814 = vmatpush.bf16.msra.mxu1 %v11874_v40  ;;  %v12958_v11 = vor.u32 %v15385_v7, %v12955_v10  ;;  %v15505_v40 = vld [vmem:[%s23801_s3 + $0xfc4] sm:$0xf]  ;;  %v15382_v57 = vld [vmem:[%s23801_s3 + $0xbe4] sm:$0xf0]  ;;  %v3471_v0 = vpop.f32.mrf.mxu2 }
 0x2d3   :  { %v13435_v50 = vld [vmem:[%s23801_s3 + $0xfe0] sm:$0xf0]  ;;  %v12065_v25 = vld [vmem:[%s23801_s3 + $0x508] sm:$0xf]  ;;  %v12930_v7 = vor.u32 %v15382_v57, %v12929_v55 }
 0x2d4   :  { %6802 = vmatpush.bf16.msra.mxu0 %v11586_v4  ;;  %6779 = vmatpush.bf16.msrb.mxu2 %v13022_v45  ;;  %v11681_v4 = vld [vmem:[%s23801_s3 + $0x208] sm:$0xf]  ;;  %v13438_v33 = vor.u32 %v15505_v40, %v13435_v50  ;;  %v15497_v53 = vld [vmem:[%s23801_s3 + $0xf84] sm:$0xf] }
 0x2d5   :  { %v12673_v45 = vld [vmem:[%s23801_s3 + $0x9c8] sm:$0xf]  ;;  %v13403_v48 = vld [vmem:[%s23801_s3 + $0xfa0] sm:$0xf0] }
 0x2d6   :  { %6815 = vmatpush.bf16.msra.mxu1 %v11842_v52  ;;  %v15070_v52 = vld [vmem:[%s23801_s3 + $0x224] sm:$0xf0]  ;;  %v12674_v58 = vor.u32 %v15318_v3, %v12673_v45  ;;  %v13406_v2 = vor.u32 %v15497_v53, %v13403_v48  ;;  %v15489_v19 = vld [vmem:[%s23801_s3 + $0xf44] sm:$0xf] }
 0x2d7   :  { %v11682_v1 = vor.u32 %v15070_v52, %v11681_v4  ;;  %v12641_v30 = vld [vmem:[%s23801_s3 + $0x988] sm:$0xf]  ;;  %v13371_v44 = vld [vmem:[%s23801_s3 + $0xf60] sm:$0xf0] }
 0x2d8   :  { %6803 = vmatpush.bf16.msra.mxu0 %v11554_v59  ;;  %6780 = vmatpush.bf16.msrb.mxu2 %v12990_v16  ;;  %v15166_v59 = vld [vmem:[%s23801_s3 + $0x524] sm:$0xf0]  ;;  %v11426_v16 = vor.u32 %v15006_v15, %v11425_v28  ;;  %v13374_v20 = vor.u32 %v15489_v19, %v13371_v44  ;;  %v19685_v39 = vld [vmem:[%s23802_s4] sm:$0xff] }
 0x2d9   :  { %v12066_v10 = vor.u32 %v15166_v59, %v12065_v25  ;;  %v12897_v54 = vld [vmem:[%s23801_s3 + $0xb88] sm:$0xf]  ;;  %v15481_v23 = vld [vmem:[%s23801_s3 + $0xf04] sm:$0xf]  ;;  %v4016_v31 = vperm.slane %v19685_v39, 0  ;;  %v6614_v59 = vpop.f32.mrf.mxu1 }
 0x2da   :  { %6816 = vmatpush.bf16.msra.mxu1 %v11810_v8  ;;  %v19630_v8 = vpack.c.bf16 %v3493_v36, %v3493_v36  ;;  %v12609_v13 = vld [vmem:[%s23801_s3 + $0x948] sm:$0xf]  ;;  %v13339_v24 = vld [vmem:[%s23801_s3 + $0xf20] sm:$0xf0]  ;;  %v6601_v36 = vpop.f32.mrf.mxu0 }
 0x2db   :  { %v15302_v17 = vld [vmem:[%s23801_s3 + $0x964] sm:$0xf0]  ;;  %v13342_v41 = vor.u32 %v15481_v23, %v13339_v24  ;;  %v13307_v50 = vld [vmem:[%s23801_s3 + $0xee0] sm:$0xf0]  ;;  %v6602_v25 = vadd.f32 %v6601_v36, %v4016_v31  ;;  %v11651_v36 = vld [vmem:[%s23801_s3 + $0x1e8] sm:$0xf0] }
 0x2dc   :  { %6804 = vmatpush.bf16.msra.mxu0 %v11522_v56  ;;  %6781 = vmatpush.bf16.msrb.mxu2 %v12958_v11  ;;  %v15374_v56 = vld [vmem:[%s23801_s3 + $0xba4] sm:$0xf0]  ;;  %v12610_v26 = vor.u32 %v15302_v17, %v12609_v13  ;;  %v15465_v57 = vld [vmem:[%s23801_s3 + $0xe84] sm:$0xf] }
 0x2dd   :  { %6691 = vmatmul.bf16.vlgmr.msrb.gmra.mxu3 %v19630_v8  ;;  %v15158_v11 = vld [vmem:[%s23801_s3 + $0x4e4] sm:$0xf0]  ;;  %v12898_v42 = vor.u32 %v15374_v56, %v12897_v54  ;;  %v6615_v38 = vadd.f32 %v6614_v59, %v6602_v25  ;;  %v13243_v19 = vld [vmem:[%s23801_s3 + $0xe60] sm:$0xf0] }
 0x2de   :  { %6817 = vmatpush.bf16.msra.mxu1 %v11778_v60  ;;  %6787 = vmatpush.bf16.msrb.mxu3 %v13438_v33  ;;  %v12033_v60 = vld [vmem:[%s23801_s3 + $0x4c8] sm:$0xf]  ;;  %v13211_v31 = vld [vmem:[%s23801_s3 + $0xe20] sm:$0xf0] }
 0x2df   :  { %6782 = vmatmul.bf16.vlgmr.msrb.gmra.mxu2 %v19396_v49  ;;  %v12034_v43 = vor.u32 %v15158_v11, %v12033_v60  ;;  %v12865_v18 = vld [vmem:[%s23801_s3 + $0xb48] sm:$0xf]  ;;  %v15457_v11 = vld [vmem:[%s23801_s3 + $0xe44] sm:$0xf] }
 0x2e0   :  { %6826 = vmatpush.bf16.msra.mxu2 %v12162_v12  ;;  %6805 = vmatpush.bf16.msra.mxu0 %v11490_v34  ;;  %v12642_v12 = vor.u32 %v15310_v6, %v12641_v30  ;;  %v15366_v34 = vld [vmem:[%s23801_s3 + $0xb64] sm:$0xf0] }
 0x2e1   :  { %v15150_v22 = vld [vmem:[%s23801_s3 + $0x4a4] sm:$0xf0] }
 0x2e2   :  { %6818 = vmatpush.bf16.msra.mxu1 %v11746_v63  ;;  %6788 = vmatpush.bf16.msrb.mxu3 %v13406_v2  ;;  %v12001_v63 = vld [vmem:[%s23801_s3 + $0x488] sm:$0xf] }
 0x2e3   :  { %v12002_v27 = vor.u32 %v15150_v22, %v12001_v63  ;;  %v12577_v32 = vld [vmem:[%s23801_s3 + $0x908] sm:$0xf]  ;;  %v6603_v63 = vpop.f32.mrf.mxu0  ;;  %v13246_v22 = vor.u32 %v15457_v11, %v13243_v19 }
 0x2e4   :  { %6827 = vmatpush.bf16.msra.mxu2 %v12130_v29  ;;  %6806 = vmatpush.bf16.msra.mxu0 %v11458_v47  ;;  %v12866_v29 = vor.u32 %v15366_v34, %v12865_v18  ;;  %v15294_v40 = vld [vmem:[%s23801_s3 + $0x924] sm:$0xf0]  ;;  %v15473_v47 = vld [vmem:[%s23801_s3 + $0xec4] sm:$0xf] }
 0x2e5   :  { %v12833_v46 = vld [vmem:[%s23801_s3 + $0xb08] sm:$0xf] }
 0x2e6   :  { %6819 = vmatpush.bf16.msra.mxu1 %v11714_v51  ;;  %6789 = vmatpush.bf16.msrb.mxu3 %v13374_v20  ;;  %v15358_v61 = vld [vmem:[%s23801_s3 + $0xb24] sm:$0xf0]  ;;  %v12578_v51 = vor.u32 %v15294_v40, %v12577_v32  ;;  %v6640_v20 = vpop.f32.mrf.mxu3 }
 0x2e7   :  { %v11969_v28 = vld [vmem:[%s23801_s3 + $0x448] sm:$0xf]  ;;  %v12834_v4 = vor.u32 %v15358_v61, %v12833_v46 }
 0x2e8   :  { %6828 = vmatpush.bf16.msra.mxu2 %v12098_v37  ;;  %6807 = vmatpush.bf16.msra.mxu0 %v11426_v16  ;;  %v15142_v15 = vld [vmem:[%s23801_s3 + $0x464] sm:$0xf0]  ;;  %v13310_v37 = vor.u32 %v15473_v47, %v13307_v50  ;;  %v13275_v16 = vld [vmem:[%s23801_s3 + $0xea0] sm:$0xf0] }
 0x2e9   :  { %v12545_v52 = vld [vmem:[%s23801_s3 + $0x8c8] sm:$0xf]  ;;  %v11970_v3 = vor.u32 %v15142_v15, %v11969_v28  ;;  %v13278_v6 = vor.u32 %v15465_v57, %v13275_v16 }
 0x2ea   :  { %6820 = vmatpush.bf16.msra.mxu1 %v11682_v1  ;;  %v15286_v45 = vld [vmem:[%s23801_s3 + $0x8e4] sm:$0xf0]  ;;  %6790 = vmatpush.bf16.msrb.mxu3 %v13342_v41 }
 0x2eb   :  { %6808 = vmatmul.bf16.vlgmr.msra.gmra.mxu0 %v18932_v14  ;;  %v12801_v55 = vld [vmem:[%s23801_s3 + $0xac8] sm:$0xf]  ;;  %v12546_v0 = vor.u32 %v15286_v45, %v12545_v52  ;;  %v15058_v45 = vld [vmem:[%s23801_s3 + $0x1cc] sm:$0xf] }
 0x2ec   :  { %6852 = vmatpush.bf16.msrb.mxu0 %v12674_v58  ;;  %6829 = vmatpush.bf16.msra.mxu2 %v12066_v10  ;;  %v15350_v33 = vld [vmem:[%s23801_s3 + $0xae4] sm:$0xf0] }
 0x2ed   :  { %6821 = vmatmul.bf16.vlgmr.msra.gmra.mxu1 %v18934_v35  ;;  %v11937_v53 = vld [vmem:[%s23801_s3 + $0x408] sm:$0xf]  ;;  %6743 = vmatmul.bf16.vlgmr.msra.gmra.mxu3 %v18945_v21 }
 0x2ee   :  { %6865 = vmatpush.bf16.msrb.mxu1 %v12930_v7  ;;  %v15134_v48 = vld [vmem:[%s23801_s3 + $0x424] sm:$0xf0]  ;;  %v12802_v7 = vor.u32 %v15350_v33, %v12801_v55  ;;  %6791 = vmatpush.bf16.msrb.mxu3 %v13310_v37  ;;  %v15122_v55 = vld [vmem:[%s23801_s3 + $0x3cc] sm:$0xf] }
 0x2ef   :  { %v13185_v1 = vld [vmem:[%s23801_s3 + $0xdc8] sm:$0xf]  ;;  %v11938_v54 = vor.u32 %v15134_v48, %v11937_v53  ;;  %v11907_v33 = vld [vmem:[%s23801_s3 + $0x3e8] sm:$0xf0] }
 0x2f0   :  { %6853 = vmatpush.bf16.msrb.mxu0 %v12642_v12  ;;  %6830 = vmatpush.bf16.msra.mxu2 %v12034_v43  ;;  %v15446_v58 = vld [vmem:[%s23801_s3 + $0xde4] sm:$0xf0] }
 0x2f1   :  { %v12513_v10 = vld [vmem:[%s23801_s3 + $0x888] sm:$0xf]  ;;  %v13186_v60 = vor.u32 %v15446_v58, %v13185_v1  ;;  %v6642_v1 = vpop.f32.mrf.mxu3  ;;  %v11654_v58 = vor.u32 %v15058_v45, %v11651_v36 }
 0x2f2   :  { %6866 = vmatpush.bf16.msrb.mxu1 %v12898_v42  ;;  %v15278_v30 = vld [vmem:[%s23801_s3 + $0x8a4] sm:$0xf0]  ;;  %v6627_v42 = vpop.f32.mrf.mxu2  ;;  %6792 = vmatpush.bf16.msrb.mxu3 %v13278_v6 }
 0x2f3   :  { %v12769_v2 = vld [vmem:[%s23801_s3 + $0xa88] sm:$0xf]  ;;  %v12514_v44 = vor.u32 %v15278_v30, %v12513_v10  ;;  %v6628_v34 = vadd.f32 %v6627_v42, %v6615_v38  ;;  %v11910_v38 = vor.u32 %v15122_v55, %v11907_v33  ;;  %v11619_v10 = vld [vmem:[%s23801_s3 + $0x1a8] sm:$0xf0] }
 0x2f4   :  { %6854 = vmatpush.bf16.msrb.mxu0 %v12610_v26  ;;  %6831 = vmatpush.bf16.msra.mxu2 %v12002_v27  ;;  %v15342_v56 = vld [vmem:[%s23801_s3 + $0xaa4] sm:$0xf0]  ;;  %v6616_v26 = vpop.f32.mrf.mxu1  ;;  %v15449_v27 = vld [vmem:[%s23801_s3 + $0xe04] sm:$0xf]  ;;  %v11587_v42 = vld [vmem:[%s23801_s3 + $0x168] sm:$0xf0] }
 0x2f5   :  { %v13153_v12 = vld [vmem:[%s23801_s3 + $0xd88] sm:$0xf]  ;;  %v12770_v43 = vor.u32 %v15342_v56, %v12769_v2  ;;  %v19795_v40 = vadd.f32 %v6640_v20, %v6628_v34  ;;  %v11875_v2 = vld [vmem:[%s23801_s3 + $0x3a8] sm:$0xf0] }
 0x2f6   :  { %6867 = vmatpush.bf16.msrb.mxu1 %v12866_v29  ;;  %v15438_v13 = vld [vmem:[%s23801_s3 + $0xda4] sm:$0xf0]  ;;  %6793 = vmatpush.bf16.msrb.mxu3 %v13246_v22  ;;  %v11843_v34 = vld [vmem:[%s23801_s3 + $0x368] sm:$0xf0] }
 0x2f7   :  { %v12481_v17 = vld [vmem:[%s23801_s3 + $0x848] sm:$0xf]  ;;  %v13154_v29 = vor.u32 %v15438_v13, %v13153_v12  ;;  %v15042_v13 = vld [vmem:[%s23801_s3 + $0x14c] sm:$0xf] }
 0x2f8   :  { %6855 = vmatpush.bf16.msrb.mxu0 %v12578_v51  ;;  %6832 = vmatpush.bf16.msra.mxu2 %v11970_v3  ;;  %v15270_v18 = vld [vmem:[%s23801_s3 + $0x864] sm:$0xf0] }
 0x2f9   :  { %v12737_v23 = vld [vmem:[%s23801_s3 + $0xa48] sm:$0xf]  ;;  %v12482_v41 = vor.u32 %v15270_v18, %v12481_v17  ;;  %v15106_v18 = vld [vmem:[%s23801_s3 + $0x34c] sm:$0xf] }
 0x2fa   :  { %6868 = vmatpush.bf16.msrb.mxu1 %v12834_v4  ;;  %v15334_v24 = vld [vmem:[%s23801_s3 + $0xa64] sm:$0xf0]  ;;  %v13214_v4 = vor.u32 %v15449_v27, %v13211_v31  ;;  %v6629_v48 = vpop.f32.mrf.mxu2  ;;  %v11846_v26 = vor.u32 %v15106_v18, %v11843_v34  ;;  %v11555_v27 = vld [vmem:[%s23801_s3 + $0x128] sm:$0xf0] }
 0x2fb   :  { %v12417_v32 = vld [vmem:[%s23801_s3 + $0x7c8] sm:$0xf]  ;;  %v12738_v50 = vor.u32 %v15334_v24, %v12737_v23  ;;  %v11590_v24 = vor.u32 %v15042_v13, %v11587_v42  ;;  %v15186_v48 = vld [vmem:[%s23801_s3 + $0x5cc] sm:$0xf] }
 0x2fc   :  { %6856 = vmatpush.bf16.msrb.mxu0 %v12546_v0  ;;  %6833 = vmatpush.bf16.msra.mxu2 %v11938_v54  ;;  %v15254_v46 = vld [vmem:[%s23801_s3 + $0x7e4] sm:$0xf0]  ;;  %v15114_v54 = vld [vmem:[%s23801_s3 + $0x38c] sm:$0xf] }
 0x2fd   :  { %v13121_v61 = vld [vmem:[%s23801_s3 + $0xd48] sm:$0xf]  ;;  %v12418_v37 = vor.u32 %v15254_v46, %v12417_v32  ;;  %6794 = vmatpush.bf16.msrb.mxu3 %v13214_v4  ;;  %v11878_v12 = vor.u32 %v15114_v54, %v11875_v2  ;;  %v11811_v46 = vld [vmem:[%s23801_s3 + $0x328] sm:$0xf0]  ;;  %v6653_v33 = vpop.f32.mrf.mxu0 }
 0x2fe   :  { %6869 = vmatpush.bf16.msrb.mxu1 %v12802_v7  ;;  %v15430_v47 = vld [vmem:[%s23801_s3 + $0xd64] sm:$0xf0]  ;;  %v15050_v7 = vld [vmem:[%s23801_s3 + $0x18c] sm:$0xf] }
 0x2ff   :  { %6834 = vmatmul.bf16.vlgmr.msra.gmra.mxu2 %v18936_v62  ;;  %v12449_v28 = vld [vmem:[%s23801_s3 + $0x808] sm:$0xf]  ;;  %v13122_v3 = vor.u32 %v15430_v47, %v13121_v61  ;;  %v15026_v4 = vld [vmem:[%s23801_s3 + $0xcc] sm:$0xf] }
 0x300   :  { %6878 = vmatpush.bf16.msrb.mxu2 %v13186_v60  ;;  %6857 = vmatpush.bf16.msrb.mxu0 %v12514_v44  ;;  %v15262_v15 = vld [vmem:[%s23801_s3 + $0x824] sm:$0xf0]  ;;  %v11622_v44 = vor.u32 %v15050_v7, %v11619_v10  ;;  %v11747_v2 = vld [vmem:[%s23801_s3 + $0x2a8] sm:$0xf0] }
 0x301   :  { %v12705_v51 = vld [vmem:[%s23801_s3 + $0xa08] sm:$0xf]  ;;  %v12450_v25 = vor.u32 %v15262_v15, %v12449_v28  ;;  %6839 = vmatpush.bf16.msra.mxu3 %v12418_v37  ;;  %v15090_v37 = vld [vmem:[%s23801_s3 + $0x2cc] sm:$0xf] }
 0x302   :  { %6870 = vmatpush.bf16.msrb.mxu1 %v12770_v43  ;;  %v15326_v52 = vld [vmem:[%s23801_s3 + $0xa24] sm:$0xf0]  ;;  %6795 = vmatmul.bf16.vlgmr.msrb.gmra.mxu3 %v19630_v8  ;;  %v11715_v18 = vld [vmem:[%s23801_s3 + $0x268] sm:$0xf0] }
 0x303   :  { %v12385_v57 = vld [vmem:[%s23801_s3 + $0x788] sm:$0xf]  ;;  %v12706_v0 = vor.u32 %v15326_v52, %v12705_v51  ;;  %v11523_v52 = vld [vmem:[%s23801_s3 + $0xe8] sm:$0xf0] }
 0x304   :  { %6879 = vmatpush.bf16.msrb.mxu2 %v13154_v29  ;;  %6858 = vmatpush.bf16.msrb.mxu0 %v12482_v41  ;;  %v15246_v59 = vld [vmem:[%s23801_s3 + $0x7a4] sm:$0xf0]  ;;  %v15034_v29 = vld [vmem:[%s23801_s3 + $0x10c] sm:$0xf]  ;;  %v11526_v1 = vor.u32 %v15026_v4, %v11523_v52 }
 0x305   :  { %v13089_v16 = vld [vmem:[%s23801_s3 + $0xd08] sm:$0xf]  ;;  %v12386_v30 = vor.u32 %v15246_v59, %v12385_v57  ;;  %v15098_v41 = vld [vmem:[%s23801_s3 + $0x30c] sm:$0xf]  ;;  %v11558_v15 = vor.u32 %v15034_v29, %v11555_v27  ;;  %v6655_v34 = vpop.f32.mrf.mxu0 }
 0x306   :  { %v15422_v53 = vld [vmem:[%s23801_s3 + $0xd24] sm:$0xf0]  ;;  %6871 = vmatpush.bf16.msrb.mxu1 %v12738_v50  ;;  %v11814_v51 = vor.u32 %v15098_v41, %v11811_v46  ;;  %v15170_v29 = vld [vmem:[%s23801_s3 + $0x54c] sm:$0xf] }
 0x307   :  { %v13090_v6 = vor.u32 %v15422_v53, %v13089_v16  ;;  %v12353_v56 = vld [vmem:[%s23801_s3 + $0x748] sm:$0xf]  ;;  %6840 = vmatpush.bf16.msra.mxu3 %v12386_v30  ;;  %v6654_v16 = vadd.f32 %v6653_v33, %v19795_v40  ;;  %v6666_v53 = vpop.f32.mrf.mxu1  ;;  %v15018_v40 = vld [vmem:[%s23801_s3 + $0x8c] sm:$0xf] }
 0x308   :  { %6880 = vmatpush.bf16.msrb.mxu2 %v13122_v3  ;;  %6859 = vmatpush.bf16.msrb.mxu0 %v12450_v25  ;;  %v15238_v60 = vld [vmem:[%s23801_s3 + $0x764] sm:$0xf0]  ;;  %v11779_v3 = vld [vmem:[%s23801_s3 + $0x2e8] sm:$0xf0] }
 0x309   :  { %v13057_v11 = vld [vmem:[%s23801_s3 + $0xcc8] sm:$0xf]  ;;  %v12354_v43 = vor.u32 %v15238_v60, %v12353_v56  ;;  %v11491_v30 = vld [vmem:[%s23801_s3 + $0xa8] sm:$0xf0] }
 0x30a   :  { %v15414_v19 = vld [vmem:[%s23801_s3 + $0xce4] sm:$0xf0]  ;;  %6872 = vmatpush.bf16.msrb.mxu1 %v12706_v0  ;;  %v12163_v0 = vld [vmem:[%s23801_s3 + $0x5e8] sm:$0xf0] }
 0x30b   :  { %v13058_v17 = vor.u32 %v15414_v19, %v13057_v11  ;;  %v12321_v20 = vld [vmem:[%s23801_s3 + $0x708] sm:$0xf]  ;;  %6860 = vmatmul.bf16.vlgmr.msrb.gmra.mxu0 %v19113_v9  ;;  %6841 = vmatpush.bf16.msra.mxu3 %v12354_v43  ;;  %v12166_v54 = vor.u32 %v15186_v48, %v12163_v0  ;;  %v15178_v11 = vld [vmem:[%s23801_s3 + $0x58c] sm:$0xf] }
 0x30c   :  { %6904 = vmatpush.bf16.msra.mxu0 %v11654_v58  ;;  %6881 = vmatpush.bf16.msrb.mxu2 %v13090_v6  ;;  %v15230_v63 = vld [vmem:[%s23801_s3 + $0x724] sm:$0xf0]  ;;  %v11782_v58 = vor.u32 %v15090_v37, %v11779_v3  ;;  %v15082_v6 = vld [vmem:[%s23801_s3 + $0x28c] sm:$0xf] }
 0x30d   :  { %6873 = vmatmul.bf16.vlgmr.msrb.gmra.mxu1 %v19124_v5  ;;  %v13025_v22 = vld [vmem:[%s23801_s3 + $0xc88] sm:$0xf]  ;;  %v12322_v31 = vor.u32 %v15230_v63, %v12321_v20  ;;  %v12131_v19 = vld [vmem:[%s23801_s3 + $0x5a8] sm:$0xf0]  ;;  %v11750_v13 = vor.u32 %v15082_v6, %v11747_v2 }
 0x30e   :  { %6917 = vmatpush.bf16.msra.mxu1 %v11910_v38  ;;  %v15406_v23 = vld [vmem:[%s23801_s3 + $0xca4] sm:$0xf0]  ;;  %v19949_v38 = vadd.f32 %v6666_v53, %v6654_v16  ;;  %v11459_v43 = vld [vmem:[%s23801_s3 + $0x68] sm:$0xf0]  ;;  %v12134_v20 = vor.u32 %v15178_v11, %v12131_v19 }
 0x30f   :  { %v13026_v32 = vor.u32 %v15406_v23, %v13025_v22  ;;  %v12289_v61 = vld [vmem:[%s23801_s3 + $0x6c8] sm:$0xf]  ;;  %6842 = vmatpush.bf16.msra.mxu3 %v12322_v31  ;;  %v12099_v27 = vld [vmem:[%s23801_s3 + $0x568] sm:$0xf0] }
 0x310   :  { %6905 = vmatpush.bf16.msra.mxu0 %v11622_v44  ;;  %6882 = vmatpush.bf16.msrb.mxu2 %v13058_v17  ;;  %v15222_v47 = vld [vmem:[%s23801_s3 + $0x6e4] sm:$0xf0]  ;;  %v11494_v44 = vor.u32 %v15018_v40, %v11491_v30  ;;  %v15074_v17 = vld [vmem:[%s23801_s3 + $0x24c] sm:$0xf] }
 0x311   :  { %v12993_v50 = vld [vmem:[%s23801_s3 + $0xc48] sm:$0xf]  ;;  %v12290_v45 = vor.u32 %v15222_v47, %v12289_v61  ;;  %v11718_v41 = vor.u32 %v15074_v17, %v11715_v18  ;;  %v11427_v61 = vld [vmem:[%s23801_s3 + $0x28] sm:$0xf0] }
 0x312   :  { %6918 = vmatpush.bf16.msra.mxu1 %v11878_v12  ;;  %v15398_v28 = vld [vmem:[%s23801_s3 + $0xc64] sm:$0xf0]  ;;  %v15010_v12 = vld [vmem:[%s23801_s3 + $0x4c] sm:$0xf] }
 0x313   :  { %v12994_v36 = vor.u32 %v15398_v28, %v12993_v50  ;;  %v12257_v55 = vld [vmem:[%s23801_s3 + $0x688] sm:$0xf]  ;;  %6843 = vmatpush.bf16.msra.mxu3 %v12290_v45  ;;  %v11462_v31 = vor.u32 %v15010_v12, %v11459_v43  ;;  %v15066_v47 = vld [vmem:[%s23801_s3 + $0x20c] sm:$0xf] }
 0x314   :  { %6906 = vmatpush.bf16.msra.mxu0 %v11590_v24  ;;  %6883 = vmatpush.bf16.msrb.mxu2 %v13026_v32  ;;  %v15214_v57 = vld [vmem:[%s23801_s3 + $0x6a4] sm:$0xf0]  ;;  %v6668_v24 = vpop.f32.mrf.mxu1  ;;  %v15002_v32 = vld [vmem:[%s23801_s3 + $0xc] sm:$0xf] }
 0x315   :  { %v12961_v25 = vld [vmem:[%s23801_s3 + $0xc08] sm:$0xf]  ;;  %v12258_v7 = vor.u32 %v15214_v57, %v12257_v55  ;;  %v11683_v50 = vld [vmem:[%s23801_s3 + $0x228] sm:$0xf0]  ;;  %v11430_v3 = vor.u32 %v15002_v32, %v11427_v61 }
 0x316   :  { %6919 = vmatpush.bf16.msra.mxu1 %v11846_v26  ;;  %v15390_v59 = vld [vmem:[%s23801_s3 + $0xc24] sm:$0xf0]  ;;  %v12675_v4 = vld [vmem:[%s23801_s3 + $0x9e8] sm:$0xf0]  ;;  %v11686_v57 = vor.u32 %v15066_v47, %v11683_v50 }
 0x317   :  { %v12962_v10 = vor.u32 %v15390_v59, %v12961_v25  ;;  %v12225_v56 = vld [vmem:[%s23801_s3 + $0x648] sm:$0xf]  ;;  %6844 = vmatpush.bf16.msra.mxu3 %v12258_v7  ;;  %v15378_v52 = vld [vmem:[%s23801_s3 + $0xbcc] sm:$0xf] }
 0x318   :  { %6907 = vmatpush.bf16.msra.mxu0 %v11558_v15  ;;  %6884 = vmatpush.bf16.msrb.mxu2 %v12994_v36  ;;  %v15206_v60 = vld [vmem:[%s23801_s3 + $0x664] sm:$0xf0]  ;;  %v12102_v15 = vor.u32 %v15170_v29, %v12099_v27  ;;  %v12931_v45 = vld [vmem:[%s23801_s3 + $0xbe8] sm:$0xf0]  ;;  %v4017_v27 = vperm.slane %v19685_v39, 1 }
 0x319   :  { %v12226_v42 = vor.u32 %v15206_v60, %v12225_v56  ;;  %v12193_v63 = vld [vmem:[%s23801_s3 + $0x608] sm:$0xf]  ;;  %v15162_v55 = vld [vmem:[%s23801_s3 + $0x50c] sm:$0xf]  ;;  %v12934_v59 = vor.u32 %v15378_v52, %v12931_v45 }
 0x31a   :  { %6920 = vmatpush.bf16.msra.mxu1 %v11814_v51  ;;  %v15198_v22 = vld [vmem:[%s23801_s3 + $0x624] sm:$0xf0]  ;;  %v15314_v51 = vld [vmem:[%s23801_s3 + $0x9cc] sm:$0xf] }
 0x31b   :  { %v13441_v23 = vld [vmem:[%s23801_s3 + $0xfc8] sm:$0xf]  ;;  %6845 = vmatpush.bf16.msra.mxu3 %v12226_v42  ;;  %v12194_v46 = vor.u32 %v15198_v22, %v12193_v63  ;;  %v12067_v33 = vld [vmem:[%s23801_s3 + $0x528] sm:$0xf0]  ;;  %v12678_v25 = vor.u32 %v15314_v51, %v12675_v4 }
 0x31c   :  { %6908 = vmatpush.bf16.msra.mxu0 %v11526_v1  ;;  %6885 = vmatpush.bf16.msrb.mxu2 %v12962_v10  ;;  %v15510_v26 = vld [vmem:[%s23801_s3 + $0xfe4] sm:$0xf0]  ;;  %v15306_v53 = vld [vmem:[%s23801_s3 + $0x98c] sm:$0xf]  ;;  %v12070_v1 = vor.u32 %v15162_v55, %v12067_v33 }
 0x31d   :  { %v13442_v28 = vor.u32 %v15510_v26, %v13441_v23  ;;  %v13409_v36 = vld [vmem:[%s23801_s3 + $0xf88] sm:$0xf]  ;;  %v12643_v48 = vld [vmem:[%s23801_s3 + $0x9a8] sm:$0xf0] }
 0x31e   :  { %6921 = vmatpush.bf16.msra.mxu1 %v11782_v58  ;;  %v15502_v37 = vld [vmem:[%s23801_s3 + $0xfa4] sm:$0xf0]  ;;  %v15370_v0 = vld [vmem:[%s23801_s3 + $0xb8c] sm:$0xf]  ;;  %v12646_v6 = vor.u32 %v15306_v53, %v12643_v48 }
 0x31f   :  { %6886 = vmatmul.bf16.vlgmr.msrb.gmra.mxu2 %v19396_v49  ;;  %6846 = vmatpush.bf16.msra.mxu3 %v12194_v46  ;;  %v13410_v16 = vor.u32 %v15502_v37, %v13409_v36  ;;  %v12899_v58 = vld [vmem:[%s23801_s3 + $0xba8] sm:$0xf0]  ;;  %v13377_v7 = vld [vmem:[%s23801_s3 + $0xf48] sm:$0xf] }
 0x320   :  { %6930 = vmatpush.bf16.msra.mxu2 %v12166_v54  ;;  %6909 = vmatpush.bf16.msra.mxu0 %v11494_v44  ;;  %v15494_v10 = vld [vmem:[%s23801_s3 + $0xf64] sm:$0xf0]  ;;  %v15154_v40 = vld [vmem:[%s23801_s3 + $0x4cc] sm:$0xf]  ;;  %v12902_v54 = vor.u32 %v15370_v0, %v12899_v58 }
 0x321   :  { %v12035_v30 = vld [vmem:[%s23801_s3 + $0x4e8] sm:$0xf0]  ;;  %v13378_v2 = vor.u32 %v15494_v10, %v13377_v7  ;;  %v13345_v12 = vld [vmem:[%s23801_s3 + $0xf08] sm:$0xf] }
 0x322   :  { %6922 = vmatpush.bf16.msra.mxu1 %v11750_v13  ;;  %6847 = vmatmul.bf16.vlgmr.msra.gmra.mxu3 %v18945_v21  ;;  %v15298_v56 = vld [vmem:[%s23801_s3 + $0x94c] sm:$0xf]  ;;  %v12038_v19 = vor.u32 %v15154_v40, %v12035_v30  ;;  %v15486_v13 = vld [vmem:[%s23801_s3 + $0xf24] sm:$0xf0] }
 0x323   :  { %6891 = vmatpush.bf16.msrb.mxu3 %v13442_v28  ;;  %v12611_v60 = vld [vmem:[%s23801_s3 + $0x968] sm:$0xf0]  ;;  %v13346_v34 = vor.u32 %v15486_v13, %v13345_v12  ;;  %v13313_v26 = vld [vmem:[%s23801_s3 + $0xec8] sm:$0xf]  ;;  %v6705_v28 = vpop.f32.mrf.mxu0  ;;  %v6718_v36 = vpop.f32.mrf.mxu1 }
 0x324   :  { %6931 = vmatpush.bf16.msra.mxu2 %v12134_v20  ;;  %6910 = vmatpush.bf16.msra.mxu0 %v11462_v31  ;;  %v15362_v11 = vld [vmem:[%s23801_s3 + $0xb4c] sm:$0xf]  ;;  %v12614_v17 = vor.u32 %v15298_v56, %v12611_v60  ;;  %v15478_v29 = vld [vmem:[%s23801_s3 + $0xee4] sm:$0xf0]  ;;  %v6706_v45 = vadd.f32 %v6705_v28, %v4017_v27 }
 0x325   :  { %v12867_v44 = vld [vmem:[%s23801_s3 + $0xb68] sm:$0xf0]  ;;  %v13314_v61 = vor.u32 %v15478_v29, %v13313_v26  ;;  %v13281_v4 = vld [vmem:[%s23801_s3 + $0xe88] sm:$0xf] }
 0x326   :  { %6923 = vmatpush.bf16.msra.mxu1 %v11718_v41  ;;  %v15146_v42 = vld [vmem:[%s23801_s3 + $0x48c] sm:$0xf]  ;;  %v12870_v18 = vor.u32 %v15362_v11, %v12867_v44  ;;  %v15470_v52 = vld [vmem:[%s23801_s3 + $0xea4] sm:$0xf0] }
 0x327   :  { %6892 = vmatpush.bf16.msrb.mxu3 %v13410_v16  ;;  %v12003_v43 = vld [vmem:[%s23801_s3 + $0x4a8] sm:$0xf0]  ;;  %v13282_v16 = vor.u32 %v15470_v52, %v13281_v4  ;;  %v13249_v10 = vld [vmem:[%s23801_s3 + $0xe48] sm:$0xf] }
 0x328   :  { %6932 = vmatpush.bf16.msra.mxu2 %v12102_v15  ;;  %6911 = vmatpush.bf16.msra.mxu0 %v11430_v3  ;;  %v15290_v20 = vld [vmem:[%s23801_s3 + $0x90c] sm:$0xf]  ;;  %v12006_v23 = vor.u32 %v15146_v42, %v12003_v43  ;;  %v15462_v40 = vld [vmem:[%s23801_s3 + $0xe64] sm:$0xf0] }
 0x329   :  { %v12579_v63 = vld [vmem:[%s23801_s3 + $0x928] sm:$0xf0]  ;;  %v13217_v43 = vld [vmem:[%s23801_s3 + $0xe08] sm:$0xf] }
 0x32a   :  { %6924 = vmatpush.bf16.msra.mxu1 %v11686_v57  ;;  %v15354_v22 = vld [vmem:[%s23801_s3 + $0xb0c] sm:$0xf]  ;;  %v12582_v41 = vor.u32 %v15290_v20, %v12579_v63 }
 0x32b   :  { %6912 = vmatmul.bf16.vlgmr.msra.gmra.mxu0 %v18932_v14  ;;  %6893 = vmatpush.bf16.msrb.mxu3 %v13378_v2  ;;  %v12835_v24 = vld [vmem:[%s23801_s3 + $0xb28] sm:$0xf0]  ;;  %v6707_v11 = vpop.f32.mrf.mxu0  ;;  %v6720_v13 = vpop.f32.mrf.mxu1 }
 0x32c   :  { %6956 = vmatpush.bf16.msrb.mxu0 %v12678_v25  ;;  %6933 = vmatpush.bf16.msra.mxu2 %v12070_v1  ;;  %v15138_v31 = vld [vmem:[%s23801_s3 + $0x44c] sm:$0xf]  ;;  %v12838_v46 = vor.u32 %v15354_v22, %v12835_v24  ;;  %v20148_v25 = vadd.f32 %v6718_v36, %v6706_v45  ;;  %v11561_v13 = vld [vmem:[%s23801_s3 + $0x110] sm:$0xf] }
 0x32d   :  { %6925 = vmatmul.bf16.vlgmr.msra.gmra.mxu1 %v18934_v35  ;;  %v11971_v32 = vld [vmem:[%s23801_s3 + $0x468] sm:$0xf0] }
 0x32e   :  { %6969 = vmatpush.bf16.msrb.mxu1 %v12934_v59  ;;  %v15282_v47 = vld [vmem:[%s23801_s3 + $0x8cc] sm:$0xf]  ;;  %v11974_v15 = vor.u32 %v15138_v31, %v11971_v32  ;;  %v11657_v32 = vld [vmem:[%s23801_s3 + $0x1d0] sm:$0xf] }
 0x32f   :  { %6894 = vmatpush.bf16.msrb.mxu3 %v13346_v34  ;;  %v12547_v39 = vld [vmem:[%s23801_s3 + $0x8e8] sm:$0xf0] }
 0x330   :  { %6957 = vmatpush.bf16.msrb.mxu0 %v12646_v6  ;;  %6934 = vmatpush.bf16.msra.mxu2 %v12038_v19  ;;  %v15346_v50 = vld [vmem:[%s23801_s3 + $0xacc] sm:$0xf]  ;;  %v12550_v55 = vor.u32 %v15282_v47, %v12547_v39  ;;  %v13250_v19 = vor.u32 %v15462_v40, %v13249_v10  ;;  %v11913_v47 = vld [vmem:[%s23801_s3 + $0x3d0] sm:$0xf] }
 0x331   :  { %v12803_v51 = vld [vmem:[%s23801_s3 + $0xae8] sm:$0xf0]  ;;  %v15127_v39 = vld [vmem:[%s23801_s3 + $0x3ec] sm:$0xf0] }
 0x332   :  { %6970 = vmatpush.bf16.msrb.mxu1 %v12902_v54  ;;  %v15130_v37 = vld [vmem:[%s23801_s3 + $0x40c] sm:$0xf]  ;;  %v12806_v59 = vor.u32 %v15346_v50, %v12803_v51  ;;  %v11914_v36 = vor.u32 %v15127_v39, %v11913_v47  ;;  %v11593_v10 = vld [vmem:[%s23801_s3 + $0x150] sm:$0xf] }
 0x333   :  { %v11939_v3 = vld [vmem:[%s23801_s3 + $0x428] sm:$0xf0]  ;;  %6895 = vmatpush.bf16.msrb.mxu3 %v13314_v61  ;;  %v15047_v40 = vld [vmem:[%s23801_s3 + $0x16c] sm:$0xf0] }
 0x334   :  { %6958 = vmatpush.bf16.msrb.mxu0 %v12614_v17  ;;  %6935 = vmatpush.bf16.msra.mxu2 %v12006_v23  ;;  %v15442_v33 = vld [vmem:[%s23801_s3 + $0xdcc] sm:$0xf]  ;;  %v11942_v0 = vor.u32 %v15130_v37, %v11939_v3  ;;  %v15454_v17 = vld [vmem:[%s23801_s3 + $0xe24] sm:$0xf0]  ;;  %v11625_v37 = vld [vmem:[%s23801_s3 + $0x190] sm:$0xf] }
 0x335   :  { %v13187_v57 = vld [vmem:[%s23801_s3 + $0xde8] sm:$0xf0]  ;;  %v13218_v27 = vor.u32 %v15454_v17, %v13217_v43  ;;  %v15055_v3 = vld [vmem:[%s23801_s3 + $0x1ac] sm:$0xf0] }
 0x336   :  { %6971 = vmatpush.bf16.msrb.mxu1 %v12870_v18  ;;  %v15274_v53 = vld [vmem:[%s23801_s3 + $0x88c] sm:$0xf]  ;;  %v13190_v7 = vor.u32 %v15442_v33, %v13187_v57  ;;  %v11881_v57 = vld [vmem:[%s23801_s3 + $0x390] sm:$0xf] }
 0x337   :  { %v12515_v48 = vld [vmem:[%s23801_s3 + $0x8a8] sm:$0xf0]  ;;  %6896 = vmatpush.bf16.msrb.mxu3 %v13282_v16  ;;  %v15095_v47 = vld [vmem:[%s23801_s3 + $0x2ec] sm:$0xf0] }
 0x338   :  { %6959 = vmatpush.bf16.msrb.mxu0 %v12582_v41  ;;  %6936 = vmatpush.bf16.msra.mxu2 %v11974_v15  ;;  %v15338_v1 = vld [vmem:[%s23801_s3 + $0xa8c] sm:$0xf]  ;;  %v12518_v30 = vor.u32 %v15274_v53, %v12515_v48  ;;  %v15063_v41 = vld [vmem:[%s23801_s3 + $0x1ec] sm:$0xf0] }
 0x339   :  { %v12771_v58 = vld [vmem:[%s23801_s3 + $0xaa8] sm:$0xf0]  ;;  %v11658_v45 = vor.u32 %v15063_v41, %v11657_v32 }
 0x33a   :  { %6972 = vmatpush.bf16.msrb.mxu1 %v12838_v46  ;;  %v15434_v6 = vld [vmem:[%s23801_s3 + $0xd8c] sm:$0xf]  ;;  %v12774_v2 = vor.u32 %v15338_v1, %v12771_v58  ;;  %v6679_v1 = vpop.f32.mrf.mxu2  ;;  %v11626_v58 = vor.u32 %v15055_v3, %v11625_v37 }
 0x33b   :  { %v13155_v54 = vld [vmem:[%s23801_s3 + $0xda8] sm:$0xf0]  ;;  %6897 = vmatpush.bf16.msrb.mxu3 %v13250_v19 }
 0x33c   :  { %6960 = vmatpush.bf16.msrb.mxu0 %v12550_v55  ;;  %v15266_v56 = vld [vmem:[%s23801_s3 + $0x84c] sm:$0xf]  ;;  %6937 = vmatpush.bf16.msra.mxu2 %v11942_v0  ;;  %v13158_v42 = vor.u32 %v15434_v6, %v13155_v54 }
 0x33d   :  { %v12483_v60 = vld [vmem:[%s23801_s3 + $0x868] sm:$0xf0] }
 0x33e   :  { %6973 = vmatpush.bf16.msrb.mxu1 %v12806_v59  ;;  %v15330_v44 = vld [vmem:[%s23801_s3 + $0xa4c] sm:$0xf]  ;;  %v12486_v34 = vor.u32 %v15266_v56, %v12483_v60  ;;  %v15119_v59 = vld [vmem:[%s23801_s3 + $0x3ac] sm:$0xf0] }
 0x33f   :  { %v12739_v12 = vld [vmem:[%s23801_s3 + $0xa68] sm:$0xf0]  ;;  %6938 = vmatmul.bf16.vlgmr.msra.gmra.mxu2 %v18936_v62  ;;  %6898 = vmatpush.bf16.msrb.mxu3 %v13218_v27  ;;  %v15111_v56 = vld [vmem:[%s23801_s3 + $0x36c] sm:$0xf0] }
 0x340   :  { %6982 = vmatpush.bf16.msrb.mxu2 %v13190_v7  ;;  %v15250_v18 = vld [vmem:[%s23801_s3 + $0x7cc] sm:$0xf]  ;;  %6961 = vmatpush.bf16.msrb.mxu0 %v12518_v30  ;;  %v12742_v23 = vor.u32 %v15330_v44, %v12739_v12  ;;  %v11882_v7 = vor.u32 %v15119_v59, %v11881_v57  ;;  %v20273_v30 = vadd.f32 %v6679_v1, %v19949_v38  ;;  %v11529_v27 = vld [vmem:[%s23801_s3 + $0xd0] sm:$0xf] }
 0x341   :  { %v12419_v20 = vld [vmem:[%s23801_s3 + $0x7e8] sm:$0xf0]  ;;  %v11594_v44 = vor.u32 %v15047_v40, %v11593_v10  ;;  %v11753_v57 = vld [vmem:[%s23801_s3 + $0x290] sm:$0xf] }
 0x342   :  { %v15426_v63 = vld [vmem:[%s23801_s3 + $0xd4c] sm:$0xf]  ;;  %6974 = vmatpush.bf16.msrb.mxu1 %v12774_v2  ;;  %v12422_v46 = vor.u32 %v15250_v18, %v12419_v20  ;;  %6899 = vmatmul.bf16.vlgmr.msrb.gmra.mxu3 %v19630_v8  ;;  %v11849_v2 = vld [vmem:[%s23801_s3 + $0x350] sm:$0xf] }
 0x343   :  { %v13123_v22 = vld [vmem:[%s23801_s3 + $0xd68] sm:$0xf0]  ;;  %v11850_v12 = vor.u32 %v15111_v56, %v11849_v2  ;;  %v11817_v18 = vld [vmem:[%s23801_s3 + $0x310] sm:$0xf] }
 0x344   :  { %v15258_v24 = vld [vmem:[%s23801_s3 + $0x80c] sm:$0xf]  ;;  %6983 = vmatpush.bf16.msrb.mxu2 %v13158_v42  ;;  %v13126_v61 = vor.u32 %v15426_v63, %v13123_v22  ;;  %6962 = vmatpush.bf16.msrb.mxu0 %v12486_v34  ;;  %v15039_v42 = vld [vmem:[%s23801_s3 + $0x12c] sm:$0xf0] }
 0x345   :  { %v12451_v26 = vld [vmem:[%s23801_s3 + $0x828] sm:$0xf0]  ;;  %6943 = vmatpush.bf16.msra.mxu3 %v12422_v46  ;;  %v15103_v34 = vld [vmem:[%s23801_s3 + $0x32c] sm:$0xf0] }
 0x346   :  { %v15322_v29 = vld [vmem:[%s23801_s3 + $0xa0c] sm:$0xf]  ;;  %v12454_v28 = vor.u32 %v15258_v24, %v12451_v26  ;;  %6975 = vmatpush.bf16.msrb.mxu1 %v12742_v23  ;;  %v6681_v24 = vpop.f32.mrf.mxu2  ;;  %v11562_v26 = vor.u32 %v15039_v42, %v11561_v13  ;;  %v15183_v1 = vld [vmem:[%s23801_s3 + $0x5ac] sm:$0xf0] }
 0x347   :  { %v12707_v31 = vld [vmem:[%s23801_s3 + $0xa28] sm:$0xf0]  ;;  %v11465_v10 = vld [vmem:[%s23801_s3 + $0x50] sm:$0xf] }
 0x348   :  { %v15242_v50 = vld [vmem:[%s23801_s3 + $0x78c] sm:$0xf]  ;;  %v12710_v52 = vor.u32 %v15322_v29, %v12707_v31  ;;  %6984 = vmatpush.bf16.msrb.mxu2 %v13126_v61  ;;  %6963 = vmatpush.bf16.msrb.mxu0 %v12454_v28  ;;  %v11818_v29 = vor.u32 %v15103_v34, %v11817_v18  ;;  %v15031_v31 = vld [vmem:[%s23801_s3 + $0xec] sm:$0xf0]  ;;  %v20325_v32 = vpop.f32.mrf.mxu0 }
 0x349   :  { %v12387_v15 = vld [vmem:[%s23801_s3 + $0x7a8] sm:$0xf0]  ;;  %v11785_v61 = vld [vmem:[%s23801_s3 + $0x2d0] sm:$0xf] }
 0x34a   :  { %v15418_v51 = vld [vmem:[%s23801_s3 + $0xd0c] sm:$0xf]  ;;  %v12390_v55 = vor.u32 %v15242_v50, %v12387_v15  ;;  %6976 = vmatpush.bf16.msrb.mxu1 %v12710_v52  ;;  %v20336_v50 = vpop.f32.mrf.mxu1  ;;  %v15191_v52 = vld [vmem:[%s23801_s3 + $0x5ec] sm:$0xf0] }
 0x34b   :  { %v13091_v4 = vld [vmem:[%s23801_s3 + $0xd28] sm:$0xf0]  ;;  %6964 = vmatmul.bf16.vlgmr.msrb.gmra.mxu0 %v19113_v9  ;;  %v15015_v56 = vld [vmem:[%s23801_s3 + $0x6c] sm:$0xf0] }
 0x34c   :  { %v13094_v33 = vor.u32 %v15418_v51, %v13091_v4  ;;  %v15234_v16 = vld [vmem:[%s23801_s3 + $0x74c] sm:$0xf]  ;;  %7008 = vmatpush.bf16.msra.mxu0 %v11658_v45  ;;  %6944 = vmatpush.bf16.msra.mxu3 %v12390_v55  ;;  %v12169_v4 = vld [vmem:[%s23801_s3 + $0x5d0] sm:$0xf]  ;;  %v11530_v45 = vor.u32 %v15031_v31, %v11529_v27 }
 0x34d   :  { %v12355_v53 = vld [vmem:[%s23801_s3 + $0x768] sm:$0xf0]  ;;  %6977 = vmatmul.bf16.vlgmr.msrb.gmra.mxu1 %v19124_v5  ;;  %v11497_v55 = vld [vmem:[%s23801_s3 + $0x90] sm:$0xf]  ;;  %v12170_v59 = vor.u32 %v15191_v52, %v12169_v4 }
 0x34e   :  { %v15410_v48 = vld [vmem:[%s23801_s3 + $0xccc] sm:$0xf]  ;;  %7021 = vmatpush.bf16.msra.mxu1 %v11914_v36  ;;  %6985 = vmatpush.bf16.msrb.mxu2 %v13094_v33  ;;  %v12358_v6 = vor.u32 %v15234_v16, %v12355_v53  ;;  %v11786_v36 = vor.u32 %v15095_v47, %v11785_v61  ;;  %v15023_v33 = vld [vmem:[%s23801_s3 + $0xac] sm:$0xf0] }
 0x34f   :  { %v13059_v0 = vld [vmem:[%s23801_s3 + $0xce8] sm:$0xf0]  ;;  %v15087_v16 = vld [vmem:[%s23801_s3 + $0x2ac] sm:$0xf0] }
 0x350   :  { %v13062_v54 = vor.u32 %v15410_v48, %v13059_v0  ;;  %v15226_v60 = vld [vmem:[%s23801_s3 + $0x70c] sm:$0xf]  ;;  %7009 = vmatpush.bf16.msra.mxu0 %v11626_v58  ;;  %6945 = vmatpush.bf16.msra.mxu3 %v12358_v6  ;;  %v12137_v0 = vld [vmem:[%s23801_s3 + $0x590] sm:$0xf]  ;;  %v6731_v58 = vpop.f32.mrf.mxu2  ;;  %v6759_v40 = vpop.f32.mrf.mxu0 }
 0x351   :  { %v12323_v38 = vld [vmem:[%s23801_s3 + $0x728] sm:$0xf0]  ;;  %v20381_v6 = vadd.f32 %v6731_v58, %v20148_v25  ;;  %v12105_v42 = vld [vmem:[%s23801_s3 + $0x550] sm:$0xf] }
 0x352   :  { %v15402_v11 = vld [vmem:[%s23801_s3 + $0xc8c] sm:$0xf]  ;;  %7022 = vmatpush.bf16.msra.mxu1 %v11882_v7  ;;  %6986 = vmatpush.bf16.msrb.mxu2 %v13062_v54  ;;  %v12326_v43 = vor.u32 %v15226_v60, %v12323_v38  ;;  %v11498_v7 = vor.u32 %v15023_v33, %v11497_v55  ;;  %v11754_v54 = vor.u32 %v15087_v16, %v11753_v57  ;;  %v11721_v60 = vld [vmem:[%s23801_s3 + $0x250] sm:$0xf] }
 0x353   :  { %v13027_v19 = vld [vmem:[%s23801_s3 + $0xca8] sm:$0xf0]  ;;  %v15079_v38 = vld [vmem:[%s23801_s3 + $0x26c] sm:$0xf0] }
 0x354   :  { %v13030_v17 = vor.u32 %v15402_v11, %v13027_v19  ;;  %v15218_v20 = vld [vmem:[%s23801_s3 + $0x6cc] sm:$0xf]  ;;  %7010 = vmatpush.bf16.msra.mxu0 %v11594_v44  ;;  %6946 = vmatpush.bf16.msra.mxu3 %v12326_v43  ;;  %v6772_v11 = vpop.f32.mrf.mxu1  ;;  %v12138_v19 = vor.u32 %v15183_v1, %v12137_v0  ;;  %v15175_v43 = vld [vmem:[%s23801_s3 + $0x56c] sm:$0xf0]  ;;  %v11722_v34 = vor.u32 %v15079_v38, %v11721_v60 }
 0x355   :  { %v12291_v63 = vld [vmem:[%s23801_s3 + $0x6e8] sm:$0xf0]  ;;  %v11433_v18 = vld [vmem:[%s23801_s3 + $0x10] sm:$0xf] }
 0x356   :  { %v15394_v22 = vld [vmem:[%s23801_s3 + $0xc4c] sm:$0xf]  ;;  %7023 = vmatpush.bf16.msra.mxu1 %v11850_v12  ;;  %6987 = vmatpush.bf16.msrb.mxu2 %v13030_v17  ;;  %v12294_v41 = vor.u32 %v15218_v20, %v12291_v63  ;;  %v11466_v17 = vor.u32 %v15015_v56, %v11465_v10  ;;  %v15007_v63 = vld [vmem:[%s23801_s3 + $0x2c] sm:$0xf0] }
 0x357   :  { %v12995_v23 = vld [vmem:[%s23801_s3 + $0xc68] sm:$0xf0]  ;;  %v15319_v27 = vld [vmem:[%s23801_s3 + $0x9ec] sm:$0xf0] }
 0x358   :  { %v12998_v46 = vor.u32 %v15394_v22, %v12995_v23  ;;  %v15210_v39 = vld [vmem:[%s23801_s3 + $0x68c] sm:$0xf]  ;;  %7011 = vmatpush.bf16.msra.mxu0 %v11562_v26  ;;  %6947 = vmatpush.bf16.msra.mxu3 %v12294_v41  ;;  %v11689_v22 = vld [vmem:[%s23801_s3 + $0x210] sm:$0xf]  ;;  %v12106_v26 = vor.u32 %v15175_v43, %v12105_v42  ;;  %v6733_v47 = vpop.f32.mrf.mxu2 }
 0x359   :  { %v12259_v28 = vld [vmem:[%s23801_s3 + $0x6a8] sm:$0xf0]  ;;  %v15071_v23 = vld [vmem:[%s23801_s3 + $0x22c] sm:$0xf0] }
 0x35a   :  { %v15386_v15 = vld [vmem:[%s23801_s3 + $0xc0c] sm:$0xf]  ;;  %7024 = vmatpush.bf16.msra.mxu1 %v11818_v29  ;;  %6988 = vmatpush.bf16.msrb.mxu2 %v12998_v46  ;;  %v12262_v37 = vor.u32 %v15210_v39, %v12259_v28  ;;  %v12681_v29 = vld [vmem:[%s23801_s3 + $0x9d0] sm:$0xf]  ;;  %v11434_v39 = vor.u32 %v15007_v63, %v11433_v18 }
 0x35b   :  { %v12963_v51 = vld [vmem:[%s23801_s3 + $0xc28] sm:$0xf0]  ;;  %v12937_v31 = vld [vmem:[%s23801_s3 + $0xbd0] sm:$0xf]  ;;  %v12682_v4 = vor.u32 %v15319_v27, %v12681_v29 }
 0x35c   :  { %v12966_v3 = vor.u32 %v15386_v15, %v12963_v51  ;;  %v15202_v53 = vld [vmem:[%s23801_s3 + $0x64c] sm:$0xf]  ;;  %7012 = vmatpush.bf16.msra.mxu0 %v11530_v45  ;;  %6948 = vmatpush.bf16.msra.mxu3 %v12262_v37  ;;  %v15383_v41 = vld [vmem:[%s23801_s3 + $0xbec] sm:$0xf0]  ;;  %v11690_v51 = vor.u32 %v15071_v23, %v11689_v22 }
 0x35d   :  { %v12227_v48 = vld [vmem:[%s23801_s3 + $0x668] sm:$0xf0]  ;;  %v12073_v28 = vld [vmem:[%s23801_s3 + $0x510] sm:$0xf]  ;;  %v12938_v52 = vor.u32 %v15383_v41, %v12937_v31 }
 0x35e   :  { %7025 = vmatpush.bf16.msra.mxu1 %v11786_v36  ;;  %6989 = vmatpush.bf16.msrb.mxu2 %v12966_v3  ;;  %v12230_v2 = vor.u32 %v15202_v53, %v12227_v48  ;;  %v15194_v25 = vld [vmem:[%s23801_s3 + $0x60c] sm:$0xf]  ;;  %v15167_v15 = vld [vmem:[%s23801_s3 + $0x52c] sm:$0xf0] }
 0x35f   :  { %v12195_v44 = vld [vmem:[%s23801_s3 + $0x628] sm:$0xf0]  ;;  %v12649_v36 = vld [vmem:[%s23801_s3 + $0x990] sm:$0xf]  ;;  %v12074_v55 = vor.u32 %v15167_v15, %v12073_v28 }
 0x360   :  { %v15506_v12 = vld [vmem:[%s23801_s3 + $0xfcc] sm:$0xf]  ;;  %7013 = vmatpush.bf16.msra.mxu0 %v11498_v7  ;;  %6949 = vmatpush.bf16.msra.mxu3 %v12230_v2  ;;  %v12198_v20 = vor.u32 %v15194_v25, %v12195_v44  ;;  %v15311_v37 = vld [vmem:[%s23801_s3 + $0x9ac] sm:$0xf0]  ;;  %v20503_v25 = vld [vmem:[%s23802_s4] sm:$0xff] }
 0x361   :  { %v13443_v13 = vld [vmem:[%s23801_s3 + $0xfe8] sm:$0xf0]  ;;  %6990 = vmatmul.bf16.vlgmr.msrb.gmra.mxu2 %v19396_v49  ;;  %v12905_v3 = vld [vmem:[%s23801_s3 + $0xb90] sm:$0xf]  ;;  %v12650_v48 = vor.u32 %v15311_v37, %v12649_v36  ;;  %v4018_v44 = vperm.slane %v20503_v25, 2 }
 0x362   :  { %7034 = vmatpush.bf16.msra.mxu2 %v12170_v59  ;;  %7026 = vmatpush.bf16.msra.mxu1 %v11754_v54  ;;  %v13446_v24 = vor.u32 %v15506_v12, %v13443_v13  ;;  %v15498_v46 = vld [vmem:[%s23801_s3 + $0xf8c] sm:$0xf]  ;;  %v15375_v33 = vld [vmem:[%s23801_s3 + $0xbac] sm:$0xf0]  ;;  %v20498_v11 = vpop.f32.mrf.mxu2 }
 0x363   :  { %v13411_v61 = vld [vmem:[%s23801_s3 + $0xfa8] sm:$0xf0]  ;;  %v12041_v16 = vld [vmem:[%s23801_s3 + $0x4d0] sm:$0xf]  ;;  %v12906_v0 = vor.u32 %v15375_v33, %v12905_v3 }
 0x364   :  { %7014 = vmatpush.bf16.msra.mxu0 %v11466_v17  ;;  %6950 = vmatpush.bf16.msra.mxu3 %v12198_v20  ;;  %v13414_v45 = vor.u32 %v15498_v46, %v13411_v61  ;;  %v15490_v57 = vld [vmem:[%s23801_s3 + $0xf4c] sm:$0xf]  ;;  %v15159_v53 = vld [vmem:[%s23801_s3 + $0x4ec] sm:$0xf0] }
 0x365   :  { %v13379_v59 = vld [vmem:[%s23801_s3 + $0xf68] sm:$0xf0]  ;;  %v12617_v58 = vld [vmem:[%s23801_s3 + $0x950] sm:$0xf]  ;;  %v12042_v40 = vor.u32 %v15159_v53, %v12041_v16 }
 0x366   :  { %7035 = vmatpush.bf16.msra.mxu2 %v12138_v19  ;;  %7027 = vmatpush.bf16.msra.mxu1 %v11722_v34  ;;  %v13382_v1 = vor.u32 %v15490_v57, %v13379_v59  ;;  %v15303_v7 = vld [vmem:[%s23801_s3 + $0x96c] sm:$0xf0]  ;;  %v15482_v2 = vld [vmem:[%s23801_s3 + $0xf0c] sm:$0xf] }
 0x367   :  { %6951 = vmatmul.bf16.vlgmr.msra.gmra.mxu3 %v18945_v21  ;;  %v12873_v10 = vld [vmem:[%s23801_s3 + $0xb50] sm:$0xf]  ;;  %v13347_v56 = vld [vmem:[%s23801_s3 + $0xf28] sm:$0xf0]  ;;  %v12618_v19 = vor.u32 %v15303_v7, %v12617_v58 }
 0x368   :  { %6995 = vmatpush.bf16.msrb.mxu3 %v13446_v24  ;;  %7015 = vmatpush.bf16.msra.mxu0 %v11434_v39  ;;  %v15367_v54 = vld [vmem:[%s23801_s3 + $0xb6c] sm:$0xf0]  ;;  %v13350_v13 = vor.u32 %v15482_v2, %v13347_v56  ;;  %v15474_v20 = vld [vmem:[%s23801_s3 + $0xecc] sm:$0xf]  ;;  %v6692_v39 = vpop.f32.mrf.mxu3 }
 0x369   :  { %v12009_v60 = vld [vmem:[%s23801_s3 + $0x490] sm:$0xf]  ;;  %v12874_v12 = vor.u32 %v15367_v54, %v12873_v10  ;;  %v13315_v63 = vld [vmem:[%s23801_s3 + $0xee8] sm:$0xf0] }
 0x36a   :  { %7036 = vmatpush.bf16.msra.mxu2 %v12106_v26  ;;  %7028 = vmatpush.bf16.msra.mxu1 %v11690_v51  ;;  %v15151_v38 = vld [vmem:[%s23801_s3 + $0x4ac] sm:$0xf0]  ;;  %v6809_v26 = vpop.f32.mrf.mxu0  ;;  %v13318_v27 = vor.u32 %v15474_v20, %v13315_v63  ;;  %v6822_v47 = vpop.f32.mrf.mxu1  ;;  %v15466_v51 = vld [vmem:[%s23801_s3 + $0xe8c] sm:$0xf] }
 0x36b   :  { %7016 = vmatmul.bf16.vlgmr.msra.gmra.mxu0 %v18932_v14  ;;  %v12585_v42 = vld [vmem:[%s23801_s3 + $0x910] sm:$0xf]  ;;  %v12010_v18 = vor.u32 %v15151_v38, %v12009_v60  ;;  %v6810_v61 = vadd.f32 %v6809_v26, %v4018_v44  ;;  %v6785_v3 = vpop.f32.mrf.mxu2  ;;  %v15458_v7 = vld [vmem:[%s23801_s3 + $0xe4c] sm:$0xf] }
 0x36c   :  { %7060 = vmatpush.bf16.msrb.mxu0 %v12682_v4  ;;  %6996 = vmatpush.bf16.msrb.mxu3 %v13414_v45  ;;  %v15295_v43 = vld [vmem:[%s23801_s3 + $0x92c] sm:$0xf0]  ;;  %v13283_v4 = vld [vmem:[%s23801_s3 + $0xea8] sm:$0xf0] }
 0x36d   :  { %7029 = vmatmul.bf16.vlgmr.msra.gmra.mxu1 %v18934_v35  ;;  %v12841_v17 = vld [vmem:[%s23801_s3 + $0xb10] sm:$0xf]  ;;  %v12586_v24 = vor.u32 %v15295_v43, %v12585_v42  ;;  %v20557_v37 = vadd.f32 %v6822_v47, %v6810_v61  ;;  %v13286_v59 = vor.u32 %v15466_v51, %v13283_v4  ;;  %v13251_v10 = vld [vmem:[%s23801_s3 + $0xe68] sm:$0xf0]  ;;  %v15059_v61 = vld [vmem:[%s23801_s3 + $0x1d4] sm:$0xf] }
 0x36e   :  { %7073 = vmatpush.bf16.msrb.mxu1 %v12938_v52  ;;  %7037 = vmatpush.bf16.msra.mxu2 %v12074_v55  ;;  %v15359_v34 = vld [vmem:[%s23801_s3 + $0xb2c] sm:$0xf0]  ;;  %v20549_v52 = vadd.f32 %v6692_v39, %v20273_v30  ;;  %v11659_v47 = vld [vmem:[%s23801_s3 + $0x1f0] sm:$0xf0] }
 0x36f   :  { %v11977_v22 = vld [vmem:[%s23801_s3 + $0x450] sm:$0xf]  ;;  %v12842_v29 = vor.u32 %v15359_v34, %v12841_v17  ;;  %v13219_v34 = vld [vmem:[%s23801_s3 + $0xe28] sm:$0xf0]  ;;  %v11915_v51 = vld [vmem:[%s23801_s3 + $0x3f0] sm:$0xf0] }
 0x370   :  { %7061 = vmatpush.bf16.msrb.mxu0 %v12650_v48  ;;  %6997 = vmatpush.bf16.msrb.mxu3 %v13382_v1  ;;  %v15143_v23 = vld [vmem:[%s23801_s3 + $0x46c] sm:$0xf0] }
 0x371   :  { %v12553_v31 = vld [vmem:[%s23801_s3 + $0x8d0] sm:$0xf]  ;;  %v11978_v28 = vor.u32 %v15143_v23, %v11977_v22 }
 0x372   :  { %7074 = vmatpush.bf16.msrb.mxu1 %v12906_v0  ;;  %7038 = vmatpush.bf16.msra.mxu2 %v12042_v40  ;;  %v15287_v41 = vld [vmem:[%s23801_s3 + $0x8ec] sm:$0xf0]  ;;  %v6811_v56 = vpop.f32.mrf.mxu0  ;;  %v6824_v44 = vpop.f32.mrf.mxu1 }
 0x373   :  { %v12809_v46 = vld [vmem:[%s23801_s3 + $0xad0] sm:$0xf]  ;;  %v12554_v55 = vor.u32 %v15287_v41, %v12553_v31 }
 0x374   :  { %7062 = vmatpush.bf16.msrb.mxu0 %v12618_v19  ;;  %6998 = vmatpush.bf16.msrb.mxu3 %v13350_v13  ;;  %v15351_v15 = vld [vmem:[%s23801_s3 + $0xaec] sm:$0xf0]  ;;  %v13254_v13 = vor.u32 %v15458_v7, %v13251_v10  ;;  %v11883_v7 = vld [vmem:[%s23801_s3 + $0x3b0] sm:$0xf0] }
 0x375   :  { %v11945_v45 = vld [vmem:[%s23801_s3 + $0x410] sm:$0xf]  ;;  %v12810_v57 = vor.u32 %v15351_v15, %v12809_v46  ;;  %v15123_v15 = vld [vmem:[%s23801_s3 + $0x3d4] sm:$0xf] }
 0x376   :  { %7075 = vmatpush.bf16.msrb.mxu1 %v12874_v12  ;;  %7039 = vmatpush.bf16.msra.mxu2 %v12010_v18  ;;  %v15135_v36 = vld [vmem:[%s23801_s3 + $0x42c] sm:$0xf0]  ;;  %v6694_v12 = vpop.f32.mrf.mxu3  ;;  %v15450_v18 = vld [vmem:[%s23801_s3 + $0xe0c] sm:$0xf] }
 0x377   :  { %v13193_v33 = vld [vmem:[%s23801_s3 + $0xdd0] sm:$0xf]  ;;  %v11946_v48 = vor.u32 %v15135_v36, %v11945_v45  ;;  %v13222_v41 = vor.u32 %v15450_v18, %v13219_v34 }
 0x378   :  { %7063 = vmatpush.bf16.msrb.mxu0 %v12586_v24  ;;  %v15447_v30 = vld [vmem:[%s23801_s3 + $0xdec] sm:$0xf0]  ;;  %6999 = vmatpush.bf16.msrb.mxu3 %v13318_v27 }
 0x379   :  { %v12521_v16 = vld [vmem:[%s23801_s3 + $0x890] sm:$0xf]  ;;  %v13194_v58 = vor.u32 %v15447_v30, %v13193_v33 }
 0x37a   :  { %7076 = vmatpush.bf16.msrb.mxu1 %v12842_v29  ;;  %v15279_v53 = vld [vmem:[%s23801_s3 + $0x8ac] sm:$0xf0]  ;;  %7040 = vmatpush.bf16.msra.mxu2 %v11978_v28 }
 0x37b   :  { %v12777_v0 = vld [vmem:[%s23801_s3 + $0xa90] sm:$0xf]  ;;  %v12522_v40 = vor.u32 %v15279_v53, %v12521_v16  ;;  %v15051_v16 = vld [vmem:[%s23801_s3 + $0x194] sm:$0xf] }
 0x37c   :  { %v15343_v1 = vld [vmem:[%s23801_s3 + $0xaac] sm:$0xf0]  ;;  %7064 = vmatpush.bf16.msrb.mxu0 %v12554_v55  ;;  %7000 = vmatpush.bf16.msrb.mxu3 %v13286_v59  ;;  %v11918_v59 = vor.u32 %v15123_v15, %v11915_v51  ;;  %v11627_v53 = vld [vmem:[%s23801_s3 + $0x1b0] sm:$0xf0] }
 0x37d   :  { %v13161_v54 = vld [vmem:[%s23801_s3 + $0xd90] sm:$0xf]  ;;  %v12778_v60 = vor.u32 %v15343_v1, %v12777_v0  ;;  %v11630_v56 = vor.u32 %v15051_v16, %v11627_v53  ;;  %v15027_v15 = vld [vmem:[%s23801_s3 + $0xd4] sm:$0xf] }
 0x37e   :  { %v15439_v2 = vld [vmem:[%s23801_s3 + $0xdac] sm:$0xf0]  ;;  %7077 = vmatpush.bf16.msrb.mxu1 %v12810_v57  ;;  %7041 = vmatpush.bf16.msra.mxu2 %v11946_v48  ;;  %v6744_v30 = vpop.f32.mrf.mxu3  ;;  %v11662_v57 = vor.u32 %v15059_v61, %v11659_v47  ;;  %v11531_v51 = vld [vmem:[%s23801_s3 + $0xf0] sm:$0xf0] }
 0x37f   :  { %v12489_v38 = vld [vmem:[%s23801_s3 + $0x850] sm:$0xf]  ;;  %v13162_v17 = vor.u32 %v15439_v2, %v13161_v54  ;;  %v6745_v48 = vadd.f32 %v6744_v30, %v20381_v6  ;;  %v15187_v53 = vld [vmem:[%s23801_s3 + $0x5d4] sm:$0xf] }
 0x380   :  { %v15271_v19 = vld [vmem:[%s23801_s3 + $0x86c] sm:$0xf0]  ;;  %7065 = vmatpush.bf16.msrb.mxu0 %v12522_v40  ;;  %7001 = vmatpush.bf16.msrb.mxu3 %v13254_v13  ;;  %v11851_v13 = vld [vmem:[%s23801_s3 + $0x370] sm:$0xf0] }
 0x381   :  { %v12745_v42 = vld [vmem:[%s23801_s3 + $0xa50] sm:$0xf]  ;;  %v12490_v63 = vor.u32 %v15271_v19, %v12489_v38  ;;  %7042 = vmatmul.bf16.vlgmr.msra.gmra.mxu2 %v18936_v62  ;;  %v6758_v2 = vadd.f32 %v20325_v32, %v6745_v48  ;;  %v15043_v38 = vld [vmem:[%s23801_s3 + $0x154] sm:$0xf] }
 0x382   :  { %v15335_v43 = vld [vmem:[%s23801_s3 + $0xa6c] sm:$0xf0]  ;;  %7086 = vmatpush.bf16.msrb.mxu2 %v13194_v58  ;;  %7078 = vmatpush.bf16.msrb.mxu1 %v12778_v60  ;;  %v15115_v58 = vld [vmem:[%s23801_s3 + $0x394] sm:$0xf] }
 0x383   :  { %v12425_v20 = vld [vmem:[%s23801_s3 + $0x7d0] sm:$0xf]  ;;  %v12746_v26 = vor.u32 %v15335_v43, %v12745_v42  ;;  %v11886_v60 = vor.u32 %v15115_v58, %v11883_v7  ;;  %v11595_v19 = vld [vmem:[%s23801_s3 + $0x170] sm:$0xf0]  ;;  %v6771_v43 = vadd.f32 %v20336_v50, %v6758_v2  ;;  %v6835_v50 = vpop.f32.mrf.mxu2  ;;  %v11534_v58 = vor.u32 %v15027_v15, %v11531_v51 }
 0x384   :  { %v15255_v22 = vld [vmem:[%s23801_s3 + $0x7ec] sm:$0xf0]  ;;  %7066 = vmatpush.bf16.msrb.mxu0 %v12490_v63  ;;  %7002 = vmatpush.bf16.msrb.mxu3 %v13222_v41  ;;  %v15107_v32 = vld [vmem:[%s23801_s3 + $0x354] sm:$0xf] }
 0x385   :  { %v13129_v23 = vld [vmem:[%s23801_s3 + $0xd50] sm:$0xf]  ;;  %v12426_v39 = vor.u32 %v15255_v22, %v12425_v20  ;;  %v6784_v20 = vadd.f32 %v20498_v11, %v6771_v43  ;;  %v11598_v22 = vor.u32 %v15043_v38, %v11595_v19  ;;  %v11819_v41 = vld [vmem:[%s23801_s3 + $0x330] sm:$0xf0] }
 0x386   :  { %v15431_v24 = vld [vmem:[%s23801_s3 + $0xd6c] sm:$0xf0]  ;;  %7087 = vmatpush.bf16.msrb.mxu2 %v13162_v17  ;;  %7079 = vmatpush.bf16.msrb.mxu1 %v12746_v26  ;;  %v6746_v63 = vpop.f32.mrf.mxu3  ;;  %v11563_v26 = vld [vmem:[%s23801_s3 + $0x130] sm:$0xf0] }
 0x387   :  { %v12457_v29 = vld [vmem:[%s23801_s3 + $0x810] sm:$0xf]  ;;  %v13130_v28 = vor.u32 %v15431_v24, %v13129_v23  ;;  %7003 = vmatmul.bf16.vlgmr.msrb.gmra.mxu3 %v19630_v8  ;;  %v11854_v23 = vor.u32 %v15107_v32, %v11851_v13  ;;  %v15035_v24 = vld [vmem:[%s23801_s3 + $0x114] sm:$0xf] }
 0x388   :  { %v15263_v27 = vld [vmem:[%s23801_s3 + $0x82c] sm:$0xf0]  ;;  %7047 = vmatpush.bf16.msra.mxu3 %v12426_v39  ;;  %v11566_v39 = vor.u32 %v15035_v24, %v11563_v26  ;;  %v12171_v48 = vld [vmem:[%s23801_s3 + $0x5f0] sm:$0xf0] }
 0x389   :  { %v12713_v31 = vld [vmem:[%s23801_s3 + $0xa10] sm:$0xf]  ;;  %v12458_v45 = vor.u32 %v15263_v27, %v12457_v29  ;;  %v20718_v29 = vadd.f32 %v6835_v50, %v20557_v37  ;;  %v11499_v2 = vld [vmem:[%s23801_s3 + $0xb0] sm:$0xf0] }
 0x38a   :  { %v15327_v46 = vld [vmem:[%s23801_s3 + $0xa2c] sm:$0xf0]  ;;  %7088 = vmatpush.bf16.msrb.mxu2 %v13130_v28  ;;  %v11755_v38 = vld [vmem:[%s23801_s3 + $0x2b0] sm:$0xf0] }
 0x38b   :  { %v12393_v4 = vld [vmem:[%s23801_s3 + $0x790] sm:$0xf]  ;;  %v12714_v33 = vor.u32 %v15327_v46, %v12713_v31  ;;  %7067 = vmatpush.bf16.msrb.mxu0 %v12458_v45  ;;  %v15099_v31 = vld [vmem:[%s23801_s3 + $0x314] sm:$0xf]  ;;  %v20746_v45 = vpop.f32.mrf.mxu1 }
 0x38c   :  { %v15247_v36 = vld [vmem:[%s23801_s3 + $0x7ac] sm:$0xf0]  ;;  %v11822_v28 = vor.u32 %v15099_v31, %v11819_v41  ;;  %v12139_v32 = vld [vmem:[%s23801_s3 + $0x5b0] sm:$0xf0] }
 0x38d   :  { %v13097_v3 = vld [vmem:[%s23801_s3 + $0xd10] sm:$0xf]  ;;  %v12394_v0 = vor.u32 %v15247_v36, %v12393_v4  ;;  %7080 = vmatpush.bf16.msrb.mxu1 %v12714_v33  ;;  %v20744_v4 = vpop.f32.mrf.mxu0  ;;  %v11787_v33 = vld [vmem:[%s23801_s3 + $0x2f0] sm:$0xf0] }
 0x38e   :  { %v15423_v55 = vld [vmem:[%s23801_s3 + $0xd2c] sm:$0xf0]  ;;  %7068 = vmatmul.bf16.vlgmr.msrb.gmra.mxu0 %v19113_v9  ;;  %v15075_v50 = vld [vmem:[%s23801_s3 + $0x254] sm:$0xf] }
 0x38f   :  { %v13098_v1 = vor.u32 %v15423_v55, %v13097_v3  ;;  %v12361_v10 = vld [vmem:[%s23801_s3 + $0x750] sm:$0xf]  ;;  %7112 = vmatpush.bf16.msra.mxu0 %v11662_v57  ;;  %7048 = vmatpush.bf16.msra.mxu3 %v12394_v0  ;;  %v15091_v55 = vld [vmem:[%s23801_s3 + $0x2d4] sm:$0xf]  ;;  %v6837_v0 = vpop.f32.mrf.mxu2 }
 0x390   :  { %v15239_v40 = vld [vmem:[%s23801_s3 + $0x76c] sm:$0xf0]  ;;  %7081 = vmatmul.bf16.vlgmr.msrb.gmra.mxu1 %v19124_v5  ;;  %v11790_v7 = vor.u32 %v15091_v55, %v11787_v33  ;;  %v11723_v63 = vld [vmem:[%s23801_s3 + $0x270] sm:$0xf0] }
 0x391   :  { %v13065_v6 = vld [vmem:[%s23801_s3 + $0xcd0] sm:$0xf]  ;;  %7125 = vmatpush.bf16.msra.mxu1 %v11918_v59  ;;  %7089 = vmatpush.bf16.msrb.mxu2 %v13098_v1  ;;  %v12362_v44 = vor.u32 %v15239_v40, %v12361_v10  ;;  %v6796_v1 = vpop.f32.mrf.mxu3  ;;  %v12107_v31 = vld [vmem:[%s23801_s3 + $0x570] sm:$0xf0] }
 0x392   :  { %v15415_v54 = vld [vmem:[%s23801_s3 + $0xcec] sm:$0xf0]  ;;  %v20772_v10 = vadd.f32 %v6796_v1, %v6784_v20  ;;  %v11467_v20 = vld [vmem:[%s23801_s3 + $0x70] sm:$0xf0] }
 0x393   :  { %v13066_v12 = vor.u32 %v15415_v54, %v13065_v6  ;;  %v12329_v42 = vld [vmem:[%s23801_s3 + $0x710] sm:$0xf]  ;;  %7113 = vmatpush.bf16.msra.mxu0 %v11630_v56  ;;  %7049 = vmatpush.bf16.msra.mxu3 %v12362_v44  ;;  %v15019_v54 = vld [vmem:[%s23801_s3 + $0x94] sm:$0xf] }
 0x394   :  { %v15231_v17 = vld [vmem:[%s23801_s3 + $0x72c] sm:$0xf0]  ;;  %v15083_v56 = vld [vmem:[%s23801_s3 + $0x294] sm:$0xf]  ;;  %v11502_v13 = vor.u32 %v15019_v54, %v11499_v2 }
 0x395   :  { %v13033_v18 = vld [vmem:[%s23801_s3 + $0xc90] sm:$0xf]  ;;  %7126 = vmatpush.bf16.msra.mxu1 %v11886_v60  ;;  %7090 = vmatpush.bf16.msrb.mxu2 %v13066_v12  ;;  %v12330_v11 = vor.u32 %v15231_v17, %v12329_v42  ;;  %v12174_v60 = vor.u32 %v15187_v53, %v12171_v48  ;;  %v15179_v12 = vld [vmem:[%s23801_s3 + $0x594] sm:$0xf]  ;;  %v6863_v43 = vpop.f32.mrf.mxu0  ;;  %v6876_v17 = vpop.f32.mrf.mxu1 }
 0x396   :  { %v15407_v34 = vld [vmem:[%s23801_s3 + $0xcac] sm:$0xf0]  ;;  %v15011_v42 = vld [vmem:[%s23801_s3 + $0x54] sm:$0xf] }
 0x397   :  { %v13034_v27 = vor.u32 %v15407_v34, %v13033_v18  ;;  %v12297_v46 = vld [vmem:[%s23801_s3 + $0x6d0] sm:$0xf]  ;;  %7114 = vmatpush.bf16.msra.mxu0 %v11598_v22  ;;  %7050 = vmatpush.bf16.msra.mxu3 %v12330_v11  ;;  %v11758_v18 = vor.u32 %v15083_v56, %v11755_v38  ;;  %v12142_v22 = vor.u32 %v15179_v12, %v12139_v32  ;;  %v11691_v15 = vld [vmem:[%s23801_s3 + $0x230] sm:$0xf0] }
 0x398   :  { %v15223_v61 = vld [vmem:[%s23801_s3 + $0x6ec] sm:$0xf0]  ;;  %v12683_v55 = vld [vmem:[%s23801_s3 + $0x9f0] sm:$0xf0] }
 0x399   :  { %v13001_v37 = vld [vmem:[%s23801_s3 + $0xc50] sm:$0xf]  ;;  %7127 = vmatpush.bf16.msra.mxu1 %v11854_v23  ;;  %7091 = vmatpush.bf16.msrb.mxu2 %v13034_v27  ;;  %v12298_v36 = vor.u32 %v15223_v61, %v12297_v46  ;;  %v15171_v27 = vld [vmem:[%s23801_s3 + $0x554] sm:$0xf]  ;;  %v6798_v41 = vpop.f32.mrf.mxu3  ;;  %v11470_v46 = vor.u32 %v15011_v42, %v11467_v20 }
 0x39a   :  { %v15399_v47 = vld [vmem:[%s23801_s3 + $0xc6c] sm:$0xf0]  ;;  %v15003_v61 = vld [vmem:[%s23801_s3 + $0x14] sm:$0xf] }
 0x39b   :  { %v13002_v3 = vor.u32 %v15399_v47, %v13001_v37  ;;  %v12265_v30 = vld [vmem:[%s23801_s3 + $0x690] sm:$0xf]  ;;  %7115 = vmatpush.bf16.msra.mxu0 %v11566_v39  ;;  %7051 = vmatpush.bf16.msra.mxu3 %v12298_v36  ;;  %v11726_v37 = vor.u32 %v15075_v50, %v11723_v63  ;;  %v11435_v39 = vld [vmem:[%s23801_s3 + $0x30] sm:$0xf0]  ;;  %v12110_v36 = vor.u32 %v15171_v27, %v12107_v31 }
 0x39c   :  { %v15215_v57 = vld [vmem:[%s23801_s3 + $0x6ac] sm:$0xf0]  ;;  %v15379_v33 = vld [vmem:[%s23801_s3 + $0xbd4] sm:$0xf] }
 0x39d   :  { %v12969_v59 = vld [vmem:[%s23801_s3 + $0xc10] sm:$0xf]  ;;  %7128 = vmatpush.bf16.msra.mxu1 %v11822_v28  ;;  %7092 = vmatpush.bf16.msrb.mxu2 %v13002_v3  ;;  %v12266_v40 = vor.u32 %v15215_v57, %v12265_v30  ;;  %v15067_v28 = vld [vmem:[%s23801_s3 + $0x214] sm:$0xf] }
 0x39e   :  { %v15391_v16 = vld [vmem:[%s23801_s3 + $0xc2c] sm:$0xf0]  ;;  %v15315_v3 = vld [vmem:[%s23801_s3 + $0x9d4] sm:$0xf]  ;;  %v11694_v0 = vor.u32 %v15067_v28, %v11691_v15 }
 0x39f   :  { %v12970_v6 = vor.u32 %v15391_v16, %v12969_v59  ;;  %v12233_v19 = vld [vmem:[%s23801_s3 + $0x650] sm:$0xf]  ;;  %7116 = vmatpush.bf16.msra.mxu0 %v11534_v58  ;;  %7052 = vmatpush.bf16.msra.mxu3 %v12266_v40  ;;  %v12939_v30 = vld [vmem:[%s23801_s3 + $0xbf0] sm:$0xf0]  ;;  %v11438_v16 = vor.u32 %v15003_v61, %v11435_v39  ;;  %v12686_v1 = vor.u32 %v15315_v3, %v12683_v55 }
 0x3a0   :  { %v15207_v44 = vld [vmem:[%s23801_s3 + $0x66c] sm:$0xf0]  ;;  %v15163_v53 = vld [vmem:[%s23801_s3 + $0x514] sm:$0xf]  ;;  %v12942_v58 = vor.u32 %v15379_v33, %v12939_v30 }
 0x3a1   :  { %7129 = vmatpush.bf16.msra.mxu1 %v11790_v7  ;;  %7093 = vmatpush.bf16.msrb.mxu2 %v12970_v6  ;;  %v12234_v34 = vor.u32 %v15207_v44, %v12233_v19  ;;  %v12201_v23 = vld [vmem:[%s23801_s3 + $0x610] sm:$0xf]  ;;  %v12075_v48 = vld [vmem:[%s23801_s3 + $0x530] sm:$0xf0] }
 0x3a2   :  { %v15199_v24 = vld [vmem:[%s23801_s3 + $0x62c] sm:$0xf0]  ;;  %v15307_v40 = vld [vmem:[%s23801_s3 + $0x994] sm:$0xf]  ;;  %v12078_v2 = vor.u32 %v15163_v53, %v12075_v48 }
 0x3a3   :  { %v13449_v26 = vld [vmem:[%s23801_s3 + $0xfd0] sm:$0xf]  ;;  %7117 = vmatpush.bf16.msra.mxu0 %v11502_v13  ;;  %7053 = vmatpush.bf16.msra.mxu3 %v12234_v34  ;;  %v12202_v47 = vor.u32 %v15199_v24, %v12201_v23  ;;  %v12651_v6 = vld [vmem:[%s23801_s3 + $0x9b0] sm:$0xf0]  ;;  %v20916_v23 = vpop.f32.mrf.mxu2 }
 0x3a4   :  { %v15511_v11 = vld [vmem:[%s23801_s3 + $0xfec] sm:$0xf0]  ;;  %7094 = vmatmul.bf16.vlgmr.msrb.gmra.mxu2 %v19396_v49  ;;  %v15371_v54 = vld [vmem:[%s23801_s3 + $0xb94] sm:$0xf]  ;;  %v12654_v12 = vor.u32 %v15307_v40, %v12651_v6 }
 0x3a5   :  { %7138 = vmatpush.bf16.msra.mxu2 %v12174_v60  ;;  %7130 = vmatpush.bf16.msra.mxu1 %v11758_v18  ;;  %v13450_v51 = vor.u32 %v15511_v11, %v13449_v26  ;;  %v13417_v57 = vld [vmem:[%s23801_s3 + $0xf90] sm:$0xf]  ;;  %v12907_v56 = vld [vmem:[%s23801_s3 + $0xbb0] sm:$0xf0]  ;;  %v4019_v26 = vperm.slane %v20503_v25, 3  ;;  %v6848_v40 = vpop.f32.mrf.mxu3 }
 0x3a6   :  { %v15503_v59 = vld [vmem:[%s23801_s3 + $0xfac] sm:$0xf0]  ;;  %v15155_v19 = vld [vmem:[%s23801_s3 + $0x4d4] sm:$0xf]  ;;  %v12910_v32 = vor.u32 %v15371_v54, %v12907_v56 }
 0x3a7   :  { %7118 = vmatpush.bf16.msra.mxu0 %v11470_v46  ;;  %7054 = vmatpush.bf16.msra.mxu3 %v12202_v47  ;;  %v13418_v7 = vor.u32 %v15503_v59, %v13417_v57  ;;  %v13385_v60 = vld [vmem:[%s23801_s3 + $0xf50] sm:$0xf]  ;;  %v12043_v44 = vld [vmem:[%s23801_s3 + $0x4f0] sm:$0xf0] }
 0x3a8   :  { %v15495_v38 = vld [vmem:[%s23801_s3 + $0xf6c] sm:$0xf0]  ;;  %v15299_v42 = vld [vmem:[%s23801_s3 + $0x954] sm:$0xf]  ;;  %v12046_v18 = vor.u32 %v15155_v19, %v12043_v44 }
 0x3a9   :  { %7139 = vmatpush.bf16.msra.mxu2 %v12142_v22  ;;  %7131 = vmatpush.bf16.msra.mxu1 %v11726_v37  ;;  %v13386_v13 = vor.u32 %v15495_v38, %v13385_v60  ;;  %v12619_v43 = vld [vmem:[%s23801_s3 + $0x970] sm:$0xf0]  ;;  %v13353_v20 = vld [vmem:[%s23801_s3 + $0xf10] sm:$0xf]  ;;  %v6849_v60 = vadd.f32 %v6848_v40, %v20718_v29 }
 0x3aa   :  { %7055 = vmatmul.bf16.vlgmr.msra.gmra.mxu3 %v18945_v21  ;;  %v15363_v17 = vld [vmem:[%s23801_s3 + $0xb54] sm:$0xf]  ;;  %v15487_v50 = vld [vmem:[%s23801_s3 + $0xf2c] sm:$0xf0]  ;;  %v12622_v24 = vor.u32 %v15299_v42, %v12619_v43  ;;  %v6926_v59 = vpop.f32.mrf.mxu1 }
 0x3ab   :  { %7099 = vmatpush.bf16.msrb.mxu3 %v13450_v51  ;;  %7119 = vmatpush.bf16.msra.mxu0 %v11438_v16  ;;  %v12875_v34 = vld [vmem:[%s23801_s3 + $0xb70] sm:$0xf0]  ;;  %v13354_v27 = vor.u32 %v15487_v50, %v13353_v20  ;;  %v13321_v37 = vld [vmem:[%s23801_s3 + $0xed0] sm:$0xf]  ;;  %v6913_v51 = vpop.f32.mrf.mxu0  ;;  %v6889_v6 = vpop.f32.mrf.mxu2  ;;  %v6862_v42 = vadd.f32 %v20744_v4, %v6849_v60 }
 0x3ac   :  { %v15147_v63 = vld [vmem:[%s23801_s3 + $0x494] sm:$0xf]  ;;  %v12878_v11 = vor.u32 %v15363_v17, %v12875_v34  ;;  %v15479_v47 = vld [vmem:[%s23801_s3 + $0xeec] sm:$0xf0]  ;;  %v6914_v57 = vadd.f32 %v6913_v51, %v4019_v26 }
 0x3ad   :  { %7140 = vmatpush.bf16.msra.mxu2 %v12110_v36  ;;  %7132 = vmatpush.bf16.msra.mxu1 %v11694_v0  ;;  %v12011_v22 = vld [vmem:[%s23801_s3 + $0x4b0] sm:$0xf0]  ;;  %v13322_v3 = vor.u32 %v15479_v47, %v13321_v37  ;;  %v13289_v48 = vld [vmem:[%s23801_s3 + $0xe90] sm:$0xf]  ;;  %v6875_v26 = vadd.f32 %v20746_v45, %v6862_v42  ;;  %v6850_v47 = vpop.f32.mrf.mxu3 }
 0x3ae   :  { %7120 = vmatmul.bf16.vlgmr.msra.gmra.mxu0 %v18932_v14  ;;  %v15291_v31 = vld [vmem:[%s23801_s3 + $0x914] sm:$0xf]  ;;  %v12014_v61 = vor.u32 %v15147_v63, %v12011_v22  ;;  %v15471_v0 = vld [vmem:[%s23801_s3 + $0xeac] sm:$0xf0] }
 0x3af   :  { %7164 = vmatpush.bf16.msrb.mxu0 %v12686_v1  ;;  %7100 = vmatpush.bf16.msrb.mxu3 %v13418_v7  ;;  %v12587_v41 = vld [vmem:[%s23801_s3 + $0x930] sm:$0xf0]  ;;  %v20967_v7 = vadd.f32 %v6926_v59, %v6914_v57  ;;  %v13290_v19 = vor.u32 %v15471_v0, %v13289_v48  ;;  %v13257_v17 = vld [vmem:[%s23801_s3 + $0xe50] sm:$0xf]  ;;  %v21024_v37 = vadd.f32 %v20916_v23, %v6875_v26  ;;  %v11665_v57 = vld [vmem:[%s23801_s3 + $0x1d8] sm:$0xf] }
 0x3b0   :  { %7133 = vmatmul.bf16.vlgmr.msra.gmra.mxu1 %v18934_v35  ;;  %v15355_v46 = vld [vmem:[%s23801_s3 + $0xb14] sm:$0xf]  ;;  %v12590_v15 = vor.u32 %v15291_v31, %v12587_v41  ;;  %v15455_v45 = vld [vmem:[%s23801_s3 + $0xe2c] sm:$0xf0]  ;;  %v15064_v59 = vld [vmem:[%s23801_s3 + $0x1f4] sm:$0xf0] }
 0x3b1   :  { %7177 = vmatpush.bf16.msrb.mxu1 %v12942_v58  ;;  %7141 = vmatpush.bf16.msra.mxu2 %v12078_v2  ;;  %v12843_v25 = vld [vmem:[%s23801_s3 + $0xb30] sm:$0xf0]  ;;  %v11921_v48 = vld [vmem:[%s23801_s3 + $0x3d8] sm:$0xf] }
 0x3b2   :  { %v15139_v39 = vld [vmem:[%s23801_s3 + $0x454] sm:$0xf]  ;;  %v12846_v36 = vor.u32 %v15355_v46, %v12843_v25  ;;  %v15128_v0 = vld [vmem:[%s23801_s3 + $0x3f4] sm:$0xf0] }
 0x3b3   :  { %7165 = vmatpush.bf16.msrb.mxu0 %v12654_v12  ;;  %7101 = vmatpush.bf16.msrb.mxu3 %v13386_v13  ;;  %v11979_v28 = vld [vmem:[%s23801_s3 + $0x470] sm:$0xf0]  ;;  %v6915_v4 = vpop.f32.mrf.mxu0  ;;  %v11922_v60 = vor.u32 %v15128_v0, %v11921_v48  ;;  %v11793_v0 = vld [vmem:[%s23801_s3 + $0x2d8] sm:$0xf] }
 0x3b4   :  { %v15283_v55 = vld [vmem:[%s23801_s3 + $0x8d4] sm:$0xf]  ;;  %v11982_v16 = vor.u32 %v15139_v39, %v11979_v28 }
 0x3b5   :  { %7178 = vmatpush.bf16.msrb.mxu1 %v12910_v32  ;;  %7142 = vmatpush.bf16.msra.mxu2 %v12046_v18  ;;  %v12555_v33 = vld [vmem:[%s23801_s3 + $0x8f0] sm:$0xf0]  ;;  %v15463_v18 = vld [vmem:[%s23801_s3 + $0xe6c] sm:$0xf0] }
 0x3b6   :  { %v15347_v30 = vld [vmem:[%s23801_s3 + $0xad4] sm:$0xf]  ;;  %v12558_v54 = vor.u32 %v15283_v55, %v12555_v33 }
 0x3b7   :  { %7166 = vmatpush.bf16.msrb.mxu0 %v12622_v24  ;;  %7102 = vmatpush.bf16.msrb.mxu3 %v13354_v27  ;;  %v12811_v53 = vld [vmem:[%s23801_s3 + $0xaf0] sm:$0xf0]  ;;  %v13258_v27 = vor.u32 %v15463_v18, %v13257_v17 }
 0x3b8   :  { %v15131_v1 = vld [vmem:[%s23801_s3 + $0x414] sm:$0xf]  ;;  %v12814_v38 = vor.u32 %v15347_v30, %v12811_v53 }
 0x3b9   :  { %7179 = vmatpush.bf16.msrb.mxu1 %v12878_v11  ;;  %7143 = vmatpush.bf16.msra.mxu2 %v12014_v61  ;;  %v11947_v58 = vld [vmem:[%s23801_s3 + $0x430] sm:$0xf0]  ;;  %v6928_v11 = vpop.f32.mrf.mxu1  ;;  %v13225_v61 = vld [vmem:[%s23801_s3 + $0xe10] sm:$0xf] }
 0x3ba   :  { %v15443_v2 = vld [vmem:[%s23801_s3 + $0xdd4] sm:$0xf]  ;;  %v11950_v32 = vor.u32 %v15131_v1, %v11947_v58  ;;  %v13226_v33 = vor.u32 %v15455_v45, %v13225_v61  ;;  %v11569_v45 = vld [vmem:[%s23801_s3 + $0x118] sm:$0xf] }
 0x3bb   :  { %7167 = vmatpush.bf16.msrb.mxu0 %v12590_v15  ;;  %v13195_v56 = vld [vmem:[%s23801_s3 + $0xdf0] sm:$0xf0]  ;;  %7103 = vmatpush.bf16.msrb.mxu3 %v13322_v3 }
 0x3bc   :  { %v15275_v44 = vld [vmem:[%s23801_s3 + $0x894] sm:$0xf]  ;;  %v13198_v43 = vor.u32 %v15443_v2, %v13195_v56  ;;  %v11666_v56 = vor.u32 %v15064_v59, %v11665_v57  ;;  %v15032_v57 = vld [vmem:[%s23801_s3 + $0xf4] sm:$0xf0] }
 0x3bd   :  { %7180 = vmatpush.bf16.msrb.mxu1 %v12846_v36  ;;  %v12523_v12 = vld [vmem:[%s23801_s3 + $0x8b0] sm:$0xf0]  ;;  %7144 = vmatpush.bf16.msra.mxu2 %v11982_v16 }
 0x3be   :  { %v15339_v13 = vld [vmem:[%s23801_s3 + $0xa94] sm:$0xf]  ;;  %v12526_v34 = vor.u32 %v15275_v44, %v12523_v12 }
 0x3bf   :  { %v12779_v29 = vld [vmem:[%s23801_s3 + $0xab0] sm:$0xf0]  ;;  %7168 = vmatpush.bf16.msrb.mxu0 %v12558_v54  ;;  %7104 = vmatpush.bf16.msrb.mxu3 %v13290_v19  ;;  %v15056_v19 = vld [vmem:[%s23801_s3 + $0x1b4] sm:$0xf0] }
 0x3c0   :  { %v15435_v20 = vld [vmem:[%s23801_s3 + $0xd94] sm:$0xf]  ;;  %v12782_v63 = vor.u32 %v15339_v13, %v12779_v29  ;;  %v15120_v13 = vld [vmem:[%s23801_s3 + $0x3b4] sm:$0xf0] }
 0x3c1   :  { %v13163_v50 = vld [vmem:[%s23801_s3 + $0xdb0] sm:$0xf0]  ;;  %7181 = vmatpush.bf16.msrb.mxu1 %v12814_v38  ;;  %7145 = vmatpush.bf16.msra.mxu2 %v11950_v32  ;;  %v11633_v38 = vld [vmem:[%s23801_s3 + $0x198] sm:$0xf] }
 0x3c2   :  { %v15267_v22 = vld [vmem:[%s23801_s3 + $0x854] sm:$0xf]  ;;  %v13166_v46 = vor.u32 %v15435_v20, %v13163_v50  ;;  %v11889_v32 = vld [vmem:[%s23801_s3 + $0x398] sm:$0xf]  ;;  %v11634_v18 = vor.u32 %v15056_v19, %v11633_v38 }
 0x3c3   :  { %v12491_v24 = vld [vmem:[%s23801_s3 + $0x870] sm:$0xf0]  ;;  %7169 = vmatpush.bf16.msrb.mxu0 %v12526_v34  ;;  %7105 = vmatpush.bf16.msrb.mxu3 %v13258_v27  ;;  %v11890_v34 = vor.u32 %v15120_v13, %v11889_v32  ;;  %v11601_v20 = vld [vmem:[%s23801_s3 + $0x158] sm:$0xf] }
 0x3c4   :  { %v15331_v31 = vld [vmem:[%s23801_s3 + $0xa54] sm:$0xf]  ;;  %v12494_v39 = vor.u32 %v15267_v22, %v12491_v24  ;;  %7146 = vmatmul.bf16.vlgmr.msra.gmra.mxu2 %v18936_v62  ;;  %v15048_v50 = vld [vmem:[%s23801_s3 + $0x174] sm:$0xf0] }
 0x3c5   :  { %v12747_v41 = vld [vmem:[%s23801_s3 + $0xa70] sm:$0xf0]  ;;  %7190 = vmatpush.bf16.msrb.mxu2 %v13198_v43  ;;  %7182 = vmatpush.bf16.msrb.mxu1 %v12782_v63  ;;  %v11857_v22 = vld [vmem:[%s23801_s3 + $0x358] sm:$0xf] }
 0x3c6   :  { %v15251_v25 = vld [vmem:[%s23801_s3 + $0x7d4] sm:$0xf]  ;;  %v12750_v23 = vor.u32 %v15331_v31, %v12747_v41  ;;  %v15112_v24 = vld [vmem:[%s23801_s3 + $0x374] sm:$0xf0]  ;;  %v6939_v41 = vpop.f32.mrf.mxu2 }
 0x3c7   :  { %v12427_v28 = vld [vmem:[%s23801_s3 + $0x7f0] sm:$0xf0]  ;;  %7170 = vmatpush.bf16.msrb.mxu0 %v12494_v39  ;;  %7106 = vmatpush.bf16.msrb.mxu3 %v13226_v33  ;;  %v11858_v61 = vor.u32 %v15112_v24, %v11857_v22  ;;  %v21130_v47 = vadd.f32 %v6939_v41, %v20967_v7  ;;  %v15080_v41 = vld [vmem:[%s23801_s3 + $0x274] sm:$0xf0] }
 0x3c8   :  { %v15427_v15 = vld [vmem:[%s23801_s3 + $0xd54] sm:$0xf]  ;;  %v12430_v16 = vor.u32 %v15251_v25, %v12427_v28  ;;  %v15040_v25 = vld [vmem:[%s23801_s3 + $0x134] sm:$0xf0]  ;;  %v21156_v59 = vpop.f32.mrf.mxu0 }
 0x3c9   :  { %v13131_v51 = vld [vmem:[%s23801_s3 + $0xd70] sm:$0xf0]  ;;  %7191 = vmatpush.bf16.msrb.mxu2 %v13166_v46  ;;  %7183 = vmatpush.bf16.msrb.mxu1 %v12750_v23  ;;  %v11602_v46 = vor.u32 %v15048_v50, %v11601_v20  ;;  %v12145_v20 = vld [vmem:[%s23801_s3 + $0x598] sm:$0xf] }
 0x3ca   :  { %v15259_v36 = vld [vmem:[%s23801_s3 + $0x814] sm:$0xf]  ;;  %v13134_v53 = vor.u32 %v15427_v15, %v13131_v51  ;;  %7107 = vmatmul.bf16.vlgmr.msrb.gmra.mxu3 %v19630_v8  ;;  %v11825_v15 = vld [vmem:[%s23801_s3 + $0x318] sm:$0xf] }
 0x3cb   :  { %v12459_v3 = vld [vmem:[%s23801_s3 + $0x830] sm:$0xf0]  ;;  %7151 = vmatpush.bf16.msra.mxu3 %v12430_v16  ;;  %v15104_v51 = vld [vmem:[%s23801_s3 + $0x334] sm:$0xf0]  ;;  %v21158_v16 = vpop.f32.mrf.mxu1 }
 0x3cc   :  { %v15323_v55 = vld [vmem:[%s23801_s3 + $0xa14] sm:$0xf]  ;;  %v12462_v58 = vor.u32 %v15259_v36, %v12459_v3  ;;  %v11826_v33 = vor.u32 %v15104_v51, %v11825_v15  ;;  %v15184_v50 = vld [vmem:[%s23801_s3 + $0x5b4] sm:$0xf0] }
 0x3cd   :  { %v12715_v30 = vld [vmem:[%s23801_s3 + $0xa30] sm:$0xf0]  ;;  %7192 = vmatpush.bf16.msrb.mxu2 %v13134_v53  ;;  %v15176_v15 = vld [vmem:[%s23801_s3 + $0x574] sm:$0xf0] }
 0x3ce   :  { %v15243_v1 = vld [vmem:[%s23801_s3 + $0x794] sm:$0xf]  ;;  %v12718_v2 = vor.u32 %v15323_v55, %v12715_v30  ;;  %7171 = vmatpush.bf16.msrb.mxu0 %v12462_v58  ;;  %v11570_v55 = vor.u32 %v15040_v25, %v11569_v45  ;;  %v11537_v30 = vld [vmem:[%s23801_s3 + $0xd8] sm:$0xf]  ;;  %v6941_v38 = vpop.f32.mrf.mxu2 }
 0x3cf   :  { %v12395_v40 = vld [vmem:[%s23801_s3 + $0x7b0] sm:$0xf0]  ;;  %v11538_v19 = vor.u32 %v15032_v57, %v11537_v30  ;;  %v15072_v30 = vld [vmem:[%s23801_s3 + $0x234] sm:$0xf0] }
 0x3d0   :  { %v15419_v6 = vld [vmem:[%s23801_s3 + $0xd14] sm:$0xf]  ;;  %v12398_v44 = vor.u32 %v15243_v1, %v12395_v40  ;;  %7184 = vmatpush.bf16.msrb.mxu1 %v12718_v2  ;;  %v15096_v1 = vld [vmem:[%s23801_s3 + $0x2f4] sm:$0xf0]  ;;  %v6967_v22 = vpop.f32.mrf.mxu0 }
 0x3d1   :  { %v13099_v54 = vld [vmem:[%s23801_s3 + $0xd30] sm:$0xf0]  ;;  %7172 = vmatmul.bf16.vlgmr.msrb.gmra.mxu0 %v19113_v9  ;;  %v12177_v2 = vld [vmem:[%s23801_s3 + $0x5d8] sm:$0xf] }
 0x3d2   :  { %v13102_v12 = vor.u32 %v15419_v6, %v13099_v54  ;;  %v15235_v29 = vld [vmem:[%s23801_s3 + $0x754] sm:$0xf]  ;;  %7216 = vmatpush.bf16.msra.mxu0 %v11666_v56  ;;  %7152 = vmatpush.bf16.msra.mxu3 %v12398_v44  ;;  %v15192_v56 = vld [vmem:[%s23801_s3 + $0x5f4] sm:$0xf0]  ;;  %v11794_v44 = vor.u32 %v15096_v1, %v11793_v0 }
 0x3d3   :  { %v12363_v42 = vld [vmem:[%s23801_s3 + $0x770] sm:$0xf0]  ;;  %7185 = vmatmul.bf16.vlgmr.msrb.gmra.mxu1 %v19124_v5  ;;  %v6980_v24 = vpop.f32.mrf.mxu1  ;;  %v15320_v0 = vld [vmem:[%s23801_s3 + $0x9f4] sm:$0xf0] }
 0x3d4   :  { %v15411_v43 = vld [vmem:[%s23801_s3 + $0xcd4] sm:$0xf]  ;;  %7229 = vmatpush.bf16.msra.mxu1 %v11922_v60  ;;  %7193 = vmatpush.bf16.msrb.mxu2 %v13102_v12  ;;  %v12366_v4 = vor.u32 %v15235_v29, %v12363_v42  ;;  %v6900_v60 = vpop.f32.mrf.mxu3  ;;  %v11505_v29 = vld [vmem:[%s23801_s3 + $0x98] sm:$0xf] }
 0x3d5   :  { %v13067_v17 = vld [vmem:[%s23801_s3 + $0xcf0] sm:$0xf0]  ;;  %v21185_v12 = vadd.f32 %v6900_v60, %v21024_v37  ;;  %v15024_v42 = vld [vmem:[%s23801_s3 + $0xb4] sm:$0xf0] }
 0x3d6   :  { %v13070_v63 = vor.u32 %v15411_v43, %v13067_v17  ;;  %v15227_v26 = vld [vmem:[%s23801_s3 + $0x714] sm:$0xf]  ;;  %7217 = vmatpush.bf16.msra.mxu0 %v11634_v18  ;;  %7153 = vmatpush.bf16.msra.mxu3 %v12366_v4  ;;  %v11761_v43 = vld [vmem:[%s23801_s3 + $0x298] sm:$0xf]  ;;  %v12178_v17 = vor.u32 %v15192_v56, %v12177_v2  ;;  %v11506_v4 = vor.u32 %v15024_v42, %v11505_v29 }
 0x3d7   :  { %v12331_v11 = vld [vmem:[%s23801_s3 + $0x730] sm:$0xf0]  ;;  %v15088_v37 = vld [vmem:[%s23801_s3 + $0x2b4] sm:$0xf0] }
 0x3d8   :  { %v15403_v27 = vld [vmem:[%s23801_s3 + $0xc94] sm:$0xf]  ;;  %7230 = vmatpush.bf16.msra.mxu1 %v11890_v34  ;;  %7194 = vmatpush.bf16.msrb.mxu2 %v13070_v63  ;;  %v12334_v39 = vor.u32 %v15227_v26, %v12331_v11  ;;  %v11473_v63 = vld [vmem:[%s23801_s3 + $0x58] sm:$0xf]  ;;  %v11762_v26 = vor.u32 %v15088_v37, %v11761_v43 }
 0x3d9   :  { %v13035_v31 = vld [vmem:[%s23801_s3 + $0xcb0] sm:$0xf0]  ;;  %v12945_v1 = vld [vmem:[%s23801_s3 + $0xbd8] sm:$0xf] }
 0x3da   :  { %v13038_v28 = vor.u32 %v15403_v27, %v13035_v31  ;;  %v15219_v23 = vld [vmem:[%s23801_s3 + $0x6d4] sm:$0xf]  ;;  %7218 = vmatpush.bf16.msra.mxu0 %v11602_v46  ;;  %7154 = vmatpush.bf16.msra.mxu3 %v12334_v39  ;;  %v15016_v27 = vld [vmem:[%s23801_s3 + $0x74] sm:$0xf0]  ;;  %v12146_v46 = vor.u32 %v15184_v50, %v12145_v20 }
 0x3db   :  { %v12299_v36 = vld [vmem:[%s23801_s3 + $0x6f0] sm:$0xf0]  ;;  %v11729_v31 = vld [vmem:[%s23801_s3 + $0x258] sm:$0xf] }
 0x3dc   :  { %v15395_v7 = vld [vmem:[%s23801_s3 + $0xc54] sm:$0xf]  ;;  %7231 = vmatpush.bf16.msra.mxu1 %v11858_v61  ;;  %7195 = vmatpush.bf16.msrb.mxu2 %v13038_v28  ;;  %v12302_v53 = vor.u32 %v15219_v23, %v12299_v36  ;;  %v12113_v28 = vld [vmem:[%s23801_s3 + $0x558] sm:$0xf]  ;;  %v6902_v51 = vpop.f32.mrf.mxu3  ;;  %v11474_v23 = vor.u32 %v15016_v27, %v11473_v63 }
 0x3dd   :  { %v13003_v3 = vld [vmem:[%s23801_s3 + $0xc70] sm:$0xf0]  ;;  %v11441_v36 = vld [vmem:[%s23801_s3 + $0x18] sm:$0xf] }
 0x3de   :  { %v13006_v48 = vor.u32 %v15395_v7, %v13003_v3  ;;  %v15211_v58 = vld [vmem:[%s23801_s3 + $0x694] sm:$0xf]  ;;  %7219 = vmatpush.bf16.msra.mxu0 %v11570_v55  ;;  %7155 = vmatpush.bf16.msra.mxu3 %v12302_v53  ;;  %v11730_v7 = vor.u32 %v15080_v41, %v11729_v31  ;;  %v15008_v55 = vld [vmem:[%s23801_s3 + $0x34] sm:$0xf0]  ;;  %v12114_v53 = vor.u32 %v15176_v15, %v12113_v28 }
 0x3df   :  { %v12267_v40 = vld [vmem:[%s23801_s3 + $0x6b0] sm:$0xf0]  ;;  %v12081_v2 = vld [vmem:[%s23801_s3 + $0x518] sm:$0xf] }
 0x3e0   :  { %v15387_v6 = vld [vmem:[%s23801_s3 + $0xc14] sm:$0xf]  ;;  %7232 = vmatpush.bf16.msra.mxu1 %v11826_v33  ;;  %7196 = vmatpush.bf16.msrb.mxu2 %v13006_v48  ;;  %v12270_v32 = vor.u32 %v15211_v58, %v12267_v40  ;;  %v11697_v33 = vld [vmem:[%s23801_s3 + $0x218] sm:$0xf] }
 0x3e1   :  { %v12971_v54 = vld [vmem:[%s23801_s3 + $0xc30] sm:$0xf0]  ;;  %v12689_v48 = vld [vmem:[%s23801_s3 + $0x9d8] sm:$0xf]  ;;  %v11698_v60 = vor.u32 %v15072_v30, %v11697_v33 }
 0x3e2   :  { %v12974_v13 = vor.u32 %v15387_v6, %v12971_v54  ;;  %v15203_v18 = vld [vmem:[%s23801_s3 + $0x654] sm:$0xf]  ;;  %7220 = vmatpush.bf16.msra.mxu0 %v11538_v19  ;;  %7156 = vmatpush.bf16.msra.mxu3 %v12270_v32  ;;  %v15384_v58 = vld [vmem:[%s23801_s3 + $0xbf4] sm:$0xf0]  ;;  %v11442_v54 = vor.u32 %v15008_v55, %v11441_v36  ;;  %v12690_v38 = vor.u32 %v15320_v0, %v12689_v48 }
 0x3e3   :  { %v12235_v34 = vld [vmem:[%s23801_s3 + $0x670] sm:$0xf0]  ;;  %v15168_v56 = vld [vmem:[%s23801_s3 + $0x534] sm:$0xf0]  ;;  %v12946_v19 = vor.u32 %v15384_v58, %v12945_v1 }
 0x3e4   :  { %7233 = vmatpush.bf16.msra.mxu1 %v11794_v44  ;;  %7197 = vmatpush.bf16.msrb.mxu2 %v12974_v13  ;;  %v12238_v11 = vor.u32 %v15203_v18, %v12235_v34  ;;  %v15195_v61 = vld [vmem:[%s23801_s3 + $0x614] sm:$0xf]  ;;  %v12657_v32 = vld [vmem:[%s23801_s3 + $0x998] sm:$0xf]  ;;  %v12082_v42 = vor.u32 %v15168_v56, %v12081_v2 }
 0x3e5   :  { %v12203_v45 = vld [vmem:[%s23801_s3 + $0x630] sm:$0xf0]  ;;  %v15312_v13 = vld [vmem:[%s23801_s3 + $0x9b4] sm:$0xf0] }
 0x3e6   :  { %v15507_v25 = vld [vmem:[%s23801_s3 + $0xfd4] sm:$0xf]  ;;  %7221 = vmatpush.bf16.msra.mxu0 %v11506_v4  ;;  %7157 = vmatpush.bf16.msra.mxu3 %v12238_v11  ;;  %v12206_v3 = vor.u32 %v15195_v61, %v12203_v45  ;;  %v12913_v29 = vld [vmem:[%s23801_s3 + $0xb98] sm:$0xf]  ;;  %v12658_v20 = vor.u32 %v15312_v13, %v12657_v32  ;;  %v21329_v61 = vpop.f32.mrf.mxu2 }
 0x3e7   :  { %v13451_v39 = vld [vmem:[%s23801_s3 + $0xff0] sm:$0xf0]  ;;  %7198 = vmatmul.bf16.vlgmr.msrb.gmra.mxu2 %v19396_v49  ;;  %v15376_v43 = vld [vmem:[%s23801_s3 + $0xbb4] sm:$0xf0] }
 0x3e8   :  { %7242 = vmatpush.bf16.msra.mxu2 %v12178_v17  ;;  %7234 = vmatpush.bf16.msra.mxu1 %v11762_v26  ;;  %v13454_v57 = vor.u32 %v15507_v25, %v13451_v39  ;;  %v15499_v40 = vld [vmem:[%s23801_s3 + $0xf94] sm:$0xf]  ;;  %v12049_v18 = vld [vmem:[%s23801_s3 + $0x4d8] sm:$0xf]  ;;  %v12914_v50 = vor.u32 %v15376_v43, %v12913_v29  ;;  %v21334_v25 = vld [vmem:[%s23802_s4] sm:$0xff]  ;;  %v7017_v48 = vpop.f32.mrf.mxu0 }
 0x3e9   :  { %v13419_v6 = vld [vmem:[%s23801_s3 + $0xfb0] sm:$0xf0]  ;;  %v15160_v34 = vld [vmem:[%s23801_s3 + $0x4f4] sm:$0xf0]  ;;  %v4020_v39 = vperm.slane %v21334_v25, 4 }
 0x3ea   :  { %7222 = vmatpush.bf16.msra.mxu0 %v11474_v23  ;;  %7158 = vmatpush.bf16.msra.mxu3 %v12206_v3  ;;  %v13422_v44 = vor.u32 %v15499_v40, %v13419_v6  ;;  %v15491_v17 = vld [vmem:[%s23801_s3 + $0xf54] sm:$0xf]  ;;  %v12625_v63 = vld [vmem:[%s23801_s3 + $0x958] sm:$0xf]  ;;  %v12050_v26 = vor.u32 %v15160_v34, %v12049_v18  ;;  %v7030_v2 = vpop.f32.mrf.mxu1  ;;  %v6952_v29 = vpop.f32.mrf.mxu3 }
 0x3eb   :  { %v13387_v37 = vld [vmem:[%s23801_s3 + $0xf70] sm:$0xf0]  ;;  %v15304_v22 = vld [vmem:[%s23801_s3 + $0x974] sm:$0xf0]  ;;  %v6953_v18 = vadd.f32 %v6952_v29, %v21130_v47 }
 0x3ec   :  { %7243 = vmatpush.bf16.msra.mxu2 %v12146_v46  ;;  %7235 = vmatpush.bf16.msra.mxu1 %v11730_v7  ;;  %v13390_v4 = vor.u32 %v15491_v17, %v13387_v37  ;;  %v12881_v24 = vld [vmem:[%s23801_s3 + $0xb58] sm:$0xf]  ;;  %v15483_v27 = vld [vmem:[%s23801_s3 + $0xf14] sm:$0xf]  ;;  %v12626_v45 = vor.u32 %v15304_v22, %v12625_v63 }
 0x3ed   :  { %7159 = vmatmul.bf16.vlgmr.msra.gmra.mxu3 %v18945_v21  ;;  %v15368_v11 = vld [vmem:[%s23801_s3 + $0xb74] sm:$0xf0]  ;;  %v13355_v31 = vld [vmem:[%s23801_s3 + $0xf30] sm:$0xf0] }
 0x3ee   :  { %7203 = vmatpush.bf16.msrb.mxu3 %v13454_v57  ;;  %7223 = vmatpush.bf16.msra.mxu0 %v11442_v54  ;;  %v12017_v41 = vld [vmem:[%s23801_s3 + $0x498] sm:$0xf]  ;;  %v12882_v28 = vor.u32 %v15368_v11, %v12881_v24  ;;  %v13358_v15 = vor.u32 %v15483_v27, %v13355_v31  ;;  %v15475_v55 = vld [vmem:[%s23801_s3 + $0xed4] sm:$0xf]  ;;  %v7018_v54 = vadd.f32 %v7017_v48, %v4020_v39 }
 0x3ef   :  { %v15152_v46 = vld [vmem:[%s23801_s3 + $0x4b4] sm:$0xf0]  ;;  %v13323_v33 = vld [vmem:[%s23801_s3 + $0xef0] sm:$0xf0]  ;;  %v6966_v24 = vadd.f32 %v21156_v59, %v6953_v18 }
 0x3f0   :  { %7244 = vmatpush.bf16.msra.mxu2 %v12114_v53  ;;  %7236 = vmatpush.bf16.msra.mxu1 %v11698_v60  ;;  %v12593_v51 = vld [vmem:[%s23801_s3 + $0x918] sm:$0xf]  ;;  %v12018_v7 = vor.u32 %v15152_v46, %v12017_v41  ;;  %v13326_v1 = vor.u32 %v15475_v55, %v13323_v33  ;;  %v21385_v13 = vadd.f32 %v7030_v2, %v7018_v54  ;;  %v15459_v11 = vld [vmem:[%s23801_s3 + $0xe54] sm:$0xf]  ;;  %v7019_v59 = vpop.f32.mrf.mxu0 }
 0x3f1   :  { %7224 = vmatmul.bf16.vlgmr.msra.gmra.mxu0 %v18932_v14  ;;  %v15296_v23 = vld [vmem:[%s23801_s3 + $0x934] sm:$0xf0]  ;;  %v13259_v27 = vld [vmem:[%s23801_s3 + $0xe70] sm:$0xf0]  ;;  %v15044_v59 = vld [vmem:[%s23801_s3 + $0x15c] sm:$0xf] }
 0x3f2   :  { %7268 = vmatpush.bf16.msrb.mxu0 %v12690_v38  ;;  %7204 = vmatpush.bf16.msrb.mxu3 %v13422_v44  ;;  %v12849_v36 = vld [vmem:[%s23801_s3 + $0xb18] sm:$0xf]  ;;  %v12594_v53 = vor.u32 %v15296_v23, %v12593_v51  ;;  %v15467_v38 = vld [vmem:[%s23801_s3 + $0xe94] sm:$0xf]  ;;  %v7032_v51 = vpop.f32.mrf.mxu1  ;;  %v13262_v23 = vor.u32 %v15459_v11, %v13259_v27 }
 0x3f3   :  { %7237 = vmatmul.bf16.vlgmr.msra.gmra.mxu1 %v18934_v35  ;;  %v15360_v3 = vld [vmem:[%s23801_s3 + $0xb34] sm:$0xf0]  ;;  %v15451_v55 = vld [vmem:[%s23801_s3 + $0xe14] sm:$0xf]  ;;  %v11859_v51 = vld [vmem:[%s23801_s3 + $0x378] sm:$0xf0] }
 0x3f4   :  { %7281 = vmatpush.bf16.msrb.mxu1 %v12946_v19  ;;  %7245 = vmatpush.bf16.msra.mxu2 %v12082_v42  ;;  %v11985_v30 = vld [vmem:[%s23801_s3 + $0x458] sm:$0xf]  ;;  %v12850_v0 = vor.u32 %v15360_v3, %v12849_v36  ;;  %v13291_v19 = vld [vmem:[%s23801_s3 + $0xeb0] sm:$0xf0]  ;;  %v6993_v42 = vpop.f32.mrf.mxu2 }
 0x3f5   :  { %v15144_v57 = vld [vmem:[%s23801_s3 + $0x474] sm:$0xf0] }
 0x3f6   :  { %7269 = vmatpush.bf16.msrb.mxu0 %v12658_v20  ;;  %7205 = vmatpush.bf16.msrb.mxu3 %v13390_v4  ;;  %v12561_v58 = vld [vmem:[%s23801_s3 + $0x8d8] sm:$0xf]  ;;  %v11986_v56 = vor.u32 %v15144_v57, %v11985_v30  ;;  %v13294_v20 = vor.u32 %v15467_v38, %v13291_v19  ;;  %v6954_v57 = vpop.f32.mrf.mxu3 }
 0x3f7   :  { %v15288_v40 = vld [vmem:[%s23801_s3 + $0x8f4] sm:$0xf0]  ;;  %v15036_v57 = vld [vmem:[%s23801_s3 + $0x11c] sm:$0xf] }
 0x3f8   :  { %7282 = vmatpush.bf16.msrb.mxu1 %v12914_v50  ;;  %7246 = vmatpush.bf16.msra.mxu2 %v12050_v26  ;;  %v12817_v6 = vld [vmem:[%s23801_s3 + $0xad8] sm:$0xf]  ;;  %v12562_v43 = vor.u32 %v15288_v40, %v12561_v58 }
 0x3f9   :  { %v15352_v60 = vld [vmem:[%s23801_s3 + $0xaf4] sm:$0xf0] }
 0x3fa   :  { %7270 = vmatpush.bf16.msrb.mxu0 %v12626_v45  ;;  %7206 = vmatpush.bf16.msrb.mxu3 %v13358_v15  ;;  %v11953_v44 = vld [vmem:[%s23801_s3 + $0x418] sm:$0xf]  ;;  %v12818_v34 = vor.u32 %v15352_v60, %v12817_v6  ;;  %v6979_v15 = vadd.f32 %v21158_v16, %v6966_v24  ;;  %v13227_v16 = vld [vmem:[%s23801_s3 + $0xe30] sm:$0xf0]  ;;  %v11667_v60 = vld [vmem:[%s23801_s3 + $0x1f8] sm:$0xf0] }
 0x3fb   :  { %v15136_v32 = vld [vmem:[%s23801_s3 + $0x434] sm:$0xf0]  ;;  %v13230_v54 = vor.u32 %v15451_v55, %v13227_v16  ;;  %v11891_v24 = vld [vmem:[%s23801_s3 + $0x3b8] sm:$0xf0] }
 0x3fc   :  { %7283 = vmatpush.bf16.msrb.mxu1 %v12882_v28  ;;  %7247 = vmatpush.bf16.msra.mxu2 %v12018_v7  ;;  %v13201_v17 = vld [vmem:[%s23801_s3 + $0xdd8] sm:$0xf]  ;;  %v11954_v63 = vor.u32 %v15136_v32, %v11953_v44  ;;  %v21442_v30 = vadd.f32 %v21329_v61, %v6979_v15  ;;  %v15124_v44 = vld [vmem:[%s23801_s3 + $0x3dc] sm:$0xf] }
 0x3fd   :  { %v15448_v37 = vld [vmem:[%s23801_s3 + $0xdf4] sm:$0xf0]  ;;  %v11923_v32 = vld [vmem:[%s23801_s3 + $0x3f8] sm:$0xf0] }
 0x3fe   :  { %7271 = vmatpush.bf16.msrb.mxu0 %v12594_v53  ;;  %7207 = vmatpush.bf16.msrb.mxu3 %v13326_v1  ;;  %v12529_v50 = vld [vmem:[%s23801_s3 + $0x898] sm:$0xf]  ;;  %v13202_v26 = vor.u32 %v15448_v37, %v13201_v17  ;;  %v15108_v15 = vld [vmem:[%s23801_s3 + $0x35c] sm:$0xf] }
 0x3ff   :  { %v15280_v4 = vld [vmem:[%s23801_s3 + $0x8b4] sm:$0xf0] }
 0x400   :  { %7284 = vmatpush.bf16.msrb.mxu1 %v12850_v0  ;;  %7248 = vmatpush.bf16.msra.mxu2 %v11986_v56  ;;  %v12785_v22 = vld [vmem:[%s23801_s3 + $0xa98] sm:$0xf]  ;;  %v12530_v31 = vor.u32 %v15280_v4, %v12529_v50  ;;  %v15060_v56 = vld [vmem:[%s23801_s3 + $0x1dc] sm:$0xf] }
 0x401   :  { %v15344_v47 = vld [vmem:[%s23801_s3 + $0xab4] sm:$0xf0]  ;;  %v15052_v50 = vld [vmem:[%s23801_s3 + $0x19c] sm:$0xf] }
 0x402   :  { %7272 = vmatpush.bf16.msrb.mxu0 %v12562_v43  ;;  %v13169_v41 = vld [vmem:[%s23801_s3 + $0xd98] sm:$0xf]  ;;  %7208 = vmatpush.bf16.msrb.mxu3 %v13294_v20  ;;  %v12786_v45 = vor.u32 %v15344_v47, %v12785_v22  ;;  %v11926_v20 = vor.u32 %v15124_v44, %v11923_v32  ;;  %v11635_v4 = vld [vmem:[%s23801_s3 + $0x1b8] sm:$0xf0] }
 0x403   :  { %v15440_v46 = vld [vmem:[%s23801_s3 + $0xdb4] sm:$0xf0]  ;;  %v15116_v47 = vld [vmem:[%s23801_s3 + $0x39c] sm:$0xf] }
 0x404   :  { %7285 = vmatpush.bf16.msrb.mxu1 %v12818_v34  ;;  %v12497_v39 = vld [vmem:[%s23801_s3 + $0x858] sm:$0xf]  ;;  %7249 = vmatpush.bf16.msra.mxu2 %v11954_v63  ;;  %v13170_v3 = vor.u32 %v15440_v46, %v13169_v41  ;;  %v11670_v34 = vor.u32 %v15060_v56, %v11667_v60  ;;  %v11638_v41 = vor.u32 %v15052_v50, %v11635_v4  ;;  %v7043_v55 = vpop.f32.mrf.mxu2  ;;  %v15028_v60 = vld [vmem:[%s23801_s3 + $0xdc] sm:$0xf] }
 0x405   :  { %v15272_v28 = vld [vmem:[%s23801_s3 + $0x874] sm:$0xf0]  ;;  %v11894_v46 = vor.u32 %v15116_v47, %v11891_v24  ;;  %v12179_v50 = vld [vmem:[%s23801_s3 + $0x5f8] sm:$0xf0] }
 0x406   :  { %v12753_v36 = vld [vmem:[%s23801_s3 + $0xa58] sm:$0xf]  ;;  %7273 = vmatpush.bf16.msrb.mxu0 %v12530_v31  ;;  %v12498_v53 = vor.u32 %v15272_v28, %v12497_v39  ;;  %7209 = vmatpush.bf16.msrb.mxu3 %v13262_v23 }
 0x407   :  { %v15336_v7 = vld [vmem:[%s23801_s3 + $0xa74] sm:$0xf0]  ;;  %7250 = vmatmul.bf16.vlgmr.msra.gmra.mxu2 %v18936_v62 }
 0x408   :  { %7294 = vmatpush.bf16.msrb.mxu2 %v13202_v26  ;;  %v12433_v33 = vld [vmem:[%s23801_s3 + $0x7d8] sm:$0xf]  ;;  %7286 = vmatpush.bf16.msrb.mxu1 %v12786_v45  ;;  %v12754_v61 = vor.u32 %v15336_v7, %v12753_v36  ;;  %v11603_v45 = vld [vmem:[%s23801_s3 + $0x178] sm:$0xf0] }
 0x409   :  { %v15256_v48 = vld [vmem:[%s23801_s3 + $0x7f4] sm:$0xf0]  ;;  %v11606_v16 = vor.u32 %v15044_v59, %v11603_v45 }
 0x40a   :  { %v13137_v0 = vld [vmem:[%s23801_s3 + $0xd58] sm:$0xf]  ;;  %v12434_v38 = vor.u32 %v15256_v48, %v12433_v33  ;;  %7274 = vmatpush.bf16.msrb.mxu0 %v12498_v53  ;;  %7210 = vmatpush.bf16.msrb.mxu3 %v13230_v54  ;;  %v11862_v33 = vor.u32 %v15108_v15, %v11859_v51  ;;  %v11571_v53 = vld [vmem:[%s23801_s3 + $0x138] sm:$0xf0]  ;;  %v21548_v48 = vadd.f32 %v7043_v55, %v21385_v13  ;;  %v7004_v4 = vpop.f32.mrf.mxu3 }
 0x40b   :  { %v15432_v1 = vld [vmem:[%s23801_s3 + $0xd74] sm:$0xf0]  ;;  %v21603_v24 = vadd.f32 %v7004_v4, %v21442_v30  ;;  %v11763_v30 = vld [vmem:[%s23801_s3 + $0x2b8] sm:$0xf0] }
 0x40c   :  { %v12465_v58 = vld [vmem:[%s23801_s3 + $0x818] sm:$0xf]  ;;  %7295 = vmatpush.bf16.msrb.mxu2 %v13170_v3  ;;  %v13138_v19 = vor.u32 %v15432_v1, %v13137_v0  ;;  %7287 = vmatpush.bf16.msrb.mxu1 %v12754_v61  ;;  %v15100_v61 = vld [vmem:[%s23801_s3 + $0x31c] sm:$0xf] }
 0x40d   :  { %v15264_v40 = vld [vmem:[%s23801_s3 + $0x834] sm:$0xf0]  ;;  %7211 = vmatmul.bf16.vlgmr.msrb.gmra.mxu3 %v19630_v8  ;;  %v21576_v44 = vpop.f32.mrf.mxu1  ;;  %v15012_v51 = vld [vmem:[%s23801_s3 + $0x5c] sm:$0xf] }
 0x40e   :  { %v12721_v6 = vld [vmem:[%s23801_s3 + $0xa18] sm:$0xf]  ;;  %v12466_v42 = vor.u32 %v15264_v40, %v12465_v58  ;;  %7255 = vmatpush.bf16.msra.mxu3 %v12434_v38  ;;  %v11827_v58 = vld [vmem:[%s23801_s3 + $0x338] sm:$0xf0] }
 0x40f   :  { %v15328_v2 = vld [vmem:[%s23801_s3 + $0xa34] sm:$0xf0]  ;;  %v11830_v56 = vor.u32 %v15100_v61, %v11827_v58  ;;  %v11539_v38 = vld [vmem:[%s23801_s3 + $0xf8] sm:$0xf0] }
 0x410   :  { %v12401_v29 = vld [vmem:[%s23801_s3 + $0x798] sm:$0xf]  ;;  %v12722_v18 = vor.u32 %v15328_v2, %v12721_v6  ;;  %7296 = vmatpush.bf16.msrb.mxu2 %v13138_v19  ;;  %7275 = vmatpush.bf16.msrb.mxu0 %v12466_v42  ;;  %v11574_v2 = vor.u32 %v15036_v57, %v11571_v53  ;;  %v21574_v19 = vpop.f32.mrf.mxu0  ;;  %v15092_v42 = vld [vmem:[%s23801_s3 + $0x2dc] sm:$0xf] }
 0x411   :  { %v15248_v43 = vld [vmem:[%s23801_s3 + $0x7b4] sm:$0xf0]  ;;  %v11475_v55 = vld [vmem:[%s23801_s3 + $0x78] sm:$0xf0] }
 0x412   :  { %v13105_v17 = vld [vmem:[%s23801_s3 + $0xd18] sm:$0xf]  ;;  %v12402_v63 = vor.u32 %v15248_v43, %v12401_v29  ;;  %7288 = vmatpush.bf16.msrb.mxu1 %v12722_v18  ;;  %v11795_v43 = vld [vmem:[%s23801_s3 + $0x2f8] sm:$0xf0] }
 0x413   :  { %v15424_v37 = vld [vmem:[%s23801_s3 + $0xd34] sm:$0xf0]  ;;  %7276 = vmatmul.bf16.vlgmr.msrb.gmra.mxu0 %v19113_v9  ;;  %v11798_v47 = vor.u32 %v15092_v42, %v11795_v43  ;;  %v15172_v58 = vld [vmem:[%s23801_s3 + $0x55c] sm:$0xf] }
 0x414   :  { %v13106_v22 = vor.u32 %v15424_v37, %v13105_v17  ;;  %v12369_v26 = vld [vmem:[%s23801_s3 + $0x758] sm:$0xf]  ;;  %7320 = vmatpush.bf16.msra.mxu0 %v11670_v34  ;;  %7256 = vmatpush.bf16.msra.mxu3 %v12402_v63  ;;  %v7045_v63 = vpop.f32.mrf.mxu2  ;;  %v15316_v43 = vld [vmem:[%s23801_s3 + $0x9dc] sm:$0xf] }
 0x415   :  { %v15240_v11 = vld [vmem:[%s23801_s3 + $0x774] sm:$0xf0]  ;;  %7289 = vmatmul.bf16.vlgmr.msrb.gmra.mxu1 %v19124_v5  ;;  %v15164_v4 = vld [vmem:[%s23801_s3 + $0x51c] sm:$0xf] }
 0x416   :  { %v13073_v27 = vld [vmem:[%s23801_s3 + $0xcd8] sm:$0xf]  ;;  %7333 = vmatpush.bf16.msra.mxu1 %v11926_v20  ;;  %7297 = vmatpush.bf16.msrb.mxu2 %v13106_v22  ;;  %v12370_v39 = vor.u32 %v15240_v11, %v12369_v26  ;;  %v15188_v20 = vld [vmem:[%s23801_s3 + $0x5dc] sm:$0xf]  ;;  %v11542_v22 = vor.u32 %v15028_v60, %v11539_v38 }
 0x417   :  { %v15416_v31 = vld [vmem:[%s23801_s3 + $0xcf4] sm:$0xf0]  ;;  %v11443_v60 = vld [vmem:[%s23801_s3 + $0x38] sm:$0xf0] }
 0x418   :  { %v13074_v28 = vor.u32 %v15416_v31, %v13073_v27  ;;  %v12337_v23 = vld [vmem:[%s23801_s3 + $0x718] sm:$0xf]  ;;  %7321 = vmatpush.bf16.msra.mxu0 %v11638_v41  ;;  %7257 = vmatpush.bf16.msra.mxu3 %v12370_v39  ;;  %v15020_v27 = vld [vmem:[%s23801_s3 + $0x9c] sm:$0xf] }
 0x419   :  { %v15232_v36 = vld [vmem:[%s23801_s3 + $0x734] sm:$0xf0]  ;;  %v11507_v31 = vld [vmem:[%s23801_s3 + $0xb8] sm:$0xf0] }
 0x41a   :  { %v13041_v7 = vld [vmem:[%s23801_s3 + $0xc98] sm:$0xf]  ;;  %7334 = vmatpush.bf16.msra.mxu1 %v11894_v46  ;;  %7298 = vmatpush.bf16.msrb.mxu2 %v13074_v28  ;;  %v12338_v0 = vor.u32 %v15232_v36, %v12337_v23  ;;  %v15084_v41 = vld [vmem:[%s23801_s3 + $0x29c] sm:$0xf]  ;;  %v12182_v46 = vor.u32 %v15188_v20, %v12179_v50  ;;  %v11510_v15 = vor.u32 %v15020_v27, %v11507_v31  ;;  %v7071_v23 = vpop.f32.mrf.mxu0  ;;  %v7084_v36 = vpop.f32.mrf.mxu1 }
 0x41b   :  { %v15408_v3 = vld [vmem:[%s23801_s3 + $0xcb4] sm:$0xf0]  ;;  %v15180_v39 = vld [vmem:[%s23801_s3 + $0x59c] sm:$0xf] }
 0x41c   :  { %v13042_v1 = vor.u32 %v15408_v3, %v13041_v7  ;;  %v12305_v40 = vld [vmem:[%s23801_s3 + $0x6d8] sm:$0xf]  ;;  %7322 = vmatpush.bf16.msra.mxu0 %v11606_v16  ;;  %7258 = vmatpush.bf16.msra.mxu3 %v12338_v0  ;;  %v12147_v28 = vld [vmem:[%s23801_s3 + $0x5b8] sm:$0xf0]  ;;  %v11766_v7 = vor.u32 %v15084_v41, %v11763_v30 }
 0x41d   :  { %v15224_v6 = vld [vmem:[%s23801_s3 + $0x6f4] sm:$0xf0]  ;;  %v15076_v16 = vld [vmem:[%s23801_s3 + $0x25c] sm:$0xf]  ;;  %v12150_v57 = vor.u32 %v15180_v39, %v12147_v28 }
 0x41e   :  { %v13009_v13 = vld [vmem:[%s23801_s3 + $0xc58] sm:$0xf]  ;;  %7335 = vmatpush.bf16.msra.mxu1 %v11862_v33  ;;  %7299 = vmatpush.bf16.msrb.mxu2 %v13042_v1  ;;  %v12306_v32 = vor.u32 %v15224_v6, %v12305_v40  ;;  %v11731_v33 = vld [vmem:[%s23801_s3 + $0x278] sm:$0xf0]  ;;  %v7006_v6 = vpop.f32.mrf.mxu3 }
 0x41f   :  { %v15400_v54 = vld [vmem:[%s23801_s3 + $0xc74] sm:$0xf0]  ;;  %v12115_v40 = vld [vmem:[%s23801_s3 + $0x578] sm:$0xf0] }
 0x420   :  { %v13010_v29 = vor.u32 %v15400_v54, %v13009_v13  ;;  %v12273_v17 = vld [vmem:[%s23801_s3 + $0x698] sm:$0xf]  ;;  %7323 = vmatpush.bf16.msra.mxu0 %v11574_v2  ;;  %7259 = vmatpush.bf16.msra.mxu3 %v12306_v32  ;;  %v11478_v13 = vor.u32 %v15012_v51, %v11475_v55  ;;  %v15004_v54 = vld [vmem:[%s23801_s3 + $0x1c] sm:$0xf]  ;;  %v11734_v2 = vor.u32 %v15076_v16, %v11731_v33 }
 0x421   :  { %v15216_v37 = vld [vmem:[%s23801_s3 + $0x6b4] sm:$0xf0]  ;;  %v15068_v38 = vld [vmem:[%s23801_s3 + $0x21c] sm:$0xf]  ;;  %v12118_v42 = vor.u32 %v15172_v58, %v12115_v40  ;;  %v11446_v50 = vor.u32 %v15004_v54, %v11443_v60 }
 0x422   :  { %v12977_v18 = vld [vmem:[%s23801_s3 + $0xc18] sm:$0xf]  ;;  %7336 = vmatpush.bf16.msra.mxu1 %v11830_v56  ;;  %7300 = vmatpush.bf16.msrb.mxu2 %v13010_v29  ;;  %v12274_v26 = vor.u32 %v15216_v37, %v12273_v17  ;;  %v11699_v32 = vld [vmem:[%s23801_s3 + $0x238] sm:$0xf0] }
 0x423   :  { %v15392_v34 = vld [vmem:[%s23801_s3 + $0xc34] sm:$0xf0]  ;;  %v12691_v17 = vld [vmem:[%s23801_s3 + $0x9f8] sm:$0xf0] }
 0x424   :  { %v12978_v11 = vor.u32 %v15392_v34, %v12977_v18  ;;  %v12241_v59 = vld [vmem:[%s23801_s3 + $0x658] sm:$0xf]  ;;  %7324 = vmatpush.bf16.msra.mxu0 %v11542_v22  ;;  %7260 = vmatpush.bf16.msra.mxu3 %v12274_v26  ;;  %v15380_v37 = vld [vmem:[%s23801_s3 + $0xbdc] sm:$0xf]  ;;  %v11702_v22 = vor.u32 %v15068_v38, %v11699_v32 }
 0x425   :  { %v15208_v45 = vld [vmem:[%s23801_s3 + $0x674] sm:$0xf0]  ;;  %v12947_v18 = vld [vmem:[%s23801_s3 + $0xbf8] sm:$0xf0] }
 0x426   :  { %7337 = vmatpush.bf16.msra.mxu1 %v11798_v47  ;;  %7301 = vmatpush.bf16.msrb.mxu2 %v12978_v11  ;;  %v12242_v3 = vor.u32 %v15208_v45, %v12241_v59  ;;  %v12209_v53 = vld [vmem:[%s23801_s3 + $0x618] sm:$0xf]  ;;  %v12083_v63 = vld [vmem:[%s23801_s3 + $0x538] sm:$0xf0]  ;;  %v12694_v47 = vor.u32 %v15316_v43, %v12691_v17  ;;  %v12950_v26 = vor.u32 %v15380_v37, %v12947_v18 }
 0x427   :  { %v15200_v0 = vld [vmem:[%s23801_s3 + $0x634] sm:$0xf0]  ;;  %v15308_v27 = vld [vmem:[%s23801_s3 + $0x99c] sm:$0xf] }
 0x428   :  { %v13457_v1 = vld [vmem:[%s23801_s3 + $0xfd8] sm:$0xf]  ;;  %7325 = vmatpush.bf16.msra.mxu0 %v11510_v15  ;;  %7261 = vmatpush.bf16.msra.mxu3 %v12242_v3  ;;  %v12210_v56 = vor.u32 %v15200_v0, %v12209_v53  ;;  %v12659_v31 = vld [vmem:[%s23801_s3 + $0x9b8] sm:$0xf0]  ;;  %v21747_v0 = vpop.f32.mrf.mxu2 }
 0x429   :  { %v15512_v61 = vld [vmem:[%s23801_s3 + $0xff4] sm:$0xf0]  ;;  %7302 = vmatmul.bf16.vlgmr.msrb.gmra.mxu2 %v19396_v49  ;;  %v15372_v41 = vld [vmem:[%s23801_s3 + $0xb9c] sm:$0xf]  ;;  %v12662_v15 = vor.u32 %v15308_v27, %v12659_v31 }
 0x42a   :  { %7346 = vmatpush.bf16.msra.mxu2 %v12182_v46  ;;  %7338 = vmatpush.bf16.msra.mxu1 %v11766_v7  ;;  %v13458_v29 = vor.u32 %v15512_v61, %v13457_v1  ;;  %v13425_v34 = vld [vmem:[%s23801_s3 + $0xf98] sm:$0xf]  ;;  %v12086_v46 = vor.u32 %v15164_v4, %v12083_v63  ;;  %v12915_v30 = vld [vmem:[%s23801_s3 + $0xbb8] sm:$0xf0]  ;;  %v4021_v61 = vperm.slane %v21334_v25, 5 }
 0x42b   :  { %v15504_v20 = vld [vmem:[%s23801_s3 + $0xfb4] sm:$0xf0]  ;;  %v15156_v39 = vld [vmem:[%s23801_s3 + $0x4dc] sm:$0xf]  ;;  %v12918_v51 = vor.u32 %v15372_v41, %v12915_v30 }
 0x42c   :  { %7326 = vmatpush.bf16.msra.mxu0 %v11478_v13  ;;  %7262 = vmatpush.bf16.msra.mxu3 %v12210_v56  ;;  %v13426_v11 = vor.u32 %v15504_v20, %v13425_v34  ;;  %v13393_v59 = vld [vmem:[%s23801_s3 + $0xf58] sm:$0xf]  ;;  %v12051_v28 = vld [vmem:[%s23801_s3 + $0x4f8] sm:$0xf0] }
 0x42d   :  { %v15496_v45 = vld [vmem:[%s23801_s3 + $0xf74] sm:$0xf0]  ;;  %v15300_v36 = vld [vmem:[%s23801_s3 + $0x95c] sm:$0xf]  ;;  %v12054_v55 = vor.u32 %v15156_v39, %v12051_v28  ;;  %v7134_v20 = vpop.f32.mrf.mxu1  ;;  %v7056_v27 = vpop.f32.mrf.mxu3 }
 0x42e   :  { %7347 = vmatpush.bf16.msra.mxu2 %v12150_v57  ;;  %7339 = vmatpush.bf16.msra.mxu1 %v11734_v2  ;;  %v13394_v23 = vor.u32 %v15496_v45, %v13393_v59  ;;  %v12627_v7 = vld [vmem:[%s23801_s3 + $0x978] sm:$0xf0]  ;;  %v13361_v33 = vld [vmem:[%s23801_s3 + $0xf18] sm:$0xf]  ;;  %v7057_v59 = vadd.f32 %v7056_v27, %v21548_v48 }
 0x42f   :  { %7263 = vmatmul.bf16.vlgmr.msra.gmra.mxu3 %v18945_v21  ;;  %v15364_v3 = vld [vmem:[%s23801_s3 + $0xb5c] sm:$0xf]  ;;  %v15488_v57 = vld [vmem:[%s23801_s3 + $0xf34] sm:$0xf0]  ;;  %v12630_v1 = vor.u32 %v15300_v36, %v12627_v7 }
 0x430   :  { %7307 = vmatpush.bf16.msrb.mxu3 %v13458_v29  ;;  %7327 = vmatpush.bf16.msra.mxu0 %v11446_v50  ;;  %v12883_v16 = vld [vmem:[%s23801_s3 + $0xb78] sm:$0xf0]  ;;  %v13362_v40 = vor.u32 %v15488_v57, %v13361_v33  ;;  %v13329_v2 = vld [vmem:[%s23801_s3 + $0xed8] sm:$0xf]  ;;  %v7121_v29 = vpop.f32.mrf.mxu0  ;;  %v7097_v31 = vpop.f32.mrf.mxu2  ;;  %v7070_v36 = vadd.f32 %v21574_v19, %v7057_v59  ;;  %v13561_v59 = vld [vmem:[%s23803_s5 + $0xc0] sm:$0xf] }
 0x431   :  { %v15148_v53 = vld [vmem:[%s23801_s3 + $0x49c] sm:$0xf]  ;;  %v12886_v58 = vor.u32 %v15364_v3, %v12883_v16  ;;  %v15480_v56 = vld [vmem:[%s23801_s3 + $0xef4] sm:$0xf0]  ;;  %v7122_v34 = vadd.f32 %v7121_v29, %v4021_v61 }
 0x432   :  { %7348 = vmatpush.bf16.msra.mxu2 %v12118_v42  ;;  %7340 = vmatpush.bf16.msra.mxu1 %v11702_v22  ;;  %v12595_v6 = vld [vmem:[%s23801_s3 + $0x938] sm:$0xf0]  ;;  %v13330_v43 = vor.u32 %v15480_v56, %v13329_v2  ;;  %v13297_v63 = vld [vmem:[%s23801_s3 + $0xe98] sm:$0xf]  ;;  %v7083_v61 = vadd.f32 %v21576_v44, %v7070_v36 }
 0x433   :  { %7328 = vmatmul.bf16.vlgmr.msra.gmra.mxu0 %v18932_v14  ;;  %v12019_v14 = vld [vmem:[%s23801_s3 + $0x4b8] sm:$0xf0]  ;;  %v15472_v22 = vld [vmem:[%s23801_s3 + $0xeb4] sm:$0xf0] }
 0x434   :  { %7372 = vmatpush.bf16.msrb.mxu0 %v12694_v47  ;;  %7308 = vmatpush.bf16.msrb.mxu3 %v13426_v11  ;;  %v15356_v13 = vld [vmem:[%s23801_s3 + $0xb1c] sm:$0xf]  ;;  %v12022_v54 = vor.u32 %v15148_v53, %v12019_v14  ;;  %v21798_v11 = vadd.f32 %v7134_v20, %v7122_v34  ;;  %v13298_v39 = vor.u32 %v15472_v22, %v13297_v63  ;;  %v13265_v3 = vld [vmem:[%s23801_s3 + $0xe58] sm:$0xf]  ;;  %v15543_v34 = vld [vmem:[%s23803_s5 + $0xec] sm:$0xf0] }
 0x435   :  { %7341 = vmatmul.bf16.vlgmr.msra.gmra.mxu1 %v18934_v35  ;;  %v15292_v35 = vld [vmem:[%s23801_s3 + $0x91c] sm:$0xf]  ;;  %v15456_v44 = vld [vmem:[%s23801_s3 + $0xe34] sm:$0xf0]  ;;  %v21855_v2 = vadd.f32 %v21747_v0, %v7083_v61  ;;  %v7058_v56 = vpop.f32.mrf.mxu3  ;;  %v15575_v63 = vld [vmem:[%s23803_s5 + $0x1ec] sm:$0xf0] }
 0x436   :  { %7385 = vmatpush.bf16.msrb.mxu1 %v12950_v26  ;;  %7349 = vmatpush.bf16.msra.mxu2 %v12086_v46  ;;  %v12851_v25 = vld [vmem:[%s23801_s3 + $0xb38] sm:$0xf0]  ;;  %v12598_v32 = vor.u32 %v15292_v35, %v12595_v6  ;;  %v15563_v56 = vld [vmem:[%s23803_s5 + $0x18c] sm:$0xf0] }
 0x437   :  { %v15140_v60 = vld [vmem:[%s23801_s3 + $0x45c] sm:$0xf]  ;;  %v12854_v42 = vor.u32 %v15356_v13, %v12851_v25 }
 0x438   :  { %7373 = vmatpush.bf16.msrb.mxu0 %v12662_v15  ;;  %7309 = vmatpush.bf16.msrb.mxu3 %v13394_v23  ;;  %v11987_v38 = vld [vmem:[%s23801_s3 + $0x478] sm:$0xf0]  ;;  %v7123_v19 = vpop.f32.mrf.mxu0 }
 0x439   :  { %v15284_v17 = vld [vmem:[%s23801_s3 + $0x8dc] sm:$0xf]  ;;  %v11990_v50 = vor.u32 %v15140_v60, %v11987_v38 }
 0x43a   :  { %7386 = vmatpush.bf16.msrb.mxu1 %v12918_v51  ;;  %7350 = vmatpush.bf16.msra.mxu2 %v12054_v55  ;;  %v12563_v37 = vld [vmem:[%s23801_s3 + $0x8f8] sm:$0xf0]  ;;  %v15464_v55 = vld [vmem:[%s23801_s3 + $0xe74] sm:$0xf0] }
 0x43b   :  { %v15348_v18 = vld [vmem:[%s23801_s3 + $0xadc] sm:$0xf]  ;;  %v12566_v41 = vor.u32 %v15284_v17, %v12563_v37 }
 0x43c   :  { %7374 = vmatpush.bf16.msrb.mxu0 %v12630_v1  ;;  %7310 = vmatpush.bf16.msrb.mxu3 %v13362_v40  ;;  %v12819_v4 = vld [vmem:[%s23801_s3 + $0xaf8] sm:$0xf0]  ;;  %v13266_v40 = vor.u32 %v15464_v55, %v13265_v3 }
 0x43d   :  { %v15132_v47 = vld [vmem:[%s23801_s3 + $0x41c] sm:$0xf]  ;;  %v12822_v45 = vor.u32 %v15348_v18, %v12819_v4  ;;  %v13577_v18 = vld [vmem:[%s23803_s5 + $0xe0] sm:$0xf] }
 0x43e   :  { %7387 = vmatpush.bf16.msrb.mxu1 %v12886_v58  ;;  %7351 = vmatpush.bf16.msra.mxu2 %v12022_v54  ;;  %v11955_v26 = vld [vmem:[%s23801_s3 + $0x438] sm:$0xf0]  ;;  %v7136_v58 = vpop.f32.mrf.mxu1  ;;  %v13233_v54 = vld [vmem:[%s23801_s3 + $0xe18] sm:$0xf]  ;;  %v13705_v4 = vld [vmem:[%s23803_s5 + $0x1e0] sm:$0xf] }
 0x43f   :  { %v15444_v46 = vld [vmem:[%s23801_s3 + $0xddc] sm:$0xf]  ;;  %v11958_v51 = vor.u32 %v15132_v47, %v11955_v26  ;;  %v13234_v37 = vor.u32 %v15456_v44, %v13233_v54 }
 0x440   :  { %7375 = vmatpush.bf16.msrb.mxu0 %v12598_v32  ;;  %v13203_v30 = vld [vmem:[%s23801_s3 + $0xdf8] sm:$0xf0]  ;;  %7311 = vmatpush.bf16.msrb.mxu3 %v13330_v43 }
 0x441   :  { %v15276_v28 = vld [vmem:[%s23801_s3 + $0x89c] sm:$0xf]  ;;  %v13206_v7 = vor.u32 %v15444_v46, %v13203_v30  ;;  %v13578_v46 = vor.u32 %v15543_v34, %v13577_v18  ;;  %v13706_v30 = vor.u32 %v15575_v63, %v13705_v4 }
 0x442   :  { %7388 = vmatpush.bf16.msrb.mxu1 %v12854_v42  ;;  %v12531_v15 = vld [vmem:[%s23801_s3 + $0x8b8] sm:$0xf0]  ;;  %7352 = vmatpush.bf16.msra.mxu2 %v11990_v50 }
 0x443   :  { %v15340_v23 = vld [vmem:[%s23801_s3 + $0xa9c] sm:$0xf]  ;;  %v12534_v16 = vor.u32 %v15276_v28, %v12531_v15  ;;  %v13689_v15 = vld [vmem:[%s23803_s5 + $0x1c0] sm:$0xf] }
 0x444   :  { %v12787_v48 = vld [vmem:[%s23801_s3 + $0xab8] sm:$0xf0]  ;;  %7376 = vmatpush.bf16.msrb.mxu0 %v12566_v41  ;;  %7312 = vmatpush.bf16.msrb.mxu3 %v13298_v39 }
 0x445   :  { %v15436_v33 = vld [vmem:[%s23801_s3 + $0xd9c] sm:$0xf]  ;;  %v12790_v53 = vor.u32 %v15340_v23, %v12787_v48 }
 0x446   :  { %v13171_v57 = vld [vmem:[%s23801_s3 + $0xdb8] sm:$0xf0]  ;;  %7389 = vmatpush.bf16.msrb.mxu1 %v12822_v45  ;;  %7353 = vmatpush.bf16.msra.mxu2 %v11958_v51  ;;  %v15539_v45 = vld [vmem:[%s23803_s5 + $0xcc] sm:$0xf0] }
 0x447   :  { %v15268_v14 = vld [vmem:[%s23801_s3 + $0x85c] sm:$0xf]  ;;  %v13174_v13 = vor.u32 %v15436_v33, %v13171_v57  ;;  %v15571_v51 = vld [vmem:[%s23803_s5 + $0x1cc] sm:$0xf0]  ;;  %v13562_v3 = vor.u32 %v15539_v45, %v13561_v59 }
 0x448   :  { %v12499_v1 = vld [vmem:[%s23801_s3 + $0x878] sm:$0xf0]  ;;  %7377 = vmatpush.bf16.msrb.mxu0 %v12534_v16  ;;  %7313 = vmatpush.bf16.msrb.mxu3 %v13266_v40  ;;  %v13690_v55 = vor.u32 %v15571_v51, %v13689_v15  ;;  %v13545_v16 = vld [vmem:[%s23803_s5 + $0xa0] sm:$0xf]  ;;  %v15535_v33 = vld [vmem:[%s23803_s5 + $0xac] sm:$0xf0] }
 0x449   :  { %v15332_v35 = vld [vmem:[%s23801_s3 + $0xa5c] sm:$0xf]  ;;  %v12502_v60 = vor.u32 %v15268_v14, %v12499_v1  ;;  %7354 = vmatmul.bf16.vlgmr.msra.gmra.mxu2 %v18936_v62  ;;  %v15567_v14 = vld [vmem:[%s23803_s5 + $0x1ac] sm:$0xf0]  ;;  %v13625_v15 = vld [vmem:[%s23803_s5 + $0x140] sm:$0xf] }
 0x44a   :  { %v12755_v6 = vld [vmem:[%s23801_s3 + $0xa78] sm:$0xf0]  ;;  %7398 = vmatpush.bf16.msrb.mxu2 %v13206_v7  ;;  %7390 = vmatpush.bf16.msrb.mxu1 %v12790_v53  ;;  %v13673_v53 = vld [vmem:[%s23803_s5 + $0x1a0] sm:$0xf] }
 0x44b   :  { %v15252_v25 = vld [vmem:[%s23801_s3 + $0x7dc] sm:$0xf]  ;;  %v12758_v0 = vor.u32 %v15332_v35, %v12755_v6  ;;  %v21954_v35 = vpop.f32.mrf.mxu2  ;;  %v13546_v6 = vor.u32 %v15535_v33, %v13545_v16  ;;  %v13481_v16 = vld [vmem:[%s23803_s5 + $0x20] sm:$0xf] }
 0x44c   :  { %v12435_v38 = vld [vmem:[%s23801_s3 + $0x7f8] sm:$0xf0]  ;;  %7378 = vmatpush.bf16.msrb.mxu0 %v12502_v60  ;;  %7314 = vmatpush.bf16.msrb.mxu3 %v13234_v37 }
 0x44d   :  { %v15428_v32 = vld [vmem:[%s23801_s3 + $0xd5c] sm:$0xf]  ;;  %v12438_v20 = vor.u32 %v15252_v25, %v12435_v38  ;;  %v13657_v25 = vld [vmem:[%s23803_s5 + $0x180] sm:$0xf] }
 0x44e   :  { %v13139_v29 = vld [vmem:[%s23801_s3 + $0xd78] sm:$0xf0]  ;;  %7399 = vmatpush.bf16.msrb.mxu2 %v13174_v13  ;;  %7391 = vmatpush.bf16.msrb.mxu1 %v12758_v0  ;;  %v15531_v13 = vld [vmem:[%s23803_s5 + $0x8c] sm:$0xf0]  ;;  %v21986_v37 = vpop.f32.mrf.mxu0 }
 0x44f   :  { %v15260_v42 = vld [vmem:[%s23801_s3 + $0x81c] sm:$0xf]  ;;  %v13142_v50 = vor.u32 %v15428_v32, %v13139_v29  ;;  %7315 = vmatmul.bf16.vlgmr.msrb.gmra.mxu3 %v19630_v8 }
 0x450   :  { %v12467_v43 = vld [vmem:[%s23801_s3 + $0x838] sm:$0xf0]  ;;  %7359 = vmatpush.bf16.msra.mxu3 %v12438_v20  ;;  %v13641_v20 = vld [vmem:[%s23803_s5 + $0x160] sm:$0xf] }
 0x451   :  { %v15324_v17 = vld [vmem:[%s23801_s3 + $0xa1c] sm:$0xf]  ;;  %v12470_v47 = vor.u32 %v15260_v42, %v12467_v43  ;;  %v13658_v42 = vor.u32 %v15563_v56, %v13657_v25  ;;  %v13513_v43 = vld [vmem:[%s23803_s5 + $0x60] sm:$0xf] }
 0x452   :  { %v12723_v62 = vld [vmem:[%s23801_s3 + $0xa38] sm:$0xf0]  ;;  %7400 = vmatpush.bf16.msrb.mxu2 %v13142_v50  ;;  %v15559_v50 = vld [vmem:[%s23803_s5 + $0x16c] sm:$0xf0]  ;;  %v13465_v56 = vld [vmem:[%s23803_s5] sm:$0xf] }
 0x453   :  { %v15244_v22 = vld [vmem:[%s23801_s3 + $0x79c] sm:$0xf]  ;;  %v12726_v41 = vor.u32 %v15324_v17, %v12723_v62  ;;  %7379 = vmatpush.bf16.msrb.mxu0 %v12470_v47  ;;  %v15527_v17 = vld [vmem:[%s23803_s5 + $0x6c] sm:$0xf0]  ;;  %v21988_v62 = vpop.f32.mrf.mxu1 }
 0x454   :  { %v12403_v26 = vld [vmem:[%s23801_s3 + $0x7b8] sm:$0xf0] }
 0x455   :  { %v15420_v27 = vld [vmem:[%s23801_s3 + $0xd1c] sm:$0xf]  ;;  %v12406_v39 = vor.u32 %v15244_v22, %v12403_v26  ;;  %7392 = vmatpush.bf16.msrb.mxu1 %v12726_v41  ;;  %v13833_v26 = vld [vmem:[%s23803_s5 + $0x2e0] sm:$0xf]  ;;  %v7149_v41 = vpop.f32.mrf.mxu2 }
 0x456   :  { %v13107_v31 = vld [vmem:[%s23801_s3 + $0xd38] sm:$0xf0]  ;;  %7380 = vmatmul.bf16.vlgmr.msrb.gmra.mxu0 %v19113_v9  ;;  %v13674_v9 = vor.u32 %v15567_v14, %v13673_v53  ;;  %v7175_v33 = vpop.f32.mrf.mxu0  ;;  %v15519_v14 = vld [vmem:[%s23803_s5 + $0x2c] sm:$0xf0] }
 0x457   :  { %v13110_v28 = vor.u32 %v15420_v27, %v13107_v31  ;;  %v15236_v23 = vld [vmem:[%s23801_s3 + $0x75c] sm:$0xf]  ;;  %8986 = vmatpush.bf16.msra.mxu0 %v13578_v46  ;;  %7360 = vmatpush.bf16.msra.mxu3 %v12406_v39  ;;  %v15607_v27 = vld [vmem:[%s23803_s5 + $0x2ec] sm:$0xf0]  ;;  %v22014_v31 = vpop.f32.mrf.mxu3  ;;  %v13514_v46 = vor.u32 %v15527_v17, %v13513_v43  ;;  %v13497_v39 = vld [vmem:[%s23803_s5 + $0x40] sm:$0xf]  ;;  %v13482_v25 = vor.u32 %v15519_v14, %v13481_v16 }
 0x458   :  { %v12371_v48 = vld [vmem:[%s23801_s3 + $0x778] sm:$0xf0]  ;;  %7393 = vmatmul.bf16.vlgmr.msrb.gmra.mxu1 %v19124_v5  ;;  %v13529_v5 = vld [vmem:[%s23803_s5 + $0x80] sm:$0xf]  ;;  %v13834_v51 = vor.u32 %v15607_v27, %v13833_v26  ;;  %v15671_v17 = vld [vmem:[%s23803_s5 + $0x4ec] sm:$0xf0] }
 0x459   :  { %v15412_v36 = vld [vmem:[%s23801_s3 + $0xcdc] sm:$0xf]  ;;  %8999 = vmatpush.bf16.msra.mxu1 %v13706_v30  ;;  %7401 = vmatpush.bf16.msrb.mxu2 %v13110_v28  ;;  %v12374_v57 = vor.u32 %v15236_v23, %v12371_v48  ;;  %v13530_v0 = vor.u32 %v15531_v13, %v13529_v5  ;;  %v13642_v30 = vor.u32 %v15559_v50, %v13641_v20  ;;  %v15523_v28 = vld [vmem:[%s23803_s5 + $0x4c] sm:$0xf0]  ;;  %v13801_v13 = vld [vmem:[%s23803_s5 + $0x2a0] sm:$0xf] }
 0x45a   :  { %v13075_v7 = vld [vmem:[%s23801_s3 + $0xcf8] sm:$0xf0]  ;;  %v15555_v23 = vld [vmem:[%s23803_s5 + $0x14c] sm:$0xf0]  ;;  %v14089_v43 = vld [vmem:[%s23803_s5 + $0x4e0] sm:$0xf] }
 0x45b   :  { %v13078_v19 = vor.u32 %v15412_v36, %v13075_v7  ;;  %v15228_v1 = vld [vmem:[%s23801_s3 + $0x71c] sm:$0xf]  ;;  %8987 = vmatpush.bf16.msra.mxu0 %v13562_v3  ;;  %7361 = vmatpush.bf16.msra.mxu3 %v12374_v57  ;;  %v13817_v7 = vld [vmem:[%s23803_s5 + $0x2c0] sm:$0xf]  ;;  %v15603_v3 = vld [vmem:[%s23803_s5 + $0x2cc] sm:$0xf0]  ;;  %v7188_v57 = vpop.f32.mrf.mxu1  ;;  %v14090_v41 = vor.u32 %v15671_v17, %v14089_v43 }
 0x45c   :  { %v12339_v61 = vld [vmem:[%s23801_s3 + $0x738] sm:$0xf0]  ;;  %v7425_v26 = vmax.f32 %v20772_v10, 0.0  ;;  %v15663_v16 = vld [vmem:[%s23803_s5 + $0x4ac] sm:$0xf0] }
 0x45d   :  { %v15404_v58 = vld [vmem:[%s23801_s3 + $0xc9c] sm:$0xf]  ;;  %9000 = vmatpush.bf16.msra.mxu1 %v13690_v55  ;;  %7402 = vmatpush.bf16.msrb.mxu2 %v13078_v19  ;;  %v12342_v54 = vor.u32 %v15228_v1, %v12339_v61  ;;  %v13498_v55 = vor.u32 %v15523_v28, %v13497_v39  ;;  %v13626_v19 = vor.u32 %v15555_v23, %v13625_v15  ;;  %v13609_v1 = vld [vmem:[%s23803_s5 + $0x120] sm:$0xf]  ;;  %v15551_v61 = vld [vmem:[%s23803_s5 + $0x12c] sm:$0xf0] }
 0x45e   :  { %v13043_v40 = vld [vmem:[%s23801_s3 + $0xcb8] sm:$0xf0]  ;;  %v15699_v39 = vld [vmem:[%s23803_s5 + $0x5cc] sm:$0xf0]  ;;  %v14185_v33 = vld [vmem:[%s23803_s5 + $0x5a0] sm:$0xf] }
 0x45f   :  { %v13046_v44 = vor.u32 %v15404_v58, %v13043_v40  ;;  %v15220_v60 = vld [vmem:[%s23801_s3 + $0x6dc] sm:$0xf]  ;;  %8988 = vmatpush.bf16.msra.mxu0 %v13546_v6  ;;  %7362 = vmatpush.bf16.msra.mxu3 %v12342_v54  ;;  %v13818_v58 = vor.u32 %v15603_v3, %v13817_v7  ;;  %v15599_v54 = vld [vmem:[%s23803_s5 + $0x2ac] sm:$0xf0]  ;;  %v22136_v7 = vpack.c.bf16 %v7425_v26, %v7425_v26 }
 0x460   :  { %v12307_v38 = vld [vmem:[%s23801_s3 + $0x6f8] sm:$0xf0]  ;;  %v15591_v23 = vld [vmem:[%s23803_s5 + $0x26c] sm:$0xf0] }
 0x461   :  { %v15396_v32 = vld [vmem:[%s23801_s3 + $0xc5c] sm:$0xf]  ;;  %9001 = vmatpush.bf16.msra.mxu1 %v13674_v9  ;;  %7403 = vmatpush.bf16.msrb.mxu2 %v13046_v44  ;;  %v12310_v18 = vor.u32 %v15220_v60, %v12307_v38  ;;  %v7110_v44 = vpop.f32.mrf.mxu3  ;;  %v13610_v60 = vor.u32 %v15551_v61, %v13609_v1  ;;  %v13753_v1 = vld [vmem:[%s23803_s5 + $0x240] sm:$0xf]  ;;  %v15587_v61 = vld [vmem:[%s23803_s5 + $0x24c] sm:$0xf0] }
 0x462   :  { %v13011_v29 = vld [vmem:[%s23801_s3 + $0xc78] sm:$0xf0]  ;;  %v15659_v44 = vld [vmem:[%s23803_s5 + $0x48c] sm:$0xf0] }
 0x463   :  { %v13014_v34 = vor.u32 %v15396_v32, %v13011_v29  ;;  %v15212_v4 = vld [vmem:[%s23801_s3 + $0x69c] sm:$0xf]  ;;  %8989 = vmatpush.bf16.msra.mxu0 %v13530_v0  ;;  %7363 = vmatpush.bf16.msra.mxu3 %v12310_v18  ;;  %v15515_v32 = vld [vmem:[%s23803_s5 + $0xc] sm:$0xf0]  ;;  %v13593_v29 = vld [vmem:[%s23803_s5 + $0x100] sm:$0xf] }
 0x464   :  { %v12275_v63 = vld [vmem:[%s23801_s3 + $0x6b8] sm:$0xf0]  ;;  %v14217_v18 = vld [vmem:[%s23803_s5 + $0x5e0] sm:$0xf] }
 0x465   :  { %v15388_v22 = vld [vmem:[%s23801_s3 + $0xc1c] sm:$0xf]  ;;  %9002 = vmatpush.bf16.msra.mxu1 %v13658_v42  ;;  %7404 = vmatpush.bf16.msrb.mxu2 %v13014_v34  ;;  %v12278_v59 = vor.u32 %v15212_v4, %v12275_v63  ;;  %v13802_v42 = vor.u32 %v15599_v54, %v13801_v13  ;;  %v15703_v34 = vld [vmem:[%s23803_s5 + $0x5ec] sm:$0xf0]  ;;  %v13466_v4 = vor.u32 %v15515_v32, %v13465_v56  ;;  %v13785_v63 = vld [vmem:[%s23803_s5 + $0x280] sm:$0xf] }
 0x466   :  { %v12979_v47 = vld [vmem:[%s23801_s3 + $0xc38] sm:$0xf0]  ;;  %v14041_v54 = vld [vmem:[%s23803_s5 + $0x480] sm:$0xf]  ;;  %v13754_v56 = vor.u32 %v15587_v61, %v13753_v1 }
 0x467   :  { %v12982_v45 = vor.u32 %v15388_v22, %v12979_v47  ;;  %v15204_v48 = vld [vmem:[%s23801_s3 + $0x65c] sm:$0xf]  ;;  %8990 = vmatpush.bf16.msra.mxu0 %v13514_v46  ;;  %7364 = vmatpush.bf16.msra.mxu3 %v12278_v59  ;;  %v15595_v22 = vld [vmem:[%s23803_s5 + $0x28c] sm:$0xf0]  ;;  %v7424_v47 = vmax.f32 %v20549_v52, 0.0  ;;  %v14218_v46 = vor.u32 %v15703_v34, %v14217_v18 }
 0x468   :  { %v12243_v36 = vld [vmem:[%s23801_s3 + $0x678] sm:$0xf0]  ;;  %v14073_v59 = vld [vmem:[%s23803_s5 + $0x4c0] sm:$0xf]  ;;  %v13786_v10 = vor.u32 %v15595_v22, %v13785_v63  ;;  %v15655_v34 = vld [vmem:[%s23803_s5 + $0x46c] sm:$0xf0] }
 0x469   :  { %9003 = vmatpush.bf16.msra.mxu1 %v13642_v30  ;;  %7405 = vmatpush.bf16.msrb.mxu2 %v12982_v45  ;;  %v12246_v53 = vor.u32 %v15204_v48, %v12243_v36  ;;  %v15196_v40 = vld [vmem:[%s23801_s3 + $0x61c] sm:$0xf]  ;;  %v15667_v45 = vld [vmem:[%s23803_s5 + $0x4cc] sm:$0xf0]  ;;  %v14201_v52 = vld [vmem:[%s23803_s5 + $0x5c0] sm:$0xf]  ;;  %v22134_v48 = vpack.c.bf16 %v7424_v47, %v7424_v47 }
 0x46a   :  { %v12211_v6 = vld [vmem:[%s23801_s3 + $0x638] sm:$0xf0]  ;;  %v14074_v36 = vor.u32 %v15667_v45, %v14073_v59  ;;  %v14202_v3 = vor.u32 %v15699_v39, %v14201_v52  ;;  %v14025_v18 = vld [vmem:[%s23803_s5 + $0x460] sm:$0xf]  ;;  %v15687_v22 = vld [vmem:[%s23803_s5 + $0x56c] sm:$0xf0] }
 0x46b   :  { %v15508_v9 = vld [vmem:[%s23801_s3 + $0xfdc] sm:$0xf]  ;;  %8991 = vmatpush.bf16.msra.mxu0 %v13498_v55  ;;  %7365 = vmatpush.bf16.msra.mxu3 %v12246_v53  ;;  %v12214_v38 = vor.u32 %v15196_v40, %v12211_v6  ;;  %v14057_v55 = vld [vmem:[%s23803_s5 + $0x4a0] sm:$0xf]  ;;  %v14026_v45 = vor.u32 %v15655_v34, %v14025_v18 }
 0x46c   :  { %v13459_v5 = vld [vmem:[%s23801_s3 + $0xff8] sm:$0xf0]  ;;  %7406 = vmatmul.bf16.vlgmr.msrb.gmra.mxu2 %v19396_v49  ;;  %v15547_v49 = vld [vmem:[%s23803_s5 + $0x10c] sm:$0xf0]  ;;  %v14058_v40 = vor.u32 %v15663_v16, %v14057_v55  ;;  %v22169_v6 = vld [vmem:[%s23802_s4] sm:$0xff] }
 0x46d   :  { %9012 = vmatpush.bf16.msra.mxu2 %v13834_v51  ;;  %9004 = vmatpush.bf16.msra.mxu1 %v13626_v19  ;;  %v13462_v0 = vor.u32 %v15508_v9, %v13459_v5  ;;  %v15500_v20 = vld [vmem:[%s23801_s3 + $0xf9c] sm:$0xf]  ;;  %v13594_v27 = vor.u32 %v15547_v49, %v13593_v29  ;;  %v13769_v51 = vld [vmem:[%s23803_s5 + $0x260] sm:$0xf]  ;;  %v15695_v19 = vld [vmem:[%s23803_s5 + $0x5ac] sm:$0xf0] }
 0x46e   :  { %v13427_v50 = vld [vmem:[%s23801_s3 + $0xfb8] sm:$0xf0]  ;;  %v13770_v57 = vor.u32 %v15591_v23, %v13769_v51  ;;  %v4022_v9 = vperm.slane %v22169_v6, 6  ;;  %v14186_v5 = vor.u32 %v15695_v19, %v14185_v33  ;;  %v13737_v29 = vld [vmem:[%s23803_s5 + $0x220] sm:$0xf] }
 0x46f   :  { %8992 = vmatpush.bf16.msra.mxu0 %v13482_v25  ;;  %7366 = vmatpush.bf16.msra.mxu3 %v12214_v38  ;;  %v13430_v30 = vor.u32 %v15500_v20, %v13427_v50  ;;  %v15492_v28 = vld [vmem:[%s23801_s3 + $0xf5c] sm:$0xf]  ;;  %v14169_v25 = vld [vmem:[%s23803_s5 + $0x580] sm:$0xf]  ;;  %v15583_v49 = vld [vmem:[%s23803_s5 + $0x22c] sm:$0xf0] }
 0x470   :  { %v13395_v15 = vld [vmem:[%s23801_s3 + $0xf78] sm:$0xf0]  ;;  %v14153_v20 = vld [vmem:[%s23803_s5 + $0x560] sm:$0xf]  ;;  %v13738_v63 = vor.u32 %v15583_v49, %v13737_v29  ;;  %v15683_v23 = vld [vmem:[%s23803_s5 + $0x54c] sm:$0xf0] }
 0x471   :  { %9013 = vmatpush.bf16.msra.mxu2 %v13818_v58  ;;  %9005 = vmatpush.bf16.msra.mxu1 %v13610_v60  ;;  %v15484_v53 = vld [vmem:[%s23801_s3 + $0xf1c] sm:$0xf]  ;;  %v22164_v58 = vpop.f32.mrf.mxu2  ;;  %v15691_v60 = vld [vmem:[%s23803_s5 + $0x58c] sm:$0xf0]  ;;  %v14154_v52 = vor.u32 %v15687_v22, %v14153_v20  ;;  %v14009_v39 = vld [vmem:[%s23803_s5 + $0x440] sm:$0xf] }
 0x472   :  { %7367 = vmatmul.bf16.vlgmr.msra.gmra.mxu3 %v18945_v21  ;;  %v13398_v21 = vor.u32 %v15492_v28, %v13395_v15  ;;  %v13363_v14 = vld [vmem:[%s23801_s3 + $0xf38] sm:$0xf0]  ;;  %v14170_v43 = vor.u32 %v15691_v60, %v14169_v25  ;;  %v15651_v28 = vld [vmem:[%s23803_s5 + $0x44c] sm:$0xf0]  ;;  %v14137_v51 = vld [vmem:[%s23803_s5 + $0x540] sm:$0xf] }
 0x473   :  { %7411 = vmatpush.bf16.msrb.mxu3 %v13462_v0  ;;  %8993 = vmatpush.bf16.msra.mxu0 %v13466_v4  ;;  %v13366_v13 = vor.u32 %v15484_v53, %v13363_v14  ;;  %v15476_v38 = vld [vmem:[%s23801_s3 + $0xedc] sm:$0xf]  ;;  %v14042_v0 = vor.u32 %v15659_v44, %v14041_v54  ;;  %v7238_v4 = vpop.f32.mrf.mxu1  ;;  %v14010_v55 = vor.u32 %v15651_v28, %v14009_v39  ;;  %v13993_v16 = vld [vmem:[%s23803_s5 + $0x420] sm:$0xf]  ;;  %v15735_v53 = vld [vmem:[%s23803_s5 + $0x6ec] sm:$0xf0] }
 0x474   :  { %v13331_v32 = vld [vmem:[%s23801_s3 + $0xef8] sm:$0xf0]  ;;  %v14345_v19 = vld [vmem:[%s23803_s5 + $0x6e0] sm:$0xf]  ;;  %v15639_v60 = vld [vmem:[%s23803_s5 + $0x3ec] sm:$0xf0]  ;;  %v7148_v28 = vadd.f32 %v21954_v35, %v21798_v11 }
 0x475   :  { %9014 = vmatpush.bf16.msra.mxu2 %v13802_v42  ;;  %9006 = vmatpush.bf16.msra.mxu1 %v13594_v27  ;;  %v7225_v42 = vpop.f32.mrf.mxu0  ;;  %v13334_v17 = vor.u32 %v15476_v38, %v13331_v32  ;;  %v15468_v47 = vld [vmem:[%s23801_s3 + $0xe9c] sm:$0xf]  ;;  %v13721_v27 = vld [vmem:[%s23803_s5 + $0x200] sm:$0xf]  ;;  %v7109_v32 = vadd.f32 %v22014_v31, %v21855_v2  ;;  %v15643_v49 = vld [vmem:[%s23803_s5 + $0x40c] sm:$0xf0] }
 0x476   :  { %8994 = vmatmul.bf16.vlgmr.msra.gmra.mxu0 %v22134_v48  ;;  %v7226_v50 = vadd.f32 %v7225_v42, %v4022_v9  ;;  %v13299_v26 = vld [vmem:[%s23801_s3 + $0xeb8] sm:$0xf0]  ;;  %v14121_v61 = vld [vmem:[%s23803_s5 + $0x520] sm:$0xf]  ;;  %v14346_v9 = vor.u32 %v15735_v53, %v14345_v19  ;;  %v15731_v42 = vld [vmem:[%s23803_s5 + $0x6cc] sm:$0xf0] }
 0x477   :  { %9038 = vmatpush.bf16.msrb.mxu0 %v14090_v41  ;;  %7412 = vmatpush.bf16.msrb.mxu3 %v13430_v30  ;;  %v15579_v41 = vld [vmem:[%s23803_s5 + $0x20c] sm:$0xf0]  ;;  %v22222_v30 = vpop.f32.mrf.mxu3  ;;  %v13235_v54 = vld [vmem:[%s23801_s3 + $0xe38] sm:$0xf0]  ;;  %v13977_v38 = vld [vmem:[%s23803_s5 + $0x400] sm:$0xf] }
 0x478   :  { %9007 = vmatmul.bf16.vlgmr.msra.gmra.mxu1 %v22136_v7  ;;  %v13722_v15 = vor.u32 %v15579_v41, %v13721_v27  ;;  %v14105_v2 = vld [vmem:[%s23803_s5 + $0x500] sm:$0xf]  ;;  %v15675_v31 = vld [vmem:[%s23803_s5 + $0x50c] sm:$0xf0]  ;;  %v13579_v20 = vld [vmem:[%s23803_s5 + $0xf0] sm:$0xf0] }
 0x479   :  { %9051 = vmatpush.bf16.msrb.mxu1 %v14218_v46  ;;  %9015 = vmatpush.bf16.msra.mxu2 %v13786_v10  ;;  %v22220_v46 = vadd.f32 %v7238_v4, %v7226_v50  ;;  %v7201_v59 = vpop.f32.mrf.mxu2  ;;  %v13302_v10 = vor.u32 %v15468_v47, %v13299_v26  ;;  %v15573_v50 = vld [vmem:[%s23803_s5 + $0x1e4] sm:$0xf]  ;;  %v13707_v4 = vld [vmem:[%s23803_s5 + $0x1f0] sm:$0xf0]  ;;  %v13945_v22 = vld [vmem:[%s23803_s5 + $0x3c0] sm:$0xf]  ;;  %v14106_v27 = vor.u32 %v15675_v31, %v14105_v2 }
 0x47a   :  { %v15635_v47 = vld [vmem:[%s23803_s5 + $0x3cc] sm:$0xf0]  ;;  %v7428_v26 = vmax.f32 %v7109_v32, 0.0  ;;  %v14313_v41 = vld [vmem:[%s23803_s5 + $0x6a0] sm:$0xf] }
 0x47b   :  { %9039 = vmatpush.bf16.msrb.mxu0 %v14074_v36  ;;  %7413 = vmatpush.bf16.msrb.mxu3 %v13398_v21  ;;  %v7426_v36 = vmax.f32 %v21185_v12, 0.0  ;;  %v13267_v21 = vld [vmem:[%s23801_s3 + $0xe78] sm:$0xf0]  ;;  %v15647_v12 = vld [vmem:[%s23803_s5 + $0x42c] sm:$0xf0]  ;;  %v7240_v14 = vpop.f32.mrf.mxu1 }
 0x47c   :  { %v13994_v25 = vor.u32 %v15647_v12, %v13993_v16  ;;  %v15727_v59 = vld [vmem:[%s23803_s5 + $0x6ac] sm:$0xf0]  ;;  %v22340_v35 = vpack.c.bf16 %v7428_v26, %v7428_v26  ;;  %v15533_v12 = vld [vmem:[%s23803_s5 + $0xa4] sm:$0xf]  ;;  %v13675_v14 = vld [vmem:[%s23803_s5 + $0x1b0] sm:$0xf0] }
 0x47d   :  { %9052 = vmatpush.bf16.msrb.mxu1 %v14202_v3  ;;  %9016 = vmatpush.bf16.msra.mxu2 %v13770_v57  ;;  %v15460_v3 = vld [vmem:[%s23801_s3 + $0xe5c] sm:$0xf]  ;;  %v7227_v33 = vpop.f32.mrf.mxu0  ;;  %v14138_v57 = vor.u32 %v15683_v23, %v14137_v51  ;;  %v14314_v39 = vor.u32 %v15727_v59, %v14313_v41  ;;  %v13563_v51 = vld [vmem:[%s23803_s5 + $0xd0] sm:$0xf0]  ;;  %v15569_v23 = vld [vmem:[%s23803_s5 + $0x1c4] sm:$0xf] }
 0x47e   :  { %v13270_v1 = vor.u32 %v15460_v3, %v13267_v21  ;;  %v13929_v3 = vld [vmem:[%s23803_s5 + $0x3a0] sm:$0xf]  ;;  %v15631_v11 = vld [vmem:[%s23803_s5 + $0x3ac] sm:$0xf0]  ;;  %v7161_v21 = vadd.f32 %v22222_v30, %v7148_v28  ;;  %v15565_v53 = vld [vmem:[%s23803_s5 + $0x1a4] sm:$0xf] }
 0x47f   :  { %9040 = vmatpush.bf16.msrb.mxu0 %v14058_v40  ;;  %7414 = vmatpush.bf16.msrb.mxu3 %v13366_v13  ;;  %v15679_v40 = vld [vmem:[%s23803_s5 + $0x52c] sm:$0xf0]  ;;  %v15452_v13 = vld [vmem:[%s23801_s3 + $0xe1c] sm:$0xf]  ;;  %v7162_v44 = vpop.f32.mrf.mxu3  ;;  %v13930_v19 = vor.u32 %v15631_v11, %v13929_v3  ;;  %v13531_v32 = vld [vmem:[%s23803_s5 + $0x90] sm:$0xf0] }
 0x480   :  { %v14122_v29 = vor.u32 %v15679_v40, %v14121_v61  ;;  %v15723_v16 = vld [vmem:[%s23803_s5 + $0x68c] sm:$0xf0]  ;;  %v14281_v40 = vld [vmem:[%s23803_s5 + $0x660] sm:$0xf]  ;;  %v15521_v28 = vld [vmem:[%s23803_s5 + $0x44] sm:$0xf] }
 0x481   :  { %9053 = vmatpush.bf16.msrb.mxu1 %v14186_v5  ;;  %9017 = vmatpush.bf16.msra.mxu2 %v13754_v56  ;;  %v22261_v5 = vpack.c.bf16 %v7426_v36, %v7426_v36  ;;  %v13961_v56 = vld [vmem:[%s23803_s5 + $0x3e0] sm:$0xf]  ;;  %v13691_v36 = vld [vmem:[%s23803_s5 + $0x1d0] sm:$0xf0]  ;;  %v15627_v61 = vld [vmem:[%s23803_s5 + $0x38c] sm:$0xf0] }
 0x482   :  { %v13962_v34 = vor.u32 %v15639_v60, %v13961_v56  ;;  %v13678_v56 = vor.u32 %v15565_v53, %v13675_v14  ;;  %v15529_v60 = vld [vmem:[%s23803_s5 + $0x84] sm:$0xf]  ;;  %v15715_v2 = vld [vmem:[%s23803_s5 + $0x64c] sm:$0xf0]  ;;  %v14249_v41 = vld [vmem:[%s23803_s5 + $0x620] sm:$0xf] }
 0x483   :  { %9041 = vmatpush.bf16.msrb.mxu0 %v14042_v0  ;;  %7415 = vmatpush.bf16.msrb.mxu3 %v13334_v17  ;;  %v14329_v0 = vld [vmem:[%s23803_s5 + $0x6c0] sm:$0xf]  ;;  %v15541_v17 = vld [vmem:[%s23803_s5 + $0xe4] sm:$0xf]  ;;  %v13534_v31 = vor.u32 %v15529_v60, %v13531_v32  ;;  %v15619_v26 = vld [vmem:[%s23803_s5 + $0x34c] sm:$0xf0] }
 0x484   :  { %v14330_v18 = vor.u32 %v15731_v42, %v14329_v0  ;;  %v15623_v0 = vld [vmem:[%s23803_s5 + $0x36c] sm:$0xf0]  ;;  %v13627_v3 = vld [vmem:[%s23803_s5 + $0x150] sm:$0xf0]  ;;  %v13865_v11 = vld [vmem:[%s23803_s5 + $0x320] sm:$0xf] }
 0x485   :  { %9054 = vmatpush.bf16.msrb.mxu1 %v14170_v43  ;;  %9018 = vmatpush.bf16.msra.mxu2 %v13738_v63  ;;  %v13238_v43 = vor.u32 %v15452_v13, %v13235_v54  ;;  %v13978_v63 = vor.u32 %v15643_v49, %v13977_v38  ;;  %v7174_v13 = vadd.f32 %v21986_v37, %v7161_v21  ;;  %v15561_v37 = vld [vmem:[%s23803_s5 + $0x184] sm:$0xf]  ;;  %v13897_v49 = vld [vmem:[%s23803_s5 + $0x360] sm:$0xf]  ;;  %v15711_v59 = vld [vmem:[%s23803_s5 + $0x62c] sm:$0xf0] }
 0x486   :  { %v15615_v21 = vld [vmem:[%s23803_s5 + $0x32c] sm:$0xf0] }
 0x487   :  { %9042 = vmatpush.bf16.msrb.mxu0 %v14026_v45  ;;  %7416 = vmatpush.bf16.msrb.mxu3 %v13302_v10  ;;  %v13582_v45 = vor.u32 %v15541_v17, %v13579_v20  ;;  %v15537_v10 = vld [vmem:[%s23803_s5 + $0xc4] sm:$0xf]  ;;  %v7187_v42 = vadd.f32 %v21988_v62, %v7174_v13 }
 0x488   :  { %v13566_v33 = vor.u32 %v15537_v10, %v13563_v51  ;;  %v15605_v13 = vld [vmem:[%s23803_s5 + $0x2e4] sm:$0xf] }
 0x489   :  { %9055 = vmatpush.bf16.msrb.mxu1 %v14154_v52  ;;  %9019 = vmatpush.bf16.msra.mxu2 %v13722_v15  ;;  %v13710_v52 = vor.u32 %v15573_v50, %v13707_v4  ;;  %v13946_v15 = vor.u32 %v15635_v47, %v13945_v22  ;;  %v13898_v50 = vor.u32 %v15623_v0, %v13897_v49  ;;  %v13515_v4 = vld [vmem:[%s23803_s5 + $0x70] sm:$0xf0]  ;;  %v13881_v47 = vld [vmem:[%s23803_s5 + $0x340] sm:$0xf]  ;;  %v15601_v49 = vld [vmem:[%s23803_s5 + $0x2c4] sm:$0xf] }
 0x48a   :  { %v22376_v44 = vpop.f32.mrf.mxu2  ;;  %v13643_v22 = vld [vmem:[%s23803_s5 + $0x170] sm:$0xf0]  ;;  %v13882_v51 = vor.u32 %v15619_v26, %v13881_v47 }
 0x48b   :  { %9043 = vmatpush.bf16.msrb.mxu0 %v14010_v55  ;;  %7417 = vmatpush.bf16.msrb.mxu3 %v13270_v1  ;;  %v14297_v55 = vld [vmem:[%s23803_s5 + $0x680] sm:$0xf]  ;;  %v13819_v0 = vld [vmem:[%s23803_s5 + $0x2d0] sm:$0xf0] }
 0x48c   :  { %9020 = vmatmul.bf16.vlgmr.msra.gmra.mxu2 %v22261_v5  ;;  %v14298_v30 = vor.u32 %v15723_v16, %v14297_v55  ;;  %v13913_v1 = vld [vmem:[%s23803_s5 + $0x380] sm:$0xf]  ;;  %v13803_v47 = vld [vmem:[%s23803_s5 + $0x2b0] sm:$0xf0] }
 0x48d   :  { %9064 = vmatpush.bf16.msrb.mxu2 %v14346_v9  ;;  %9056 = vmatpush.bf16.msrb.mxu1 %v14138_v57  ;;  %v13694_v57 = vor.u32 %v15569_v23, %v13691_v36  ;;  %v15719_v9 = vld [vmem:[%s23803_s5 + $0x66c] sm:$0xf0]  ;;  %v13914_v38 = vor.u32 %v15627_v61, %v13913_v1  ;;  %v13499_v23 = vld [vmem:[%s23803_s5 + $0x50] sm:$0xf0]  ;;  %v15553_v36 = vld [vmem:[%s23803_s5 + $0x144] sm:$0xf] }
 0x48e   :  { %v14282_v54 = vor.u32 %v15719_v9, %v14281_v40  ;;  %v14233_v16 = vld [vmem:[%s23803_s5 + $0x600] sm:$0xf]  ;;  %v13866_v40 = vor.u32 %v15615_v21, %v13865_v11  ;;  %v13611_v9 = vld [vmem:[%s23803_s5 + $0x130] sm:$0xf0]  ;;  %v15693_v21 = vld [vmem:[%s23803_s5 + $0x5a4] sm:$0xf] }
 0x48f   :  { %9044 = vmatpush.bf16.msrb.mxu0 %v13994_v25  ;;  %7418 = vmatpush.bf16.msrb.mxu3 %v13238_v43  ;;  %v14265_v43 = vld [vmem:[%s23803_s5 + $0x640] sm:$0xf] }
 0x490   :  { %v22406_v20 = vpop.f32.mrf.mxu0 }
 0x491   :  { %9065 = vmatpush.bf16.msrb.mxu2 %v14330_v18  ;;  %9057 = vmatpush.bf16.msrb.mxu1 %v14122_v29  ;;  %v13659_v29 = vld [vmem:[%s23803_s5 + $0x190] sm:$0xf0]  ;;  %v15525_v18 = vld [vmem:[%s23803_s5 + $0x64] sm:$0xf] }
 0x492   :  { %7419 = vmatmul.bf16.vlgmr.msrb.gmra.mxu3 %v19630_v8  ;;  %v13547_v8 = vld [vmem:[%s23803_s5 + $0xb0] sm:$0xf0]  ;;  %v13662_v17 = vor.u32 %v15561_v37, %v13659_v29  ;;  %v22408_v62 = vpop.f32.mrf.mxu1  ;;  %v13518_v10 = vor.u32 %v15525_v18, %v13515_v4  ;;  %v15669_v18 = vld [vmem:[%s23803_s5 + $0x4e4] sm:$0xf] }
 0x493   :  { %9025 = vmatpush.bf16.msra.mxu3 %v13962_v34  ;;  %9045 = vmatpush.bf16.msrb.mxu0 %v13978_v63  ;;  %v13550_v25 = vor.u32 %v15533_v12, %v13547_v8  ;;  %v14266_v34 = vor.u32 %v15715_v2, %v14265_v43  ;;  %v15557_v63 = vld [vmem:[%s23803_s5 + $0x164] sm:$0xf]  ;;  %v13630_v12 = vor.u32 %v15553_v36, %v13627_v3  ;;  %v14219_v4 = vld [vmem:[%s23803_s5 + $0x5f0] sm:$0xf0] }
 0x494   :  { %v15517_v8 = vld [vmem:[%s23803_s5 + $0x24] sm:$0xf]  ;;  %v14059_v3 = vld [vmem:[%s23803_s5 + $0x4b0] sm:$0xf0] }
 0x495   :  { %9066 = vmatpush.bf16.msrb.mxu2 %v14314_v39  ;;  %9058 = vmatpush.bf16.msrb.mxu1 %v14106_v27  ;;  %v7200_v27 = vadd.f32 %v22164_v58, %v7187_v42  ;;  %v13646_v39 = vor.u32 %v15557_v63, %v13643_v22  ;;  %v15513_v43 = vld [vmem:[%s23803_s5 + $0x4] sm:$0xf] }
 0x496   :  { %9046 = vmatmul.bf16.vlgmr.msrb.gmra.mxu0 %v22340_v35  ;;  %v15545_v2 = vld [vmem:[%s23803_s5 + $0x104] sm:$0xf] }
 0x497   :  { %9090 = vmatpush.bf16.msra.mxu0 %v13582_v45  ;;  %9026 = vmatpush.bf16.msra.mxu3 %v13946_v15  ;;  %v7212_v45 = vpop.f32.mrf.mxu3  ;;  %v14250_v15 = vor.u32 %v15711_v59, %v14249_v41  ;;  %v15597_v22 = vld [vmem:[%s23803_s5 + $0x2a4] sm:$0xf] }
 0x498   :  { %v7213_v58 = vadd.f32 %v7212_v45, %v7200_v27  ;;  %v7279_v1 = vpop.f32.mrf.mxu0  ;;  %v15665_v45 = vld [vmem:[%s23803_s5 + $0x4c4] sm:$0xf] }
 0x499   :  { %9103 = vmatpush.bf16.msra.mxu1 %v13710_v52  ;;  %9067 = vmatpush.bf16.msrb.mxu2 %v14298_v30  ;;  %v7253_v52 = vpop.f32.mrf.mxu2  ;;  %v13483_v30 = vld [vmem:[%s23803_s5 + $0x30] sm:$0xf0]  ;;  %v15661_v36 = vld [vmem:[%s23803_s5 + $0x4a4] sm:$0xf]  ;;  %v4023_v1 = vperm.slane %v22169_v6, 7 }
 0x49a   :  { %v7429_v55 = vmax.f32 %v7213_v58, 0.0  ;;  %v7292_v61 = vpop.f32.mrf.mxu1  ;;  %v13486_v37 = vor.u32 %v15517_v8, %v13483_v30  ;;  %v14075_v52 = vld [vmem:[%s23803_s5 + $0x4d0] sm:$0xf0]  ;;  %v15657_v30 = vld [vmem:[%s23803_s5 + $0x484] sm:$0xf] }
 0x49b   :  { %9091 = vmatpush.bf16.msra.mxu0 %v13566_v33  ;;  %9027 = vmatpush.bf16.msra.mxu3 %v13930_v19  ;;  %v15707_v33 = vld [vmem:[%s23803_s5 + $0x60c] sm:$0xf0]  ;;  %v15549_v19 = vld [vmem:[%s23803_s5 + $0x124] sm:$0xf]  ;;  %v13787_v58 = vld [vmem:[%s23803_s5 + $0x290] sm:$0xf0] }
 0x49c   :  { %v14234_v53 = vor.u32 %v15707_v33, %v14233_v16  ;;  %v22465_v14 = vpack.c.bf16 %v7429_v55, %v7429_v55  ;;  %v13614_v29 = vor.u32 %v15549_v19, %v13611_v9  ;;  %v14187_v55 = vld [vmem:[%s23803_s5 + $0x5b0] sm:$0xf0]  ;;  %v15589_v16 = vld [vmem:[%s23803_s5 + $0x264] sm:$0xf] }
 0x49d   :  { %9104 = vmatpush.bf16.msra.mxu1 %v13694_v57  ;;  %9068 = vmatpush.bf16.msrb.mxu2 %v14282_v54  ;;  %v13502_v57 = vor.u32 %v15521_v28, %v13499_v23  ;;  %v13835_v54 = vld [vmem:[%s23803_s5 + $0x2f0] sm:$0xf0]  ;;  %v14190_v8 = vor.u32 %v15693_v21, %v14187_v55  ;;  %v15689_v61 = vld [vmem:[%s23803_s5 + $0x584] sm:$0xf]  ;;  %v15763_v21 = vld [vmem:[%s23803_s5 + $0x7cc] sm:$0xf0] }
 0x49e   :  { %v13838_v60 = vor.u32 %v15605_v13, %v13835_v54  ;;  %9059 = vmatmul.bf16.vlgmr.msrb.gmra.mxu1 %v22465_v14  ;;  %v14203_v28 = vld [vmem:[%s23803_s5 + $0x5d0] sm:$0xf0]  ;;  %v15585_v9 = vld [vmem:[%s23803_s5 + $0x244] sm:$0xf] }
 0x49f   :  { %9092 = vmatpush.bf16.msra.mxu0 %v13550_v25  ;;  %9028 = vmatpush.bf16.msra.mxu3 %v13914_v38  ;;  %v13849_v25 = vld [vmem:[%s23803_s5 + $0x300] sm:$0xf]  ;;  %v7427_v38 = vmax.f32 %v21603_v24, 0.0  ;;  %v7214_v32 = vpop.f32.mrf.mxu3  ;;  %v13467_v24 = vld [vmem:[%s23803_s5 + $0x10] sm:$0xf0] }
 0x4a0   :  { %v13470_v63 = vor.u32 %v15513_v43, %v13467_v24  ;;  %v13771_v33 = vld [vmem:[%s23803_s5 + $0x270] sm:$0xf0] }
 0x4a1   :  { %9105 = vmatpush.bf16.msra.mxu1 %v13678_v56  ;;  %9069 = vmatpush.bf16.msrb.mxu2 %v14266_v34  ;;  %v15611_v56 = vld [vmem:[%s23803_s5 + $0x30c] sm:$0xf0]  ;;  %v14091_v34 = vld [vmem:[%s23803_s5 + $0x4f0] sm:$0xf0]  ;;  %v22520_v41 = vpack.c.bf16 %v7427_v38, %v7427_v38 }
 0x4a2   :  { %v13850_v42 = vor.u32 %v15611_v56, %v13849_v25  ;;  %v14094_v27 = vor.u32 %v15669_v18, %v14091_v34  ;;  %v14043_v19 = vld [vmem:[%s23803_s5 + $0x490] sm:$0xf0]  ;;  %v15653_v56 = vld [vmem:[%s23803_s5 + $0x464] sm:$0xf] }
 0x4a3   :  { %9093 = vmatpush.bf16.msra.mxu0 %v13534_v31  ;;  %9029 = vmatpush.bf16.msra.mxu3 %v13898_v50  ;;  %v13822_v31 = vor.u32 %v15601_v49, %v13819_v0  ;;  %v15701_v50 = vld [vmem:[%s23803_s5 + $0x5e4] sm:$0xf]  ;;  %v13755_v13 = vld [vmem:[%s23803_s5 + $0x250] sm:$0xf0]  ;;  %v14046_v54 = vor.u32 %v15657_v30, %v14043_v19  ;;  %v13585_v19 = vld [vmem:[%s23803_s5 + $0xe8] sm:$0xf] }
 0x4a4   :  { %v14222_v59 = vor.u32 %v15701_v50, %v14219_v4  ;;  %v13758_v38 = vor.u32 %v15585_v9, %v13755_v13  ;;  %v14155_v49 = vld [vmem:[%s23803_s5 + $0x570] sm:$0xf0]  ;;  %v15581_v0 = vld [vmem:[%s23803_s5 + $0x224] sm:$0xf]  ;;  %v14441_v9 = vld [vmem:[%s23803_s5 + $0x7a0] sm:$0xf] }
 0x4a5   :  { %9106 = vmatpush.bf16.msra.mxu1 %v13662_v17  ;;  %9070 = vmatpush.bf16.msrb.mxu2 %v14250_v15  ;;  %v13595_v17 = vld [vmem:[%s23803_s5 + $0x110] sm:$0xf0]  ;;  %v15593_v15 = vld [vmem:[%s23803_s5 + $0x284] sm:$0xf]  ;;  %v15759_v13 = vld [vmem:[%s23803_s5 + $0x7ac] sm:$0xf0] }
 0x4a6   :  { %v13598_v26 = vor.u32 %v15545_v2, %v13595_v17  ;;  %v13790_v11 = vor.u32 %v15593_v15, %v13787_v58  ;;  %v15649_v18 = vld [vmem:[%s23803_s5 + $0x444] sm:$0xf]  ;;  %v14011_v34 = vld [vmem:[%s23803_s5 + $0x450] sm:$0xf0] }
 0x4a7   :  { %9094 = vmatpush.bf16.msra.mxu0 %v13518_v10  ;;  %9030 = vmatpush.bf16.msra.mxu3 %v13882_v51  ;;  %v13806_v10 = vor.u32 %v15597_v22, %v13803_v47  ;;  %v14078_v51 = vor.u32 %v15665_v45, %v14075_v52  ;;  %v15681_v4 = vld [vmem:[%s23803_s5 + $0x544] sm:$0xf]  ;;  %v13723_v47 = vld [vmem:[%s23803_s5 + $0x210] sm:$0xf0] }
 0x4a8   :  { %v15577_v22 = vld [vmem:[%s23803_s5 + $0x204] sm:$0xf]  ;;  %v13995_v52 = vld [vmem:[%s23803_s5 + $0x430] sm:$0xf0] }
 0x4a9   :  { %9107 = vmatpush.bf16.msra.mxu1 %v13646_v39  ;;  %9071 = vmatpush.bf16.msrb.mxu2 %v14234_v53  ;;  %v15697_v39 = vld [vmem:[%s23803_s5 + $0x5c4] sm:$0xf]  ;;  %v13774_v53 = vor.u32 %v15589_v16, %v13771_v33  ;;  %v13979_v33 = vld [vmem:[%s23803_s5 + $0x410] sm:$0xf0] }
 0x4aa   :  { %v14206_v23 = vor.u32 %v15697_v39, %v14203_v28  ;;  %v14473_v39 = vld [vmem:[%s23803_s5 + $0x7e0] sm:$0xf]  ;;  %v15767_v28 = vld [vmem:[%s23803_s5 + $0x7ec] sm:$0xf0]  ;;  %v15677_v58 = vld [vmem:[%s23803_s5 + $0x524] sm:$0xf] }
 0x4ab   :  { %9095 = vmatpush.bf16.msra.mxu0 %v13502_v57  ;;  %9031 = vmatpush.bf16.msra.mxu3 %v13866_v40  ;;  %v14171_v40 = vld [vmem:[%s23803_s5 + $0x590] sm:$0xf0]  ;;  %v15641_v16 = vld [vmem:[%s23803_s5 + $0x404] sm:$0xf] }
 0x4ac   :  { %v22560_v57 = vpop.f32.mrf.mxu2  ;;  %v14174_v25 = vor.u32 %v15689_v61, %v14171_v40  ;;  %v14107_v30 = vld [vmem:[%s23803_s5 + $0x510] sm:$0xf0]  ;;  %v15576_v61 = vld [vmem:[%s23803_s5 + $0x1f4] sm:$0xf0]  ;;  %v13982_v40 = vor.u32 %v15641_v16, %v13979_v33 }
 0x4ad   :  { %9108 = vmatpush.bf16.msra.mxu1 %v13630_v12  ;;  %9116 = vmatpush.bf16.msra.mxu2 %v13838_v60  ;;  %v14062_v12 = vor.u32 %v15661_v36, %v14059_v3  ;;  %v14027_v60 = vld [vmem:[%s23803_s5 + $0x470] sm:$0xf0] }
 0x4af   :  { %9096 = vmatpush.bf16.msra.mxu0 %v13486_v37  ;;  %9032 = vmatpush.bf16.msra.mxu3 %v13850_v42  ;;  %v13739_v42 = vld [vmem:[%s23803_s5 + $0x230] sm:$0xf0] }
 0x4b0   :  { %v7329_v6 = vpop.f32.mrf.mxu0  ;;  %v13742_v50 = vor.u32 %v15581_v0, %v13739_v42  ;;  %v15755_v0 = vld [vmem:[%s23803_s5 + $0x78c] sm:$0xf0] }
 0x4b1   :  { %9109 = vmatpush.bf16.msra.mxu1 %v13614_v29  ;;  %9117 = vmatpush.bf16.msra.mxu2 %v13822_v31  ;;  %v7330_v32 = vadd.f32 %v7329_v6, %v4023_v1  ;;  %v15685_v29 = vld [vmem:[%s23803_s5 + $0x564] sm:$0xf]  ;;  %v14030_v31 = vor.u32 %v15653_v56, %v14027_v60  ;;  %v13713_v1 = vld [vmem:[%s23803_s5 + $0x1e8] sm:$0xf] }
 0x4b2   :  { %9033 = vmatmul.bf16.vlgmr.msra.gmra.mxu3 %v22520_v41  ;;  %v7342_v37 = vpop.f32.mrf.mxu1  ;;  %v22602_v24 = vpop.f32.mrf.mxu3  ;;  %v14158_v17 = vor.u32 %v15685_v29, %v14155_v49  ;;  %v13714_v56 = vor.u32 %v15576_v61, %v13713_v1  ;;  %v13569_v60 = vld [vmem:[%s23803_s5 + $0xc8] sm:$0xf]  ;;  %v15572_v29 = vld [vmem:[%s23803_s5 + $0x1d4] sm:$0xf0]  ;;  %v14425_v49 = vld [vmem:[%s23803_s5 + $0x780] sm:$0xf] }
 0x4b3   :  { %9097 = vmatpush.bf16.msra.mxu0 %v13470_v63  ;;  %v22600_v43 = vadd.f32 %v7342_v37, %v7330_v32  ;;  %v14139_v63 = vld [vmem:[%s23803_s5 + $0x550] sm:$0xf0]  ;;  %v7252_v32 = vadd.f32 %v22376_v44, %v22220_v46  ;;  %v13697_v37 = vld [vmem:[%s23803_s5 + $0x1c8] sm:$0xf]  ;;  %v14426_v42 = vor.u32 %v15755_v0, %v14425_v49  ;;  %v15524_v1 = vld [vmem:[%s23803_s5 + $0x54] sm:$0xf0] }
 0x4b4   :  { %v7305_v2 = vpop.f32.mrf.mxu2  ;;  %v14142_v45 = vor.u32 %v15681_v4, %v14139_v63  ;;  %v13633_v61 = vld [vmem:[%s23803_s5 + $0x148] sm:$0xf]  ;;  %v15552_v0 = vld [vmem:[%s23803_s5 + $0x134] sm:$0xf0] }
 0x4b5   :  { %9110 = vmatpush.bf16.msra.mxu1 %v13598_v26  ;;  %9118 = vmatpush.bf16.msra.mxu2 %v13806_v10  ;;  %v14014_v26 = vor.u32 %v15649_v18, %v14011_v34  ;;  %v13726_v10 = vor.u32 %v15577_v22, %v13723_v47  ;;  %v7265_v46 = vadd.f32 %v22602_v24, %v7252_v32  ;;  %v13681_v18 = vld [vmem:[%s23803_s5 + $0x1a8] sm:$0xf]  ;;  %v15568_v24 = vld [vmem:[%s23803_s5 + $0x1b4] sm:$0xf0]  ;;  %v14409_v34 = vld [vmem:[%s23803_s5 + $0x760] sm:$0xf] }
 0x4b6   :  { %9098 = vmatmul.bf16.vlgmr.msra.gmra.mxu0 %v22134_v48  ;;  %v13698_v2 = vor.u32 %v15572_v29, %v13697_v37  ;;  %v13617_v49 = vld [vmem:[%s23803_s5 + $0x128] sm:$0xf] }
 0x4b7   :  { %9142 = vmatpush.bf16.msrb.mxu0 %v14094_v27  ;;  %v15645_v27 = vld [vmem:[%s23803_s5 + $0x424] sm:$0xf]  ;;  %v7278_v63 = vadd.f32 %v22406_v20, %v7265_v46  ;;  %v15564_v20 = vld [vmem:[%s23803_s5 + $0x194] sm:$0xf0] }
 0x4b8   :  { %9111 = vmatmul.bf16.vlgmr.msra.gmra.mxu1 %v22136_v7  ;;  %v13998_v3 = vor.u32 %v15645_v27, %v13995_v52  ;;  %v13537_v27 = vld [vmem:[%s23803_s5 + $0x88] sm:$0xf]  ;;  %v14393_v52 = vld [vmem:[%s23803_s5 + $0x740] sm:$0xf]  ;;  %v15729_v46 = vld [vmem:[%s23803_s5 + $0x6c4] sm:$0xf] }
 0x4b9   :  { %9155 = vmatpush.bf16.msrb.mxu1 %v14222_v59  ;;  %9119 = vmatpush.bf16.msra.mxu2 %v13790_v11  ;;  %v7331_v59 = vpop.f32.mrf.mxu0  ;;  %v14457_v11 = vld [vmem:[%s23803_s5 + $0x7c0] sm:$0xf] }
 0x4ba   :  { %v7344_v15 = vpop.f32.mrf.mxu1  ;;  %v7266_v36 = vpop.f32.mrf.mxu3  ;;  %v15532_v59 = vld [vmem:[%s23803_s5 + $0x94] sm:$0xf0] }
 0x4bb   :  { %9143 = vmatpush.bf16.msrb.mxu0 %v14078_v51  ;;  %v14123_v51 = vld [vmem:[%s23803_s5 + $0x530] sm:$0xf0] }
 0x4bc   :  { %v14126_v55 = vor.u32 %v15677_v58, %v14123_v51  ;;  %v13521_v51 = vld [vmem:[%s23803_s5 + $0x68] sm:$0xf] }
 0x4bd   :  { %9156 = vmatpush.bf16.msrb.mxu1 %v14206_v23  ;;  %9120 = vmatpush.bf16.msra.mxu2 %v13774_v53  ;;  %v14474_v23 = vor.u32 %v15767_v28, %v14473_v39  ;;  %v15544_v53 = vld [vmem:[%s23803_s5 + $0xf4] sm:$0xf0]  ;;  %v13538_v39 = vor.u32 %v15532_v59, %v13537_v27  ;;  %v7291_v28 = vadd.f32 %v22408_v62, %v7278_v63  ;;  %v15633_v63 = vld [vmem:[%s23803_s5 + $0x3c4] sm:$0xf]  ;;  %v13601_v59 = vld [vmem:[%s23803_s5 + $0x108] sm:$0xf] }
 0x4be   :  { %v13586_v6 = vor.u32 %v15544_v53, %v13585_v19  ;;  %v15560_v62 = vld [vmem:[%s23803_s5 + $0x174] sm:$0xf0]  ;;  %v13505_v53 = vld [vmem:[%s23803_s5 + $0x48] sm:$0xf] }
 0x4bf   :  { %9144 = vmatpush.bf16.msrb.mxu0 %v14062_v12  ;;  %9077 = vmatpush.bf16.msrb.mxu3 %v14474_v23  ;;  %v15673_v12 = vld [vmem:[%s23803_s5 + $0x504] sm:$0xf]  ;;  %v15528_v23 = vld [vmem:[%s23803_s5 + $0x74] sm:$0xf0]  ;;  %v7304_v16 = vadd.f32 %v22560_v57, %v7291_v28 }
 0x4c0   :  { %v13522_v33 = vor.u32 %v15528_v23, %v13521_v51  ;;  %v15556_v57 = vld [vmem:[%s23803_s5 + $0x154] sm:$0xf0] }
 0x4c1   :  { %9157 = vmatpush.bf16.msrb.mxu1 %v14190_v8  ;;  %9121 = vmatpush.bf16.msra.mxu2 %v13758_v38  ;;  %v14458_v8 = vor.u32 %v15763_v21, %v14457_v11  ;;  %v15540_v38 = vld [vmem:[%s23803_s5 + $0xd4] sm:$0xf0]  ;;  %v13649_v11 = vld [vmem:[%s23803_s5 + $0x168] sm:$0xf]  ;;  %v14377_v21 = vld [vmem:[%s23803_s5 + $0x720] sm:$0xf]  ;;  %v13634_v37 = vor.u32 %v15556_v57, %v13633_v61 }
 0x4c2   :  { %v13570_v44 = vor.u32 %v15540_v38, %v13569_v60  ;;  %v13650_v19 = vor.u32 %v15560_v62, %v13649_v11  ;;  %v13489_v60 = vld [vmem:[%s23803_s5 + $0x28] sm:$0xf]  ;;  %v15520_v38 = vld [vmem:[%s23803_s5 + $0x34] sm:$0xf0]  ;;  %v15629_v11 = vld [vmem:[%s23803_s5 + $0x3a4] sm:$0xf] }
 0x4c3   :  { %9145 = vmatpush.bf16.msrb.mxu0 %v14046_v54  ;;  %9078 = vmatpush.bf16.msrb.mxu3 %v14458_v8  ;;  %v14110_v54 = vor.u32 %v15673_v12, %v14107_v30  ;;  %v15704_v51 = vld [vmem:[%s23803_s5 + $0x5f4] sm:$0xf0]  ;;  %v13931_v62 = vld [vmem:[%s23803_s5 + $0x3b0] sm:$0xf0]  ;;  %v15625_v57 = vld [vmem:[%s23803_s5 + $0x384] sm:$0xf] }
 0x4c4   :  { %v13934_v61 = vor.u32 %v15629_v11, %v13931_v62 }
 0x4c5   :  { %9158 = vmatpush.bf16.msrb.mxu1 %v14174_v25  ;;  %9122 = vmatpush.bf16.msra.mxu2 %v13742_v50  ;;  %v14442_v25 = vor.u32 %v15759_v13, %v14441_v9  ;;  %v15751_v50 = vld [vmem:[%s23803_s5 + $0x76c] sm:$0xf0]  ;;  %v15733_v9 = vld [vmem:[%s23803_s5 + $0x6e4] sm:$0xf]  ;;  %v14347_v13 = vld [vmem:[%s23803_s5 + $0x6f0] sm:$0xf0] }
 0x4c6   :  { %v14410_v4 = vor.u32 %v15751_v50, %v14409_v34  ;;  %v14350_v29 = vor.u32 %v15733_v9, %v14347_v13  ;;  %v13490_v34 = vor.u32 %v15520_v38, %v13489_v60  ;;  %v13473_v50 = vld [vmem:[%s23803_s5 + $0x8] sm:$0xf]  ;;  %v13915_v9 = vld [vmem:[%s23803_s5 + $0x390] sm:$0xf0]  ;;  %v15664_v60 = vld [vmem:[%s23803_s5 + $0x4b4] sm:$0xf0] }
 0x4c7   :  { %9146 = vmatpush.bf16.msrb.mxu0 %v14030_v31  ;;  %9079 = vmatpush.bf16.msrb.mxu3 %v14442_v25  ;;  %v13553_v31 = vld [vmem:[%s23803_s5 + $0xa8] sm:$0xf] }
 0x4c8   :  { %v14193_v38 = vld [vmem:[%s23803_s5 + $0x5a8] sm:$0xf] }
 0x4c9   :  { %9159 = vmatpush.bf16.msrb.mxu1 %v14158_v17  ;;  %9123 = vmatpush.bf16.msra.mxu2 %v13726_v10  ;;  %v15536_v17 = vld [vmem:[%s23803_s5 + $0xb4] sm:$0xf0]  ;;  %v15747_v10 = vld [vmem:[%s23803_s5 + $0x74c] sm:$0xf0] }
 0x4ca   :  { %v13554_v22 = vor.u32 %v15536_v17, %v13553_v31  ;;  %v14394_v15 = vor.u32 %v15747_v10, %v14393_v52  ;;  %v14331_v31 = vld [vmem:[%s23803_s5 + $0x6d0] sm:$0xf0]  ;;  %v15637_v17 = vld [vmem:[%s23803_s5 + $0x3e4] sm:$0xf] }
 0x4cb   :  { %9147 = vmatpush.bf16.msrb.mxu0 %v14014_v26  ;;  %9080 = vmatpush.bf16.msrb.mxu3 %v14426_v42  ;;  %v13682_v26 = vor.u32 %v15568_v24, %v13681_v18  ;;  %v13963_v18 = vld [vmem:[%s23803_s5 + $0x3f0] sm:$0xf0]  ;;  %v14334_v27 = vor.u32 %v15729_v46, %v14331_v31  ;;  %v15725_v52 = vld [vmem:[%s23803_s5 + $0x6a4] sm:$0xf] }
 0x4cc   :  { %v22718_v47 = vpop.f32.mrf.mxu2  ;;  %v13966_v24 = vor.u32 %v15637_v17, %v13963_v18  ;;  %v14315_v10 = vld [vmem:[%s23803_s5 + $0x6b0] sm:$0xf0]  ;;  %v15713_v17 = vld [vmem:[%s23803_s5 + $0x644] sm:$0xf] }
 0x4cd   :  { %9160 = vmatpush.bf16.msrb.mxu1 %v14142_v45  ;;  %v13665_v45 = vld [vmem:[%s23803_s5 + $0x188] sm:$0xf]  ;;  %v13899_v46 = vld [vmem:[%s23803_s5 + $0x370] sm:$0xf0] }
 0x4ce   :  { %v13666_v58 = vor.u32 %v15564_v20, %v13665_v45  ;;  %v15548_v45 = vld [vmem:[%s23803_s5 + $0x114] sm:$0xf0]  ;;  %v13947_v20 = vld [vmem:[%s23803_s5 + $0x3d0] sm:$0xf0] }
 0x4cf   :  { %9148 = vmatpush.bf16.msrb.mxu0 %v13998_v3  ;;  %9081 = vmatpush.bf16.msrb.mxu3 %v14410_v4  ;;  %v15516_v4 = vld [vmem:[%s23803_s5 + $0x14] sm:$0xf0]  ;;  %v13950_v28 = vor.u32 %v15633_v63, %v13947_v20  ;;  %v14267_v18 = vld [vmem:[%s23803_s5 + $0x650] sm:$0xf0] }
 0x4d0   :  { %v13474_v23 = vor.u32 %v15516_v4, %v13473_v50  ;;  %v14177_v50 = vld [vmem:[%s23803_s5 + $0x588] sm:$0xf]  ;;  %v15692_v4 = vld [vmem:[%s23803_s5 + $0x594] sm:$0xf0] }
 0x4d1   :  { %9161 = vmatpush.bf16.msrb.mxu1 %v14126_v55  ;;  %v15743_v55 = vld [vmem:[%s23803_s5 + $0x72c] sm:$0xf0]  ;;  %v14178_v20 = vor.u32 %v15692_v4, %v14177_v50 }
 0x4d2   :  { %v14378_v12 = vor.u32 %v15743_v55, %v14377_v21  ;;  %v7316_v8 = vpop.f32.mrf.mxu3  ;;  %v13602_v21 = vor.u32 %v15548_v45, %v13601_v59  ;;  %v14318_v55 = vor.u32 %v15725_v52, %v14315_v10  ;;  %v14270_v59 = vor.u32 %v15713_v17, %v14267_v18  ;;  %v15709_v52 = vld [vmem:[%s23803_s5 + $0x624] sm:$0xf]  ;;  %v14251_v10 = vld [vmem:[%s23803_s5 + $0x630] sm:$0xf0] }
 0x4d3   :  { %9149 = vmatpush.bf16.msrb.mxu0 %v13982_v40  ;;  %v22745_v36 = vpop.f32.mrf.mxu0  ;;  %9082 = vmatpush.bf16.msrb.mxu3 %v14394_v15  ;;  %v7317_v40 = vadd.f32 %v7316_v8, %v7304_v16  ;;  %v15672_v15 = vld [vmem:[%s23803_s5 + $0x4f4] sm:$0xf0]  ;;  %v14299_v8 = vld [vmem:[%s23803_s5 + $0x690] sm:$0xf0] }
 0x4d4   :  { %v7357_v30 = vpop.f32.mrf.mxu2 }
 0x4d5   :  { %9162 = vmatpush.bf16.msrb.mxu1 %v14110_v54  ;;  %v22747_v3 = vpop.f32.mrf.mxu1  ;;  %v14361_v54 = vld [vmem:[%s23803_s5 + $0x700] sm:$0xf]  ;;  %v7430_v25 = vmax.f32 %v7317_v40, 0.0  ;;  %v14081_v30 = vld [vmem:[%s23803_s5 + $0x4c8] sm:$0xf] }
 0x4d6   :  { %9150 = vmatmul.bf16.vlgmr.msrb.gmra.mxu0 %v22340_v35 }
 0x4d7   :  { %9194 = vmatpush.bf16.msra.mxu0 %v13586_v6  ;;  %9083 = vmatpush.bf16.msrb.mxu3 %v14378_v12  ;;  %v15739_v6 = vld [vmem:[%s23803_s5 + $0x70c] sm:$0xf0]  ;;  %v15721_v12 = vld [vmem:[%s23803_s5 + $0x684] sm:$0xf] }
 0x4d8   :  { %9163 = vmatmul.bf16.vlgmr.msrb.gmra.mxu1 %v22465_v14  ;;  %v14362_v32 = vor.u32 %v15739_v6, %v14361_v54  ;;  %v14302_v40 = vor.u32 %v15721_v12, %v14299_v8  ;;  %v15717_v6 = vld [vmem:[%s23803_s5 + $0x664] sm:$0xf] }
 0x4d9   :  { %9207 = vmatpush.bf16.msra.mxu1 %v13714_v56  ;;  %v13506_v56 = vor.u32 %v15524_v1, %v13505_v53  ;;  %v14209_v53 = vld [vmem:[%s23803_s5 + $0x5c8] sm:$0xf]  ;;  %v15700_v1 = vld [vmem:[%s23803_s5 + $0x5d4] sm:$0xf0] }
 0x4da   :  { %v14210_v54 = vor.u32 %v15700_v1, %v14209_v53  ;;  %v15705_v53 = vld [vmem:[%s23803_s5 + $0x604] sm:$0xf]  ;;  %v14235_v1 = vld [vmem:[%s23803_s5 + $0x610] sm:$0xf0] }
 0x4db   :  { %9195 = vmatpush.bf16.msra.mxu0 %v13570_v44  ;;  %v22801_v44 = vpack.c.bf16 %v7430_v25, %v7430_v25  ;;  %v7383_v42 = vpop.f32.mrf.mxu0  ;;  %9084 = vmatpush.bf16.msrb.mxu3 %v14362_v32  ;;  %v14283_v25 = vld [vmem:[%s23803_s5 + $0x670] sm:$0xf0]  ;;  %v15696_v32 = vld [vmem:[%s23803_s5 + $0x5b4] sm:$0xf0] }
 0x4dc   :  { %v14194_v31 = vor.u32 %v15696_v32, %v14193_v38 }
 0x4dd   :  { %9208 = vmatpush.bf16.msra.mxu1 %v13698_v2  ;;  %v7396_v2 = vpop.f32.mrf.mxu1  ;;  %9072 = vmatmul.bf16.vlgmr.msrb.gmra.mxu2 %v22801_v44 }
 0x4de   :  { %9168 = vmatpush.bf16.msrb.mxu2 %v14350_v29  ;;  %v14286_v29 = vor.u32 %v15717_v6, %v14283_v25  ;;  %v15608_v6 = vld [vmem:[%s23803_s5 + $0x2f4] sm:$0xf0]  ;;  %v14238_v25 = vor.u32 %v15705_v53, %v14235_v1  ;;  %v13699_v53 = vld [vmem:[%s23803_s5 + $0x1d8] sm:$0xf0] }
 0x4df   :  { %9196 = vmatpush.bf16.msra.mxu0 %v13554_v22  ;;  %v7318_v22 = vpop.f32.mrf.mxu3  ;;  %9129 = vmatpush.bf16.msra.mxu3 %v13966_v24  ;;  %v14049_v24 = vld [vmem:[%s23803_s5 + $0x488] sm:$0xf] }
 0x4e1   :  { %9209 = vmatpush.bf16.msra.mxu1 %v13682_v26  ;;  %v13618_v26 = vor.u32 %v15552_v0, %v13617_v49  ;;  %v22902_v49 = vld [vmem:[%s23804_s6] sm:$0xf]  ;;  %v15621_v0 = vld [vmem:[%s23803_s5 + $0x364] sm:$0xf] }
 0x4e2   :  { %9169 = vmatpush.bf16.msrb.mxu2 %v14334_v27  ;;  %v13902_v63 = vor.u32 %v15621_v0, %v13899_v46  ;;  %v7698_v22 = vperm.slane %v22902_v49, 0  ;;  %v13883_v27 = vld [vmem:[%s23803_s5 + $0x350] sm:$0xf0]  ;;  %v15648_v46 = vld [vmem:[%s23803_s5 + $0x434] sm:$0xf0] }
 0x4e3   :  { %9197 = vmatpush.bf16.msra.mxu0 %v13538_v39  ;;  %v14097_v39 = vld [vmem:[%s23803_s5 + $0x4e8] sm:$0xf]  ;;  %9130 = vmatpush.bf16.msra.mxu3 %v13950_v28 }
 0x4e4   :  { %v14098_v16 = vor.u32 %v15672_v15, %v14097_v39  ;;  %v14033_v39 = vld [vmem:[%s23803_s5 + $0x468] sm:$0xf]  ;;  %v15656_v15 = vld [vmem:[%s23803_s5 + $0x474] sm:$0xf0] }
 0x4e5   :  { %9210 = vmatpush.bf16.msra.mxu1 %v13666_v58  ;;  %v14225_v58 = vld [vmem:[%s23803_s5 + $0x5e8] sm:$0xf] }
 0x4e6   :  { %9170 = vmatpush.bf16.msrb.mxu2 %v14318_v55  ;;  %v15613_v55 = vld [vmem:[%s23803_s5 + $0x324] sm:$0xf] }
 0x4e7   :  { %9198 = vmatpush.bf16.msra.mxu0 %v13522_v33  ;;  %v14226_v33 = vor.u32 %v15704_v51, %v14225_v58  ;;  %9131 = vmatpush.bf16.msra.mxu3 %v13934_v61  ;;  %v14161_v58 = vld [vmem:[%s23803_s5 + $0x568] sm:$0xf]  ;;  %v15688_v51 = vld [vmem:[%s23803_s5 + $0x574] sm:$0xf0] }
 0x4e8   :  { %v14017_v61 = vld [vmem:[%s23803_s5 + $0x448] sm:$0xf] }
 0x4e9   :  { %9211 = vmatpush.bf16.msra.mxu1 %v13650_v19  ;;  %v15668_v19 = vld [vmem:[%s23803_s5 + $0x4d4] sm:$0xf0] }
 0x4ea   :  { %v14082_v13 = vor.u32 %v15668_v19, %v14081_v30  ;;  %9171 = vmatpush.bf16.msrb.mxu2 %v14302_v40  ;;  %v14034_v30 = vor.u32 %v15656_v15, %v14033_v39  ;;  %v14162_v19 = vor.u32 %v15688_v51, %v14161_v58  ;;  %v15652_v40 = vld [vmem:[%s23803_s5 + $0x454] sm:$0xf0]  ;;  %v13587_v39 = vld [vmem:[%s23803_s5 + $0xf8] sm:$0xf0] }
 0x4eb   :  { %9199 = vmatpush.bf16.msra.mxu0 %v13506_v56  ;;  %v14065_v56 = vld [vmem:[%s23803_s5 + $0x4a8] sm:$0xf]  ;;  %v14018_v38 = vor.u32 %v15652_v40, %v14017_v61  ;;  %v13715_v15 = vld [vmem:[%s23803_s5 + $0x1f8] sm:$0xf0] }
 0x4ec   :  { %v14066_v2 = vor.u32 %v15664_v60, %v14065_v56  ;;  %v15609_v56 = vld [vmem:[%s23803_s5 + $0x304] sm:$0xf]  ;;  %v13851_v60 = vld [vmem:[%s23803_s5 + $0x310] sm:$0xf0] }
 0x4ed   :  { %9212 = vmatpush.bf16.msra.mxu1 %v13634_v37  ;;  %v13918_v37 = vor.u32 %v15625_v57, %v13915_v9  ;;  %9124 = vmatmul.bf16.vlgmr.msra.gmra.mxu2 %v22261_v5  ;;  %v14145_v57 = vld [vmem:[%s23803_s5 + $0x548] sm:$0xf]  ;;  %v15684_v9 = vld [vmem:[%s23803_s5 + $0x554] sm:$0xf0]  ;;  %v13854_v17 = vor.u32 %v15609_v56, %v13851_v60 }
 0x4ee   :  { %9172 = vmatpush.bf16.msrb.mxu2 %v14286_v29  ;;  %v14146_v32 = vor.u32 %v15684_v9, %v14145_v57  ;;  %v15592_v57 = vld [vmem:[%s23803_s5 + $0x274] sm:$0xf0]  ;;  %v15534_v9 = vld [vmem:[%s23803_s5 + $0xac] sm:$0xf]  ;;  %v13761_v60 = vld [vmem:[%s23803_s5 + $0x248] sm:$0xf] }
 0x4ef   :  { %9200 = vmatpush.bf16.msra.mxu0 %v13490_v34  ;;  %v22910_v42 = vpop.f32.mrf.mxu2  ;;  %v15660_v34 = vld [vmem:[%s23803_s5 + $0x494] sm:$0xf0]  ;;  %9132 = vmatpush.bf16.msra.mxu3 %v13918_v37  ;;  %v14001_v37 = vld [vmem:[%s23803_s5 + $0x428] sm:$0xf] }
 0x4f0   :  { %v14050_v45 = vor.u32 %v15660_v34, %v14049_v24  ;;  %v13825_v24 = vld [vmem:[%s23803_s5 + $0x2c8] sm:$0xf]  ;;  %v15604_v34 = vld [vmem:[%s23803_s5 + $0x2d4] sm:$0xf0]  ;;  %v14002_v4 = vor.u32 %v15648_v46, %v14001_v37  ;;  %v15562_v46 = vld [vmem:[%s23803_s5 + $0x18c] sm:$0xf] }
 0x4f1   :  { %9213 = vmatpush.bf16.msra.mxu1 %v13618_v26  ;;  %v15617_v26 = vld [vmem:[%s23803_s5 + $0x344] sm:$0xf]  ;;  %v15588_v37 = vld [vmem:[%s23803_s5 + $0x254] sm:$0xf0] }
 0x4f2   :  { %9173 = vmatpush.bf16.msrb.mxu2 %v14270_v59  ;;  %v14113_v59 = vld [vmem:[%s23803_s5 + $0x508] sm:$0xf] }
 0x4f3   :  { %9201 = vmatpush.bf16.msra.mxu0 %v13474_v23  ;;  %v8995_v28 = vpop.f32.mrf.mxu0  ;;  %9133 = vmatpush.bf16.msra.mxu3 %v13902_v63  ;;  %v13886_v23 = vor.u32 %v15617_v26, %v13883_v27  ;;  %v15644_v26 = vld [vmem:[%s23803_s5 + $0x414] sm:$0xf0]  ;;  %v13826_v27 = vor.u32 %v15604_v34, %v13825_v24  ;;  %v13745_v24 = vld [vmem:[%s23803_s5 + $0x228] sm:$0xf] }
 0x4f4   :  { %v8996_v11 = vadd.f32 %v8995_v28, %v7698_v22  ;;  %v13985_v22 = vld [vmem:[%s23803_s5 + $0x408] sm:$0xf]  ;;  %v15574_v28 = vld [vmem:[%s23803_s5 + $0x1ec] sm:$0xf] }
 0x4f5   :  { %9214 = vmatpush.bf16.msra.mxu1 %v13602_v21  ;;  %v9008_v62 = vpop.f32.mrf.mxu1  ;;  %v14254_v21 = vor.u32 %v15709_v52, %v14251_v10  ;;  %v22964_v12 = vpop.f32.mrf.mxu3  ;;  %v15600_v52 = vld [vmem:[%s23803_s5 + $0x2b4] sm:$0xf0]  ;;  %v15542_v10 = vld [vmem:[%s23803_s5 + $0xec] sm:$0xf]  ;;  %v13986_v58 = vor.u32 %v15644_v26, %v13985_v22  ;;  %v13651_v22 = vld [vmem:[%s23803_s5 + $0x178] sm:$0xf0] }
 0x4f6   :  { %9202 = vmatmul.bf16.vlgmr.msra.gmra.mxu0 %v22134_v48 }
 0x4f7   :  { %9246 = vmatpush.bf16.msrb.mxu0 %v14098_v16  ;;  %v13867_v16 = vld [vmem:[%s23803_s5 + $0x330] sm:$0xf0]  ;;  %v7409_v8 = vpop.f32.mrf.mxu2  ;;  %9134 = vmatpush.bf16.msra.mxu3 %v13886_v23 }
 0x4f8   :  { %9215 = vmatmul.bf16.vlgmr.msra.gmra.mxu1 %v22136_v7  ;;  %9174 = vmatpush.bf16.msrb.mxu2 %v14254_v21  ;;  %v13718_v21 = vor.u32 %v15574_v28, %v13715_v15  ;;  %v13571_v8 = vld [vmem:[%s23803_s5 + $0xd8] sm:$0xf0]  ;;  %v15522_v28 = vld [vmem:[%s23803_s5 + $0x4c] sm:$0xf] }
 0x4f9   :  { %9259 = vmatpush.bf16.msrb.mxu1 %v14226_v33  ;;  %v22962_v33 = vadd.f32 %v9008_v62, %v8996_v11  ;;  %v13590_v11 = vor.u32 %v15542_v10, %v13587_v39  ;;  %v13793_v62 = vld [vmem:[%s23803_s5 + $0x288] sm:$0xf]  ;;  %v15580_v39 = vld [vmem:[%s23803_s5 + $0x214] sm:$0xf0] }
 0x4fb   :  { %9247 = vmatpush.bf16.msrb.mxu0 %v14082_v13  ;;  %v13870_v13 = vor.u32 %v15613_v55, %v13867_v16  ;;  %v8997_v29 = vpop.f32.mrf.mxu0  ;;  %v15596_v55 = vld [vmem:[%s23803_s5 + $0x294] sm:$0xf0]  ;;  %v15538_v16 = vld [vmem:[%s23803_s5 + $0xcc] sm:$0xf] }
 0x4fc   :  { %9175 = vmatpush.bf16.msrb.mxu2 %v14238_v25  ;;  %v13794_v61 = vor.u32 %v15596_v55, %v13793_v62  ;;  %v13574_v40 = vor.u32 %v15538_v16, %v13571_v8  ;;  %v15530_v29 = vld [vmem:[%s23803_s5 + $0x8c] sm:$0xf]  ;;  %v14353_v62 = vld [vmem:[%s23803_s5 + $0x6e8] sm:$0xf] }
 0x4fd   :  { %9260 = vmatpush.bf16.msrb.mxu1 %v14210_v54  ;;  %v13841_v54 = vld [vmem:[%s23803_s5 + $0x2e8] sm:$0xf]  ;;  %9135 = vmatpush.bf16.msra.mxu3 %v13870_v13  ;;  %v9010_v18 = vpop.f32.mrf.mxu1  ;;  %v7370_v50 = vpop.f32.mrf.mxu3  ;;  %v15566_v13 = vld [vmem:[%s23803_s5 + $0x1ac] sm:$0xf] }
 0x4fe   :  { %v13842_v0 = vor.u32 %v15608_v6, %v13841_v54  ;;  %v13683_v54 = vld [vmem:[%s23803_s5 + $0x1b8] sm:$0xf0]  ;;  %v15584_v50 = vld [vmem:[%s23803_s5 + $0x234] sm:$0xf0] }
 0x4ff   :  { %9248 = vmatpush.bf16.msrb.mxu0 %v14066_v2  ;;  %v14129_v2 = vld [vmem:[%s23803_s5 + $0x528] sm:$0xf]  ;;  %9176 = vmatmul.bf16.vlgmr.msrb.gmra.mxu2 %v22801_v44 }
 0x500   :  { %9220 = vmatpush.bf16.msra.mxu2 %v13842_v0 }
 0x501   :  { %9261 = vmatpush.bf16.msrb.mxu1 %v14194_v31  ;;  %v15680_v31 = vld [vmem:[%s23803_s5 + $0x534] sm:$0xf0]  ;;  %9136 = vmatpush.bf16.msra.mxu3 %v13854_v17 }
 0x502   :  { %v14130_v63 = vor.u32 %v15680_v31, %v14129_v2  ;;  %v13667_v2 = vld [vmem:[%s23803_s5 + $0x198] sm:$0xf0]  ;;  %v13762_v31 = vor.u32 %v15588_v37, %v13761_v60 }
 0x503   :  { %9249 = vmatpush.bf16.msrb.mxu0 %v14050_v45  ;;  %v15676_v45 = vld [vmem:[%s23803_s5 + $0x514] sm:$0xf0]  ;;  %v13670_v34 = vor.u32 %v15562_v46, %v13667_v2  ;;  %v13603_v37 = vld [vmem:[%s23803_s5 + $0x118] sm:$0xf0]  ;;  %v15757_v46 = vld [vmem:[%s23803_s5 + $0x7a4] sm:$0xf] }
 0x504   :  { %v14114_v51 = vor.u32 %v15676_v45, %v14113_v59  ;;  %9221 = vmatpush.bf16.msra.mxu2 %v13826_v27  ;;  %v13746_v27 = vor.u32 %v15584_v50, %v13745_v24  ;;  %v13729_v45 = vld [vmem:[%s23803_s5 + $0x208] sm:$0xf]  ;;  %v15670_v2 = vld [vmem:[%s23803_s5 + $0x4ec] sm:$0xf]  ;;  %v15728_v24 = vld [vmem:[%s23803_s5 + $0x6b4] sm:$0xf0] }
 0x505   :  { %9262 = vmatpush.bf16.msrb.mxu1 %v14178_v20  ;;  %v13809_v20 = vld [vmem:[%s23803_s5 + $0x2a8] sm:$0xf]  ;;  %v13730_v16 = vor.u32 %v15580_v39, %v13729_v45  ;;  %v15702_v50 = vld [vmem:[%s23803_s5 + $0x5ec] sm:$0xf]  ;;  %v14083_v45 = vld [vmem:[%s23803_s5 + $0x4d8] sm:$0xf0] }
 0x506   :  { %v13810_v23 = vor.u32 %v15600_v52, %v13809_v20  ;;  %v14305_v39 = vld [vmem:[%s23803_s5 + $0x688] sm:$0xf] }
 0x507   :  { %9250 = vmatpush.bf16.msrb.mxu0 %v14034_v30  ;;  %v7356_v30 = vadd.f32 %v22718_v47, %v22600_v43  ;;  %v13777_v43 = vld [vmem:[%s23803_s5 + $0x268] sm:$0xf] }
 0x508   :  { %9222 = vmatpush.bf16.msra.mxu2 %v13810_v23  ;;  %v13778_v25 = vor.u32 %v15592_v57, %v13777_v43  ;;  %v15765_v23 = vld [vmem:[%s23803_s5 + $0x7e4] sm:$0xf]  ;;  %v13619_v57 = vld [vmem:[%s23803_s5 + $0x138] sm:$0xf0] }
 0x509   :  { %9263 = vmatpush.bf16.msrb.mxu1 %v14162_v19  ;;  %v15570_v19 = vld [vmem:[%s23803_s5 + $0x1cc] sm:$0xf]  ;;  %v7369_v1 = vadd.f32 %v22964_v12, %v7356_v30  ;;  %v13555_v12 = vld [vmem:[%s23803_s5 + $0xb8] sm:$0xf0] }
 0x50a   :  { %v13702_v47 = vor.u32 %v15570_v19, %v13699_v53  ;;  %v13558_v56 = vor.u32 %v15534_v9, %v13555_v12  ;;  %v15518_v53 = vld [vmem:[%s23803_s5 + $0x2c] sm:$0xf]  ;;  %v15761_v9 = vld [vmem:[%s23803_s5 + $0x7c4] sm:$0xf]  ;;  %v14459_v12 = vld [vmem:[%s23803_s5 + $0x7d0] sm:$0xf0] }
 0x50b   :  { %9251 = vmatpush.bf16.msrb.mxu0 %v14018_v38  ;;  %v7382_v6 = vadd.f32 %v22745_v36, %v7369_v1  ;;  %v13539_v36 = vld [vmem:[%s23803_s5 + $0x98] sm:$0xf0] }
 0x50c   :  { %9223 = vmatpush.bf16.msra.mxu2 %v13794_v61  ;;  %v13542_v17 = vor.u32 %v15530_v29, %v13539_v36  ;;  %v13491_v1 = vld [vmem:[%s23803_s5 + $0x38] sm:$0xf0]  ;;  %v14462_v29 = vor.u32 %v15761_v9, %v14459_v12  ;;  %v14395_v12 = vld [vmem:[%s23803_s5 + $0x750] sm:$0xf0] }
 0x50d   :  { %9264 = vmatpush.bf16.msrb.mxu1 %v14146_v32  ;;  %v13686_v32 = vor.u32 %v15566_v13, %v13683_v54  ;;  %v7395_v18 = vadd.f32 %v22747_v3, %v7382_v6  ;;  %v13523_v3 = vld [vmem:[%s23803_s5 + $0x78] sm:$0xf0]  ;;  %v14337_v13 = vld [vmem:[%s23803_s5 + $0x6c8] sm:$0xf]  ;;  %v15732_v54 = vld [vmem:[%s23803_s5 + $0x6d4] sm:$0xf0]  ;;  %v13494_v6 = vor.u32 %v15518_v53, %v13491_v1 }
 0x50e   :  { %v14338_v36 = vor.u32 %v15732_v54, %v14337_v13  ;;  %v14273_v13 = vld [vmem:[%s23803_s5 + $0x648] sm:$0xf]  ;;  %v15716_v54 = vld [vmem:[%s23803_s5 + $0x654] sm:$0xf0] }
 0x50f   :  { %9252 = vmatpush.bf16.msrb.mxu0 %v14002_v4  ;;  %v9021_v38 = vpop.f32.mrf.mxu2  ;;  %v15526_v4 = vld [vmem:[%s23803_s5 + $0x6c] sm:$0xf]  ;;  %v7408_v26 = vadd.f32 %v22910_v42, %v7395_v18  ;;  %v13507_v42 = vld [vmem:[%s23803_s5 + $0x58] sm:$0xf0]  ;;  %v14321_v18 = vld [vmem:[%s23803_s5 + $0x6a8] sm:$0xf] }
 0x510   :  { %v23100_v0 = vadd.f32 %v9021_v38, %v22962_v33  ;;  %9224 = vmatpush.bf16.msra.mxu2 %v13778_v25  ;;  %v13526_v59 = vor.u32 %v15526_v4, %v13523_v3  ;;  %v13510_v8 = vor.u32 %v15522_v28, %v13507_v42  ;;  %v15514_v25 = vld [vmem:[%s23803_s5 + $0xc] sm:$0xf]  ;;  %v13475_v38 = vld [vmem:[%s23803_s5 + $0x18] sm:$0xf0]  ;;  %v15724_v28 = vld [vmem:[%s23803_s5 + $0x694] sm:$0xf0] }
 0x511   :  { %9265 = vmatpush.bf16.msrb.mxu1 %v14130_v63  ;;  %v15558_v63 = vld [vmem:[%s23803_s5 + $0x16c] sm:$0xf]  ;;  %v14227_v4 = vld [vmem:[%s23803_s5 + $0x5f8] sm:$0xf0] }
 0x512   :  { %v13654_v10 = vor.u32 %v15558_v63, %v13651_v22  ;;  %v15698_v42 = vld [vmem:[%s23803_s5 + $0x5cc] sm:$0xf] }
 0x513   :  { %9253 = vmatpush.bf16.msrb.mxu0 %v13986_v58  ;;  %v23112_v33 = vpop.f32.mrf.mxu0  ;;  %v15554_v58 = vld [vmem:[%s23803_s5 + $0x14c] sm:$0xf] }
 0x514   :  { %9225 = vmatpush.bf16.msra.mxu2 %v13762_v31  ;;  %v14099_v31 = vld [vmem:[%s23803_s5 + $0x4f8] sm:$0xf0] }
 0x515   :  { %9266 = vmatpush.bf16.msrb.mxu1 %v14114_v51  ;;  %v7420_v20 = vpop.f32.mrf.mxu3  ;;  %v13635_v51 = vld [vmem:[%s23803_s5 + $0x158] sm:$0xf0]  ;;  %v14102_v63 = vor.u32 %v15670_v2, %v14099_v31  ;;  %v14379_v31 = vld [vmem:[%s23803_s5 + $0x730] sm:$0xf0] }
 0x516   :  { %9254 = vmatmul.bf16.vlgmr.msrb.gmra.mxu0 %v22340_v35  ;;  %v7421_v15 = vadd.f32 %v7420_v20, %v7408_v26  ;;  %v13638_v19 = vor.u32 %v15554_v58, %v13635_v51  ;;  %v14322_v26 = vor.u32 %v15728_v24, %v14321_v18  ;;  %v14230_v20 = vor.u32 %v15702_v50, %v14227_v4  ;;  %v15712_v18 = vld [vmem:[%s23803_s5 + $0x634] sm:$0xf0]  ;;  %v15686_v24 = vld [vmem:[%s23803_s5 + $0x56c] sm:$0xf]  ;;  %v15737_v4 = vld [vmem:[%s23803_s5 + $0x704] sm:$0xf] }
 0x517   :  { %9298 = vmatpush.bf16.msra.mxu0 %v13590_v11  ;;  %v9023_v52 = vpop.f32.mrf.mxu2  ;;  %v14475_v11 = vld [vmem:[%s23803_s5 + $0x7f0] sm:$0xf0] }
 0x518   :  { %9267 = vmatmul.bf16.vlgmr.msrb.gmra.mxu1 %v22465_v14  ;;  %v7431_v55 = vmax.f32 %v7421_v15, 0.0  ;;  %9226 = vmatpush.bf16.msra.mxu2 %v13746_v27  ;;  %v15753_v27 = vld [vmem:[%s23803_s5 + $0x784] sm:$0xf]  ;;  %v14211_v15 = vld [vmem:[%s23803_s5 + $0x5d8] sm:$0xf0] }
 0x519   :  { %9311 = vmatpush.bf16.msra.mxu1 %v13718_v21  ;;  %v15736_v21 = vld [vmem:[%s23803_s5 + $0x6f4] sm:$0xf0] }
 0x51a   :  { %v23166_v61 = vpack.c.bf16 %v7431_v55, %v7431_v55  ;;  %v14354_v43 = vor.u32 %v15736_v21, %v14353_v62  ;;  %v15662_v62 = vld [vmem:[%s23803_s5 + $0x4ac] sm:$0xf]  ;;  %v14067_v21 = vld [vmem:[%s23803_s5 + $0x4b8] sm:$0xf0]  ;;  %v14214_v55 = vor.u32 %v15698_v42, %v14211_v15  ;;  %v15708_v42 = vld [vmem:[%s23803_s5 + $0x614] sm:$0xf0] }
 0x51b   :  { %9299 = vmatpush.bf16.msra.mxu0 %v13574_v40  ;;  %v9049_v30 = vpop.f32.mrf.mxu0  ;;  %v14478_v40 = vor.u32 %v15765_v23, %v14475_v11  ;;  %v23233_v52 = vpop.f32.mrf.mxu1  ;;  %v14306_v23 = vor.u32 %v15724_v28, %v14305_v39  ;;  %v15749_v11 = vld [vmem:[%s23803_s5 + $0x764] sm:$0xf]  ;;  %v14070_v53 = vor.u32 %v15662_v62, %v14067_v21  ;;  %v14241_v28 = vld [vmem:[%s23803_s5 + $0x608] sm:$0xf]  ;;  %v15682_v15 = vld [vmem:[%s23803_s5 + $0x54c] sm:$0xf] }
 0x51c   :  { %9227 = vmatpush.bf16.msra.mxu2 %v13730_v16  ;;  %9085 = vmatmul.bf16.vlgmr.msrb.gmra.mxu3 %v23166_v61  ;;  %v14411_v16 = vld [vmem:[%s23803_s5 + $0x770] sm:$0xf0]  ;;  %v15720_v30 = vld [vmem:[%s23803_s5 + $0x674] sm:$0xf0]  ;;  %v15606_v21 = vld [vmem:[%s23803_s5 + $0x2ec] sm:$0xf] }
 0x51d   :  { %9312 = vmatpush.bf16.msra.mxu1 %v13702_v47  ;;  %v15550_v47 = vld [vmem:[%s23803_s5 + $0x12c] sm:$0xf]  ;;  %9181 = vmatpush.bf16.msrb.mxu3 %v14478_v40  ;;  %v14414_v1 = vor.u32 %v15749_v11, %v14411_v16 }
 0x51e   :  { %v13622_v60 = vor.u32 %v15550_v47, %v13619_v57  ;;  %v14051_v47 = vld [vmem:[%s23803_s5 + $0x498] sm:$0xf0] }
 0x51f   :  { %9300 = vmatpush.bf16.msra.mxu0 %v13558_v56  ;;  %v7422_v56 = vpop.f32.mrf.mxu3  ;;  %9228 = vmatmul.bf16.vlgmr.msra.gmra.mxu2 %v22261_v5 }
 0x520   :  { %9272 = vmatpush.bf16.msrb.mxu2 %v14354_v43  ;;  %v15745_v43 = vld [vmem:[%s23803_s5 + $0x744] sm:$0xf]  ;;  %v7699_v56 = vperm.slane %v22902_v49, 1 }
 0x521   :  { %9313 = vmatpush.bf16.msra.mxu1 %v13686_v32  ;;  %v15546_v32 = vld [vmem:[%s23803_s5 + $0x10c] sm:$0xf]  ;;  %9182 = vmatpush.bf16.msrb.mxu3 %v14462_v29 }
 0x522   :  { %v13606_v3 = vor.u32 %v15546_v32, %v13603_v37  ;;  %v14274_v32 = vor.u32 %v15716_v54, %v14273_v13  ;;  %v15741_v37 = vld [vmem:[%s23803_s5 + $0x724] sm:$0xf]  ;;  %v15654_v29 = vld [vmem:[%s23803_s5 + $0x46c] sm:$0xf] }
 0x523   :  { %9301 = vmatpush.bf16.msra.mxu0 %v13542_v17  ;;  %v14443_v17 = vld [vmem:[%s23803_s5 + $0x7b0] sm:$0xf0]  ;;  %v9062_v9 = vpop.f32.mrf.mxu1 }
 0x524   :  { %9273 = vmatpush.bf16.msrb.mxu2 %v14338_v36  ;;  %v14446_v22 = vor.u32 %v15757_v46, %v14443_v17  ;;  %v14035_v36 = vld [vmem:[%s23803_s5 + $0x478] sm:$0xf0]  ;;  %v14257_v17 = vld [vmem:[%s23803_s5 + $0x628] sm:$0xf]  ;;  %v15602_v9 = vld [vmem:[%s23803_s5 + $0x2cc] sm:$0xf] }
 0x525   :  { %9314 = vmatpush.bf16.msra.mxu1 %v13670_v34  ;;  %v13478_v34 = vor.u32 %v15514_v25, %v13475_v38  ;;  %v14179_v25 = vld [vmem:[%s23803_s5 + $0x598] sm:$0xf0]  ;;  %v14398_v38 = vor.u32 %v15745_v43, %v14395_v12  ;;  %v14038_v50 = vor.u32 %v15654_v29, %v14035_v36  ;;  %v13937_v29 = vld [vmem:[%s23803_s5 + $0x3a8] sm:$0xf]  ;;  %v15632_v36 = vld [vmem:[%s23803_s5 + $0x3b4] sm:$0xf0] }
 0x526   :  { %9183 = vmatpush.bf16.msrb.mxu3 %v14446_v22  ;;  %v14382_v22 = vor.u32 %v15741_v37, %v14379_v31  ;;  %v14115_v37 = vld [vmem:[%s23803_s5 + $0x518] sm:$0xf0] }
 0x527   :  { %9302 = vmatpush.bf16.msra.mxu0 %v13526_v59  ;;  %v15666_v59 = vld [vmem:[%s23803_s5 + $0x4cc] sm:$0xf] }
 0x528   :  { %v14086_v58 = vor.u32 %v15666_v59, %v14083_v45  ;;  %9274 = vmatpush.bf16.msrb.mxu2 %v14322_v26  ;;  %v14258_v26 = vor.u32 %v15712_v18, %v14257_v17  ;;  %v15650_v59 = vld [vmem:[%s23803_s5 + $0x44c] sm:$0xf]  ;;  %v14019_v45 = vld [vmem:[%s23803_s5 + $0x458] sm:$0xf0]  ;;  %v13938_v18 = vor.u32 %v15632_v36, %v13937_v29 }
 0x529   :  { %9315 = vmatpush.bf16.msra.mxu1 %v13654_v10  ;;  %v14427_v10 = vld [vmem:[%s23803_s5 + $0x790] sm:$0xf0]  ;;  %v14022_v62 = vor.u32 %v15650_v59, %v14019_v45  ;;  %v15590_v59 = vld [vmem:[%s23803_s5 + $0x26c] sm:$0xf]  ;;  %v13779_v45 = vld [vmem:[%s23803_s5 + $0x278] sm:$0xf0] }
 0x52a   :  { %v14430_v51 = vor.u32 %v15753_v27, %v14427_v10  ;;  %v14363_v27 = vld [vmem:[%s23803_s5 + $0x710] sm:$0xf0]  ;;  %v14323_v29 = vld [vmem:[%s23803_s5 + $0x6b8] sm:$0xf0] }
 0x52b   :  { %9303 = vmatpush.bf16.msra.mxu0 %v13510_v8  ;;  %v14289_v8 = vld [vmem:[%s23803_s5 + $0x668] sm:$0xf]  ;;  %v14366_v16 = vor.u32 %v15737_v4, %v14363_v27  ;;  %v15594_v4 = vld [vmem:[%s23803_s5 + $0x28c] sm:$0xf]  ;;  %v15624_v27 = vld [vmem:[%s23803_s5 + $0x374] sm:$0xf0] }
 0x52c   :  { %9184 = vmatpush.bf16.msrb.mxu3 %v14430_v51  ;;  %9275 = vmatpush.bf16.msrb.mxu2 %v14306_v23  ;;  %v14290_v40 = vor.u32 %v15720_v30, %v14289_v8  ;;  %v13969_v51 = vld [vmem:[%s23803_s5 + $0x3e8] sm:$0xf]  ;;  %v15640_v23 = vld [vmem:[%s23803_s5 + $0x3f4] sm:$0xf0]  ;;  %v14242_v8 = vor.u32 %v15708_v42, %v14241_v28  ;;  %v15586_v28 = vld [vmem:[%s23803_s5 + $0x24c] sm:$0xf] }
 0x52d   :  { %9316 = vmatpush.bf16.msra.mxu1 %v13638_v19  ;;  %v15694_v19 = vld [vmem:[%s23803_s5 + $0x5ac] sm:$0xf]  ;;  %9137 = vmatmul.bf16.vlgmr.msra.gmra.mxu3 %v22520_v41 }
 0x52f   :  { %9304 = vmatpush.bf16.msra.mxu0 %v13494_v6  ;;  %v15690_v6 = vld [vmem:[%s23803_s5 + $0x58c] sm:$0xf] }
 0x530   :  { %9185 = vmatpush.bf16.msrb.mxu3 %v14414_v1  ;;  %9276 = vmatpush.bf16.msrb.mxu2 %v14290_v40  ;;  %v14182_v2 = vor.u32 %v15690_v6, %v14179_v25  ;;  %v15678_v1 = vld [vmem:[%s23803_s5 + $0x52c] sm:$0xf] }
 0x531   :  { %9317 = vmatpush.bf16.msra.mxu1 %v13622_v60 }
 0x533   :  { %9305 = vmatpush.bf16.msra.mxu0 %v13478_v34  ;;  %v9099_v46 = vpop.f32.mrf.mxu0  ;;  %v14163_v34 = vld [vmem:[%s23803_s5 + $0x578] sm:$0xf0] }
 0x534   :  { %9186 = vmatpush.bf16.msrb.mxu3 %v14398_v38  ;;  %9277 = vmatpush.bf16.msrb.mxu2 %v14274_v32  ;;  %v14166_v10 = vor.u32 %v15686_v24, %v14163_v34  ;;  %v15674_v38 = vld [vmem:[%s23803_s5 + $0x50c] sm:$0xf]  ;;  %v13921_v34 = vld [vmem:[%s23803_s5 + $0x388] sm:$0xf] }
 0x535   :  { %9318 = vmatpush.bf16.msra.mxu1 %v13606_v3  ;;  %v9100_v3 = vadd.f32 %v9099_v46, %v7699_v56  ;;  %v9112_v39 = vpop.f32.mrf.mxu1  ;;  %v15642_v56 = vld [vmem:[%s23803_s5 + $0x40c] sm:$0xf]  ;;  %v14118_v17 = vor.u32 %v15674_v38, %v14115_v37  ;;  %v14449_v38 = vld [vmem:[%s23803_s5 + $0x7a8] sm:$0xf] }
 0x536   :  { %9306 = vmatmul.bf16.vlgmr.msra.gmra.mxu0 %v22134_v48  ;;  %v14195_v48 = vld [vmem:[%s23803_s5 + $0x5b8] sm:$0xf0]  ;;  %v15598_v46 = vld [vmem:[%s23803_s5 + $0x2ac] sm:$0xf] }
 0x537   :  { %9350 = vmatpush.bf16.msrb.mxu0 %v14102_v63  ;;  %v14198_v57 = vor.u32 %v15694_v19, %v14195_v48  ;;  %v9034_v63 = vpop.f32.mrf.mxu3  ;;  %v13970_v48 = vor.u32 %v15640_v23, %v13969_v51  ;;  %v13873_v51 = vld [vmem:[%s23803_s5 + $0x328] sm:$0xf]  ;;  %v15616_v23 = vld [vmem:[%s23803_s5 + $0x334] sm:$0xf0]  ;;  %v15726_v37 = vld [vmem:[%s23803_s5 + $0x6ac] sm:$0xf] }
 0x538   :  { %9319 = vmatmul.bf16.vlgmr.msra.gmra.mxu1 %v22136_v7  ;;  %v15658_v7 = vld [vmem:[%s23803_s5 + $0x48c] sm:$0xf]  ;;  %9187 = vmatpush.bf16.msrb.mxu3 %v14382_v22 }
 0x539   :  { %9363 = vmatpush.bf16.msrb.mxu1 %v14230_v20  ;;  %v14054_v60 = vor.u32 %v15658_v7, %v14051_v47  ;;  %v9035_v20 = vadd.f32 %v9034_v63, %v23100_v0  ;;  %v14147_v0 = vld [vmem:[%s23803_s5 + $0x558] sm:$0xf0]  ;;  %9278 = vmatpush.bf16.msrb.mxu2 %v14258_v26  ;;  %v13953_v47 = vld [vmem:[%s23803_s5 + $0x3c8] sm:$0xf] }
 0x53a   :  { %v14150_v19 = vor.u32 %v15682_v15, %v14147_v0  ;;  %v14131_v7 = vld [vmem:[%s23803_s5 + $0x538] sm:$0xf0]  ;;  %v13905_v26 = vld [vmem:[%s23803_s5 + $0x368] sm:$0xf] }
 0x53b   :  { %9351 = vmatpush.bf16.msrb.mxu0 %v14086_v58  ;;  %v23348_v58 = vadd.f32 %v9112_v39, %v9100_v3  ;;  %v9048_v11 = vadd.f32 %v23112_v33, %v9035_v20  ;;  %v9101_v30 = vpop.f32.mrf.mxu0  ;;  %v15646_v33 = vld [vmem:[%s23803_s5 + $0x42c] sm:$0xf]  ;;  %v14134_v54 = vor.u32 %v15678_v1, %v14131_v7  ;;  %v13795_v3 = vld [vmem:[%s23803_s5 + $0x298] sm:$0xf0]  ;;  %v13906_v20 = vor.u32 %v15624_v27, %v13905_v26  ;;  %v13889_v39 = vld [vmem:[%s23803_s5 + $0x348] sm:$0xf] }
 0x53c   :  { %9188 = vmatpush.bf16.msrb.mxu3 %v14366_v16  ;;  %v13798_v22 = vor.u32 %v15594_v4, %v13795_v3  ;;  %v15612_v30 = vld [vmem:[%s23803_s5 + $0x314] sm:$0xf0]  ;;  %v15734_v1 = vld [vmem:[%s23803_s5 + $0x6ec] sm:$0xf]  ;;  %v14291_v3 = vld [vmem:[%s23803_s5 + $0x678] sm:$0xf0] }
 0x53d   :  { %9364 = vmatpush.bf16.msrb.mxu1 %v14214_v55  ;;  %v13843_v55 = vld [vmem:[%s23803_s5 + $0x2f8] sm:$0xf0]  ;;  %v23376_v40 = vadd.f32 %v23233_v52, %v9048_v11  ;;  %9279 = vmatpush.bf16.msrb.mxu2 %v14242_v8  ;;  %v9114_v6 = vpop.f32.mrf.mxu1  ;;  %v13857_v8 = vld [vmem:[%s23803_s5 + $0x308] sm:$0xf]  ;;  %v15718_v4 = vld [vmem:[%s23803_s5 + $0x66c] sm:$0xf] }
 0x53e   :  { %v13846_v43 = vor.u32 %v15606_v21, %v13843_v55  ;;  %v13827_v52 = vld [vmem:[%s23803_s5 + $0x2d8] sm:$0xf0]  ;;  %v13874_v55 = vor.u32 %v15616_v23, %v13873_v51  ;;  %v13858_v7 = vor.u32 %v15612_v30, %v13857_v8  ;;  %v15730_v6 = vld [vmem:[%s23803_s5 + $0x6cc] sm:$0xf]  ;;  %v14294_v26 = vor.u32 %v15718_v4, %v14291_v3  ;;  %v14401_v27 = vld [vmem:[%s23803_s5 + $0x748] sm:$0xf] }
 0x53f   :  { %9352 = vmatpush.bf16.msrb.mxu0 %v14070_v53  ;;  %v14003_v53 = vld [vmem:[%s23803_s5 + $0x438] sm:$0xf0]  ;;  %v9036_v12 = vpop.f32.mrf.mxu3  ;;  %v13830_v32 = vor.u32 %v15602_v9, %v13827_v52  ;;  %9189 = vmatmul.bf16.vlgmr.msrb.gmra.mxu3 %v23166_v61  ;;  %v15710_v51 = vld [vmem:[%s23803_s5 + $0x62c] sm:$0xf]  ;;  %v14369_v8 = vld [vmem:[%s23803_s5 + $0x708] sm:$0xf] }
 0x540   :  { %v14006_v13 = vor.u32 %v15646_v33, %v14003_v53  ;;  %9233 = vmatpush.bf16.msra.mxu3 %v13970_v48  ;;  %9280 = vmatmul.bf16.vlgmr.msrb.gmra.mxu2 %v22801_v44  ;;  %v13747_v21 = vld [vmem:[%s23803_s5 + $0x238] sm:$0xf0]  ;;  %v14481_v33 = vld [vmem:[%s23803_s5 + $0x7e8] sm:$0xf]  ;;  %v15768_v53 = vld [vmem:[%s23803_s5 + $0x7f4] sm:$0xf0] }
 0x541   :  { %9365 = vmatpush.bf16.msrb.mxu1 %v14198_v57  ;;  %v15636_v57 = vld [vmem:[%s23803_s5 + $0x3d4] sm:$0xf0]  ;;  %9324 = vmatpush.bf16.msra.mxu2 %v13846_v43  ;;  %v13731_v48 = vld [vmem:[%s23803_s5 + $0x218] sm:$0xf0]  ;;  %v14482_v9 = vor.u32 %v15768_v53, %v14481_v33  ;;  %v15638_v33 = vld [vmem:[%s23803_s5 + $0x3ec] sm:$0xf] }
 0x542   :  { %v13954_v25 = vor.u32 %v15636_v57, %v13953_v47  ;;  %v14355_v43 = vld [vmem:[%s23803_s5 + $0x6f8] sm:$0xf0]  ;;  %v15740_v30 = vld [vmem:[%s23803_s5 + $0x714] sm:$0xf0]  ;;  %v15766_v3 = vld [vmem:[%s23803_s5 + $0x7ec] sm:$0xf] }
 0x543   :  { %9353 = vmatpush.bf16.msrb.mxu0 %v14054_v60  ;;  %v13987_v60 = vld [vmem:[%s23803_s5 + $0x418] sm:$0xf0]  ;;  %v14358_v12 = vor.u32 %v15734_v1, %v14355_v43  ;;  %v14370_v1 = vor.u32 %v15740_v30, %v14369_v8 }
 0x544   :  { %v13990_v31 = vor.u32 %v15642_v56, %v13987_v60  ;;  %9234 = vmatpush.bf16.msra.mxu3 %v13954_v25  ;;  %v14339_v25 = vld [vmem:[%s23803_s5 + $0x6d8] sm:$0xf0] }
 0x545   :  { %9366 = vmatpush.bf16.msrb.mxu1 %v14182_v2  ;;  %v13811_v2 = vld [vmem:[%s23803_s5 + $0x2b8] sm:$0xf0]  ;;  %9325 = vmatpush.bf16.msra.mxu2 %v13830_v32  ;;  %v14342_v60 = vor.u32 %v15730_v6, %v14339_v25  ;;  %v15760_v32 = vld [vmem:[%s23803_s5 + $0x7b4] sm:$0xf0]  ;;  %v15630_v6 = vld [vmem:[%s23803_s5 + $0x3ac] sm:$0xf] }
 0x546   :  { %v13814_v24 = vor.u32 %v15598_v46, %v13811_v2  ;;  %v14450_v36 = vor.u32 %v15760_v32, %v14449_v38  ;;  %v14326_v46 = vor.u32 %v15726_v37, %v14323_v29  ;;  %v14433_v2 = vld [vmem:[%s23803_s5 + $0x788] sm:$0xf]  ;;  %v14259_v23 = vld [vmem:[%s23803_s5 + $0x638] sm:$0xf0]  ;;  %v15622_v37 = vld [vmem:[%s23803_s5 + $0x36c] sm:$0xf] }
 0x547   :  { %9354 = vmatpush.bf16.msrb.mxu0 %v14038_v50  ;;  %v15628_v50 = vld [vmem:[%s23803_s5 + $0x394] sm:$0xf0]  ;;  %v13971_v53 = vld [vmem:[%s23803_s5 + $0x3f8] sm:$0xf0] }
 0x548   :  { %9235 = vmatpush.bf16.msra.mxu3 %v13938_v18  ;;  %v13922_v63 = vor.u32 %v15628_v50, %v13921_v34  ;;  %v14417_v34 = vld [vmem:[%s23803_s5 + $0x768] sm:$0xf]  ;;  %v15752_v50 = vld [vmem:[%s23803_s5 + $0x774] sm:$0xf0]  ;;  %v13939_v25 = vld [vmem:[%s23803_s5 + $0x3b8] sm:$0xf0] }
 0x549   :  { %9367 = vmatpush.bf16.msrb.mxu1 %v14166_v10  ;;  %9326 = vmatpush.bf16.msra.mxu2 %v13814_v24  ;;  %v13782_v10 = vor.u32 %v15590_v59, %v13779_v45  ;;  %v15748_v59 = vld [vmem:[%s23803_s5 + $0x754] sm:$0xf0]  ;;  %v7700_v45 = vperm.slane %v22902_v49, 2  ;;  %v13859_v4 = vld [vmem:[%s23803_s5 + $0x318] sm:$0xf0] }
 0x54a   :  { %v15744_v49 = vld [vmem:[%s23803_s5 + $0x734] sm:$0xf0]  ;;  %v14403_v8 = vld [vmem:[%s23803_s5 + $0x758] sm:$0xf0] }
 0x54b   :  { %9355 = vmatpush.bf16.msrb.mxu0 %v14022_v62  ;;  %v15582_v62 = vld [vmem:[%s23803_s5 + $0x22c] sm:$0xf] }
 0x54c   :  { %9236 = vmatpush.bf16.msra.mxu3 %v13922_v63  ;;  %v13750_v16 = vor.u32 %v15582_v62, %v13747_v21 }
 0x54d   :  { %9368 = vmatpush.bf16.msrb.mxu1 %v14150_v19  ;;  %9327 = vmatpush.bf16.msra.mxu2 %v13798_v22  ;;  %v15578_v19 = vld [vmem:[%s23803_s5 + $0x20c] sm:$0xf]  ;;  %v14418_v22 = vor.u32 %v15752_v50, %v14417_v34 }
 0x54e   :  { %v13734_v57 = vor.u32 %v15578_v19, %v13731_v48  ;;  %v15706_v19 = vld [vmem:[%s23803_s5 + $0x60c] sm:$0xf]  ;;  %v14243_v48 = vld [vmem:[%s23803_s5 + $0x618] sm:$0xf0] }
 0x54f   :  { %9356 = vmatpush.bf16.msrb.mxu0 %v14006_v13  ;;  %v14465_v13 = vld [vmem:[%s23803_s5 + $0x7c8] sm:$0xf]  ;;  %v15610_v50 = vld [vmem:[%s23803_s5 + $0x30c] sm:$0xf] }
 0x550   :  { %9237 = vmatpush.bf16.msra.mxu3 %v13906_v20  ;;  %v15714_v20 = vld [vmem:[%s23803_s5 + $0x64c] sm:$0xf] }
 0x551   :  { %9369 = vmatpush.bf16.msrb.mxu1 %v14134_v54  ;;  %9328 = vmatpush.bf16.msra.mxu2 %v13782_v10  ;;  %v15764_v54 = vld [vmem:[%s23803_s5 + $0x7d4] sm:$0xf0]  ;;  %v14275_v10 = vld [vmem:[%s23803_s5 + $0x658] sm:$0xf0] }
 0x552   :  { %v14466_v56 = vor.u32 %v15764_v54, %v14465_v13 }
 0x553   :  { %9357 = vmatpush.bf16.msrb.mxu0 %v13990_v31  ;;  %v23457_v15 = vpop.f32.mrf.mxu0  ;;  %v15756_v31 = vld [vmem:[%s23803_s5 + $0x794] sm:$0xf0] }
 0x554   :  { %v14434_v18 = vor.u32 %v15756_v31, %v14433_v2 }
 0x555   :  { %9370 = vmatpush.bf16.msrb.mxu1 %v14118_v17  ;;  %v23465_v11 = vpop.f32.mrf.mxu1  ;;  %v15722_v17 = vld [vmem:[%s23803_s5 + $0x68c] sm:$0xf] }
 0x556   :  { %9358 = vmatmul.bf16.vlgmr.msrb.gmra.mxu0 %v22340_v35  ;;  %v15620_v35 = vld [vmem:[%s23803_s5 + $0x354] sm:$0xf0] }
 0x557   :  { %v13890_v42 = vor.u32 %v15620_v35, %v13889_v39  ;;  %v14402_v39 = vor.u32 %v15748_v59, %v14401_v27  ;;  %v13862_v27 = vor.u32 %v15610_v50, %v13859_v4  ;;  %v15776_v4 = vld [vmem:[%s23807_s7 + $0x38] sm:$0xff] }
 0x558   :  { %9371 = vmatmul.bf16.vlgmr.msrb.gmra.mxu1 %v22465_v14  ;;  %v13763_v14 = vld [vmem:[%s23803_s5 + $0x258] sm:$0xf0]  ;;  %9580 = vmatpush.bf16.msra.mxu0 %v15776_v4 }
 0x559   :  { %v13766_v0 = vor.u32 %v15586_v28, %v13763_v14  ;;  %9238 = vmatpush.bf16.msra.mxu3 %v13890_v42  ;;  %v14278_v28 = vor.u32 %v15714_v20, %v14275_v10  ;;  %v14385_v14 = vld [vmem:[%s23803_s5 + $0x728] sm:$0xf]  ;;  %v15762_v10 = vld [vmem:[%s23803_s5 + $0x7cc] sm:$0xf] }
 0x55b   :  { %9329 = vmatpush.bf16.msra.mxu2 %v13766_v0  ;;  %v9153_v47 = vpop.f32.mrf.mxu0 }
 0x55c   :  { %v13974_v47 = vor.u32 %v15638_v33, %v13971_v53 }
 0x55d   :  { %9239 = vmatpush.bf16.msra.mxu3 %v13874_v55  ;;  %v9166_v52 = vpop.f32.mrf.mxu1  ;;  %v14386_v55 = vor.u32 %v15744_v49, %v14385_v14  ;;  %v14451_v14 = vld [vmem:[%s23803_s5 + $0x7b8] sm:$0xf0] }
 0x55e   :  { %v13955_v52 = vld [vmem:[%s23803_s5 + $0x3d8] sm:$0xf0] }
 0x55f   :  { %9330 = vmatpush.bf16.msra.mxu2 %v13750_v16  ;;  %v14262_v16 = vor.u32 %v15710_v51, %v14259_v23  ;;  %v15750_v23 = vld [vmem:[%s23803_s5 + $0x76c] sm:$0xf] }
 0x560   :  { %v23547_v63 = vpop.f32.mrf.mxu2 }
 0x561   :  { %9240 = vmatpush.bf16.msra.mxu3 %v13858_v7  ;;  %v14246_v7 = vor.u32 %v15706_v19, %v14243_v48  ;;  %v15799_v48 = vld [vmem:[%s23804_s6] sm:$0xf] }
 0x562   :  { %v7701_v33 = vperm.slane %v15799_v48, 3 }
 0x563   :  { %9331 = vmatpush.bf16.msra.mxu2 %v13734_v57 }
 0x564   :  { %9241 = vmatmul.bf16.vlgmr.msra.gmra.mxu3 %v22520_v41 }
 0x565   :  { %9285 = vmatpush.bf16.msrb.mxu3 %v14482_v9  ;;  %v15634_v9 = vld [vmem:[%s23803_s5 + $0x3cc] sm:$0xf] }
 0x566   :  { %9332 = vmatmul.bf16.vlgmr.msra.gmra.mxu2 %v22261_v5  ;;  %v14307_v5 = vld [vmem:[%s23803_s5 + $0x698] sm:$0xf0]  ;;  %v13958_v54 = vor.u32 %v15634_v9, %v13955_v52 }
 0x567   :  { %9376 = vmatpush.bf16.msrb.mxu2 %v14358_v12  ;;  %v14310_v24 = vor.u32 %v15722_v17, %v14307_v5  ;;  %v15614_v17 = vld [vmem:[%s23803_s5 + $0x32c] sm:$0xf]  ;;  %v13875_v5 = vld [vmem:[%s23803_s5 + $0x338] sm:$0xf0] }
 0x568   :  { %v9075_v21 = vpop.f32.mrf.mxu2  ;;  %v13878_v34 = vor.u32 %v15614_v17, %v13875_v5 }
 0x569   :  { %9286 = vmatpush.bf16.msrb.mxu3 %v14466_v56  ;;  %v13942_v56 = vor.u32 %v15630_v6, %v13939_v25 }
 0x56b   :  { %9377 = vmatpush.bf16.msrb.mxu2 %v14342_v60  ;;  %v13923_v60 = vld [vmem:[%s23803_s5 + $0x398] sm:$0xf0] }
 0x56d   :  { %9287 = vmatpush.bf16.msrb.mxu3 %v14450_v36  ;;  %v15618_v36 = vld [vmem:[%s23803_s5 + $0x34c] sm:$0xf] }
 0x56f   :  { %9378 = vmatpush.bf16.msrb.mxu2 %v14326_v46  ;;  %v13891_v46 = vld [vmem:[%s23803_s5 + $0x358] sm:$0xf0] }
 0x570   :  { %v9125_v12 = vpop.f32.mrf.mxu2  ;;  %v13894_v31 = vor.u32 %v15618_v36, %v13891_v46 }
 0x571   :  { %9288 = vmatpush.bf16.msrb.mxu3 %v14434_v18  ;;  %v23601_v13 = vadd.f32 %v9125_v12, %v23348_v58  ;;  %v15626_v58 = vld [vmem:[%s23803_s5 + $0x38c] sm:$0xf] }
 0x572   :  { %v13926_v32 = vor.u32 %v15626_v58, %v13923_v60  ;;  %v15738_v12 = vld [vmem:[%s23803_s5 + $0x70c] sm:$0xf] }
 0x573   :  { %9379 = vmatpush.bf16.msrb.mxu2 %v14310_v24  ;;  %v9203_v35 = vpop.f32.mrf.mxu0 }
 0x574   :  { %v9204_v42 = vadd.f32 %v9203_v35, %v7700_v45 }
 0x575   :  { %9289 = vmatpush.bf16.msrb.mxu3 %v14418_v22  ;;  %v9216_v0 = vpop.f32.mrf.mxu1  ;;  %v14483_v22 = vld [vmem:[%s23803_s5 + $0x7f8] sm:$0xf0] }
 0x576   :  { %v23574_v62 = vadd.f32 %v9216_v0, %v9204_v42  ;;  %v14486_v59 = vor.u32 %v15766_v3, %v14483_v22  ;;  %v15754_v42 = vld [vmem:[%s23803_s5 + $0x78c] sm:$0xf]  ;;  %v14435_v0 = vld [vmem:[%s23803_s5 + $0x798] sm:$0xf0]  ;;  %v15775_v22 = vld [vmem:[%s23807_s7 + $0x30] sm:$0xff] }
 0x577   :  { %9380 = vmatpush.bf16.msrb.mxu2 %v14294_v26  ;;  %v14438_v51 = vor.u32 %v15754_v42, %v14435_v0  ;;  %9581 = vmatpush.bf16.msra.mxu0 %v15775_v22 }
 0x578   :  { %v9127_v38 = vpop.f32.mrf.mxu2 }
 0x579   :  { %9290 = vmatpush.bf16.msrb.mxu3 %v14402_v39  ;;  %v14467_v39 = vld [vmem:[%s23803_s5 + $0x7d8] sm:$0xf0] }
 0x57a   :  { %v14470_v35 = vor.u32 %v15762_v10, %v14467_v39  ;;  %v15772_v10 = vld [vmem:[%s23807_s7 + $0x18] sm:$0xff] }
 0x57b   :  { %9381 = vmatpush.bf16.msrb.mxu2 %v14278_v28  ;;  %v9205_v43 = vpop.f32.mrf.mxu0  ;;  %v15758_v28 = vld [vmem:[%s23803_s5 + $0x7ac] sm:$0xf] }
 0x57c   :  { %v14454_v49 = vor.u32 %v15758_v28, %v14451_v14  ;;  %v14387_v43 = vld [vmem:[%s23803_s5 + $0x738] sm:$0xf0]  ;;  %v15770_v14 = vld [vmem:[%s23807_s7 + $0x8] sm:$0xff] }
 0x57d   :  { %9291 = vmatpush.bf16.msrb.mxu3 %v14386_v55  ;;  %v9218_v57 = vpop.f32.mrf.mxu1  ;;  %v9074_v55 = vadd.f32 %v23547_v63, %v23376_v40  ;;  %v15742_v63 = vld [vmem:[%s23803_s5 + $0x72c] sm:$0xf] }
 0x57e   :  { %v14390_v9 = vor.u32 %v15742_v63, %v14387_v43 }
 0x57f   :  { %9382 = vmatpush.bf16.msrb.mxu2 %v14262_v16  ;;  %v15746_v16 = vld [vmem:[%s23803_s5 + $0x74c] sm:$0xf] }
 0x581   :  { %9292 = vmatpush.bf16.msrb.mxu3 %v14370_v1  ;;  %v14406_v1 = vor.u32 %v15746_v16, %v14403_v8 }
 0x582   :  { %v23629_v2 = vpop.f32.mrf.mxu2 }
 0x583   :  { %9383 = vmatpush.bf16.msrb.mxu2 %v14246_v7 }
 0x584   :  { %9293 = vmatmul.bf16.vlgmr.msrb.gmra.mxu3 %v23166_v61 }
 0x585   :  { %9337 = vmatpush.bf16.msra.mxu3 %v13974_v47 }
 0x586   :  { %9384 = vmatmul.bf16.vlgmr.msrb.gmra.mxu2 %v22801_v44  ;;  %v13907_v44 = vld [vmem:[%s23803_s5 + $0x378] sm:$0xf0] }
 0x587   :  { %v13910_v29 = vor.u32 %v15622_v37, %v13907_v44 }
 0x589   :  { %9338 = vmatpush.bf16.msra.mxu3 %v13958_v54 }
 0x58a   :  { %v9179_v26 = vpop.f32.mrf.mxu2 }
 0x58d   :  { %9339 = vmatpush.bf16.msra.mxu3 %v13942_v56 }
 0x591   :  { %9340 = vmatpush.bf16.msra.mxu3 %v13926_v32 }
 0x593   :  { %v23637_v18 = vpop.f32.mrf.mxu0 }
 0x595   :  { %9341 = vmatpush.bf16.msra.mxu3 %v13910_v29  ;;  %v23639_v24 = vpop.f32.mrf.mxu1 }
 0x599   :  { %9342 = vmatpush.bf16.msra.mxu3 %v13894_v31 }
 0x59b   :  { %v9257_v45 = vpop.f32.mrf.mxu0 }
 0x59c   :  { %v15773_v45 = vld [vmem:[%s23807_s7 + $0x20] sm:$0xff] }
 0x59d   :  { %9343 = vmatpush.bf16.msra.mxu3 %v13878_v34  ;;  %v9270_v20 = vpop.f32.mrf.mxu1 }
 0x59f   :  { %v9086_v30 = vpop.f32.mrf.mxu3 }
 0x5a0   :  { %v23686_v19 = vadd.f32 %v9086_v30, %v9074_v55 }
 0x5a1   :  { %9344 = vmatpush.bf16.msra.mxu3 %v13862_v27  ;;  %v15774_v27 = vld [vmem:[%s23807_s7 + $0x28] sm:$0xff] }
 0x5a2   :  { %v9229_v53 = vpop.f32.mrf.mxu2  ;;  %9606 = vst [vmem:[%s23805_s10] sm:$0xff] %v23686_v19  ;;  %9582 = vmatpush.bf16.msra.mxu0 %v15774_v27 }
 0x5a3   :  { %v9230_v40 = vadd.f32 %v9229_v53, %v23574_v62  ;;  %v14371_v62 = vld [vmem:[%s23803_s5 + $0x718] sm:$0xf0] }
 0x5a4   :  { %9345 = vmatmul.bf16.vlgmr.msra.gmra.mxu3 %v22520_v41  ;;  %v14419_v41 = vld [vmem:[%s23803_s5 + $0x778] sm:$0xf0]  ;;  %v14374_v25 = vor.u32 %v15738_v12, %v14371_v62 }
 0x5a5   :  { %9389 = vmatpush.bf16.msrb.mxu3 %v14486_v59  ;;  %v14422_v21 = vor.u32 %v15750_v23, %v14419_v41  ;;  %v15784_v12 = vld [vmem:[%s23807_s7 + $0x78] sm:$0xff] }
 0x5a6   :  { %9583 = vmatpush.bf16.msra.mxu0 %v15773_v45  ;;  %9593 = vmatpush.bf16.msra.mxu1 %v15784_v12 }
 0x5a7   :  { %v9088_v54 = vpop.f32.mrf.mxu3 }
 0x5a9   :  { %9390 = vmatpush.bf16.msrb.mxu3 %v14470_v35  ;;  %v15771_v35 = vld [vmem:[%s23807_s7 + $0x10] sm:$0xff] }
 0x5aa   :  { %v9231_v6 = vpop.f32.mrf.mxu2  ;;  %9584 = vmatpush.bf16.msra.mxu0 %v15772_v10  ;;  %v9441_v10 = vld [vmem:[%s23808_s9 + $0x8] sm:$0xff] }
 0x5ad   :  { %9391 = vmatpush.bf16.msrb.mxu3 %v14454_v49 }
 0x5ae   :  { %9585 = vmatpush.bf16.msra.mxu0 %v15771_v35 }
 0x5b0   :  { %v9138_v60 = vpop.f32.mrf.mxu3 }
 0x5b1   :  { %9392 = vmatpush.bf16.msrb.mxu3 %v14438_v51  ;;  %v9139_v38 = vadd.f32 %v9138_v60, %v23601_v13  ;;  %v15769_v51 = vld [vmem:[%s23807_s7] sm:$0xff] }
 0x5b2   :  { %9586 = vmatpush.bf16.msra.mxu0 %v15770_v14 }
 0x5b3   :  { %v9307_v7 = vpop.f32.mrf.mxu0  ;;  %v9152_v32 = vadd.f32 %v23457_v15, %v9139_v38  ;;  %v15780_v38 = vld [vmem:[%s23807_s7 + $0x58] sm:$0xff] }
 0x5b4   :  { %v9308_v47 = vadd.f32 %v9307_v7, %v7701_v33 }
 0x5b5   :  { %9393 = vmatpush.bf16.msrb.mxu3 %v14422_v21  ;;  %v9320_v57 = vpop.f32.mrf.mxu1  ;;  %v9165_v44 = vadd.f32 %v23465_v11, %v9152_v32 }
 0x5b6   :  { %v9321_v52 = vadd.f32 %v9320_v57, %v9308_v47  ;;  %9587 = vmatpush.bf16.msra.mxu0 %v15769_v51  ;;  %v9440_v57 = vld [vmem:[%s23808_s9] sm:$0xff] }
 0x5b7   :  { %v9178_v29 = vadd.f32 %v23629_v2, %v9165_v44 }
 0x5b8   :  { %v9140_v37 = vpop.f32.mrf.mxu3 }
 0x5b9   :  { %9394 = vmatpush.bf16.msrb.mxu3 %v14406_v1  ;;  %v15779_v37 = vld [vmem:[%s23807_s7 + $0x50] sm:$0xff] }
 0x5bb   :  { %v9309_v56 = vpop.f32.mrf.mxu0 }
 0x5bc   :  { %v15782_v56 = vld [vmem:[%s23807_s7 + $0x68] sm:$0xff] }
 0x5bd   :  { %9395 = vmatpush.bf16.msrb.mxu3 %v14390_v9  ;;  %v9322_v58 = vpop.f32.mrf.mxu1 }
 0x5c1   :  { %9396 = vmatpush.bf16.msrb.mxu3 %v14374_v25  ;;  %v15783_v25 = vld [vmem:[%s23807_s7 + $0x70] sm:$0xff] }
 0x5c2   :  { %v9190_v46 = vpop.f32.mrf.mxu3  ;;  %9594 = vmatpush.bf16.msra.mxu1 %v15783_v25 }
 0x5c3   :  { %v9281_v36 = vpop.f32.mrf.mxu2  ;;  %v23713_v31 = vadd.f32 %v9190_v46, %v9178_v29  ;;  %v15778_v29 = vld [vmem:[%s23807_s7 + $0x48] sm:$0xff] }
 0x5c4   :  { %9397 = vmatmul.bf16.vlgmr.msrb.gmra.mxu3 %v23166_v61 }
 0x5c5   :  { %9607 = vst [vmem:[%s23805_s10 + $0x8] sm:$0xff] %v23713_v31 }
 0x5c6   :  { %9595 = vmatpush.bf16.msra.mxu1 %v15782_v56 }
 0x5ca   :  { %v9192_v15 = vpop.f32.mrf.mxu3 }
 0x5cb   :  { %v9283_v13 = vpop.f32.mrf.mxu2 }
 0x5cc   :  { %v15777_v13 = vld [vmem:[%s23807_s7 + $0x40] sm:$0xff] }
 0x5d3   :  { %v23715_v17 = vpop.f32.mrf.mxu0 }
 0x5d5   :  { %v23721_v61 = vpop.f32.mrf.mxu1 }
 0x5db   :  { %v9361_v5 = vpop.f32.mrf.mxu0 }
 0x5dd   :  { %v9374_v34 = vpop.f32.mrf.mxu1 }
 0x5e7   :  { %v9242_v11 = vpop.f32.mrf.mxu3 }
 0x5e8   :  { %v9243_v59 = vadd.f32 %v9242_v11, %v9230_v40 }
 0x5e9   :  { %v9333_v50 = vpop.f32.mrf.mxu2 }
 0x5ea   :  { %v23723_v2 = vadd.f32 %v9333_v50, %v9321_v52  ;;  %v9256_v20 = vadd.f32 %v23637_v18, %v9243_v59 }
 0x5ec   :  { %v9269_v39 = vadd.f32 %v23639_v24, %v9256_v20 }
 0x5ee   :  { %v9282_v28 = vadd.f32 %v9281_v36, %v9269_v39 }
 0x5ef   :  { %v9244_v3 = vpop.f32.mrf.mxu3 }
 0x5f1   :  { %v9335_v26 = vpop.f32.mrf.mxu2 }
 0x607   :  { %v9294_v49 = vpop.f32.mrf.mxu3 }
 0x608   :  { %v9295_v42 = vadd.f32 %v9294_v49, %v9282_v28 }
 0x609   :  { %v9385_v18 = vpop.f32.mrf.mxu2 }
 0x60a   :  { %v14487_v0 = vadd.f32 -5.0, %v9295_v42 }
 0x60c   :  { %v9410_v24 = vand.u32 2147483647, %v14487_v0  ;;  %v9404_v63 = vmax.f32 %v14487_v0, 0.0  ;;  %vm9406_vm1 = vcmp.ne.f32.partialorder %v14487_v0, %v14487_v0 }
 0x60e   :  { %v9412_v23 = vsub.f32 0.0, %v9410_v24 }
 0x60f   :  { %v9296_v41 = vpop.f32.mrf.mxu3 }
 0x610   :  { %v9414_v21 = vmul.f32 1.442695, %v9412_v23 }
 0x611   :  { %v9387_v55 = vpop.f32.mrf.mxu2 }
 0x612   :  { %15786 = vpow2.f32 %v9414_v21 }
 0x618   :  { %v15787_v16 = vpop.eup %15786 }
 0x619   :  { %v9418_v8 = vadd.f32 1.0, %v15787_v16  ;;  %v9421_v30 = vmul.f32 -0.5, %v15787_v16  ;;  %v9424_v33 = vand.u32 2147483647, %v15787_v16 }
 0x61b   :  { %15788 = vlog2.f32 %v9418_v8  ;;  %v9422_v48 = vadd.f32 1.0, %v9421_v30  ;;  %vm9425_vm0 = vcmp.lt.f32.partialorder %v9424_v33, 0.0004427343 }
 0x61d   :  { %v9423_v40 = vmul.f32 %v15787_v16, %v9422_v48 }
 0x621   :  { %v15789_v53 = vpop.eup %15788 }
 0x622   :  { %v9420_v1 = vmul.f32 0.6931472, %v15789_v53 }
 0x624   :  { %v9426_v43 = vsel %vm9425_vm0, %v9423_v40, %v9420_v1 }
 0x625   :  { %v9436_v47 = vadd.f32 %v9426_v43, %v9404_v63 }
 0x627   :  { %v9346_v7 = vpop.f32.mrf.mxu3  ;;  %v9438_v9 = vsel %vm9406_vm1, %v14487_v0, %v9436_v47 }
 0x628   :  { %v9442_v52 = vmul.f32 %v9440_v57, %v9438_v9  ;;  %9608 = vst [vmem:[%s23809_s11] sm:$0xff] %v9438_v9  ;;  %v9347_v58 = vadd.f32 %v9346_v7, %v23723_v2 }
 0x62a   :  { %v9444_v62 = vadd.f32 %v9442_v52, %v23686_v19  ;;  %v15781_v19 = vld [vmem:[%s23807_s7 + $0x60] sm:$0xff]  ;;  %v9360_v60 = vadd.f32 %v23715_v17, %v9347_v58 }
 0x62b   :  { %9596 = vmatpush.bf16.msra.mxu1 %v15781_v19 }
 0x62c   :  { %v9446_v6 = vpack.c.bf16 %v9444_v62, %v9444_v62  ;;  %v9373_v32 = vadd.f32 %v23721_v61, %v9360_v60 }
 0x62e   :  { %9588 = vmatmul.bf16.vlgmr.msra.gmra.mxu0 %v9446_v6  ;;  %v9386_v44 = vadd.f32 %v9385_v18, %v9373_v32  ;;  %v15785_v18 = vld [vmem:[%s23806_s8] ss:$0 sm:$0xff] }
 0x62f   :  { %v9348_v54 = vpop.f32.mrf.mxu3  ;;  %9597 = vmatpush.bf16.msra.mxu1 %v15780_v38 }
 0x633   :  { %9598 = vmatpush.bf16.msra.mxu1 %v15779_v37 }
 0x637   :  { %9599 = vmatpush.bf16.msra.mxu1 %v15778_v29 }
 0x63b   :  { %9600 = vmatpush.bf16.msra.mxu1 %v15777_v13 }
 0x647   :  { %v9398_v36 = vpop.f32.mrf.mxu3 }
 0x648   :  { %v9399_v46 = vadd.f32 %v9398_v36, %v9386_v44 }
 0x64a   :  { %v14488_v17 = vadd.f32 -5.0, %v9399_v46 }
 0x64c   :  { %v9411_v15 = vand.u32 2147483647, %v14488_v17  ;;  %v9405_v59 = vmax.f32 %v14488_v17, 0.0  ;;  %vm9407_vm3 = vcmp.ne.f32.partialorder %v14488_v17, %v14488_v17 }
 0x64e   :  { %v9413_v61 = vsub.f32 0.0, %v9411_v15 }
 0x64f   :  { %v9400_v5 = vpop.f32.mrf.mxu3 }
 0x650   :  { %v9416_v34 = vmul.f32 1.442695, %v9413_v61 }
 0x652   :  { %15790 = vpow2.f32 %v9416_v34 }
 0x658   :  { %v15791_v11 = vpop.eup %15790 }
 0x659   :  { %v9427_v50 = vadd.f32 1.0, %v15791_v11  ;;  %v9430_v2 = vmul.f32 -0.5, %v15791_v11  ;;  %v9433_v3 = vand.u32 2147483647, %v15791_v11 }
 0x65b   :  { %15792 = vlog2.f32 %v9427_v50  ;;  %v9431_v4 = vadd.f32 1.0, %v9430_v2  ;;  %vm9434_vm2 = vcmp.lt.f32.partialorder %v9433_v3, 0.0004427343 }
 0x65d   :  { %v9432_v27 = vmul.f32 %v15791_v11, %v9431_v4 }
 0x661   :  { %v15793_v22 = vpop.eup %15792 }
 0x662   :  { %v9429_v26 = vmul.f32 0.6931472, %v15793_v22 }
 0x664   :  { %v9435_v45 = vsel %vm9434_vm2, %v9432_v27, %v9429_v26 }
 0x665   :  { %v9437_v20 = vadd.f32 %v9435_v45, %v9405_v59 }
 0x667   :  { %v9439_v39 = vsel %vm9407_vm3, %v14488_v17, %v9437_v20 }
 0x668   :  { %v9443_v35 = vmul.f32 %v9441_v10, %v9439_v39  ;;  %9609 = vst [vmem:[%s23809_s11 + $0x8] sm:$0xff] %v9439_v39 }
 0x66a   :  { %v9445_v28 = vadd.f32 %v9443_v35, %v23713_v31 }
 0x66c   :  { %v9447_v14 = vpack.c.bf16 %v9445_v28, %v9445_v28 }
 0x66e   :  { %9601 = vmatmul.bf16.vlgmr.msra.gmra.mxu1 %v9447_v14 }
 0x6ab   :  { %v9589_v49 = vpop.f32.mrf.mxu0 }
 0x6ac   :  { %v9590_v0 = vadd.f32 %v15785_v18, %v9589_v49 }
 0x6b3   :  { %v9591_v42 = vpop.f32.mrf.mxu0 }
 0x6eb   :  { %v9602_v51 = vpop.f32.mrf.mxu1 }
 0x6ec   :  { %v9603_v24 = vadd.f32 %v9602_v51, %v9590_v0 }
 0x6ee   :  { %9610 = vst [vmem:[%s23810_s12] sm:$0xff] %v9603_v24 }
 0x6f3   :  { %v9604_v23 = vpop.f32.mrf.mxu1 }

</bundles_post_ra>
